<compile_context>
chip_gen: v7x
topology: tpu7x:2x2x1
jax: 0.10.0
libtpu: 0.0.40
codegen_flags: <defaults>
</compile_context>

<pallas_src>
import functools

import jax
import jax.numpy as jnp
from jax.experimental import pallas as pl
from jax.experimental.pallas import tpu as pltpu

W = 32                      # voxel grid resolution (PointQuantizer(w=32))
V = W * W * W               # 32768 codebook entries / voxel cells
_LANE = 128
_HIT_TILE_BUDGET = 4 * 1024 * 1024   # bytes for the per-step (Np, TV) f32 hit tile


def _round_up(x, m):
    return (x + m - 1) // m * m


def _pow2_floor(x):
    return 1 << (max(int(x), 1).bit_length() - 1)


def _pq_kernel(x_ln_ref, x_sl_ref, idx_ref, voxel_ref, *, n_valid, w):
    """One grid step = (batch b, voxel tile vt).

    x_ln_ref : (1, 3, Np)  f32  points along lanes    (lane-dense index row)
    x_sl_ref : (1, Np, 3)  f32  points along sublanes (voxel occupancy path)
    idx_ref  : (1, 1, Np)  i32  flat codebook index per point (-1 on padding)
    voxel_ref: (1, 1, TV)  f32  occupancy tile, rescaled to {-0.8, +0.8}
    """
    vt = pl.program_id(1)
    np_pad = x_ln_ref.shape[2]
    tv = voxel_ref.shape[2]
    half_w = float(w) * 0.5
    w_max = float(w - 1)

    # ---- per-point flat index, lane-dense; written once per batch (vt == 0) ----
    @pl.when(vt == 0)
    def _():
        xt = x_ln_ref[0]                                              # (3, Np)
        cell = jnp.clip(jnp.floor((xt + 1.0) * half_w), 0.0, w_max)
        cell = cell.astype(jnp.int32)                                 # (3, Np)
        idx_row = cell[0:1, :] * (w * w) + cell[1:2, :] * w + cell[2:3, :]
        lane = jax.lax.broadcasted_iota(jnp.int32, (1, np_pad), 1)
        idx_ref[0] = jnp.where(lane < n_valid, idx_row, -1)           # (1, Np)

    # ---- voxel occupancy for this TV-wide tile (points on sublanes) ----
    xs = x_sl_ref[0]                                                  # (Np, 3)
    cell_c = jnp.clip(jnp.floor((xs + 1.0) * half_w), 0.0, w_max)
    cell_c = cell_c.astype(jnp.int32)                                 # (Np, 3)
    idx_col = (cell_c[:, 0:1] * (w * w)
               + cell_c[:, 1:2] * w
               + cell_c[:, 2:3])                                      # (Np, 1)
    row = jax.lax.broadcasted_iota(jnp.int32, (np_pad, 1), 0)
    idx_col = jnp.where(row < n_valid, idx_col, -1)                   # mask padding

    v_ids = vt * tv + jax.lax.broadcasted_iota(jnp.int32, (1, tv), 1)  # (1, TV)
    hit = jnp.where(idx_col == v_ids, 1.0, 0.0)                        # (Np, TV)
    occ = jnp.max(hit, axis=0, keepdims=True)                          # (1, TV)
    voxel_ref[0] = occ * 1.6 - 0.8                                     # {0,1}->{-0.8,0.8}


def point_quantizer_forward(x):
    """JAX/Pallas port of PointQuantizer.forward.

    x: (B, N, 3) f32 -> (sorted indices (B, N) i32, voxel (B, 1, 32, 32, 32) f32)
    """
    B, N, C = x.shape
    assert C == 3
    x = x.astype(jnp.float32)
    np_pad = max(_LANE, _round_up(N, _LANE))

    x_sl = jnp.pad(x, ((0, 0), (0, np_pad - N), (0, 0)))      # (B, Np, 3)
    x_ln = jnp.transpose(x_sl, (0, 2, 1))                     # (B, 3, Np)

    # Voxel lane-tile sized so the (Np, TV) f32 hit tile stays within budget.
    tv = _pow2_floor(_HIT_TILE_BUDGET // (np_pad * 4))
    tv = max(_LANE, min(tv, V))
    num_vt = V // tv

    kernel = functools.partial(_pq_kernel, n_valid=N, w=W)

    idx_pad, voxel_flat = pl.pallas_call(
        kernel,
        out_shape=(
            jax.ShapeDtypeStruct((B, 1, np_pad), jnp.int32),
            jax.ShapeDtypeStruct((B, 1, V), jnp.float32),
        ),
        grid=(B, num_vt),
        in_specs=[
            pl.BlockSpec((1, 3, np_pad), lambda b, v: (b, 0, 0)),
            pl.BlockSpec((1, np_pad, 3), lambda b, v: (b, 0, 0)),
        ],
        out_specs=(
            pl.BlockSpec((1, 1, np_pad), lambda b, v: (b, 0, 0)),
            pl.BlockSpec((1, 1, tv), lambda b, v: (b, 0, v)),
        ),
        compiler_params=pltpu.CompilerParams(
            dimension_semantics=("parallel", "arbitrary"),
            vmem_limit_bytes=32 * 1024 * 1024,
        ),
    )(x_ln, x_sl)

    indices = jnp.sort(idx_pad[:, 0, :N], axis=1)             # torch.sort(..., dim=1)
    voxel = voxel_flat.reshape(B, 1, W, W, W)                 # NCDHW like PyTorch
    return indices, voxel


def make_grid_points(w=W):
    """The PointQuantizer codebook, shape (w^3, 3) (row v is cell (i0, i1, i2))."""
    coords = jnp.stack(
        jnp.meshgrid(jnp.arange(w), jnp.arange(w), jnp.arange(w), indexing="ij"),
        axis=0,
    ).astype(jnp.float32)                                     # (3, w, w, w)
    grid = (coords + 0.5) * (2.0 / w) - 1.0
    return grid.reshape(3, -1).T                              # (w^3, 3)


def _reference_point_quantizer(x):
    """Pure-JAX reference (analytic nearest grid point == PyTorch brute-force
    argmin over the regular grid, up to measure-zero Voronoi-boundary ties)."""
    B, N, _ = x.shape
    cell = jnp.clip(jnp.floor((x + 1.0) * (W * 0.5)), 0.0, W - 1.0).astype(jnp.int32)
    idx = cell[..., 0] * (W * W) + cell[..., 1] * W + cell[..., 2]   # (B, N)
    idx_sorted = jnp.sort(idx, axis=1).astype(jnp.int32)
    vox = jnp.zeros((B, V), jnp.float32)
    vox = vox.at[jnp.arange(B)[:, None], idx].set(1.0)
    vox = (vox - 0.5) / 0.5 * 0.8
    return idx_sorted, vox.reshape(B, 1, W, W, W)


class Decoder:
    """JAX/Pallas port of the PyTorch Decoder (holds a PointQuantizer)."""

    def __init__(self, w=W):
        self.w = w

    def quantize(self, x):
        return point_quantizer_forward(x)

    def forward(self):
        # Reference Decoder.forward is `pass`.
        return None


if __name__ == "__main__":
    B, N = 2, 8                                               # small synthetic shapes
    key = jax.random.PRNGKey(0)
    x = jax.random.uniform(key, (B, N, 3), dtype=jnp.float32,
                           minval=-1.0, maxval=1.0)

    dec = Decoder()
    indices, voxel = dec.quantize(x)
    jax.block_until_ready((indices, voxel))

    ref_idx, ref_vox = _reference_point_quantizer(x)
    assert indices.shape == (B, N) and indices.dtype == jnp.int32
    assert voxel.shape == (B, 1, W, W, W) and voxel.dtype == jnp.float32
    assert bool(jnp.array_equal(indices, ref_idx)), "index mismatch vs reference"
    assert bool(jnp.allclose(voxel, ref_vox)), "voxel mismatch vs reference"
    assert dec.forward() is None
    print("KERNEL_OK")
</pallas_src>

<mosaic_0001>
module attributes {stable_mosaic.version = 11 : i64} {
  func.func @_pq_kernel(%arg0: i32, %arg1: i32, %arg2: memref<1x3x128xf32, #tpu.memory_space<vmem>>, %arg3: memref<1x128x3xf32, #tpu.memory_space<vmem>>, %arg4: memref<1x1x128xi32, #tpu.memory_space<vmem>>, %arg5: memref<1x1x8192xf32, #tpu.memory_space<vmem>>) attributes {dimension_semantics = [#tpu.dimension_semantics<parallel>, #tpu.dimension_semantics<arbitrary>], iteration_bounds = array<i64: 2, 4>, scalar_prefetch = 0 : i64, scratch_operands = 0 : i64, tpu.core_type = #tpu.core_type<tc>, window_params = [{transform_indices = @transform_0, window_bounds = array<i64: 1, 3, 128>}, {transform_indices = @transform_1, window_bounds = array<i64: 1, 128, 3>}, {transform_indices = @transform_2, window_bounds = array<i64: 1, 1, 128>}, {transform_indices = @transform_3, window_bounds = array<i64: 1, 1, 8192>}]} {
    %c0_i32 = arith.constant 0 : i32
    %0 = arith.cmpi eq, %arg1, %c0_i32 : i32
    %1 = arith.extui %0 : i1 to i32
    %c0_i32_0 = arith.constant 0 : i32
    %2 = arith.cmpi ne, %1, %c0_i32_0 : i32
    scf.if %2 {
      %c0_14 = arith.constant 0 : index
      %c0_15 = arith.constant 0 : index
      %c0_16 = arith.constant 0 : index
      %48 = vector.load %arg2[%c0_14, %c0_15, %c0_16] : memref<1x3x128xf32, #tpu.memory_space<vmem>>, vector<1x3x128xf32>
      %49 = vector.shape_cast %48 : vector<1x3x128xf32> to vector<3x128xf32>
      %cst_17 = arith.constant 1.000000e+00 : f32
      %50 = vector.broadcast %cst_17 : f32 to vector<3x128xf32>
      %51 = arith.addf %49, %50 : vector<3x128xf32>
      %cst_18 = arith.constant 1.600000e+01 : f32
      %52 = vector.broadcast %cst_18 : f32 to vector<3x128xf32>
      %53 = arith.mulf %51, %52 : vector<3x128xf32>
      %54 = math.floor %53 : vector<3x128xf32>
      %cst_19 = arith.constant 0.000000e+00 : f32
      %cst_20 = arith.constant 3.100000e+01 : f32
      %55 = vector.broadcast %cst_19 : f32 to vector<3x128xf32>
      %56 = arith.maximumf %55, %54 : vector<3x128xf32>
      %57 = vector.broadcast %cst_20 : f32 to vector<3x128xf32>
      %58 = arith.minimumf %57, %56 : vector<3x128xf32>
      %59 = arith.fptosi %58 : vector<3x128xf32> to vector<3x128xi32>
      %60 = vector.extract_strided_slice %59 {offsets = [0, 0], sizes = [1, 128], strides = [1, 1]} : vector<3x128xi32> to vector<1x128xi32>
      %c1024_i32_21 = arith.constant 1024 : i32
      %61 = vector.broadcast %c1024_i32_21 : i32 to vector<1x128xi32>
      %62 = arith.muli %60, %61 : vector<1x128xi32>
      %63 = vector.extract_strided_slice %59 {offsets = [1, 0], sizes = [1, 128], strides = [1, 1]} : vector<3x128xi32> to vector<1x128xi32>
      %c32_i32_22 = arith.constant 32 : i32
      %64 = vector.broadcast %c32_i32_22 : i32 to vector<1x128xi32>
      %65 = arith.muli %63, %64 : vector<1x128xi32>
      %66 = arith.addi %62, %65 : vector<1x128xi32>
      %67 = vector.extract_strided_slice %59 {offsets = [2, 0], sizes = [1, 128], strides = [1, 1]} : vector<3x128xi32> to vector<1x128xi32>
      %68 = arith.addi %66, %67 : vector<1x128xi32>
      %69 = tpu.iota {dimensions = array<i32: 1>} : vector<1x128xi32>
      %c8_i32_23 = arith.constant 8 : i32
      %70 = vector.broadcast %c8_i32_23 : i32 to vector<1x128xi32>
      %71 = arith.cmpi slt, %69, %70 : vector<1x128xi32>
      %c-1_i32_24 = arith.constant -1 : i32
      %72 = vector.broadcast %c-1_i32_24 : i32 to vector<1x128xi32>
      %73 = arith.select %71, %68, %72 : vector<1x128xi1>, vector<1x128xi32>
      %c0_25 = arith.constant 0 : index
      %c0_26 = arith.constant 0 : index
      %c0_27 = arith.constant 0 : index
      %74 = vector.load %arg4[%c0_25, %c0_26, %c0_27] : memref<1x1x128xi32, #tpu.memory_space<vmem>>, vector<1x1x128xi32>
      %75 = vector.shape_cast %74 : vector<1x1x128xi32> to vector<1x128xi32>
      %76 = vector.shape_cast %73 : vector<1x128xi32> to vector<1x1x128xi32>
      tpu.vector_store %arg4[%c0_25, %c0_26, %c0_27], %76 {strides = array<i32>} : memref<1x1x128xi32, #tpu.memory_space<vmem>>, vector<1x1x128xi32>,
    } else {
    }
    %c0 = arith.constant 0 : index
    %c0_1 = arith.constant 0 : index
    %c0_2 = arith.constant 0 : index
    %3 = vector.load %arg3[%c0, %c0_1, %c0_2] : memref<1x128x3xf32, #tpu.memory_space<vmem>>, vector<1x128x3xf32>
    %4 = vector.shape_cast %3 : vector<1x128x3xf32> to vector<128x3xf32>
    %cst = arith.constant 1.000000e+00 : f32
    %5 = vector.broadcast %cst : f32 to vector<128x3xf32>
    %6 = arith.addf %4, %5 : vector<128x3xf32>
    %cst_3 = arith.constant 1.600000e+01 : f32
    %7 = vector.broadcast %cst_3 : f32 to vector<128x3xf32>
    %8 = arith.mulf %6, %7 : vector<128x3xf32>
    %9 = math.floor %8 : vector<128x3xf32>
    %cst_4 = arith.constant 0.000000e+00 : f32
    %cst_5 = arith.constant 3.100000e+01 : f32
    %10 = vector.broadcast %cst_4 : f32 to vector<128x3xf32>
    %11 = arith.maximumf %10, %9 : vector<128x3xf32>
    %12 = vector.broadcast %cst_5 : f32 to vector<128x3xf32>
    %13 = arith.minimumf %12, %11 : vector<128x3xf32>
    %14 = arith.fptosi %13 : vector<128x3xf32> to vector<128x3xi32>
    %15 = vector.extract_strided_slice %14 {offsets = [0, 0], sizes = [128, 1], strides = [1, 1]} : vector<128x3xi32> to vector<128x1xi32>
    %c1024_i32 = arith.constant 1024 : i32
    %16 = vector.broadcast %c1024_i32 : i32 to vector<128x1xi32>
    %17 = arith.muli %15, %16 : vector<128x1xi32>
    %18 = vector.extract_strided_slice %14 {offsets = [0, 1], sizes = [128, 1], strides = [1, 1]} : vector<128x3xi32> to vector<128x1xi32>
    %c32_i32 = arith.constant 32 : i32
    %19 = vector.broadcast %c32_i32 : i32 to vector<128x1xi32>
    %20 = arith.muli %18, %19 : vector<128x1xi32>
    %21 = arith.addi %17, %20 : vector<128x1xi32>
    %22 = vector.extract_strided_slice %14 {offsets = [0, 2], sizes = [128, 1], strides = [1, 1]} : vector<128x3xi32> to vector<128x1xi32>
    %23 = arith.addi %21, %22 : vector<128x1xi32>
    %24 = tpu.iota {dimensions = array<i32: 0>} : vector<128x1xi32>
    %c8_i32 = arith.constant 8 : i32
    %25 = vector.broadcast %c8_i32 : i32 to vector<128x1xi32>
    %26 = arith.cmpi slt, %24, %25 : vector<128x1xi32>
    %c-1_i32 = arith.constant -1 : i32
    %27 = vector.broadcast %c-1_i32 : i32 to vector<128x1xi32>
    %28 = arith.select %26, %23, %27 : vector<128x1xi1>, vector<128x1xi32>
    %c8192_i32 = arith.constant 8192 : i32
    %29 = arith.muli %arg1, %c8192_i32 : i32
    %30 = tpu.iota {dimensions = array<i32: 1>} : vector<1x8192xi32>
    %31 = vector.broadcast %29 : i32 to vector<1x8192xi32>
    %32 = arith.addi %31, %30 : vector<1x8192xi32>
    %33 = vector.broadcast %28 : vector<128x1xi32> to vector<128x8192xi32>
    %34 = vector.broadcast %32 : vector<1x8192xi32> to vector<128x8192xi32>
    %35 = arith.cmpi eq, %33, %34 : vector<128x8192xi32>
    %cst_6 = arith.constant 1.000000e+00 : f32
    %cst_7 = arith.constant 0.000000e+00 : f32
    %36 = vector.broadcast %cst_6 : f32 to vector<128x8192xf32>
    %37 = vector.broadcast %cst_7 : f32 to vector<128x8192xf32>
    %38 = arith.select %35, %36, %37 : vector<128x8192xi1>, vector<128x8192xf32>
    %cst_8 = arith.constant dense<0xFF800000> : vector<8192xf32>
    %39 = vector.multi_reduction <maximumf>, %38, %cst_8 [0] : vector<128x8192xf32> to vector<8192xf32>
    %40 = vector.shape_cast %39 : vector<8192xf32> to vector<1x8192xf32>
    %cst_9 = arith.constant 1.600000e+00 : f32
    %41 = vector.broadcast %cst_9 : f32 to vector<1x8192xf32>
    %42 = arith.mulf %40, %41 : vector<1x8192xf32>
    %cst_10 = arith.constant 8.000000e-01 : f32
    %43 = vector.broadcast %cst_10 : f32 to vector<1x8192xf32>
    %44 = arith.subf %42, %43 : vector<1x8192xf32>
    %c0_11 = arith.constant 0 : index
    %c0_12 = arith.constant 0 : index
    %c0_13 = arith.constant 0 : index
    %45 = vector.load %arg5[%c0_11, %c0_12, %c0_13] : memref<1x1x8192xf32, #tpu.memory_space<vmem>>, vector<1x1x8192xf32>
    %46 = vector.shape_cast %45 : vector<1x1x8192xf32> to vector<1x8192xf32>
    %47 = vector.shape_cast %44 : vector<1x8192xf32> to vector<1x1x8192xf32>
    tpu.vector_store %arg5[%c0_11, %c0_12, %c0_13], %47 {strides = array<i32>} : memref<1x1x8192xf32, #tpu.memory_space<vmem>>, vector<1x1x8192xf32>,
    return
  }
  func.func @transform_0(%arg0: i32, %arg1: i32) -> (i32, i32, i32) {
    %c0_i32 = arith.constant 0 : i32
    %c0_i32_0 = arith.constant 0 : i32
    %c0_i32_1 = arith.constant 0 : i32
    return %arg0, %c0_i32, %c0_i32_0 : i32, i32, i32
  }
  func.func @transform_1(%arg0: i32, %arg1: i32) -> (i32, i32, i32) {
    %c0_i32 = arith.constant 0 : i32
    %c0_i32_0 = arith.constant 0 : i32
    %c0_i32_1 = arith.constant 0 : i32
    return %arg0, %c0_i32, %c0_i32_0 : i32, i32, i32
  }
  func.func @transform_2(%arg0: i32, %arg1: i32) -> (i32, i32, i32) {
    %c0_i32 = arith.constant 0 : i32
    %c0_i32_0 = arith.constant 0 : i32
    %c0_i32_1 = arith.constant 0 : i32
    return %arg0, %c0_i32, %c0_i32_0 : i32, i32, i32
  }
  func.func @transform_3(%arg0: i32, %arg1: i32) -> (i32, i32, i32) {
    %c0_i32 = arith.constant 0 : i32
    %c0_i32_0 = arith.constant 0 : i32
    return %arg0, %c0_i32, %arg1 : i32, i32, i32
  }
}

</mosaic_0001>

<bundles_post_ra>
// kernel: tpu_custom_call.1
= control target key start
LH: loop header
LB: loop body
LE: loop exit
PB: predicated region body
PF: predicated region fallthrough
CT: control target
= control target key end

     0   :  { %9 = vsyncpa [#allocation3], 0  ;;  %s17281_s0 = inlined_call_operand.vmem [shape: f32[2,3,128], index: 0, kind: input, shape index: {}]   ;;  %s17282_s1 = inlined_call_operand.vmem [shape: f32[2,128,3], index: 1, kind: input, shape index: {}]   ;;  %s17283_s2 = inlined_call_operand.hbm [shape: s32[2,1,128], index: 2, kind: output, shape index: {0}]   ;;  %s17284_s3 = inlined_call_operand.hbm [shape: f32[2,1,32768], index: 3, kind: output, shape index: {1}]  }
   0x1   :  { %11 = vsyncpa [#allocation3 + $0x1], 0 }
   0x2   :  { %12 = vsyncpa [#allocation5], 0 }
   0x3   :  { %14 = vsyncpa [#allocation5 + $0x1], 0  ;;  %s5215_s12 = smov 0   ;;  %s5217_s13 = smov 0  }
   0x4   :  { %s5219_s14 = smov 0   ;;  %s5221_s15 = smov 0  }
   0x5   :  { %s5223_s16 = smov 0   ;;  %s5225_s17 = smov 0  }
   0x6   :  { %s5227_s18 = smov 0   ;;  %s5229_s19 = smov 0  }
   0x7   :  { %s5231_s20 = smov 0   ;;  %s5233_s21 = smov 0  }
   0x8   :  { %s5235_s22 = smov 0  }
   0x9 LB: > { %18728 = sst [smem:[#allocation8_spill]] %s5165_s17  ;;  %s4840_s23 = sadd.s32 4294967295, %s5185_s22   ;;  %s5185_s22 = sphi %s5235_s22, %s20_s22   ;;  %s5181_s21 = sphi %s5233_s21, %s22861_s21   ;;  %s5177_s20 = sphi %s5231_s20, %s22860_s20   ;;  %s5173_s19 = sphi %s5229_s19, %s22859_s19   ;;  %s5169_s18 = sphi %s5227_s18, %s22858_s18   ;;  %s5165_s17 = sphi %s5225_s17, %s22857_s17   ;;  %s5161_s16 = sphi %s5223_s16, %s22866_s16   ;;  %s5157_s15 = sphi %s5221_s15, %s22865_s15   ;;  %s5153_s14 = sphi %s5219_s14, %s22864_s14   ;;  %s5149_s13 = sphi %s5217_s13, %s22863_s13   ;;  %s5145_s12 = sphi %s5215_s12, %s22862_s12  }
   0xa   : > { %18729 = sst [smem:[#allocation9_spill]] %s5177_s20  ;;  %s4841_s24 = sadd.s32 4294967294, %s5185_s22  }
   0xb   : > { %18730 = sst [smem:[#allocation10_spill]] %s5181_s21  ;;  %s29_s25 = sadd.s32 1, %s5177_s20 }
   0xc   : > { %s32_s26 = sadd.s32 1, %s5181_s21  ;;  %p30_p0 = scmp.ge.s32.totalorder %s29_s25, 4 }
   0xd   : > { %s91_s27 = sadd.s32 1, %s5165_s17  ;;  %p101_p1 = scmp.ne.s32.totalorder %s5165_s17, %s5161_s16 }
   0xe   : > { %p5277_p2 = scmp.eq.s32.totalorder %s4840_s23, 7  ;;  %s22868_s25 = smov (%p30_p0, %s29_s25), 0 }
   0xf   : > { %18732 = sst [smem:[#allocation11_spill]] %s22868_s25  ;;  %s22870_s26 = smov (!%p30_p0, %s32_s26), %s5181_s21 }
  0x10   : > { %p5286_p3 = por %p5277_p2, %p101_p1  ;;  %p107_p4 = scmp.ne.s32.totalorder %s5161_s16, %s5157_s15 }
  0x11   : > { %p34_p5 = scmp.ge.s32.totalorder %s22870_s26, 2  ;;  %p5292_p6 = scmp.eq.s32.totalorder %s4841_s24, 7 }
  0x12   : > { %s115_s4 = ssub.s32 %s5177_s20, %s22868_s25  ;;  %s119_s5 = sadd.s32 1, %s5153_s14 }
  0x13   : > { %s22872_s26 = smov (%p34_p5, %s22870_s26), 0  ;;  %p5303_p7 = por %p5292_p6, %p107_p4 }
  0x14   : > { %18735 = sst [smem:[#allocation12_spill]] %s22872_s26  ;;  %p129_p8 = scmp.ne.s32.totalorder %s5153_s14, %s5149_s13 }
  0x15   : > { %s88_s7 = ssub.s32 %s5181_s21, %s22872_s26  ;;  %p135_p9 = scmp.ne.s32.totalorder %s5149_s13, %s5145_s12 }
  0x16   : > { %p89_p10 = scmp.eq.s32.totalorder %s88_s7, 0  ;;  %s116_s8 = sor.u32 %s115_s4, %s88_s7 }
  0x17   : > { %p117_p11 = scmp.eq.s32.totalorder %s116_s8, 0  ;;  %p5315_p12 = por %p129_p8, %p5277_p2 }
  0x18   : > { %s5320_s10 = scalar_select %p89_p10, %s5165_s17, %s91_s27  }
  0x19   : > { %s5323_s11 = scalar_select %p117_p11, %s5153_s14, %s119_s5  }
  0x1a   : > { %18738 = sst [smem:[#allocation13_spill]] %s5320_s10  ;;  %p5327_p13 = por %p135_p9, %p5292_p6 }
  0x1b   : > { %p4844_p0 = scmp.ge.s32.totalorder %s5185_s22, 1  ;;  %p169_p1 = scmp.lt.s32.totalorder %s5185_s22, 9 }
  0x1d   : > { %p170_p4 = pnand %p4844_p0, %p169_p1 }
  0x1f   : > { %173 = sbr.rel (%p170_p4) target bundleno = 1362 (0x552), region = 28 }
  0x26   : > { %s192_s24 = sand.u32 1, %s5161_s16   ;;  %s198_s27 = sand.u32 1, %s5149_s13  }
  0x27   : > { %s4845_s28 = sshll.u32 %s198_s27, 6  ;;  %p201_p2 = scmp.lt.s32.totalorder %s5173_s19, 1 }
  0x28   : > { %s5347_s10 = scalar_lea.vmem [#allocation2], %s192_s24  ;;  %s5349_s17 = scalar_lea.vmem [#allocation4], %s4845_s28 }
  0x29   : > { %s202_s30 = scalar_select %p201_p2, %s5173_s19, 1 }
  0x2a   : > { %p4849_p5 = scmp.ne.s32.totalorder %s5169_s18, 0 }
  0x2b   : > { %s4846_s4 = sshll.u32 %s202_s30, 2  ;;  %s4922_s5 = sshll.u32 %s202_s30, 7  ;;  %v228_v7 = vlaneseq (!%p4849_p5) }
  0x2c   : > { %s204_s26 = scalar_lea.vmem %s17281_s0, %s4846_s4  ;;  %s209_s20 = scalar_lea.vmem %s17282_s1, %s4922_s5 }
  0x2d   : > { %214 = sbr.rel (%p4849_p5) target bundleno = 70 (0x46), region = 32  ;;  %v215_v0 = vld [vmem:[%s204_s26] sm:$0x7] (!%p4849_p5)  ;;  %v229_v11 = vand.u32 (!%p4849_p5), 127, %v228_v7 }
  0x2e   : > { %v216_v1 = vadd.f32 (!%p4849_p5), 1.0, %v215_v0 }
  0x2f   : > { %vm230_vm0 = vcmp.lt.s32.totalorder (!%p4849_p5), %v229_v11, 8 }
  0x30   : > { %v217_v2 = vmul.f32 (!%p4849_p5), 16.0, %v216_v1 }
  0x32   : > { %v218_v3 = vfloor.f32 (!%p4849_p5), %v217_v2 }
  0x34   : > { %v219_v4 = vmax.f32 %v218_v3, 0.0 }
  0x36   : > { %v220_v5 = vmin.f32 %v219_v4, 31.0 }
  0x38   : > { %v4923_v6 = vtrunc.f32 %v220_v5 }
  0x3a   : > { %v4924_v8 = vcvt.f32.s32 %v4923_v6 }
  0x3c   : > { %v222_v9 = vmul.u32 1024, %v4924_v8  ;;  %v223_v10 = vmul.u32 32, %v4924_v8  ;;  %v226_v13 = vrot.slane %v4924_v8, 2 }
  0x3e   : > { %v224_v12 = vrot.slane %v223_v10, 1 }
  0x40   : > { %v225_v14 = vadd.s32 %v224_v12, %v222_v9 }
  0x42   : > { %v227_v15 = vadd.s32 %v226_v13, %v225_v14 }
  0x44   : > { %v231_v16 = vsel %vm230_vm0, %v227_v15, 4294967295 }
  0x45   : > { %232 = vst [vmem:[%s5347_s10] sm:$0x1] %v231_v16 }
  0x46 PF: > { %v233_v17 = vld [vmem:[%s209_s20] sm:$0xff]  ;;  %v5187_v19 = vmov 0   ;;  %v5188_v20 = vmov 4294967295   ;;  %s5189_s21 = smov 127   ;;  %s5190_s25 = smov 126   ;;  %v17290_v33 = vlaneseq }
  0x47   : > { %v249_v18 = vadd.f32 1.0, %v233_v17  ;;  %5034 = vset.pattern.permute.xlu0 %v5187_v19  ;;  %5033 = vset.pattern.permute.xlu1 %v5187_v19  ;;  %s4850_s20 = sshll.u32 %s5169_s18, 13  ;;  %s4916_s26 = sshll.u32 %s5173_s19, 4 }
  0x48   : > { %657 = vperm.xlu1 %5033, %v5188_v20   ;;  %v5354_v34 = vand.u32 127, %v17290_v33  ;;  %s4711_s28 = sshll.u32 %s5347_s10, 4  ;;  %s16369_s10 = scalar_lea.hbm %s17283_s2, %s4916_s26  ;;  %s16371_s28 = int_to_ptr.vmem [resolvable:$true] %s4711_s28 }
  0x49   : > { %v265_v21 = vmul.f32 16.0, %v249_v18  ;;  %s4694_s5 = scalar_lea.sflag [#allocation3], %s192_s24  ;;  %s5035_s7 = scalar_lea.vmem %s16371_s28, 16 }
  0x4a   : > { %v5357_v35 = vadd.s32 128, %v5354_v34  ;;  %v5360_v36 = vadd.s32 256, %v5354_v34  ;;  %v5363_v37 = vadd.s32 384, %v5354_v34  ;;  %v5366_v38 = vadd.s32 512, %v5354_v34  ;;  %p5036_p6 = scmp.ne.s32.totalorder %s16371_s28, %s5035_s7  ;;  %s5192_s8 = smov [#allocation2]  }
  0x4b   : > { %v281_v22 = vfloor.f32 %v265_v21  ;;  %v5369_v39 = vadd.s32 640, %v5354_v34  ;;  %v5372_v40 = vadd.s32 768, %v5354_v34  ;;  %v5375_v41 = vadd.s32 896, %v5354_v34 }
  0x4c   : > { %v5378_v42 = vadd.s32 1024, %v5354_v34  ;;  %v5381_v43 = vadd.s32 1152, %v5354_v34  ;;  %v5384_v44 = vadd.s32 1280, %v5354_v34  ;;  %v5387_v45 = vadd.s32 1408, %v5354_v34  ;;  %p5037_p8 = pnand %p5036_p6, %p5286_p3 }
  0x4d   : > { %v297_v23 = vmax.f32 %v281_v22, 0.0  ;;  %v5390_v46 = vadd.s32 1536, %v5354_v34  ;;  %v5393_v47 = vadd.s32 1664, %v5354_v34  ;;  %v5396_v48 = vadd.s32 1792, %v5354_v34 }
  0x4e   : > { %v5399_v49 = vadd.s32 1920, %v5354_v34  ;;  %v5402_v50 = vadd.s32 2048, %v5354_v34  ;;  %v5405_v51 = vadd.s32 2176, %v5354_v34  ;;  %v5408_v52 = vadd.s32 2304, %v5354_v34  ;;  %p5038_p9 = pneg %p5037_p8 }
  0x4f   : > { %v313_v24 = vmin.f32 %v297_v23, 31.0  ;;  %v5411_v53 = vadd.s32 2432, %v5354_v34  ;;  %v5414_v54 = vadd.s32 2560, %v5354_v34  ;;  %v5417_v55 = vadd.s32 2688, %v5354_v34 }
  0x50   : > { %v5420_v56 = vadd.s32 2816, %v5354_v34  ;;  %v5423_v57 = vadd.s32 2944, %v5354_v34  ;;  %v5426_v58 = vadd.s32 3072, %v5354_v34  ;;  %v5429_v59 = vadd.s32 3200, %v5354_v34 }
  0x51   : > { %v4925_v25 = vtrunc.f32 %v313_v24  ;;  %v5432_v60 = vadd.s32 3328, %v5354_v34  ;;  %v5435_v61 = vadd.s32 3456, %v5354_v34  ;;  %v5438_v62 = vadd.s32 3584, %v5354_v34 }
  0x52   : > { %v5441_v63 = vadd.s32 3712, %v5354_v34  ;;  %v5444_v0 = vadd.s32 3840, %v5354_v34  ;;  %v5447_v1 = vadd.s32 3968, %v5354_v34  ;;  %v5450_v2 = vadd.s32 4096, %v5354_v34 }
  0x53   : > { %v4926_v26 = vcvt.f32.s32 %v4925_v25  ;;  %v5453_v3 = vadd.s32 4224, %v5354_v34  ;;  %v5456_v4 = vadd.s32 4352, %v5354_v34  ;;  %v5459_v5 = vadd.s32 4480, %v5354_v34 }
  0x54   : > { %v5462_v6 = vadd.s32 4608, %v5354_v34  ;;  %v5465_v7 = vadd.s32 4736, %v5354_v34  ;;  %v5468_v8 = vadd.s32 4864, %v5354_v34  ;;  %v5472_v9 = vadd.s32 4992, %v5354_v34 }
  0x55   : > { %v361_v27 = vmul.u32 32, %v4926_v26  ;;  %v345_v28 = vmul.u32 1024, %v4926_v26  ;;  %v5475_v10 = vadd.s32 5120, %v5354_v34  ;;  %v5478_v11 = vadd.s32 5248, %v5354_v34 }
  0x56   : > { %v5481_v12 = vadd.s32 5376, %v5354_v34  ;;  %v5484_v13 = vadd.s32 5504, %v5354_v34  ;;  %v5487_v14 = vadd.s32 5632, %v5354_v34  ;;  %v5490_v15 = vadd.s32 5760, %v5354_v34 }
  0x57   : > { %377 = vrot.lane.b32.xlu0 %v361_v27, %s5189_s21  ;;  %v5493_v16 = vadd.s32 5888, %v5354_v34  ;;  %v5496_v17 = vadd.s32 6016, %v5354_v34  ;;  %v5499_v18 = vadd.s32 6144, %v5354_v34  ;;  %v5502_v19 = vadd.s32 6272, %v5354_v34  ;;  %s5039_s21 = sshll.u32 %s5192_s8, 4  ;;  %s5040_s21 = int_to_ptr.vmem [resolvable:$false] %s5039_s21 }
  0x58   : > { %v5508_v21 = vadd.s32 6528, %v5354_v34  ;;  %v5511_v22 = vadd.s32 6656, %v5354_v34  ;;  %v5514_v23 = vadd.s32 6784, %v5354_v34  ;;  %v5516_v24 = vstv %s4850_s20  ;;  %p5042_p10 = scmp.lt.s32.totalorder %s16371_s28, %s5040_s21 }
  0x59   : > { %v5519_v25 = vadd.s32 6912, %v5354_v34  ;;  %v5525_v27 = vadd.s32 7168, %v5354_v34  ;;  %v5543_v33 = vadd.s32 7936, %v5354_v34 }
  0x5b   : > { %425 = vrot.lane.b32.xlu0 %v4926_v26, %s5190_s25  ;;  %v5522_v26 = vadd.s32 7040, %v5354_v34  ;;  %18740 = vst [vmem:[#allocation14_spill] sm:$0xff] %v5525_v27  ;;  %18745 = vst [vmem:[#allocation19_spill] sm:$0xff] %v5543_v33  ;;  %v5546_v27 = vadd.s32 8064, %v5354_v34  ;;  %v5566_v33 = vadd.s32 %v5516_v24, %v5366_v38  ;;  %v5586_v38 = vadd.s32 %v5516_v24, %v5381_v43  ;;  %s5041_s25 = scalar_lea.vmem %s5040_s21, 32 }
  0x5c   : > { %v5606_v43 = vadd.s32 %v5516_v24, %v5396_v48  ;;  %v5626_v48 = vadd.s32 %v5516_v24, %v5411_v53  ;;  %v5646_v53 = vadd.s32 %v5516_v24, %v5426_v58  ;;  %v5668_v58 = vadd.s32 %v5516_v24, %v5441_v63  ;;  %p5043_p11 = scmp.lt.s32.totalorder %s5041_s25, %s5035_s7 }
  0x5d   : > { %18750 = vst [vmem:[#allocation24_spill] sm:$0xff] %v5566_v33  ;;  %18755 = vst [vmem:[#allocation29_spill] sm:$0xff] %v5586_v38  ;;  %v5688_v63 = vadd.s32 %v5516_v24, %v5456_v4  ;;  %v5708_v4 = vadd.s32 %v5516_v24, %v5472_v9  ;;  %v5728_v9 = vadd.s32 %v5516_v24, %v5487_v14 }
  0x5e   : > { %18760 = vst [vmem:[#allocation34_spill] sm:$0xff] %v5606_v43  ;;  %18765 = vst [vmem:[#allocation39_spill] sm:$0xff] %v5626_v48  ;;  %v5748_v14 = vadd.s32 %v5516_v24, %v5502_v19  ;;  %v5770_v19 = vadd.s32 %v5516_v24, %v5519_v25  ;;  %p5044_p0 = por %p5043_p11, %p5042_p10 }
  0x5f   : > { %660 = vperm.xlu0 %5034, %v5188_v20   ;;  %18770 = vst [vmem:[#allocation44_spill] sm:$0xff] %v5646_v53  ;;  %18776 = vst [vmem:[#allocation50_spill] sm:$0xff] %v5668_v58 }
  0x60   : > { %18781 = vst [vmem:[#allocation55_spill] sm:$0xff] %v5688_v63  ;;  %18786 = vst [vmem:[#allocation60_spill] sm:$0xff] %v5708_v4  ;;  %p5045_p1 = pnand %p5044_p0, %p5038_p9 }
  0x61   : > { %18791 = vst [vmem:[#allocation65_spill] sm:$0xff] %v5728_v9  ;;  %18796 = vst [vmem:[#allocation70_spill] sm:$0xff] %v5748_v14 }
  0x62   : > { %18801 = vst [vmem:[#allocation75_spill] sm:$0xff] %v5770_v19 }
  0x63   : > { %669 = vperm.xlu0 %5034, %v5188_v20  }
  0x67   : > { %675 = vperm.xlu0 %5034, %v5188_v20  }
  0x6b   : > { %681 = vperm.xlu0 %5034, %v5188_v20  }
  0x6f   : > { %687 = vperm.xlu0 %5034, %v5188_v20  }
  0x73   : > { %693 = vperm.xlu0 %5034, %v5188_v20  }
  0x77   : > { %699 = vperm.xlu0 %5034, %v5188_v20  }
  0xc9   : > { %v378_v29 = vpop.permute.xlu0 %377 }
  0xca   : > { %v409_v30 = vadd.s32 %v378_v29, %v345_v28  ;;  %v5528_v28 = vadd.s32 7296, %v5354_v34  ;;  %v5531_v29 = vadd.s32 7424, %v5354_v34 }
  0xcc   : > { %18741 = vst [vmem:[#allocation15_spill] sm:$0xff] %v5528_v28  ;;  %18742 = vst [vmem:[#allocation16_spill] sm:$0xff] %v5531_v29  ;;  %v5550_v28 = vadd.s32 %v5516_v24, %v5354_v34  ;;  %v5554_v29 = vadd.s32 %v5516_v24, %v5357_v35  ;;  %v5574_v35 = vadd.s32 %v5516_v24, %v5372_v40 }
  0xcd   : > { %v426_v31 = vpop.permute.xlu0 %425  ;;  %v5594_v40 = vadd.s32 %v5516_v24, %v5387_v45  ;;  %v5614_v45 = vadd.s32 %v5516_v24, %v5402_v50  ;;  %v5634_v50 = vadd.s32 %v5516_v24, %v5417_v55  ;;  %v5656_v55 = vadd.s32 %v5516_v24, %v5432_v60 }
  0xce   : > { %v457_v32 = vadd.s32 %v426_v31, %v409_v30  ;;  %v5534_v30 = vadd.s32 7552, %v5354_v34  ;;  %v5537_v31 = vadd.s32 7680, %v5354_v34  ;;  %18746 = vst [vmem:[#allocation20_spill] sm:$0xff] %v5550_v28  ;;  %18747 = vst [vmem:[#allocation21_spill] sm:$0xff] %v5554_v29  ;;  %v5676_v60 = vadd.s32 %v5516_v24, %v5447_v1 }
  0xcf   : > { %18752 = vst [vmem:[#allocation26_spill] sm:$0xff] %v5574_v35  ;;  %18757 = vst [vmem:[#allocation31_spill] sm:$0xff] %v5594_v40  ;;  %v5696_v1 = vadd.s32 %v5516_v24, %v5462_v6  ;;  %v5716_v6 = vadd.s32 %v5516_v24, %v5478_v11  ;;  %v5736_v11 = vadd.s32 %v5516_v24, %v5493_v16 }
  0xd0   : > { %654 = vperm.xlu1 %5033, %v457_v32   ;;  %18743 = vst [vmem:[#allocation17_spill] sm:$0xff] %v5537_v31  ;;  %v5540_v32 = vadd.s32 7808, %v5354_v34  ;;  %v5558_v31 = vadd.s32 %v5516_v24, %v5360_v36  ;;  %v5578_v36 = vadd.s32 %v5516_v24, %v5375_v41  ;;  %v5598_v41 = vadd.s32 %v5516_v24, %v5390_v46 }
  0xd1   : > { %18762 = vst [vmem:[#allocation36_spill] sm:$0xff] %v5614_v45  ;;  %v5618_v46 = vadd.s32 %v5516_v24, %v5405_v51  ;;  %18767 = vst [vmem:[#allocation41_spill] sm:$0xff] %v5634_v50  ;;  %v5638_v51 = vadd.s32 %v5516_v24, %v5420_v56  ;;  %v5660_v56 = vadd.s32 %v5516_v24, %v5435_v61 }
  0xd2   : > { %18744 = vst [vmem:[#allocation18_spill] sm:$0xff] %v5540_v32  ;;  %18748 = vst [vmem:[#allocation22_spill] sm:$0xff] %v5558_v31  ;;  %v5562_v32 = vadd.s32 %v5516_v24, %v5363_v37  ;;  %v5582_v37 = vadd.s32 %v5516_v24, %v5378_v42  ;;  %v5602_v42 = vadd.s32 %v5516_v24, %v5393_v47 }
  0xd3   : > { %18753 = vst [vmem:[#allocation27_spill] sm:$0xff] %v5578_v36  ;;  %18758 = vst [vmem:[#allocation32_spill] sm:$0xff] %v5598_v41  ;;  %v5622_v47 = vadd.s32 %v5516_v24, %v5408_v52  ;;  %v5642_v52 = vadd.s32 %v5516_v24, %v5423_v57  ;;  %v5664_v57 = vadd.s32 %v5516_v24, %v5438_v62 }
  0xd4   : > { %663 = vperm.xlu1 %5033, %v5188_v20   ;;  %18749 = vst [vmem:[#allocation23_spill] sm:$0xff] %v5562_v32  ;;  %18754 = vst [vmem:[#allocation28_spill] sm:$0xff] %v5582_v37  ;;  %v5680_v61 = vadd.s32 %v5516_v24, %v5450_v2  ;;  %v5684_v62 = vadd.s32 %v5516_v24, %v5453_v3  ;;  %v5700_v2 = vadd.s32 %v5516_v24, %v5465_v7 }
  0xd5   : > { %18759 = vst [vmem:[#allocation33_spill] sm:$0xff] %v5602_v42  ;;  %18763 = vst [vmem:[#allocation37_spill] sm:$0xff] %v5618_v46  ;;  %v5704_v3 = vadd.s32 %v5516_v24, %v5468_v8  ;;  %v5720_v7 = vadd.s32 %v5516_v24, %v5481_v12  ;;  %v5724_v8 = vadd.s32 %v5516_v24, %v5484_v13 }
  0xd6   : > { %18764 = vst [vmem:[#allocation38_spill] sm:$0xff] %v5622_v47  ;;  %18768 = vst [vmem:[#allocation42_spill] sm:$0xff] %v5638_v51  ;;  %v5740_v12 = vadd.s32 %v5516_v24, %v5496_v17  ;;  %v5744_v13 = vadd.s32 %v5516_v24, %v5499_v18  ;;  %v5758_v16 = vadd.s32 %v5516_v24, %v5508_v21 }
  0xd7   : > { %18769 = vst [vmem:[#allocation43_spill] sm:$0xff] %v5642_v52  ;;  %18773 = vst [vmem:[#allocation47_spill] sm:$0xff] %v5656_v55  ;;  %v5762_v17 = vadd.s32 %v5516_v24, %v5511_v22  ;;  %v5766_v18 = vadd.s32 %v5516_v24, %v5514_v23  ;;  %v5790_v25 = vadd.s32 %v5516_v24, %v5534_v30  ;;  %v18810_v19 = vld [vmem:[#allocation17_spill] sm:$0xff] }
  0xd8   : > { %666 = vperm.xlu1 %5033, %v5188_v20   ;;  %18774 = vst [vmem:[#allocation48_spill] sm:$0xff] %v5660_v56  ;;  %18775 = vst [vmem:[#allocation49_spill] sm:$0xff] %v5664_v57 }
  0xd9   : > { %18778 = vst [vmem:[#allocation52_spill] sm:$0xff] %v5676_v60  ;;  %18779 = vst [vmem:[#allocation53_spill] sm:$0xff] %v5680_v61 }
  0xda   : > { %18780 = vst [vmem:[#allocation54_spill] sm:$0xff] %v5684_v62  ;;  %18783 = vst [vmem:[#allocation57_spill] sm:$0xff] %v5696_v1 }
  0xdb   : > { %18784 = vst [vmem:[#allocation58_spill] sm:$0xff] %v5700_v2  ;;  %18785 = vst [vmem:[#allocation59_spill] sm:$0xff] %v5704_v3 }
  0xdc   : > { %672 = vperm.xlu1 %5033, %v5188_v20   ;;  %18788 = vst [vmem:[#allocation62_spill] sm:$0xff] %v5716_v6  ;;  %18789 = vst [vmem:[#allocation63_spill] sm:$0xff] %v5720_v7 }
  0xdd   : > { %18790 = vst [vmem:[#allocation64_spill] sm:$0xff] %v5724_v8  ;;  %18793 = vst [vmem:[#allocation67_spill] sm:$0xff] %v5736_v11 }
  0xde   : > { %18794 = vst [vmem:[#allocation68_spill] sm:$0xff] %v5740_v12  ;;  %18795 = vst [vmem:[#allocation69_spill] sm:$0xff] %v5744_v13 }
  0xdf   : > { %18798 = vst [vmem:[#allocation72_spill] sm:$0xff] %v5758_v16  ;;  %18799 = vst [vmem:[#allocation73_spill] sm:$0xff] %v5762_v17  ;;  %v18805_v16 = vld [vmem:[#allocation15_spill] sm:$0xff]  ;;  %v18807_v17 = vld [vmem:[#allocation16_spill] sm:$0xff] }
  0xe0   : > { %678 = vperm.xlu1 %5033, %v5188_v20   ;;  %18800 = vst [vmem:[#allocation74_spill] sm:$0xff] %v5766_v18  ;;  %v5782_v22 = vadd.s32 %v5516_v24, %v18805_v16  ;;  %v5786_v23 = vadd.s32 %v5516_v24, %v18807_v17  ;;  %18809 = vst [vmem:[#allocation77_spill] sm:$0xff] %v5790_v25  ;;  %v5806_v17 = vadd.s32 %v5516_v24, %v5546_v27  ;;  %v17437_v27 = vmov 0.0  }
  0xe2   : > { %18806 = vst [vmem:[#allocation15_spill] sm:$0xff] %v5782_v22  ;;  %18808 = vst [vmem:[#allocation16_spill] sm:$0xff] %v5786_v23 }
  0xe3   : > { %18816 = vst [vmem:[#allocation78_spill] sm:$0xff] %v5806_v17 }
  0xe4   : > { %684 = vperm.xlu1 %5033, %v5188_v20  }
  0xe8   : > { %690 = vperm.xlu1 %5033, %v5188_v20  }
  0xec   : > { %696 = vperm.xlu1 %5033, %v5188_v20   ;;  %v5505_v20 = vadd.s32 6400, %v5354_v34  ;;  %v5570_v34 = vadd.s32 %v5516_v24, %v5369_v39  ;;  %v5590_v39 = vadd.s32 %v5516_v24, %v5384_v44  ;;  %v5610_v44 = vadd.s32 %v5516_v24, %v5399_v49 }
  0xed   : > { %v5630_v49 = vadd.s32 %v5516_v24, %v5414_v54  ;;  %v5650_v54 = vadd.s32 %v5516_v24, %v5429_v59  ;;  %v5672_v59 = vadd.s32 %v5516_v24, %v5444_v0  ;;  %v5692_v0 = vadd.s32 %v5516_v24, %v5459_v5 }
  0xee   : > { %18751 = vst [vmem:[#allocation25_spill] sm:$0xff] %v5570_v34  ;;  %18756 = vst [vmem:[#allocation30_spill] sm:$0xff] %v5590_v39  ;;  %v5712_v5 = vadd.s32 %v5516_v24, %v5475_v10  ;;  %v5732_v10 = vadd.s32 %v5516_v24, %v5490_v15  ;;  %v5754_v15 = vadd.s32 %v5516_v24, %v5505_v20 }
  0xef   : > { %18761 = vst [vmem:[#allocation35_spill] sm:$0xff] %v5610_v44  ;;  %18766 = vst [vmem:[#allocation40_spill] sm:$0xff] %v5630_v49  ;;  %v5652_v49 = vpop.permute.xlu1 %657  ;;  %v5774_v20 = vadd.s32 %v5516_v24, %v5522_v26  ;;  %v5794_v26 = vadd.s32 %v5516_v24, %v18810_v19 }
  0xf0   : > { %18771 = vst [vmem:[#allocation45_spill] sm:$0xff] %v5650_v54  ;;  %18772 = vst [vmem:[#allocation46_spill] sm:$0xff] %v5652_v49 }
  0xf1   : > { %18777 = vst [vmem:[#allocation51_spill] sm:$0xff] %v5672_v59  ;;  %18782 = vst [vmem:[#allocation56_spill] sm:$0xff] %v5692_v0 }
  0xf2   : > { %18787 = vst [vmem:[#allocation61_spill] sm:$0xff] %v5712_v5  ;;  %18792 = vst [vmem:[#allocation66_spill] sm:$0xff] %v5732_v10 }
  0xf3   : > { %18797 = vst [vmem:[#allocation71_spill] sm:$0xff] %v5754_v15  ;;  %18802 = vst [vmem:[#allocation76_spill] sm:$0xff] %v5774_v20  ;;  %v18803_v15 = vld [vmem:[#allocation14_spill] sm:$0xff] }
  0xf4   : > { %v5778_v21 = vadd.s32 %v5516_v24, %v18803_v15  ;;  %18811 = vst [vmem:[#allocation17_spill] sm:$0xff] %v5794_v26  ;;  %v18812_v20 = vld [vmem:[#allocation18_spill] sm:$0xff] }
  0xf5   : > { %v5798_v15 = vadd.s32 %v5516_v24, %v18812_v20 }
  0xf6   : > { %18804 = vst [vmem:[#allocation14_spill] sm:$0xff] %v5778_v21  ;;  %v18814_v21 = vld [vmem:[#allocation19_spill] sm:$0xff] }
  0xf7   : > { %18813 = vst [vmem:[#allocation18_spill] sm:$0xff] %v5798_v15  ;;  %v5802_v16 = vadd.s32 %v5516_v24, %v18814_v21  ;;  %v18817_v24 = vld [vmem:[#allocation40_spill] sm:$0xff] }
  0xf9   : > { %18815 = vst [vmem:[#allocation19_spill] sm:$0xff] %v5802_v16 }
 0x14f   : > { %v5750_v49 = vpop.permute.xlu1 %654 }
 0x150   : > { %vm701_vm1 = vcmp.eq.s32.totalorder %v5750_v49, %v5550_v28  ;;  %vm702_vm2 = vcmp.eq.s32.totalorder %v5750_v49, %v5554_v29  ;;  %vm703_vm3 = vcmp.eq.s32.totalorder %v5750_v49, %v5558_v31  ;;  %vm704_vm4 = vcmp.eq.s32.totalorder %v5750_v49, %v5562_v32 }
 0x151   : > { %vm705_vm5 = vcmp.eq.s32.totalorder %v5750_v49, %v5566_v33  ;;  %vm706_vm6 = vcmp.eq.s32.totalorder %v5750_v49, %v5570_v34  ;;  %vm707_vm7 = vcmp.eq.s32.totalorder %v5750_v49, %v5574_v35  ;;  %vm708_vm8 = vcmp.eq.s32.totalorder %v5750_v49, %v5578_v36 }
 0x152   : > { %vm709_vm9 = vcmp.eq.s32.totalorder %v5750_v49, %v5582_v37  ;;  %vm740_vm12 = vcmp.eq.s32.totalorder %v5750_v49, %v5708_v4  ;;  %vm741_vm13 = vcmp.eq.s32.totalorder %v5750_v49, %v5712_v5  ;;  %vm742_vm14 = vcmp.eq.s32.totalorder %v5750_v49, %v5716_v6 }
 0x153   : > { %v5904_v30 = vsel %vm701_vm1, 1.0, %v17437_v27  ;;  %v5910_v19 = vsel %vm702_vm2, 1.0, %v17437_v27  ;;  %vm747_vm0 = vcmp.eq.s32.totalorder %v5750_v49, %v5736_v11  ;;  %vm748_vm10 = vcmp.eq.s32.totalorder %v5750_v49, %v5740_v12 }
 0x154   : > { %18818 = vst [vmem:[#allocation79_spill] sm:$0xff] %v5904_v30  ;;  %18819 = vst [vmem:[#allocation80_spill] sm:$0xff] %v5910_v19  ;;  %vm749_vm11 = vcmp.eq.s32.totalorder %v5750_v49, %v5744_v13  ;;  %vm750_vm15 = vcmp.eq.s32.totalorder %v5750_v49, %v5748_v14  ;;  %v5924_v20 = vsel %vm703_vm3, 1.0, %v17437_v27  ;;  %v5930_v21 = vsel %vm704_vm4, 1.0, %v17437_v27  ;;  %v18824_v14 = vld [vmem:[#allocation71_spill] sm:$0xff]  ;;  %v18826_v13 = vld [vmem:[#allocation73_spill] sm:$0xff] }
 0x155   : > { %18820 = vst [vmem:[#allocation81_spill] sm:$0xff] %v5924_v20  ;;  %18821 = vst [vmem:[#allocation82_spill] sm:$0xff] %v5930_v21  ;;  %v5936_v19 = vsel %vm705_vm5, 1.0, %v17437_v27  ;;  %v5942_v30 = vsel %vm706_vm6, 1.0, %v17437_v27  ;;  %vm751_vm1 = vcmp.eq.s32.totalorder %v5750_v49, %v18824_v14  ;;  %v18825_v20 = vld [vmem:[#allocation72_spill] sm:$0xff]  ;;  %vm753_vm3 = vcmp.eq.s32.totalorder %v5750_v49, %v18826_v13  ;;  %v18832_v13 = vld [vmem:[#allocation75_spill] sm:$0xff] }
 0x156   : > { %18822 = vst [vmem:[#allocation83_spill] sm:$0xff] %v5936_v19  ;;  %18823 = vst [vmem:[#allocation84_spill] sm:$0xff] %v5942_v30  ;;  %vm752_vm2 = vcmp.eq.s32.totalorder %v5750_v49, %v18825_v20  ;;  %v5956_v19 = vsel %vm707_vm7, 1.0, %v17437_v27  ;;  %v5962_v30 = vsel %vm708_vm8, 1.0, %v17437_v27  ;;  %v5968_v21 = vsel %vm709_vm9, 1.0, %v17437_v27  ;;  %v18834_v20 = vld [vmem:[#allocation14_spill] sm:$0xff] }
 0x157   : > { %18827 = vst [vmem:[#allocation85_spill] sm:$0xff] %v5956_v19  ;;  %18828 = vst [vmem:[#allocation86_spill] sm:$0xff] %v5962_v30  ;;  %vm18830_vm5 = vcmp.eq.s32.totalorder %v5750_v49, %v5586_v38  ;;  %v18833_v19 = vld [vmem:[#allocation76_spill] sm:$0xff]  ;;  %vm18835_vm9 = vcmp.eq.s32.totalorder %v5750_v49, %v5590_v39  ;;  %vm18839_vm7 = vcmp.eq.s32.totalorder %v5750_v49, %v5598_v41 }
 0x158   : > { %18829 = vst [vmem:[#allocation87_spill] sm:$0xff] %v5968_v21  ;;  %v5974_v18 = vsel %vm18830_vm5, 1.0, %v17437_v27  ;;  %v5988_v21 = vsel %vm18835_vm9, 1.0, %v17437_v27  ;;  %vm18837_vm5 = vcmp.eq.s32.totalorder %v5750_v49, %v5594_v40  ;;  %v6000_v30 = vsel %vm18839_vm7, 1.0, %v17437_v27 }
 0x159   : > { %18831 = vst [vmem:[#allocation88_spill] sm:$0xff] %v5974_v18  ;;  %18836 = vst [vmem:[#allocation89_spill] sm:$0xff] %v5988_v21  ;;  %v5994_v18 = vsel %vm18837_vm5, 1.0, %v17437_v27  ;;  %vm18841_vm4 = vcmp.eq.s32.totalorder %v5750_v49, %v5602_v42  ;;  %vm18843_vm7 = vcmp.eq.s32.totalorder %v5750_v49, %v5606_v43  ;;  %vm18847_vm8 = vcmp.eq.s32.totalorder %v5750_v49, %v5614_v45 }
 0x15a   : > { %18838 = vst [vmem:[#allocation90_spill] sm:$0xff] %v5994_v18  ;;  %18840 = vst [vmem:[#allocation91_spill] sm:$0xff] %v6000_v30  ;;  %v6006_v22 = vsel %vm18841_vm4, 1.0, %v17437_v27  ;;  %v6020_v30 = vsel %vm18843_vm7, 1.0, %v17437_v27  ;;  %vm18845_vm4 = vcmp.eq.s32.totalorder %v5750_v49, %v5610_v44  ;;  %v6032_v18 = vsel %vm18847_vm8, 1.0, %v17437_v27 }
 0x15b   : > { %18842 = vst [vmem:[#allocation92_spill] sm:$0xff] %v6006_v22  ;;  %18844 = vst [vmem:[#allocation93_spill] sm:$0xff] %v6020_v30  ;;  %v6026_v22 = vsel %vm18845_vm4, 1.0, %v17437_v27  ;;  %vm18849_vm6 = vcmp.eq.s32.totalorder %v5750_v49, %v5618_v46  ;;  %vm18852_vm8 = vcmp.eq.s32.totalorder %v5750_v49, %v5622_v47  ;;  %vm18856_vm5 = vcmp.eq.s32.totalorder %v5750_v49, %v18817_v24 }
 0x15c   : > { %18846 = vst [vmem:[#allocation94_spill] sm:$0xff] %v6026_v22  ;;  %18848 = vst [vmem:[#allocation95_spill] sm:$0xff] %v6032_v18  ;;  %v6038_v21 = vsel %vm18849_vm6, 1.0, %v17437_v27  ;;  %v18851_v22 = vld [vmem:[#allocation46_spill] sm:$0xff]  ;;  %v6052_v18 = vsel %vm18852_vm8, 1.0, %v17437_v27  ;;  %vm18854_vm6 = vcmp.eq.s32.totalorder %v5750_v49, %v5626_v48  ;;  %v6064_v30 = vsel %vm18856_vm5, 1.0, %v17437_v27 }
 0x15d   : > { %18850 = vst [vmem:[#allocation96_spill] sm:$0xff] %v6038_v21  ;;  %18853 = vst [vmem:[#allocation46_spill] sm:$0xff] %v6052_v18  ;;  %v6058_v21 = vsel %vm18854_vm6, 1.0, %v17437_v27  ;;  %vm18858_vm9 = vcmp.eq.s32.totalorder %v5750_v49, %v5634_v50  ;;  %vm18860_vm5 = vcmp.eq.s32.totalorder %v5750_v49, %v5638_v51  ;;  %vm18864_vm4 = vcmp.eq.s32.totalorder %v5750_v49, %v5646_v53 }
 0x15e   : > { %18855 = vst [vmem:[#allocation97_spill] sm:$0xff] %v6058_v21  ;;  %18857 = vst [vmem:[#allocation98_spill] sm:$0xff] %v6064_v30  ;;  %v6070_v29 = vsel %vm18858_vm9, 1.0, %v17437_v27  ;;  %v6084_v30 = vsel %vm18860_vm5, 1.0, %v17437_v27  ;;  %vm18862_vm9 = vcmp.eq.s32.totalorder %v5750_v49, %v5642_v52  ;;  %v6096_v21 = vsel %vm18864_vm4, 1.0, %v17437_v27 }
 0x15f   : > { %18859 = vst [vmem:[#allocation99_spill] sm:$0xff] %v6070_v29  ;;  %18861 = vst [vmem:[#allocation100_spill] sm:$0xff] %v6084_v30  ;;  %v6090_v29 = vsel %vm18862_vm9, 1.0, %v17437_v27  ;;  %vm18866_vm7 = vcmp.eq.s32.totalorder %v5750_v49, %v5650_v54  ;;  %vm18868_vm4 = vcmp.eq.s32.totalorder %v5750_v49, %v5656_v55  ;;  %vm18872_vm6 = vcmp.eq.s32.totalorder %v5750_v49, %v5664_v57 }
 0x160   : > { %18863 = vst [vmem:[#allocation101_spill] sm:$0xff] %v6090_v29  ;;  %18865 = vst [vmem:[#allocation102_spill] sm:$0xff] %v6096_v21  ;;  %v6102_v18 = vsel %vm18866_vm7, 1.0, %v17437_v27  ;;  %v6116_v21 = vsel %vm18868_vm4, 1.0, %v17437_v27  ;;  %vm18870_vm7 = vcmp.eq.s32.totalorder %v5750_v49, %v5660_v56  ;;  %v6128_v29 = vsel %vm18872_vm6, 1.0, %v17437_v27 }
 0x161   : > { %18867 = vst [vmem:[#allocation103_spill] sm:$0xff] %v6102_v18  ;;  %18869 = vst [vmem:[#allocation104_spill] sm:$0xff] %v6116_v21  ;;  %v6122_v18 = vsel %vm18870_vm7, 1.0, %v17437_v27  ;;  %vm18874_vm8 = vcmp.eq.s32.totalorder %v5750_v49, %v5668_v58  ;;  %vm18876_vm6 = vcmp.eq.s32.totalorder %v5750_v49, %v5672_v59  ;;  %vm18880_vm9 = vcmp.eq.s32.totalorder %v5750_v49, %v5680_v61 }
 0x162   : > { %18871 = vst [vmem:[#allocation105_spill] sm:$0xff] %v6122_v18  ;;  %18873 = vst [vmem:[#allocation106_spill] sm:$0xff] %v6128_v29  ;;  %v6134_v30 = vsel %vm18874_vm8, 1.0, %v17437_v27  ;;  %v6148_v29 = vsel %vm18876_vm6, 1.0, %v17437_v27  ;;  %vm18878_vm8 = vcmp.eq.s32.totalorder %v5750_v49, %v5676_v60  ;;  %v6160_v18 = vsel %vm18880_vm9, 1.0, %v17437_v27 }
 0x163   : > { %18875 = vst [vmem:[#allocation107_spill] sm:$0xff] %v6134_v30  ;;  %18877 = vst [vmem:[#allocation108_spill] sm:$0xff] %v6148_v29  ;;  %v6154_v30 = vsel %vm18878_vm8, 1.0, %v17437_v27  ;;  %vm18882_vm5 = vcmp.eq.s32.totalorder %v5750_v49, %v5684_v62  ;;  %vm18884_vm9 = vcmp.eq.s32.totalorder %v5750_v49, %v5688_v63  ;;  %vm18888_vm7 = vcmp.eq.s32.totalorder %v5750_v49, %v5696_v1  ;;  %v18916_v62 = vld [vmem:[#allocation74_spill] sm:$0xff] }
 0x164   : > { %18879 = vst [vmem:[#allocation109_spill] sm:$0xff] %v6154_v30  ;;  %18881 = vst [vmem:[#allocation110_spill] sm:$0xff] %v6160_v18  ;;  %v6166_v21 = vsel %vm18882_vm5, 1.0, %v17437_v27  ;;  %v6180_v18 = vsel %vm18884_vm9, 1.0, %v17437_v27  ;;  %vm18886_vm5 = vcmp.eq.s32.totalorder %v5750_v49, %v5692_v0  ;;  %v6192_v30 = vsel %vm18888_vm7, 1.0, %v17437_v27 }
 0x165   : > { %18883 = vst [vmem:[#allocation111_spill] sm:$0xff] %v6166_v21  ;;  %18885 = vst [vmem:[#allocation112_spill] sm:$0xff] %v6180_v18  ;;  %v6186_v21 = vsel %vm18886_vm5, 1.0, %v17437_v27  ;;  %vm18890_vm4 = vcmp.eq.s32.totalorder %v5750_v49, %v5700_v2  ;;  %vm783_vm9 = vcmp.eq.s32.totalorder %v18851_v22, %v5622_v47  ;;  %vm784_vm8 = vcmp.eq.s32.totalorder %v18851_v22, %v5626_v48 }
 0x166   : > { %18887 = vst [vmem:[#allocation113_spill] sm:$0xff] %v6186_v21  ;;  %18889 = vst [vmem:[#allocation114_spill] sm:$0xff] %v6192_v30  ;;  %v6198_v29 = vsel %vm18890_vm4, 1.0, %v17437_v27  ;;  %vm785_vm5 = vcmp.eq.s32.totalorder %v18851_v22, %v18817_v24  ;;  %vm18892_vm7 = vcmp.eq.s32.totalorder %v5750_v49, %v5704_v3  ;;  %v6224_v21 = vsel %vm741_vm13, 1.0, %v17437_v27 }
 0x167   : > { %18891 = vst [vmem:[#allocation115_spill] sm:$0xff] %v6198_v29  ;;  %v6212_v30 = vsel %vm18892_vm7, 1.0, %v17437_v27  ;;  %v6218_v29 = vsel %vm740_vm12, 1.0, %v17437_v27  ;;  %18895 = vst [vmem:[#allocation118_spill] sm:$0xff] %v6224_v21  ;;  %v6230_v18 = vsel %vm742_vm14, 1.0, %v17437_v27  ;;  %vm18897_vm13 = vcmp.eq.s32.totalorder %v5750_v49, %v5720_v7 }
 0x168   : > { %18893 = vst [vmem:[#allocation116_spill] sm:$0xff] %v6212_v30  ;;  %18894 = vst [vmem:[#allocation117_spill] sm:$0xff] %v6218_v29  ;;  %v6244_v21 = vsel %vm18897_vm13, 1.0, %v17437_v27  ;;  %vm18899_vm14 = vcmp.eq.s32.totalorder %v5750_v49, %v5724_v8  ;;  %vm18901_vm7 = vcmp.eq.s32.totalorder %v5750_v49, %v5728_v9  ;;  %vm18903_vm6 = vcmp.eq.s32.totalorder %v5750_v49, %v5732_v10 }
 0x169   : > { %18896 = vst [vmem:[#allocation119_spill] sm:$0xff] %v6230_v18  ;;  %18898 = vst [vmem:[#allocation120_spill] sm:$0xff] %v6244_v21  ;;  %v6250_v18 = vsel %vm18899_vm14, 1.0, %v17437_v27  ;;  %v6256_v29 = vsel %vm18901_vm7, 1.0, %v17437_v27  ;;  %v6262_v30 = vsel %vm18903_vm6, 1.0, %v17437_v27  ;;  %vm791_vm13 = vcmp.eq.s32.totalorder %v18851_v22, %v5656_v55 }
 0x16a   : > { %18900 = vst [vmem:[#allocation121_spill] sm:$0xff] %v6250_v18  ;;  %18902 = vst [vmem:[#allocation122_spill] sm:$0xff] %v6256_v29  ;;  %vm792_vm12 = vcmp.eq.s32.totalorder %v18851_v22, %v5660_v56  ;;  %vm793_vm14 = vcmp.eq.s32.totalorder %v18851_v22, %v5664_v57  ;;  %vm794_vm4 = vcmp.eq.s32.totalorder %v18851_v22, %v5668_v58  ;;  %v6276_v29 = vsel %vm747_vm0, 1.0, %v17437_v27  ;;  %v18907_v18 = vld [vmem:[#allocation69_spill] sm:$0xff]  ;;  %v18909_v58 = vld [vmem:[#allocation70_spill] sm:$0xff] }
 0x16b   : > { %18904 = vst [vmem:[#allocation123_spill] sm:$0xff] %v6262_v30  ;;  %18905 = vst [vmem:[#allocation124_spill] sm:$0xff] %v6276_v29  ;;  %v6282_v30 = vsel %vm748_vm10, 1.0, %v17437_v27  ;;  %v6288_v21 = vsel %vm749_vm11, 1.0, %v17437_v27  ;;  %v6294_v57 = vsel %vm750_vm15, 1.0, %v17437_v27  ;;  %vm795_vm0 = vcmp.eq.s32.totalorder %v18851_v22, %v5672_v59  ;;  %v18914_v29 = vld [vmem:[#allocation73_spill] sm:$0xff] }
 0x16c   : > { %18906 = vst [vmem:[#allocation125_spill] sm:$0xff] %v6282_v30  ;;  %18908 = vst [vmem:[#allocation126_spill] sm:$0xff] %v6288_v21  ;;  %vm796_vm6 = vcmp.eq.s32.totalorder %v18851_v22, %v5676_v60  ;;  %vm797_vm10 = vcmp.eq.s32.totalorder %v18851_v22, %v5680_v61  ;;  %v6308_v21 = vsel %vm751_vm1, 1.0, %v17437_v27  ;;  %v6314_v30 = vsel %vm752_vm2, 1.0, %v17437_v27 }
 0x16d   : > { %18910 = vst [vmem:[#allocation127_spill] sm:$0xff] %v6294_v57  ;;  %18911 = vst [vmem:[#allocation128_spill] sm:$0xff] %v6308_v21  ;;  %v18912_v57 = vld [vmem:[#allocation72_spill] sm:$0xff]  ;;  %v6320_v61 = vsel %vm753_vm3, 1.0, %v17437_v27  ;;  %vm18917_vm11 = vcmp.eq.s32.totalorder %v5750_v49, %v18916_v62  ;;  %vm18919_vm3 = vcmp.eq.s32.totalorder %v5750_v49, %v18832_v13  ;;  %vm18923_vm1 = vcmp.eq.s32.totalorder %v5750_v49, %v18834_v20  ;;  %v18925_v21 = vld [vmem:[#allocation15_spill] sm:$0xff] }
 0x16e   : > { %18913 = vst [vmem:[#allocation129_spill] sm:$0xff] %v6314_v30  ;;  %18915 = vst [vmem:[#allocation130_spill] sm:$0xff] %v6320_v61  ;;  %v6326_v60 = vsel %vm18917_vm11, 1.0, %v17437_v27  ;;  %v6340_v61 = vsel %vm18919_vm3, 1.0, %v17437_v27  ;;  %vm18921_vm11 = vcmp.eq.s32.totalorder %v5750_v49, %v18833_v19  ;;  %v6352_v30 = vsel %vm18923_vm1, 1.0, %v17437_v27 }
 0x16f   : > { %18918 = vst [vmem:[#allocation131_spill] sm:$0xff] %v6326_v60  ;;  %18920 = vst [vmem:[#allocation132_spill] sm:$0xff] %v6340_v61  ;;  %v6346_v60 = vsel %vm18921_vm11, 1.0, %v17437_v27  ;;  %vm18926_vm7 = vcmp.eq.s32.totalorder %v5750_v49, %v18925_v21  ;;  %vm18928_vm1 = vcmp.eq.s32.totalorder %v5750_v49, %v5786_v23  ;;  %vm18932_vm2 = vcmp.eq.s32.totalorder %v5750_v49, %v5794_v26 }
 0x170   : > { %18922 = vst [vmem:[#allocation133_spill] sm:$0xff] %v6346_v60  ;;  %18924 = vst [vmem:[#allocation134_spill] sm:$0xff] %v6352_v30  ;;  %v6358_v2 = vsel %vm18926_vm7, 1.0, %v17437_v27  ;;  %v6372_v30 = vsel %vm18928_vm1, 1.0, %v17437_v27  ;;  %vm18930_vm7 = vcmp.eq.s32.totalorder %v5750_v49, %v5790_v25  ;;  %v6384_v60 = vsel %vm18932_vm2, 1.0, %v17437_v27 }
 0x171   : > { %18927 = vst [vmem:[#allocation135_spill] sm:$0xff] %v6358_v2  ;;  %18929 = vst [vmem:[#allocation136_spill] sm:$0xff] %v6372_v30  ;;  %v6378_v2 = vsel %vm18930_vm7, 1.0, %v17437_v27  ;;  %vm18934_vm15 = vcmp.eq.s32.totalorder %v5750_v49, %v5798_v15  ;;  %vm18936_vm2 = vcmp.eq.s32.totalorder %v5750_v49, %v5802_v16  ;;  %vm18940_vm11 = vcmp.eq.s32.totalorder %v18851_v22, %v5550_v28  ;;  %v18942_v30 = vld [vmem:[#allocation21_spill] sm:$0xff] }
 0x172   : > { %18931 = vst [vmem:[#allocation137_spill] sm:$0xff] %v6378_v2  ;;  %18933 = vst [vmem:[#allocation138_spill] sm:$0xff] %v6384_v60  ;;  %v6390_v61 = vsel %vm18934_vm15, 1.0, %v17437_v27  ;;  %v6404_v60 = vsel %vm18936_vm2, 1.0, %v17437_v27  ;;  %vm18938_vm15 = vcmp.eq.s32.totalorder %v5750_v49, %v5806_v17  ;;  %v6416_v2 = vsel %vm18940_vm11, 1.0, %v17437_v27 }
 0x173   : > { %18935 = vst [vmem:[#allocation139_spill] sm:$0xff] %v6390_v61  ;;  %18937 = vst [vmem:[#allocation140_spill] sm:$0xff] %v6404_v60  ;;  %v6410_v61 = vsel %vm18938_vm15, 1.0, %v17437_v27  ;;  %vm18943_vm3 = vcmp.eq.s32.totalorder %v18851_v22, %v18942_v30  ;;  %vm18945_vm11 = vcmp.eq.s32.totalorder %v18851_v22, %v5558_v31  ;;  %vm18949_vm7 = vcmp.eq.s32.totalorder %v18851_v22, %v5566_v33 }
 0x174   : > { %18939 = vst [vmem:[#allocation141_spill] sm:$0xff] %v6410_v61  ;;  %18941 = vst [vmem:[#allocation142_spill] sm:$0xff] %v6416_v2  ;;  %v6422_v10 = vsel %vm18943_vm3, 1.0, %v17437_v27  ;;  %v6436_v49 = vsel %vm18945_vm11, 1.0, %v17437_v27  ;;  %vm18947_vm3 = vcmp.eq.s32.totalorder %v18851_v22, %v5562_v32  ;;  %v6448_v60 = vsel %vm18949_vm7, 1.0, %v17437_v27  ;;  %v6520_v2 = vpop.permute.xlu0 %660 }
 0x175   : > { %18944 = vst [vmem:[#allocation143_spill] sm:$0xff] %v6422_v10  ;;  %18946 = vst [vmem:[#allocation144_spill] sm:$0xff] %v6436_v49  ;;  %v6442_v61 = vsel %vm18947_vm3, 1.0, %v17437_v27  ;;  %vm18951_vm1 = vcmp.eq.s32.totalorder %v18851_v22, %v5570_v34  ;;  %vm18953_vm7 = vcmp.eq.s32.totalorder %v18851_v22, %v5574_v35  ;;  %vm18957_vm15 = vcmp.eq.s32.totalorder %v18851_v22, %v5582_v37 }
 0x176   : > { %18948 = vst [vmem:[#allocation145_spill] sm:$0xff] %v6442_v61  ;;  %18950 = vst [vmem:[#allocation146_spill] sm:$0xff] %v6448_v60  ;;  %v6454_v10 = vsel %vm18951_vm1, 1.0, %v17437_v27  ;;  %v6468_v60 = vsel %vm18953_vm7, 1.0, %v17437_v27  ;;  %vm18955_vm1 = vcmp.eq.s32.totalorder %v18851_v22, %v5578_v36  ;;  %v6480_v61 = vsel %vm18957_vm15, 1.0, %v17437_v27 }
 0x177   : > { %18952 = vst [vmem:[#allocation147_spill] sm:$0xff] %v6454_v10  ;;  %18954 = vst [vmem:[#allocation148_spill] sm:$0xff] %v6468_v60  ;;  %v6474_v10 = vsel %vm18955_vm1, 1.0, %v17437_v27  ;;  %vm18959_vm2 = vcmp.eq.s32.totalorder %v18851_v22, %v5586_v38  ;;  %vm18961_vm15 = vcmp.eq.s32.totalorder %v18851_v22, %v5590_v39  ;;  %vm18965_vm3 = vcmp.eq.s32.totalorder %v18851_v22, %v5598_v41 }
 0x178   : > { %18956 = vst [vmem:[#allocation149_spill] sm:$0xff] %v6474_v10  ;;  %18958 = vst [vmem:[#allocation150_spill] sm:$0xff] %v6480_v61  ;;  %v6486_v49 = vsel %vm18959_vm2, 1.0, %v17437_v27  ;;  %v6500_v61 = vsel %vm18961_vm15, 1.0, %v17437_v27  ;;  %vm18963_vm2 = vcmp.eq.s32.totalorder %v18851_v22, %v5594_v40  ;;  %v6512_v10 = vsel %vm18965_vm3, 1.0, %v17437_v27 }
 0x179   : > { %18960 = vst [vmem:[#allocation151_spill] sm:$0xff] %v6486_v49  ;;  %18962 = vst [vmem:[#allocation152_spill] sm:$0xff] %v6500_v61  ;;  %v6506_v49 = vsel %vm18963_vm2, 1.0, %v17437_v27  ;;  %vm18967_vm11 = vcmp.eq.s32.totalorder %v18851_v22, %v5602_v42  ;;  %vm18969_vm7 = vcmp.eq.s32.totalorder %v18851_v22, %v5606_v43  ;;  %vm18973_vm2 = vcmp.eq.s32.totalorder %v18851_v22, %v5614_v45  ;;  %v19001_v42 = vld [vmem:[#allocation54_spill] sm:$0xff] }
 0x17a   : > { %18964 = vst [vmem:[#allocation153_spill] sm:$0xff] %v6506_v49  ;;  %18966 = vst [vmem:[#allocation154_spill] sm:$0xff] %v6512_v10  ;;  %v6518_v60 = vsel %vm18967_vm11, 1.0, %v17437_v27  ;;  %v6534_v10 = vsel %vm18969_vm7, 1.0, %v17437_v27  ;;  %vm18971_vm11 = vcmp.eq.s32.totalorder %v18851_v22, %v5610_v44  ;;  %v6546_v49 = vsel %vm18973_vm2, 1.0, %v17437_v27 }
 0x17b   : > { %18968 = vst [vmem:[#allocation155_spill] sm:$0xff] %v6518_v60  ;;  %18970 = vst [vmem:[#allocation156_spill] sm:$0xff] %v6534_v10  ;;  %v6540_v60 = vsel %vm18971_vm11, 1.0, %v17437_v27  ;;  %vm18975_vm3 = vcmp.eq.s32.totalorder %v18851_v22, %v5618_v46  ;;  %vm827_vm7 = vcmp.eq.s32.totalorder %v18851_v22, %v5802_v16  ;;  %vm828_vm1 = vcmp.eq.s32.totalorder %v18851_v22, %v5806_v17 }
 0x17c   : > { %18972 = vst [vmem:[#allocation157_spill] sm:$0xff] %v6540_v60  ;;  %18974 = vst [vmem:[#allocation158_spill] sm:$0xff] %v6546_v49  ;;  %v6552_v61 = vsel %vm18975_vm3, 1.0, %v17437_v27  ;;  %vm829_vm11 = vcmp.eq.s32.totalorder %v6520_v2, %v5550_v28  ;;  %v6566_v49 = vsel %vm783_vm9, 1.0, %v17437_v27  ;;  %v6578_v60 = vsel %vm785_vm5, 1.0, %v17437_v27 }
 0x17d   : > { %18976 = vst [vmem:[#allocation159_spill] sm:$0xff] %v6552_v61  ;;  %18977 = vst [vmem:[#allocation160_spill] sm:$0xff] %v6566_v49  ;;  %v6572_v61 = vsel %vm784_vm8, 1.0, %v17437_v27  ;;  %vm18980_vm2 = vcmp.eq.s32.totalorder %v18851_v22, %v5634_v50  ;;  %vm18982_vm5 = vcmp.eq.s32.totalorder %v18851_v22, %v5638_v51  ;;  %vm18986_vm3 = vcmp.eq.s32.totalorder %v18851_v22, %v5646_v53 }
 0x17e   : > { %18978 = vst [vmem:[#allocation161_spill] sm:$0xff] %v6572_v61  ;;  %18979 = vst [vmem:[#allocation162_spill] sm:$0xff] %v6578_v60  ;;  %v6584_v10 = vsel %vm18980_vm2, 1.0, %v17437_v27  ;;  %v6598_v60 = vsel %vm18982_vm5, 1.0, %v17437_v27  ;;  %vm18984_vm2 = vcmp.eq.s32.totalorder %v18851_v22, %v5642_v52  ;;  %v6610_v61 = vsel %vm18986_vm3, 1.0, %v17437_v27 }
 0x17f   : > { %18981 = vst [vmem:[#allocation163_spill] sm:$0xff] %v6584_v10  ;;  %18983 = vst [vmem:[#allocation164_spill] sm:$0xff] %v6598_v60  ;;  %v6604_v10 = vsel %vm18984_vm2, 1.0, %v17437_v27  ;;  %vm18988_vm15 = vcmp.eq.s32.totalorder %v18851_v22, %v5650_v54  ;;  %vm835_vm5 = vcmp.eq.s32.totalorder %v6520_v2, %v5574_v35  ;;  %vm836_vm8 = vcmp.eq.s32.totalorder %v6520_v2, %v5578_v36 }
 0x180   : > { %18985 = vst [vmem:[#allocation165_spill] sm:$0xff] %v6604_v10  ;;  %18987 = vst [vmem:[#allocation166_spill] sm:$0xff] %v6610_v61  ;;  %v6616_v49 = vsel %vm18988_vm15, 1.0, %v17437_v27  ;;  %vm837_vm2 = vcmp.eq.s32.totalorder %v6520_v2, %v5582_v37  ;;  %vm838_vm9 = vcmp.eq.s32.totalorder %v6520_v2, %v5586_v38  ;;  %v6630_v61 = vsel %vm791_vm13, 1.0, %v17437_v27  ;;  %v18992_v10 = vld [vmem:[#allocation49_spill] sm:$0xff]  ;;  %v18994_v38 = vld [vmem:[#allocation50_spill] sm:$0xff] }
 0x181   : > { %18989 = vst [vmem:[#allocation167_spill] sm:$0xff] %v6616_v49  ;;  %18990 = vst [vmem:[#allocation168_spill] sm:$0xff] %v6630_v61  ;;  %v6636_v49 = vsel %vm792_vm12, 1.0, %v17437_v27  ;;  %v6642_v60 = vsel %vm793_vm14, 1.0, %v17437_v27  ;;  %v6648_v37 = vsel %vm794_vm4, 1.0, %v17437_v27  ;;  %vm839_vm13 = vcmp.eq.s32.totalorder %v6520_v2, %v5590_v39  ;;  %v18999_v61 = vld [vmem:[#allocation53_spill] sm:$0xff] }
 0x182   : > { %18991 = vst [vmem:[#allocation169_spill] sm:$0xff] %v6636_v49  ;;  %18993 = vst [vmem:[#allocation170_spill] sm:$0xff] %v6642_v60  ;;  %vm840_vm15 = vcmp.eq.s32.totalorder %v6520_v2, %v5594_v40  ;;  %vm841_vm12 = vcmp.eq.s32.totalorder %v6520_v2, %v5598_v41  ;;  %v6662_v60 = vsel %vm795_vm0, 1.0, %v17437_v27  ;;  %v6668_v49 = vsel %vm796_vm6, 1.0, %v17437_v27 }
 0x183   : > { %18995 = vst [vmem:[#allocation171_spill] sm:$0xff] %v6648_v37  ;;  %18996 = vst [vmem:[#allocation172_spill] sm:$0xff] %v6662_v60  ;;  %v18997_v37 = vld [vmem:[#allocation52_spill] sm:$0xff]  ;;  %v6674_v41 = vsel %vm797_vm10, 1.0, %v17437_v27  ;;  %vm19002_vm4 = vcmp.eq.s32.totalorder %v18851_v22, %v19001_v42  ;;  %vm19004_vm10 = vcmp.eq.s32.totalorder %v18851_v22, %v5688_v63  ;;  %vm19008_vm0 = vcmp.eq.s32.totalorder %v18851_v22, %v5696_v1  ;;  %v19010_v60 = vld [vmem:[#allocation58_spill] sm:$0xff] }
 0x184   : > { %18998 = vst [vmem:[#allocation173_spill] sm:$0xff] %v6668_v49  ;;  %19000 = vst [vmem:[#allocation174_spill] sm:$0xff] %v6674_v41  ;;  %v6680_v40 = vsel %vm19002_vm4, 1.0, %v17437_v27  ;;  %v6694_v41 = vsel %vm19004_vm10, 1.0, %v17437_v27  ;;  %vm19006_vm4 = vcmp.eq.s32.totalorder %v18851_v22, %v5692_v0  ;;  %v6706_v49 = vsel %vm19008_vm0, 1.0, %v17437_v27 }
 0x185   : > { %19003 = vst [vmem:[#allocation175_spill] sm:$0xff] %v6680_v40  ;;  %19005 = vst [vmem:[#allocation176_spill] sm:$0xff] %v6694_v41  ;;  %v6700_v40 = vsel %vm19006_vm4, 1.0, %v17437_v27  ;;  %vm19011_vm3 = vcmp.eq.s32.totalorder %v18851_v22, %v19010_v60  ;;  %vm19013_vm0 = vcmp.eq.s32.totalorder %v18851_v22, %v5704_v3  ;;  %vm19017_vm6 = vcmp.eq.s32.totalorder %v18851_v22, %v5712_v5 }
 0x186   : > { %19007 = vst [vmem:[#allocation177_spill] sm:$0xff] %v6700_v40  ;;  %19009 = vst [vmem:[#allocation178_spill] sm:$0xff] %v6706_v49  ;;  %v6712_v46 = vsel %vm19011_vm3, 1.0, %v17437_v27  ;;  %v6726_v49 = vsel %vm19013_vm0, 1.0, %v17437_v27  ;;  %vm19015_vm3 = vcmp.eq.s32.totalorder %v18851_v22, %v5708_v4  ;;  %v6738_v40 = vsel %vm19017_vm6, 1.0, %v17437_v27 }
 0x187   : > { %19012 = vst [vmem:[#allocation179_spill] sm:$0xff] %v6712_v46  ;;  %19014 = vst [vmem:[#allocation180_spill] sm:$0xff] %v6726_v49  ;;  %v6732_v46 = vsel %vm19015_vm3, 1.0, %v17437_v27  ;;  %vm19019_vm14 = vcmp.eq.s32.totalorder %v18851_v22, %v5716_v6  ;;  %vm19021_vm6 = vcmp.eq.s32.totalorder %v18851_v22, %v5720_v7  ;;  %vm19025_vm4 = vcmp.eq.s32.totalorder %v18851_v22, %v5728_v9  ;;  %v19027_v49 = vld [vmem:[#allocation66_spill] sm:$0xff] }
 0x188   : > { %19016 = vst [vmem:[#allocation181_spill] sm:$0xff] %v6732_v46  ;;  %19018 = vst [vmem:[#allocation182_spill] sm:$0xff] %v6738_v40  ;;  %v6744_v41 = vsel %vm19019_vm14, 1.0, %v17437_v27  ;;  %v6758_v40 = vsel %vm19021_vm6, 1.0, %v17437_v27  ;;  %vm19023_vm14 = vcmp.eq.s32.totalorder %v18851_v22, %v5724_v8  ;;  %v6770_v46 = vsel %vm19025_vm4, 1.0, %v17437_v27 }
 0x189   : > { %19020 = vst [vmem:[#allocation183_spill] sm:$0xff] %v6744_v41  ;;  %19022 = vst [vmem:[#allocation184_spill] sm:$0xff] %v6758_v40  ;;  %v6764_v41 = vsel %vm19023_vm14, 1.0, %v17437_v27  ;;  %vm19028_vm10 = vcmp.eq.s32.totalorder %v18851_v22, %v19027_v49  ;;  %vm19030_vm4 = vcmp.eq.s32.totalorder %v18851_v22, %v5736_v11  ;;  %vm19034_vm3 = vcmp.eq.s32.totalorder %v18851_v22, %v18907_v18  ;;  %v6938_v49 = vpop.permute.xlu1 %663 }
 0x18a   : > { %19024 = vst [vmem:[#allocation185_spill] sm:$0xff] %v6764_v41  ;;  %19026 = vst [vmem:[#allocation186_spill] sm:$0xff] %v6770_v46  ;;  %v6776_v54 = vsel %vm19028_vm10, 1.0, %v17437_v27  ;;  %v6790_v46 = vsel %vm19030_vm4, 1.0, %v17437_v27  ;;  %vm19032_vm10 = vcmp.eq.s32.totalorder %v18851_v22, %v5740_v12  ;;  %v6802_v41 = vsel %vm19034_vm3, 1.0, %v17437_v27 }
 0x18b   : > { %19029 = vst [vmem:[#allocation187_spill] sm:$0xff] %v6776_v54  ;;  %19031 = vst [vmem:[#allocation188_spill] sm:$0xff] %v6790_v46  ;;  %v6796_v54 = vsel %vm19032_vm10, 1.0, %v17437_v27  ;;  %vm19036_vm0 = vcmp.eq.s32.totalorder %v18851_v22, %v18909_v58  ;;  %vm19038_vm3 = vcmp.eq.s32.totalorder %v18851_v22, %v18824_v14  ;;  %vm19042_vm14 = vcmp.eq.s32.totalorder %v18851_v22, %v18914_v29 }
 0x18c   : > { %19033 = vst [vmem:[#allocation189_spill] sm:$0xff] %v6796_v54  ;;  %19035 = vst [vmem:[#allocation190_spill] sm:$0xff] %v6802_v41  ;;  %v6808_v40 = vsel %vm19036_vm0, 1.0, %v17437_v27  ;;  %v6822_v41 = vsel %vm19038_vm3, 1.0, %v17437_v27  ;;  %vm19040_vm0 = vcmp.eq.s32.totalorder %v18851_v22, %v18912_v57  ;;  %v6834_v54 = vsel %vm19042_vm14, 1.0, %v17437_v27 }
 0x18d   : > { %19037 = vst [vmem:[#allocation191_spill] sm:$0xff] %v6808_v40  ;;  %19039 = vst [vmem:[#allocation192_spill] sm:$0xff] %v6822_v41  ;;  %v6828_v40 = vsel %vm19040_vm0, 1.0, %v17437_v27  ;;  %vm19044_vm6 = vcmp.eq.s32.totalorder %v18851_v22, %v18916_v62  ;;  %vm19046_vm14 = vcmp.eq.s32.totalorder %v18851_v22, %v18832_v13  ;;  %vm19050_vm10 = vcmp.eq.s32.totalorder %v18851_v22, %v18834_v20 }
 0x18e   : > { %19041 = vst [vmem:[#allocation193_spill] sm:$0xff] %v6828_v40  ;;  %19043 = vst [vmem:[#allocation194_spill] sm:$0xff] %v6834_v54  ;;  %v6840_v46 = vsel %vm19044_vm6, 1.0, %v17437_v27  ;;  %v6854_v54 = vsel %vm19046_vm14, 1.0, %v17437_v27  ;;  %vm19048_vm6 = vcmp.eq.s32.totalorder %v18851_v22, %v18833_v19  ;;  %v6866_v40 = vsel %vm19050_vm10, 1.0, %v17437_v27 }
 0x18f   : > { %19045 = vst [vmem:[#allocation195_spill] sm:$0xff] %v6840_v46  ;;  %19047 = vst [vmem:[#allocation196_spill] sm:$0xff] %v6854_v54  ;;  %v6860_v46 = vsel %vm19048_vm6, 1.0, %v17437_v27  ;;  %vm19052_vm4 = vcmp.eq.s32.totalorder %v18851_v22, %v18925_v21  ;;  %vm19054_vm10 = vcmp.eq.s32.totalorder %v18851_v22, %v5786_v23  ;;  %vm19058_vm0 = vcmp.eq.s32.totalorder %v18851_v22, %v5794_v26  ;;  %v19086_v21 = vld [vmem:[#allocation33_spill] sm:$0xff] }
 0x190   : > { %19049 = vst [vmem:[#allocation197_spill] sm:$0xff] %v6860_v46  ;;  %19051 = vst [vmem:[#allocation198_spill] sm:$0xff] %v6866_v40  ;;  %v6872_v41 = vsel %vm19052_vm4, 1.0, %v17437_v27  ;;  %v6886_v40 = vsel %vm19054_vm10, 1.0, %v17437_v27  ;;  %vm19056_vm4 = vcmp.eq.s32.totalorder %v18851_v22, %v5790_v25  ;;  %v6898_v46 = vsel %vm19058_vm0, 1.0, %v17437_v27 }
 0x191   : > { %19053 = vst [vmem:[#allocation199_spill] sm:$0xff] %v6872_v41  ;;  %19055 = vst [vmem:[#allocation200_spill] sm:$0xff] %v6886_v40  ;;  %v6892_v41 = vsel %vm19056_vm4, 1.0, %v17437_v27  ;;  %vm19060_vm3 = vcmp.eq.s32.totalorder %v18851_v22, %v5798_v15  ;;  %vm871_vm10 = vcmp.eq.s32.totalorder %v6520_v2, %v5720_v7  ;;  %vm872_vm6 = vcmp.eq.s32.totalorder %v6520_v2, %v5724_v8 }
 0x192   : > { %19057 = vst [vmem:[#allocation201_spill] sm:$0xff] %v6892_v41  ;;  %19059 = vst [vmem:[#allocation202_spill] sm:$0xff] %v6898_v46  ;;  %v6904_v54 = vsel %vm19060_vm3, 1.0, %v17437_v27  ;;  %vm873_vm4 = vcmp.eq.s32.totalorder %v6520_v2, %v5728_v9  ;;  %v6918_v46 = vsel %vm827_vm7, 1.0, %v17437_v27  ;;  %v6930_v41 = vsel %vm829_vm11, 1.0, %v17437_v27 }
 0x193   : > { %19061 = vst [vmem:[#allocation203_spill] sm:$0xff] %v6904_v54  ;;  %19062 = vst [vmem:[#allocation204_spill] sm:$0xff] %v6918_v46  ;;  %v6924_v54 = vsel %vm828_vm1, 1.0, %v17437_v27  ;;  %vm19065_vm3 = vcmp.eq.s32.totalorder %v6520_v2, %v18942_v30  ;;  %vm19067_vm14 = vcmp.eq.s32.totalorder %v6520_v2, %v5558_v31  ;;  %vm19071_vm1 = vcmp.eq.s32.totalorder %v6520_v2, %v5566_v33 }
 0x194   : > { %19063 = vst [vmem:[#allocation205_spill] sm:$0xff] %v6924_v54  ;;  %19064 = vst [vmem:[#allocation206_spill] sm:$0xff] %v6930_v41  ;;  %v6936_v40 = vsel %vm19065_vm3, 1.0, %v17437_v27  ;;  %v6952_v22 = vsel %vm19067_vm14, 1.0, %v17437_v27  ;;  %vm19069_vm3 = vcmp.eq.s32.totalorder %v6520_v2, %v5562_v32  ;;  %v6964_v46 = vsel %vm19071_vm1, 1.0, %v17437_v27  ;;  %v19079_v41 = vld [vmem:[#allocation29_spill] sm:$0xff] }
 0x195   : > { %19066 = vst [vmem:[#allocation207_spill] sm:$0xff] %v6936_v40  ;;  %19068 = vst [vmem:[#allocation208_spill] sm:$0xff] %v6952_v22  ;;  %v6958_v54 = vsel %vm19069_vm3, 1.0, %v17437_v27  ;;  %vm19073_vm11 = vcmp.eq.s32.totalorder %v6520_v2, %v5570_v34  ;;  %vm879_vm14 = vcmp.eq.s32.totalorder %v6520_v2, %v18824_v14  ;;  %vm880_vm0 = vcmp.eq.s32.totalorder %v6520_v2, %v18912_v57 }
 0x196   : > { %19070 = vst [vmem:[#allocation209_spill] sm:$0xff] %v6958_v54  ;;  %19072 = vst [vmem:[#allocation210_spill] sm:$0xff] %v6964_v46  ;;  %v6970_v40 = vsel %vm19073_vm11, 1.0, %v17437_v27  ;;  %vm881_vm3 = vcmp.eq.s32.totalorder %v6520_v2, %v18914_v29  ;;  %vm882_vm7 = vcmp.eq.s32.totalorder %v6520_v2, %v18916_v62  ;;  %v6984_v46 = vsel %vm835_vm5, 1.0, %v17437_v27  ;;  %v19077_v54 = vld [vmem:[#allocation28_spill] sm:$0xff] }
 0x197   : > { %19074 = vst [vmem:[#allocation211_spill] sm:$0xff] %v6970_v40  ;;  %19075 = vst [vmem:[#allocation212_spill] sm:$0xff] %v6984_v46  ;;  %v6990_v40 = vsel %vm836_vm8, 1.0, %v17437_v27  ;;  %v6996_v22 = vsel %vm837_vm2, 1.0, %v17437_v27  ;;  %v7002_v62 = vsel %vm838_vm9, 1.0, %v17437_v27  ;;  %vm883_vm5 = vcmp.eq.s32.totalorder %v6520_v2, %v18832_v13  ;;  %v19084_v46 = vld [vmem:[#allocation32_spill] sm:$0xff] }
 0x198   : > { %19076 = vst [vmem:[#allocation213_spill] sm:$0xff] %v6990_v40  ;;  %19078 = vst [vmem:[#allocation214_spill] sm:$0xff] %v6996_v22  ;;  %vm884_vm1 = vcmp.eq.s32.totalorder %v6520_v2, %v18833_v19  ;;  %vm885_vm8 = vcmp.eq.s32.totalorder %v6520_v2, %v18834_v20  ;;  %v7016_v22 = vsel %vm839_vm13, 1.0, %v17437_v27  ;;  %v7022_v40 = vsel %vm840_vm15, 1.0, %v17437_v27 }
 0x199   : > { %19080 = vst [vmem:[#allocation215_spill] sm:$0xff] %v7002_v62  ;;  %19081 = vst [vmem:[#allocation216_spill] sm:$0xff] %v7016_v22  ;;  %v19082_v62 = vld [vmem:[#allocation31_spill] sm:$0xff]  ;;  %v7028_v20 = vsel %vm841_vm12, 1.0, %v17437_v27  ;;  %vm19087_vm9 = vcmp.eq.s32.totalorder %v6520_v2, %v19086_v21  ;;  %vm19089_vm12 = vcmp.eq.s32.totalorder %v6520_v2, %v5606_v43  ;;  %vm19093_vm13 = vcmp.eq.s32.totalorder %v6520_v2, %v5614_v45  ;;  %v19095_v22 = vld [vmem:[#allocation37_spill] sm:$0xff] }
 0x19a   : > { %19083 = vst [vmem:[#allocation217_spill] sm:$0xff] %v7022_v40  ;;  %19085 = vst [vmem:[#allocation218_spill] sm:$0xff] %v7028_v20  ;;  %v7034_v19 = vsel %vm19087_vm9, 1.0, %v17437_v27  ;;  %v7048_v20 = vsel %vm19089_vm12, 1.0, %v17437_v27  ;;  %vm19091_vm9 = vcmp.eq.s32.totalorder %v6520_v2, %v5610_v44  ;;  %v7060_v40 = vsel %vm19093_vm13, 1.0, %v17437_v27 }
 0x19b   : > { %19088 = vst [vmem:[#allocation219_spill] sm:$0xff] %v7034_v19  ;;  %19090 = vst [vmem:[#allocation220_spill] sm:$0xff] %v7048_v20  ;;  %v7054_v19 = vsel %vm19091_vm9, 1.0, %v17437_v27  ;;  %vm19096_vm11 = vcmp.eq.s32.totalorder %v6520_v2, %v19095_v22  ;;  %vm19098_vm13 = vcmp.eq.s32.totalorder %v6520_v2, %v5622_v47  ;;  %vm19102_vm15 = vcmp.eq.s32.totalorder %v6520_v2, %v18817_v24 }
 0x19c   : > { %19092 = vst [vmem:[#allocation221_spill] sm:$0xff] %v7054_v19  ;;  %19094 = vst [vmem:[#allocation222_spill] sm:$0xff] %v7060_v40  ;;  %v7066_v30 = vsel %vm19096_vm11, 1.0, %v17437_v27  ;;  %v7080_v40 = vsel %vm19098_vm13, 1.0, %v17437_v27  ;;  %vm19100_vm11 = vcmp.eq.s32.totalorder %v6520_v2, %v5626_v48  ;;  %v7092_v19 = vsel %vm19102_vm15, 1.0, %v17437_v27 }
 0x19d   : > { %19097 = vst [vmem:[#allocation223_spill] sm:$0xff] %v7066_v30  ;;  %19099 = vst [vmem:[#allocation224_spill] sm:$0xff] %v7080_v40  ;;  %v7086_v30 = vsel %vm19100_vm11, 1.0, %v17437_v27  ;;  %vm19104_vm2 = vcmp.eq.s32.totalorder %v6520_v2, %v5634_v50  ;;  %vm19106_vm15 = vcmp.eq.s32.totalorder %v6520_v2, %v5638_v51  ;;  %vm19110_vm9 = vcmp.eq.s32.totalorder %v6520_v2, %v5646_v53  ;;  %v19112_v40 = vld [vmem:[#allocation45_spill] sm:$0xff] }
 0x19e   : > { %19101 = vst [vmem:[#allocation225_spill] sm:$0xff] %v7086_v30  ;;  %19103 = vst [vmem:[#allocation226_spill] sm:$0xff] %v7092_v19  ;;  %v7098_v20 = vsel %vm19104_vm2, 1.0, %v17437_v27  ;;  %v7112_v19 = vsel %vm19106_vm15, 1.0, %v17437_v27  ;;  %vm19108_vm2 = vcmp.eq.s32.totalorder %v6520_v2, %v5642_v52  ;;  %v7124_v30 = vsel %vm19110_vm9, 1.0, %v17437_v27 }
 0x19f   : > { %19105 = vst [vmem:[#allocation227_spill] sm:$0xff] %v7098_v20  ;;  %19107 = vst [vmem:[#allocation228_spill] sm:$0xff] %v7112_v19  ;;  %v7118_v20 = vsel %vm19108_vm2, 1.0, %v17437_v27  ;;  %vm19113_vm12 = vcmp.eq.s32.totalorder %v6520_v2, %v19112_v40  ;;  %vm19115_vm2 = vcmp.eq.s32.totalorder %v6520_v2, %v5656_v55  ;;  %vm19117_vm9 = vcmp.eq.s32.totalorder %v6520_v2, %v5660_v56 }
 0x1a0   : > { %19109 = vst [vmem:[#allocation229_spill] sm:$0xff] %v7118_v20  ;;  %19111 = vst [vmem:[#allocation230_spill] sm:$0xff] %v7124_v30  ;;  %v7130_v36 = vsel %vm19113_vm12, 1.0, %v17437_v27  ;;  %v7140_v20 = vsel %vm19115_vm2, 1.0, %v17437_v27  ;;  %v7146_v30 = vsel %vm19117_vm9, 1.0, %v17437_v27  ;;  %vm19119_vm12 = vcmp.eq.s32.totalorder %v6520_v2, %v18992_v10 }
 0x1a1   : > { %19114 = vst [vmem:[#allocation231_spill] sm:$0xff] %v7130_v36  ;;  %19116 = vst [vmem:[#allocation232_spill] sm:$0xff] %v7140_v20  ;;  %v7152_v36 = vsel %vm19119_vm12, 1.0, %v17437_v27  ;;  %vm19121_vm11 = vcmp.eq.s32.totalorder %v6520_v2, %v18994_v38  ;;  %vm19123_vm2 = vcmp.eq.s32.totalorder %v6520_v2, %v5672_v59  ;;  %vm19125_vm9 = vcmp.eq.s32.totalorder %v6520_v2, %v18997_v37  ;;  %v19271_v37 = vld [vmem:[#allocation75_spill] sm:$0xff] }
 0x1a2   : > { %19118 = vst [vmem:[#allocation233_spill] sm:$0xff] %v7146_v30  ;;  %19120 = vst [vmem:[#allocation234_spill] sm:$0xff] %v7152_v36  ;;  %v7158_v19 = vsel %vm19121_vm11, 1.0, %v17437_v27  ;;  %v7164_v20 = vsel %vm19123_vm2, 1.0, %v17437_v27  ;;  %v7170_v30 = vsel %vm19125_vm9, 1.0, %v17437_v27  ;;  %vm19127_vm12 = vcmp.eq.s32.totalorder %v6520_v2, %v18999_v61 }
 0x1a3   : > { %19122 = vst [vmem:[#allocation235_spill] sm:$0xff] %v7158_v19  ;;  %19124 = vst [vmem:[#allocation236_spill] sm:$0xff] %v7164_v20  ;;  %v7176_v36 = vsel %vm19127_vm12, 1.0, %v17437_v27  ;;  %vm19129_vm11 = vcmp.eq.s32.totalorder %v6520_v2, %v19001_v42  ;;  %vm19131_vm9 = vcmp.eq.s32.totalorder %v6520_v2, %v5688_v63  ;;  %vm19133_vm12 = vcmp.eq.s32.totalorder %v6520_v2, %v5692_v0 }
 0x1a4   : > { %19126 = vst [vmem:[#allocation237_spill] sm:$0xff] %v7170_v30  ;;  %19128 = vst [vmem:[#allocation238_spill] sm:$0xff] %v7176_v36  ;;  %v7182_v19 = vsel %vm19129_vm11, 1.0, %v17437_v27  ;;  %v7192_v30 = vsel %vm19131_vm9, 1.0, %v17437_v27  ;;  %v7198_v36 = vsel %vm19133_vm12, 1.0, %v17437_v27  ;;  %vm19135_vm11 = vcmp.eq.s32.totalorder %v6520_v2, %v5696_v1 }
 0x1a5   : > { %19130 = vst [vmem:[#allocation239_spill] sm:$0xff] %v7182_v19  ;;  %19132 = vst [vmem:[#allocation240_spill] sm:$0xff] %v7192_v30  ;;  %v7204_v19 = vsel %vm19135_vm11, 1.0, %v17437_v27  ;;  %vm19137_vm15 = vcmp.eq.s32.totalorder %v6520_v2, %v19010_v60  ;;  %vm19139_vm11 = vcmp.eq.s32.totalorder %v6520_v2, %v5704_v3  ;;  %vm19143_vm2 = vcmp.eq.s32.totalorder %v6520_v2, %v5712_v5 }
 0x1a6   : > { %19134 = vst [vmem:[#allocation241_spill] sm:$0xff] %v7198_v36  ;;  %19136 = vst [vmem:[#allocation242_spill] sm:$0xff] %v7204_v19  ;;  %v7210_v20 = vsel %vm19137_vm15, 1.0, %v17437_v27  ;;  %v7224_v19 = vsel %vm19139_vm11, 1.0, %v17437_v27  ;;  %vm19141_vm15 = vcmp.eq.s32.totalorder %v6520_v2, %v5708_v4  ;;  %v7236_v36 = vsel %vm19143_vm2, 1.0, %v17437_v27 }
 0x1a7   : > { %19138 = vst [vmem:[#allocation243_spill] sm:$0xff] %v7210_v20  ;;  %19140 = vst [vmem:[#allocation244_spill] sm:$0xff] %v7224_v19  ;;  %v7230_v20 = vsel %vm19141_vm15, 1.0, %v17437_v27  ;;  %vm19145_vm13 = vcmp.eq.s32.totalorder %v6520_v2, %v5716_v6  ;;  %vm907_vm11 = vcmp.eq.s32.totalorder %v6938_v49, %v5606_v43  ;;  %vm908_vm12 = vcmp.eq.s32.totalorder %v6938_v49, %v5610_v44  ;;  %v19150_v19 = vld [vmem:[#allocation66_spill] sm:$0xff] }
 0x1a8   : > { %19142 = vst [vmem:[#allocation245_spill] sm:$0xff] %v7230_v20  ;;  %19144 = vst [vmem:[#allocation246_spill] sm:$0xff] %v7236_v36  ;;  %v7242_v30 = vsel %vm19145_vm13, 1.0, %v17437_v27  ;;  %vm909_vm15 = vcmp.eq.s32.totalorder %v6938_v49, %v5614_v45  ;;  %vm910_vm9 = vcmp.eq.s32.totalorder %v6938_v49, %v19095_v22  ;;  %v7256_v36 = vsel %vm871_vm10, 1.0, %v17437_v27  ;;  %v19261_v45 = vld [vmem:[#allocation72_spill] sm:$0xff] }
 0x1a9   : > { %19146 = vst [vmem:[#allocation247_spill] sm:$0xff] %v7242_v30  ;;  %19147 = vst [vmem:[#allocation248_spill] sm:$0xff] %v7256_v36  ;;  %v7262_v30 = vsel %vm872_vm6, 1.0, %v17437_v27  ;;  %v7268_v20 = vsel %vm873_vm4, 1.0, %v17437_v27  ;;  %vm19151_vm13 = vcmp.eq.s32.totalorder %v6520_v2, %v19150_v19  ;;  %vm911_vm10 = vcmp.eq.s32.totalorder %v6938_v49, %v5622_v47  ;;  %v19263_v47 = vld [vmem:[#allocation74_spill] sm:$0xff] }
 0x1aa   : > { %19148 = vst [vmem:[#allocation249_spill] sm:$0xff] %v7262_v30  ;;  %19149 = vst [vmem:[#allocation250_spill] sm:$0xff] %v7268_v20  ;;  %v7274_v6 = vsel %vm19151_vm13, 1.0, %v17437_v27  ;;  %vm19153_vm6 = vcmp.eq.s32.totalorder %v6520_v2, %v5736_v11  ;;  %vm19155_vm4 = vcmp.eq.s32.totalorder %v6520_v2, %v5740_v12  ;;  %vm19157_vm13 = vcmp.eq.s32.totalorder %v6520_v2, %v18907_v18 }
 0x1ab   : > { %19152 = vst [vmem:[#allocation251_spill] sm:$0xff] %v7274_v6  ;;  %v7284_v30 = vsel %vm19153_vm6, 1.0, %v17437_v27  ;;  %v7290_v20 = vsel %vm19155_vm4, 1.0, %v17437_v27  ;;  %v7296_v6 = vsel %vm19157_vm13, 1.0, %v17437_v27  ;;  %vm19159_vm2 = vcmp.eq.s32.totalorder %v6520_v2, %v18909_v58 }
 0x1ac   : > { %19154 = vst [vmem:[#allocation252_spill] sm:$0xff] %v7284_v30  ;;  %19156 = vst [vmem:[#allocation253_spill] sm:$0xff] %v7290_v20  ;;  %v7302_v36 = vsel %vm19159_vm2, 1.0, %v17437_v27  ;;  %v7308_v30 = vsel %vm879_vm14, 1.0, %v17437_v27  ;;  %v7314_v20 = vsel %vm880_vm0, 1.0, %v17437_v27  ;;  %v7326_v58 = vsel %vm882_vm7, 1.0, %v17437_v27 }
 0x1ad   : > { %19158 = vst [vmem:[#allocation254_spill] sm:$0xff] %v7296_v6  ;;  %19160 = vst [vmem:[#allocation255_spill] sm:$0xff] %v7302_v36  ;;  %v7320_v6 = vsel %vm881_vm3, 1.0, %v17437_v27  ;;  %v7338_v57 = vsel %vm884_vm1, 1.0, %v17437_v27  ;;  %v7344_v29 = vsel %vm885_vm8, 1.0, %v17437_v27  ;;  %vm913_vm0 = vcmp.eq.s32.totalorder %v6938_v49, %v18817_v24 }
 0x1ae   : > { %19161 = vst [vmem:[#allocation256_spill] sm:$0xff] %v7308_v30  ;;  %19162 = vst [vmem:[#allocation257_spill] sm:$0xff] %v7314_v20  ;;  %v7332_v30 = vsel %vm883_vm5, 1.0, %v17437_v27  ;;  %vm914_vm14 = vcmp.eq.s32.totalorder %v6938_v49, %v5634_v50  ;;  %vm19174_vm3 = vcmp.eq.s32.totalorder %v6520_v2, %v5786_v23  ;;  %vm19176_vm5 = vcmp.eq.s32.totalorder %v6520_v2, %v5790_v25  ;;  %v19268_v23 = vld [vmem:[#allocation52_spill] sm:$0xff] }
 0x1af   : > { %19163 = vst [vmem:[#allocation258_spill] sm:$0xff] %v7320_v6  ;;  %19165 = vst [vmem:[#allocation259_spill] sm:$0xff] %v7326_v58  ;;  %v19171_v58 = vld [vmem:[#allocation15_spill] sm:$0xff]  ;;  %vm19178_vm1 = vcmp.eq.s32.totalorder %v6938_v49, %v5550_v28  ;;  %vm915_vm2 = vcmp.eq.s32.totalorder %v6938_v49, %v5638_v51  ;;  %vm916_vm6 = vcmp.eq.s32.totalorder %v6938_v49, %v5642_v52 }
 0x1b0   : > { %19166 = vst [vmem:[#allocation260_spill] sm:$0xff] %v7332_v30  ;;  %19168 = vst [vmem:[#allocation261_spill] sm:$0xff] %v7338_v57  ;;  %vm19172_vm7 = vcmp.eq.s32.totalorder %v6520_v2, %v19171_v58  ;;  %v7360_v57 = vsel %vm19174_vm3, 1.0, %v17437_v27  ;;  %v19180_v30 = vld [vmem:[#allocation21_spill] sm:$0xff]  ;;  %vm917_vm4 = vcmp.eq.s32.totalorder %v6938_v49, %v5646_v53  ;;  %vm19185_vm3 = vcmp.eq.s32.totalorder %v6938_v49, %v5562_v32 }
 0x1b1   : > { %19170 = vst [vmem:[#allocation262_spill] sm:$0xff] %v7344_v29  ;;  %v7350_v36 = vsel %vm19172_vm7, 1.0, %v17437_v27  ;;  %19175 = vst [vmem:[#allocation264_spill] sm:$0xff] %v7360_v57  ;;  %v7366_v29 = vsel %vm19176_vm5, 1.0, %v17437_v27  ;;  %vm19181_vm8 = vcmp.eq.s32.totalorder %v6938_v49, %v19180_v30  ;;  %vm19183_vm7 = vcmp.eq.s32.totalorder %v6938_v49, %v5558_v31  ;;  %v19197_v31 = vld [vmem:[#allocation27_spill] sm:$0xff] }
 0x1b2   : > { %19173 = vst [vmem:[#allocation263_spill] sm:$0xff] %v7350_v36  ;;  %19177 = vst [vmem:[#allocation265_spill] sm:$0xff] %v7366_v29  ;;  %v7372_v36 = vsel %vm19178_vm1, 1.0, %v17437_v27  ;;  %v7378_v58 = vsel %vm19181_vm8, 1.0, %v17437_v27  ;;  %v7392_v29 = vsel %vm19183_vm7, 1.0, %v17437_v27  ;;  %v7398_v57 = vsel %vm19185_vm3, 1.0, %v17437_v27 }
 0x1b3   : > { %19179 = vst [vmem:[#allocation266_spill] sm:$0xff] %v7372_v36  ;;  %19182 = vst [vmem:[#allocation267_spill] sm:$0xff] %v7378_v58  ;;  %vm19187_vm5 = vcmp.eq.s32.totalorder %v6938_v49, %v5566_v33  ;;  %vm19189_vm1 = vcmp.eq.s32.totalorder %v6938_v49, %v5570_v34  ;;  %vm19195_vm7 = vcmp.eq.s32.totalorder %v6938_v49, %v5574_v35  ;;  %v7712_v36 = vpop.permute.xlu1 %666 }
 0x1b4   : > { %19184 = vst [vmem:[#allocation268_spill] sm:$0xff] %v7392_v29  ;;  %19186 = vst [vmem:[#allocation269_spill] sm:$0xff] %v7398_v57  ;;  %v7404_v30 = vsel %vm19187_vm5, 1.0, %v17437_v27  ;;  %v7410_v28 = vsel %vm19189_vm1, 1.0, %v17437_v27  ;;  %vm19191_vm5 = vcmp.eq.s32.totalorder %v6520_v2, %v5794_v26  ;;  %vm19193_vm1 = vcmp.eq.s32.totalorder %v6520_v2, %v5798_v15  ;;  %v19252_v29 = vld [vmem:[#allocation70_spill] sm:$0xff] }
 0x1b5   : > { %19188 = vst [vmem:[#allocation270_spill] sm:$0xff] %v7404_v30  ;;  %19190 = vst [vmem:[#allocation271_spill] sm:$0xff] %v7410_v28  ;;  %v7424_v33 = vsel %vm19191_vm5, 1.0, %v17437_v27  ;;  %v7430_v34 = vsel %vm19193_vm1, 1.0, %v17437_v27  ;;  %v7436_v32 = vsel %vm19195_vm7, 1.0, %v17437_v27  ;;  %vm19198_vm13 = vcmp.eq.s32.totalorder %v6938_v49, %v19197_v31  ;;  %v19287_v15 = vld [vmem:[#allocation14_spill] sm:$0xff] }
 0x1b6   : > { %19192 = vst [vmem:[#allocation272_spill] sm:$0xff] %v7424_v33  ;;  %19194 = vst [vmem:[#allocation273_spill] sm:$0xff] %v7430_v34  ;;  %v7442_v25 = vsel %vm19198_vm13, 1.0, %v17437_v27  ;;  %vm19200_vm1 = vcmp.eq.s32.totalorder %v6520_v2, %v5802_v16  ;;  %vm19202_vm7 = vcmp.eq.s32.totalorder %v6520_v2, %v5806_v17  ;;  %v19212_v31 = vmov 0.0  }
 0x1b7   : > { %19196 = vst [vmem:[#allocation274_spill] sm:$0xff] %v7436_v32  ;;  %19199 = vst [vmem:[#allocation275_spill] sm:$0xff] %v7442_v25  ;;  %v7452_v34 = vsel %vm19200_vm1, 1.0, %v17437_v27  ;;  %v7458_v33 = vsel %vm19202_vm7, 1.0, %v17437_v27  ;;  %vm19213_vm13 = vcmp.eq.s32.totalorder %v6938_v49, %v19077_v54  ;;  %vm19215_vm1 = vcmp.eq.s32.totalorder %v6938_v49, %v19079_v41  ;;  %v19229_v32 = vld [vmem:[#allocation62_spill] sm:$0xff] }
 0x1b8   : > { %19201 = vst [vmem:[#allocation276_spill] sm:$0xff] %v7452_v34  ;;  %19203 = vst [vmem:[#allocation277_spill] sm:$0xff] %v7458_v33  ;;  %v7480_v6 = vsel %vm19213_vm13, 1.0, %v19212_v31  ;;  %v7486_v34 = vsel %vm19215_vm1, 1.0, %v19212_v31  ;;  %vm19217_vm5 = vcmp.eq.s32.totalorder %v6938_v49, %v5590_v39  ;;  %vm19219_vm13 = vcmp.eq.s32.totalorder %v6938_v49, %v19082_v62 }
 0x1b9   : > { %19214 = vst [vmem:[#allocation278_spill] sm:$0xff] %v7480_v6  ;;  %19216 = vst [vmem:[#allocation279_spill] sm:$0xff] %v7486_v34  ;;  %v7496_v35 = vsel %vm19217_vm5, 1.0, %v19212_v31  ;;  %v7502_v33 = vsel %vm19219_vm13, 1.0, %v19212_v31  ;;  %vm19221_vm1 = vcmp.eq.s32.totalorder %v6938_v49, %v19084_v46  ;;  %vm19223_vm3 = vcmp.eq.s32.totalorder %v6938_v49, %v19086_v21 }
 0x1ba   : > { %19218 = vst [vmem:[#allocation280_spill] sm:$0xff] %v7496_v35  ;;  %19220 = vst [vmem:[#allocation281_spill] sm:$0xff] %v7502_v33  ;;  %v7508_v2 = vsel %vm19221_vm1, 1.0, %v19212_v31  ;;  %v7514_v16 = vsel %vm19223_vm3, 1.0, %v19212_v31  ;;  %vm927_vm5 = vcmp.eq.s32.totalorder %v6938_v49, %v5688_v63  ;;  %vm928_vm7 = vcmp.eq.s32.totalorder %v6938_v49, %v5692_v0  ;;  %v19304_v33 = vld [vmem:[#allocation20_spill] sm:$0xff]  ;;  %v19369_v0 = vld [vmem:[#allocation39_spill] sm:$0xff] }
 0x1bb   : > { %19222 = vst [vmem:[#allocation282_spill] sm:$0xff] %v7508_v2  ;;  %19224 = vst [vmem:[#allocation283_spill] sm:$0xff] %v7514_v16  ;;  %vm929_vm13 = vcmp.eq.s32.totalorder %v6938_v49, %v5696_v1  ;;  %vm930_vm8 = vcmp.eq.s32.totalorder %v6938_v49, %v19010_v60  ;;  %v7528_v26 = vsel %vm907_vm11, 1.0, %v19212_v31  ;;  %v7534_v17 = vsel %vm908_vm12, 1.0, %v19212_v31  ;;  %v19272_v2 = vld [vmem:[#allocation76_spill] sm:$0xff]  ;;  %v19362_v60 = vld [vmem:[#allocation37_spill] sm:$0xff] }
 0x1bc   : > { %19225 = vst [vmem:[#allocation284_spill] sm:$0xff] %v7528_v26  ;;  %19226 = vst [vmem:[#allocation285_spill] sm:$0xff] %v7534_v17  ;;  %v7540_v25 = vsel %vm909_vm15, 1.0, %v19212_v31  ;;  %v7546_v27 = vsel %vm910_vm9, 1.0, %v19212_v31  ;;  %vm931_vm11 = vcmp.eq.s32.totalorder %v6938_v49, %v5704_v3  ;;  %vm932_vm3 = vcmp.eq.s32.totalorder %v6938_v49, %v5708_v4  ;;  %v19310_v4 = vld [vmem:[#allocation22_spill] sm:$0xff]  ;;  %v19325_v63 = vld [vmem:[#allocation24_spill] sm:$0xff] }
 0x1bd   : > { %19227 = vst [vmem:[#allocation286_spill] sm:$0xff] %v7540_v25  ;;  %19228 = vst [vmem:[#allocation287_spill] sm:$0xff] %v7546_v27  ;;  %vm933_vm12 = vcmp.eq.s32.totalorder %v6938_v49, %v5712_v5  ;;  %v7564_v20 = vsel %vm911_vm10, 1.0, %v19212_v31  ;;  %vm19233_vm9 = vcmp.eq.s32.totalorder %v6938_v49, %v5626_v48  ;;  %vm935_vm15 = vcmp.eq.s32.totalorder %v6938_v49, %v5720_v7  ;;  %v19262_v27 = vld [vmem:[#allocation73_spill] sm:$0xff]  ;;  %v19336_v17 = vld [vmem:[#allocation27_spill] sm:$0xff] }
 0x1be   : > { %19232 = vst [vmem:[#allocation288_spill] sm:$0xff] %v7564_v20  ;;  %v7570_v57 = vsel %vm19233_vm9, 1.0, %v19212_v31  ;;  %vm936_vm1 = vcmp.eq.s32.totalorder %v6938_v49, %v5724_v8  ;;  %v7600_v58 = vsel %vm913_vm0, 1.0, %v19212_v31  ;;  %v7606_v22 = vsel %vm914_vm14, 1.0, %v19212_v31 }
 0x1bf   : > { %19234 = vst [vmem:[#allocation289_spill] sm:$0xff] %v7570_v57  ;;  %19245 = vst [vmem:[#allocation290_spill] sm:$0xff] %v7600_v58  ;;  %vm937_vm10 = vcmp.eq.s32.totalorder %v6938_v49, %v5728_v9  ;;  %v7616_v6 = vsel %vm915_vm2, 1.0, %v19212_v31  ;;  %v7622_v34 = vsel %vm916_vm6, 1.0, %v19212_v31  ;;  %v7628_v30 = vsel %vm917_vm4, 1.0, %v19212_v31 }
 0x1c0   : > { %19246 = vst [vmem:[#allocation291_spill] sm:$0xff] %v7606_v22  ;;  %19247 = vst [vmem:[#allocation292_spill] sm:$0xff] %v7616_v6  ;;  %vm19250_vm0 = vcmp.eq.s32.totalorder %v6938_v49, %v19112_v40  ;;  %vm19253_vm4 = vcmp.eq.s32.totalorder %v6938_v49, %v5656_v55  ;;  %vm19257_vm2 = vcmp.eq.s32.totalorder %v6938_v49, %v18992_v10  ;;  %v19288_v10 = vld [vmem:[#allocation15_spill] sm:$0xff]  ;;  %v7738_v35 = vsel %vm927_vm5, 1.0, %v19212_v31  ;;  %v19293_v22 = vld [vmem:[#allocation16_spill] sm:$0xff] }
 0x1c1   : > { %19248 = vst [vmem:[#allocation293_spill] sm:$0xff] %v7622_v34  ;;  %19249 = vst [vmem:[#allocation294_spill] sm:$0xff] %v7628_v30  ;;  %v7634_v48 = vsel %vm19250_vm0, 1.0, %v19212_v31  ;;  %v7648_v13 = vsel %vm19253_vm4, 1.0, %v19212_v31  ;;  %vm19255_vm0 = vcmp.eq.s32.totalorder %v6938_v49, %v5660_v56  ;;  %v7660_v28 = vsel %vm19257_vm2, 1.0, %v19212_v31  ;;  %v19295_v40 = vld [vmem:[#allocation17_spill] sm:$0xff] }
 0x1c2   : > { %19251 = vst [vmem:[#allocation295_spill] sm:$0xff] %v7634_v48  ;;  %19254 = vst [vmem:[#allocation296_spill] sm:$0xff] %v7648_v13  ;;  %v7654_v57 = vsel %vm19255_vm0, 1.0, %v19212_v31  ;;  %vm19259_vm9 = vcmp.eq.s32.totalorder %v6938_v49, %v18994_v38  ;;  %vm943_vm4 = vcmp.eq.s32.totalorder %v6938_v49, %v18824_v14  ;;  %vm944_vm6 = vcmp.eq.s32.totalorder %v6938_v49, %v19261_v45  ;;  %v19303_v13 = vld [vmem:[#allocation78_spill] sm:$0xff]  ;;  %v19305_v48 = vld [vmem:[#allocation21_spill] sm:$0xff] }
 0x1c3   : > { %19256 = vst [vmem:[#allocation297_spill] sm:$0xff] %v7654_v57  ;;  %19258 = vst [vmem:[#allocation298_spill] sm:$0xff] %v7660_v28  ;;  %v7666_v20 = vsel %vm19259_vm9, 1.0, %v19212_v31  ;;  %vm19266_vm9 = vcmp.eq.s32.totalorder %v6938_v49, %v5672_v59  ;;  %vm19269_vm2 = vcmp.eq.s32.totalorder %v6938_v49, %v19268_v23  ;;  %vm949_vm0 = vcmp.eq.s32.totalorder %v6938_v49, %v19287_v15  ;;  %v19302_v23 = vld [vmem:[#allocation19_spill] sm:$0xff]  ;;  %v19326_v6 = vld [vmem:[#allocation25_spill] sm:$0xff] }
 0x1c4   : > { %19260 = vst [vmem:[#allocation299_spill] sm:$0xff] %v7666_v20  ;;  %v7684_v26 = vsel %vm19266_vm9, 1.0, %v19212_v31  ;;  %v7690_v16 = vsel %vm19269_vm2, 1.0, %v19212_v31  ;;  %vm19283_vm9 = vcmp.eq.s32.totalorder %v6938_v49, %v18999_v61  ;;  %vm19285_vm2 = vcmp.eq.s32.totalorder %v6938_v49, %v19001_v42  ;;  %19289 = vst [vmem:[#allocation304_spill] sm:$0xff] %v7738_v35  ;;  %v19296_v20 = vld [vmem:[#allocation18_spill] sm:$0xff]  ;;  %v19392_v35 = vld [vmem:[#allocation207_spill] sm:$0xff] }
 0x1c5   : > { %19267 = vst [vmem:[#allocation300_spill] sm:$0xff] %v7684_v26  ;;  %19270 = vst [vmem:[#allocation301_spill] sm:$0xff] %v7690_v16  ;;  %v7722_v59 = vsel %vm19283_vm9, 1.0, %v19212_v31  ;;  %v7728_v55 = vsel %vm19285_vm2, 1.0, %v19212_v31  ;;  %vm950_vm14 = vcmp.eq.s32.totalorder %v6938_v49, %v19288_v10  ;;  %v7744_v58 = vsel %vm928_vm7, 1.0, %v19212_v31  ;;  %v19294_v26 = vld [vmem:[#allocation77_spill] sm:$0xff] }
 0x1c6   : > { %19284 = vst [vmem:[#allocation302_spill] sm:$0xff] %v7722_v59  ;;  %19286 = vst [vmem:[#allocation303_spill] sm:$0xff] %v7728_v55  ;;  %v7750_v25 = vsel %vm929_vm13, 1.0, %v19212_v31  ;;  %v7756_v16 = vsel %vm930_vm8, 1.0, %v19212_v31  ;;  %vm951_vm5 = vcmp.eq.s32.totalorder %v6938_v49, %v19293_v22  ;;  %vm952_vm9 = vcmp.eq.s32.totalorder %v6938_v49, %v19294_v26 }
 0x1c7   : > { %19290 = vst [vmem:[#allocation305_spill] sm:$0xff] %v7744_v58  ;;  %19291 = vst [vmem:[#allocation306_spill] sm:$0xff] %v7750_v25  ;;  %vm953_vm7 = vcmp.eq.s32.totalorder %v6938_v49, %v19295_v40  ;;  %v7770_v56 = vsel %vm931_vm11, 1.0, %v19212_v31  ;;  %v7776_v28 = vsel %vm932_vm3, 1.0, %v19212_v31  ;;  %v7782_v38 = vsel %vm933_vm12, 1.0, %v19212_v31 }
 0x1c8   : > { %19292 = vst [vmem:[#allocation307_spill] sm:$0xff] %v7756_v16  ;;  %19297 = vst [vmem:[#allocation308_spill] sm:$0xff] %v7770_v56  ;;  %vm19300_vm8 = vcmp.eq.s32.totalorder %v6938_v49, %v19229_v32  ;;  %vm955_vm13 = vcmp.eq.s32.totalorder %v6938_v49, %v19302_v23  ;;  %vm956_vm11 = vcmp.eq.s32.totalorder %v6938_v49, %v19303_v13  ;;  %v7806_v32 = vsel %vm935_vm15, 1.0, %v19212_v31  ;;  %v19377_v16 = vld [vmem:[#allocation23_spill] sm:$0xff]  ;;  %v19387_v13 = vld [vmem:[#allocation266_spill] sm:$0xff] }
 0x1c9   : > { %19298 = vst [vmem:[#allocation309_spill] sm:$0xff] %v7776_v28  ;;  %19299 = vst [vmem:[#allocation310_spill] sm:$0xff] %v7782_v38  ;;  %v7788_v57 = vsel %vm19300_vm8, 1.0, %v19212_v31  ;;  %vm957_vm3 = vcmp.eq.s32.totalorder %v7712_v36, %v19304_v33  ;;  %v7812_v5 = vsel %vm936_vm1, 1.0, %v19212_v31  ;;  %v7842_v1 = vsel %vm937_vm10, 1.0, %v19212_v31  ;;  %v19379_v38 = vld [vmem:[#allocation47_spill] sm:$0xff] }
 0x1ca   : > { %19301 = vst [vmem:[#allocation311_spill] sm:$0xff] %v7788_v57  ;;  %19308 = vst [vmem:[#allocation312_spill] sm:$0xff] %v7806_v32  ;;  %vm19323_vm1 = vcmp.eq.s32.totalorder %v6938_v49, %v19150_v19  ;;  %vm19327_vm12 = vcmp.eq.s32.totalorder %v6938_v49, %v5736_v11  ;;  %vm19329_vm10 = vcmp.eq.s32.totalorder %v6938_v49, %v5740_v12  ;;  %v7890_v32 = vsel %vm943_vm4, 1.0, %v19212_v31  ;;  %v19388_v23 = vld [vmem:[#allocation206_spill] sm:$0xff]  ;;  %v19415_v33 = vld [vmem:[#allocation55_spill] sm:$0xff] }
 0x1cb   : > { %19309 = vst [vmem:[#allocation313_spill] sm:$0xff] %v7812_v5  ;;  %19322 = vst [vmem:[#allocation314_spill] sm:$0xff] %v7842_v1  ;;  %v7848_v61 = vsel %vm19323_vm1, 1.0, %v19212_v31  ;;  %v7858_v59 = vsel %vm19327_vm12, 1.0, %v19212_v31  ;;  %v7864_v55 = vsel %vm19329_vm10, 1.0, %v19212_v31  ;;  %vm19331_vm1 = vcmp.eq.s32.totalorder %v6938_v49, %v18907_v18  ;;  %v19335_v5 = vld [vmem:[#allocation26_spill] sm:$0xff] }
 0x1cc   : > { %19324 = vst [vmem:[#allocation315_spill] sm:$0xff] %v7848_v61  ;;  %19328 = vst [vmem:[#allocation316_spill] sm:$0xff] %v7858_v59  ;;  %v7870_v8 = vsel %vm19331_vm1, 1.0, %v19212_v31  ;;  %vm19333_vm8 = vcmp.eq.s32.totalorder %v6938_v49, %v19252_v29  ;;  %vm963_vm12 = vcmp.eq.s32.totalorder %v7712_v36, %v19335_v5  ;;  %vm964_vm15 = vcmp.eq.s32.totalorder %v7712_v36, %v19336_v17  ;;  %v19441_v17 = vld [vmem:[#allocation279_spill] sm:$0xff] }
 0x1cd   : > { %19330 = vst [vmem:[#allocation317_spill] sm:$0xff] %v7864_v55  ;;  %19332 = vst [vmem:[#allocation318_spill] sm:$0xff] %v7870_v8  ;;  %v7876_v34 = vsel %vm19333_vm8, 1.0, %v19212_v31  ;;  %v7896_v3 = vsel %vm944_vm6, 1.0, %v19212_v31  ;;  %vm19339_vm8 = vcmp.eq.s32.totalorder %v6938_v49, %v19262_v27  ;;  %vm19341_vm1 = vcmp.eq.s32.totalorder %v6938_v49, %v19263_v47  ;;  %v19380_v8 = vld [vmem:[#allocation48_spill] sm:$0xff]  ;;  %v19399_v55 = vld [vmem:[#allocation269_spill] sm:$0xff] }
 0x1ce   : > { %19334 = vst [vmem:[#allocation319_spill] sm:$0xff] %v7876_v34  ;;  %19337 = vst [vmem:[#allocation320_spill] sm:$0xff] %v7890_v32  ;;  %v7902_v57 = vsel %vm19339_vm8, 1.0, %v19212_v31  ;;  %v7908_v42 = vsel %vm19341_vm1, 1.0, %v19212_v31  ;;  %vm967_vm4 = vcmp.eq.s32.totalorder %v7712_v36, %v5590_v39  ;;  %vm968_vm2 = vcmp.eq.s32.totalorder %v7712_v36, %v19082_v62  ;;  %v19442_v5 = vld [vmem:[#allocation215_spill] sm:$0xff] }
 0x1cf   : > { %19338 = vst [vmem:[#allocation321_spill] sm:$0xff] %v7896_v3  ;;  %19340 = vst [vmem:[#allocation322_spill] sm:$0xff] %v7902_v57  ;;  %vm19345_vm8 = vcmp.eq.s32.totalorder %v6938_v49, %v19271_v37  ;;  %vm19347_vm1 = vcmp.eq.s32.totalorder %v6938_v49, %v19272_v2  ;;  %vm971_vm10 = vcmp.eq.s32.totalorder %v7712_v36, %v5606_v43  ;;  %v7962_v58 = vsel %vm949_vm0, 1.0, %v19212_v31  ;;  %v19361_v2 = vld [vmem:[#allocation36_spill] sm:$0xff]  ;;  %v19391_v57 = vld [vmem:[#allocation267_spill] sm:$0xff] }
 0x1d0   : > { %19342 = vst [vmem:[#allocation323_spill] sm:$0xff] %v7908_v42  ;;  %v7926_v56 = vsel %vm19345_vm8, 1.0, %v19212_v31  ;;  %v7932_v7 = vsel %vm19347_vm1, 1.0, %v19212_v31  ;;  %vm972_vm6 = vcmp.eq.s32.totalorder %v7712_v36, %v5610_v44  ;;  %19359 = vst [vmem:[#allocation326_spill] sm:$0xff] %v7962_v58  ;;  %v7968_v47 = vsel %vm950_vm14, 1.0, %v19212_v31  ;;  %v19395_v58 = vld [vmem:[#allocation268_spill] sm:$0xff] }
 0x1d1   : > { %19346 = vst [vmem:[#allocation324_spill] sm:$0xff] %v7926_v56  ;;  %19348 = vst [vmem:[#allocation325_spill] sm:$0xff] %v7932_v7  ;;  %vm973_vm8 = vcmp.eq.s32.totalorder %v7712_v36, %v19361_v2  ;;  %v7978_v1 = vsel %vm951_vm5, 1.0, %v19212_v31  ;;  %v7984_v61 = vsel %vm952_vm9, 1.0, %v19212_v31  ;;  %v7990_v30 = vsel %vm953_vm7, 1.0, %v19212_v31  ;;  %v19368_v7 = vld [vmem:[#allocation38_spill] sm:$0xff] }
 0x1d2   : > { %19360 = vst [vmem:[#allocation327_spill] sm:$0xff] %v7968_v47  ;;  %19363 = vst [vmem:[#allocation36_spill] sm:$0xff] %v7978_v1  ;;  %vm19366_vm14 = vcmp.eq.s32.totalorder %v6938_v49, %v19296_v20  ;;  %vm975_vm0 = vcmp.eq.s32.totalorder %v7712_v36, %v19368_v7  ;;  %vm976_vm5 = vcmp.eq.s32.totalorder %v7712_v36, %v19369_v0  ;;  %v8010_v56 = vsel %vm955_vm13, 1.0, %v19212_v31  ;;  %v19373_v49 = vld [vmem:[#allocation45_spill] sm:$0xff]  ;;  %v19396_v47 = vld [vmem:[#allocation208_spill] sm:$0xff] }
 0x1d3   : > { %19364 = vst [vmem:[#allocation37_spill] sm:$0xff] %v7984_v61  ;;  %19365 = vst [vmem:[#allocation328_spill] sm:$0xff] %v7990_v30  ;;  %v7996_v28 = vsel %vm19366_vm14, 1.0, %v19212_v31  ;;  %vm977_vm9 = vcmp.eq.s32.totalorder %v7712_v36, %v18817_v24  ;;  %v8016_v27 = vsel %vm956_vm11, 1.0, %v19212_v31  ;;  %v1981_v42 = vsel %vm957_vm3, 1.0, %v19212_v31  ;;  %v19423_v61 = vld [vmem:[#allocation271_spill] sm:$0xff] }
 0x1d4   : > { %19367 = vst [vmem:[#allocation329_spill] sm:$0xff] %v7996_v28  ;;  %19370 = vst [vmem:[#allocation330_spill] sm:$0xff] %v8010_v56  ;;  %vm19372_vm7 = vcmp.eq.s32.totalorder %v7712_v36, %v19305_v48  ;;  %vm979_vm13 = vcmp.eq.s32.totalorder %v7712_v36, %v5638_v51  ;;  %vm980_vm14 = vcmp.eq.s32.totalorder %v7712_v36, %v5642_v52  ;;  %v19420_v48 = vld [vmem:[#allocation210_spill] sm:$0xff]  ;;  %v19424_v1 = vld [vmem:[#allocation211_spill] sm:$0xff]  ;;  %v1995_v62 = vsel %vm971_vm10, 1.0, %v19212_v31 }
 0x1d5   : > { %19371 = vst [vmem:[#allocation331_spill] sm:$0xff] %v8016_v27  ;;  %v1982_v37 = vsel %vm19372_vm7, 1.0, %v19212_v31  ;;  %vm19376_vm3 = vcmp.eq.s32.totalorder %v7712_v36, %v19310_v4  ;;  %vm19378_vm7 = vcmp.eq.s32.totalorder %v7712_v36, %v19377_v16  ;;  %v19389_v20 = vmax.f32 %v19387_v13, %v19388_v23  ;;  %v19400_v4 = vld [vmem:[#allocation209_spill] sm:$0xff]  ;;  %v19412_v13 = vld [vmem:[#allocation54_spill] sm:$0xff] }
 0x1d6   : > { %v1983_v32 = vsel %vm19376_vm3, 1.0, %v19212_v31  ;;  %v1984_v34 = vsel %vm19378_vm7, 1.0, %v19212_v31  ;;  %v19393_v3 = vmax.f32 %v19391_v57, %v19392_v35  ;;  %v19397_v30 = vmax.f32 %v19395_v58, %v19396_v47  ;;  %v19409_v58 = vld [vmem:[#allocation51_spill] sm:$0xff]  ;;  %v19438_v43 = vld [vmem:[#allocation214_spill] sm:$0xff] }
 0x1d7   : > { %v8065_v40 = vmax.f32 %v19389_v20, %v1981_v42  ;;  %v19401_v16 = vmax.f32 %v19399_v55, %v19400_v4  ;;  %vm19403_vm3 = vcmp.eq.s32.totalorder %v7712_v36, %v19325_v63  ;;  %vm19404_vm7 = vcmp.eq.s32.totalorder %v7712_v36, %v19326_v6  ;;  %v19411_v4 = vld [vmem:[#allocation53_spill] sm:$0xff] }
 0x1d8   : > { %v8070_v25 = vmax.f32 %v19393_v3, %v1982_v37  ;;  %v8075_v59 = vmax.f32 %v19397_v30, %v1983_v32  ;;  %v1985_v42 = vsel %vm19403_vm3, 1.0, %v19212_v31  ;;  %v1986_v35 = vsel %vm19404_vm7, 1.0, %v19212_v31  ;;  %v19405_v37 = vld [vmem:[#allocation49_spill] sm:$0xff]  ;;  %v19406_v32 = vld [vmem:[#allocation50_spill] sm:$0xff]  ;;  %v19410_v3 = vld [vmem:[#allocation52_spill] sm:$0xff] }
 0x1d9   : > { %19390 = vst [vmem:[#allocation266_spill] sm:$0xff] %v8065_v40  ;;  %v8080_v56 = vmax.f32 %v19401_v16, %v1984_v34  ;;  %v1987_v34 = vsel %vm963_vm12, 1.0, %v19212_v31  ;;  %v1988_v47 = vsel %vm964_vm15, 1.0, %v19212_v31  ;;  %vm19407_vm3 = vcmp.eq.s32.totalorder %v7712_v36, %v19077_v54  ;;  %v19419_v40 = vld [vmem:[#allocation270_spill] sm:$0xff] }
 0x1da   : > { %19394 = vst [vmem:[#allocation206_spill] sm:$0xff] %v8070_v25  ;;  %19398 = vst [vmem:[#allocation267_spill] sm:$0xff] %v8075_v59  ;;  %v1989_v55 = vsel %vm19407_vm3, 1.0, %v19212_v31  ;;  %vm19408_vm7 = vcmp.eq.s32.totalorder %v7712_v36, %v19079_v41  ;;  %vm987_vm11 = vcmp.eq.s32.totalorder %v7712_v36, %v19409_v58  ;;  %vm988_vm12 = vcmp.eq.s32.totalorder %v7712_v36, %v19410_v3  ;;  %v19417_v59 = vld [vmem:[#allocation57_spill] sm:$0xff]  ;;  %v19418_v25 = vld [vmem:[#allocation58_spill] sm:$0xff] }
 0x1db   : > { %19402 = vst [vmem:[#allocation207_spill] sm:$0xff] %v8080_v56  ;;  %v1990_v57 = vsel %vm19408_vm7, 1.0, %v19212_v31  ;;  %v1991_v23 = vsel %vm967_vm4, 1.0, %v19212_v31  ;;  %v1992_v16 = vsel %vm968_vm2, 1.0, %v19212_v31  ;;  %vm19413_vm3 = vcmp.eq.s32.totalorder %v7712_v36, %v19084_v46  ;;  %v19416_v56 = vld [vmem:[#allocation56_spill] sm:$0xff]  ;;  %v19427_v41 = vld [vmem:[#allocation59_spill] sm:$0xff] }
 0x1dc   : > { %v1993_v30 = vsel %vm19413_vm3, 1.0, %v19212_v31  ;;  %vm19414_vm7 = vcmp.eq.s32.totalorder %v7712_v36, %v19086_v21  ;;  %vm991_vm15 = vcmp.eq.s32.totalorder %v7712_v36, %v19415_v33  ;;  %vm992_vm4 = vcmp.eq.s32.totalorder %v7712_v36, %v19416_v56  ;;  %v19562_v56 = vld [vmem:[#allocation303_spill] sm:$0xff]  ;;  %v19566_v3 = vld [vmem:[#allocation304_spill] sm:$0xff] }
 0x1dd   : > { %v1994_v20 = vsel %vm19414_vm7, 1.0, %v19212_v31  ;;  %vm993_vm1 = vcmp.eq.s32.totalorder %v7712_v36, %v19417_v59  ;;  %vm994_vm2 = vcmp.eq.s32.totalorder %v7712_v36, %v19418_v25  ;;  %v19421_v27 = vmax.f32 %v19419_v40, %v19420_v48  ;;  %v19429_v48 = vld [vmem:[#allocation274_spill] sm:$0xff]  ;;  %v19445_v40 = vld [vmem:[#allocation280_spill] sm:$0xff]  ;;  %v19548_v25 = vld [vmem:[#allocation19_spill] sm:$0xff] }
 0x1de   : > { %v19425_v21 = vmax.f32 %v19423_v61, %v19424_v1  ;;  %v1996_v39 = vsel %vm972_vm6, 1.0, %v19212_v31  ;;  %vm995_vm3 = vcmp.eq.s32.totalorder %v7712_v36, %v19427_v41  ;;  %v19430_v61 = vld [vmem:[#allocation212_spill] sm:$0xff]  ;;  %v19443_v6 = vmax.f32 %v19441_v17, %v19442_v5  ;;  %v19563_v33 = vld [vmem:[#allocation239_spill] sm:$0xff] }
 0x1df   : > { %v8145_v28 = vmax.f32 %v19421_v27, %v1985_v42  ;;  %v19431_v1 = vmax.f32 %v19429_v48, %v19430_v61  ;;  %v19434_v42 = vld [vmem:[#allocation213_spill] sm:$0xff]  ;;  %v19446_v41 = vld [vmem:[#allocation216_spill] sm:$0xff]  ;;  %vm19469_vm10 = vcmp.eq.s32.totalorder %v7712_v36, %v19362_v60  ;;  %vm1013_vm7 = vcmp.eq.s32.totalorder %v7712_v36, %v19287_v15 }
 0x1e0   : > { %v8150_v46 = vmax.f32 %v19425_v21, %v1986_v35  ;;  %v19433_v21 = vld [vmem:[#allocation275_spill] sm:$0xff]  ;;  %v8182_v63 = vmax.f32 %v19443_v6, %v1990_v57  ;;  %v19447_v48 = vmax.f32 %v19445_v40, %v19446_v41  ;;  %v19449_v61 = vld [vmem:[#allocation281_spill] sm:$0xff]  ;;  %v19461_v17 = vld [vmem:[#allocation284_spill] sm:$0xff] }
 0x1e1   : > { %19422 = vst [vmem:[#allocation268_spill] sm:$0xff] %v8145_v28  ;;  %v8167_v27 = vmax.f32 %v19431_v1, %v1987_v34  ;;  %v19435_v35 = vmax.f32 %v19433_v21, %v19434_v42  ;;  %v19437_v28 = vld [vmem:[#allocation278_spill] sm:$0xff]  ;;  %v19450_v1 = vld [vmem:[#allocation217_spill] sm:$0xff]  ;;  %v19462_v57 = vld [vmem:[#allocation220_spill] sm:$0xff] }
 0x1e2   : > { %19426 = vst [vmem:[#allocation208_spill] sm:$0xff] %v8150_v46  ;;  %v19439_v44 = vmax.f32 %v19437_v28, %v19438_v43  ;;  %19444 = vst [vmem:[#allocation210_spill] sm:$0xff] %v8182_v63  ;;  %v8187_v34 = vmax.f32 %v19447_v48, %v1991_v23  ;;  %v19451_v21 = vmax.f32 %v19449_v61, %v19450_v1  ;;  %v19453_v42 = vld [vmem:[#allocation282_spill] sm:$0xff]  ;;  %v19465_v40 = vld [vmem:[#allocation285_spill] sm:$0xff] }
 0x1e3   : > { %19432 = vst [vmem:[#allocation269_spill] sm:$0xff] %v8167_v27  ;;  %v8172_v46 = vmax.f32 %v19435_v35, %v1988_v47  ;;  %v19454_v35 = vld [vmem:[#allocation218_spill] sm:$0xff]  ;;  %v19463_v41 = vmax.f32 %v19461_v17, %v19462_v57  ;;  %v19466_v48 = vld [vmem:[#allocation221_spill] sm:$0xff]  ;;  %v19500_v27 = vld [vmem:[#allocation227_spill] sm:$0xff] }
 0x1e4   : > { %v8177_v54 = vmax.f32 %v19439_v44, %v1989_v55  ;;  %19448 = vst [vmem:[#allocation271_spill] sm:$0xff] %v8187_v34  ;;  %v8192_v47 = vmax.f32 %v19451_v21, %v1992_v16  ;;  %v19455_v28 = vmax.f32 %v19453_v42, %v19454_v35  ;;  %v19457_v44 = vld [vmem:[#allocation283_spill] sm:$0xff]  ;;  %v19467_v61 = vmax.f32 %v19465_v40, %v19466_v48  ;;  %v19470_v1 = vld [vmem:[#allocation61_spill] sm:$0xff]  ;;  %v19478_v40 = vld [vmem:[#allocation222_spill] sm:$0xff] }
 0x1e5   : > { %19436 = vst [vmem:[#allocation209_spill] sm:$0xff] %v8172_v46  ;;  %v19458_v55 = vld [vmem:[#allocation219_spill] sm:$0xff]  ;;  %v8207_v23 = vmax.f32 %v19463_v41, %v1995_v62  ;;  %vm997_vm6 = vcmp.eq.s32.totalorder %v7712_v36, %v19470_v1  ;;  %v19471_v62 = vld [vmem:[#allocation62_spill] sm:$0xff]  ;;  %v2000_v21 = vsel %vm976_vm5, 1.0, %v19212_v31  ;;  %v2001_v42 = vsel %vm977_vm9, 1.0, %v19212_v31  ;;  %v19567_v58 = vld [vmem:[#allocation240_spill] sm:$0xff] }
 0x1e6   : > { %19440 = vst [vmem:[#allocation270_spill] sm:$0xff] %v8177_v54  ;;  %19452 = vst [vmem:[#allocation211_spill] sm:$0xff] %v8192_v47  ;;  %v8197_v43 = vmax.f32 %v19455_v28, %v1993_v30  ;;  %v19459_v5 = vmax.f32 %v19457_v44, %v19458_v55  ;;  %v8212_v16 = vmax.f32 %v19467_v61, %v1996_v39  ;;  %v1997_v30 = vsel %vm973_vm8, 1.0, %v19212_v31  ;;  %v19473_v28 = vld [vmem:[#allocation63_spill] sm:$0xff]  ;;  %v19474_v44 = vld [vmem:[#allocation64_spill] sm:$0xff] }
 0x1e7   : > { %19464 = vst [vmem:[#allocation275_spill] sm:$0xff] %v8207_v23  ;;  %v1999_v39 = vsel %vm975_vm0, 1.0, %v19212_v31  ;;  %vm19472_vm8 = vcmp.eq.s32.totalorder %v7712_v36, %v5634_v50  ;;  %vm1000_vm0 = vcmp.eq.s32.totalorder %v7712_v36, %v19474_v44  ;;  %v2003_v55 = vsel %vm979_vm13, 1.0, %v19212_v31  ;;  %v19477_v41 = vld [vmem:[#allocation286_spill] sm:$0xff]  ;;  %v19482_v23 = vld [vmem:[#allocation223_spill] sm:$0xff] }
 0x1e8   : > { %19456 = vst [vmem:[#allocation274_spill] sm:$0xff] %v8197_v43  ;;  %v8202_v6 = vmax.f32 %v19459_v5, %v1994_v20  ;;  %19468 = vst [vmem:[#allocation213_spill] sm:$0xff] %v8212_v16  ;;  %v1998_v20 = vsel %vm19469_vm10, 1.0, %v19212_v31  ;;  %v2002_v35 = vsel %vm19472_vm8, 1.0, %v19212_v31  ;;  %vm999_vm10 = vcmp.eq.s32.totalorder %v7712_v36, %v19473_v28  ;;  %v19481_v16 = vld [vmem:[#allocation287_spill] sm:$0xff] }
 0x1e9   : > { %v2004_v5 = vsel %vm980_vm14, 1.0, %v19212_v31  ;;  %vm19475_vm9 = vcmp.eq.s32.totalorder %v7712_v36, %v5646_v53  ;;  %vm19476_vm8 = vcmp.eq.s32.totalorder %v7712_v36, %v19373_v49  ;;  %vm1003_vm5 = vcmp.eq.s32.totalorder %v7712_v36, %v5736_v11  ;;  %v19499_v46 = vld [vmem:[#allocation291_spill] sm:$0xff]  ;;  %v19503_v49 = vld [vmem:[#allocation292_spill] sm:$0xff] }
 0x1ea   : > { %19460 = vst [vmem:[#allocation212_spill] sm:$0xff] %v8202_v6  ;;  %v2005_v17 = vsel %vm19475_vm9, 1.0, %v19212_v31  ;;  %v2006_v57 = vsel %vm19476_vm8, 1.0, %v19212_v31  ;;  %vm1004_vm13 = vcmp.eq.s32.totalorder %v7712_v36, %v5740_v12  ;;  %v19479_v48 = vmax.f32 %v19477_v41, %v19478_v40  ;;  %v19492_v41 = vld [vmem:[#allocation225_spill] sm:$0xff]  ;;  %v19504_v53 = vld [vmem:[#allocation228_spill] sm:$0xff]  ;;  %v19626_v12 = vld [vmem:[#allocation251_spill] sm:$0xff] }
 0x1eb   : > { %v19483_v6 = vmax.f32 %v19481_v16, %v19482_v23  ;;  %vm19485_vm9 = vcmp.eq.s32.totalorder %v7712_v36, %v19379_v38  ;;  %vm19486_vm8 = vcmp.eq.s32.totalorder %v7712_v36, %v19380_v8  ;;  %v19488_v23 = vld [vmem:[#allocation224_spill] sm:$0xff]  ;;  %v19501_v8 = vmax.f32 %v19499_v46, %v19500_v27 }
 0x1ec   : > { %v8277_v61 = vmax.f32 %v19479_v48, %v1997_v30  ;;  %v2007_v47 = vsel %vm19485_vm9, 1.0, %v19212_v31  ;;  %v2008_v34 = vsel %vm19486_vm8, 1.0, %v19212_v31  ;;  %v19487_v30 = vld [vmem:[#allocation288_spill] sm:$0xff]  ;;  %vm19527_vm9 = vcmp.eq.s32.totalorder %v7712_v36, %v19405_v37 }
 0x1ed   : > { %v8282_v43 = vmax.f32 %v19483_v6, %v1998_v20  ;;  %v19489_v6 = vmax.f32 %v19487_v30, %v19488_v23  ;;  %v19491_v20 = vld [vmem:[#allocation289_spill] sm:$0xff]  ;;  %v8314_v38 = vmax.f32 %v19501_v8, %v2002_v35  ;;  %v19505_v30 = vmax.f32 %v19503_v49, %v19504_v53  ;;  %v19519_v27 = vld [vmem:[#allocation296_spill] sm:$0xff] }
 0x1ee   : > { %19480 = vst [vmem:[#allocation278_spill] sm:$0xff] %v8277_v61  ;;  %v19493_v40 = vmax.f32 %v19491_v20, %v19492_v41  ;;  %v19496_v61 = vld [vmem:[#allocation226_spill] sm:$0xff]  ;;  %v19507_v23 = vld [vmem:[#allocation293_spill] sm:$0xff]  ;;  %v19520_v35 = vld [vmem:[#allocation232_spill] sm:$0xff]  ;;  %vm19528_vm8 = vcmp.eq.s32.totalorder %v7712_v36, %v19406_v32 }
 0x1ef   : > { %19484 = vst [vmem:[#allocation214_spill] sm:$0xff] %v8282_v43  ;;  %v8299_v16 = vmax.f32 %v19489_v6, %v1999_v39  ;;  %v19495_v43 = vld [vmem:[#allocation290_spill] sm:$0xff]  ;;  %19502 = vst [vmem:[#allocation216_spill] sm:$0xff] %v8314_v38  ;;  %v8319_v39 = vmax.f32 %v19505_v30, %v2003_v55  ;;  %v19508_v6 = vld [vmem:[#allocation229_spill] sm:$0xff]  ;;  %v19521_v53 = vmax.f32 %v19519_v27, %v19520_v35  ;;  %v2017_v27 = vsel %vm993_vm1, 1.0, %v19212_v31 }
 0x1f0   : > { %v8304_v48 = vmax.f32 %v19493_v40, %v2000_v21  ;;  %v19497_v63 = vmax.f32 %v19495_v43, %v19496_v61  ;;  %v19509_v20 = vmax.f32 %v19507_v23, %v19508_v6  ;;  %v19511_v41 = vld [vmem:[#allocation294_spill] sm:$0xff]  ;;  %v19516_v61 = vld [vmem:[#allocation231_spill] sm:$0xff]  ;;  %v19523_v55 = vld [vmem:[#allocation297_spill] sm:$0xff]  ;;  %v2018_v35 = vsel %vm994_vm2, 1.0, %v19212_v31 }
 0x1f1   : > { %19490 = vst [vmem:[#allocation279_spill] sm:$0xff] %v8299_v16  ;;  %19506 = vst [vmem:[#allocation281_spill] sm:$0xff] %v8319_v39  ;;  %v19512_v40 = vld [vmem:[#allocation230_spill] sm:$0xff]  ;;  %v8339_v49 = vmax.f32 %v19521_v53, %v2007_v47  ;;  %v19524_v30 = vld [vmem:[#allocation233_spill] sm:$0xff]  ;;  %vm1019_vm2 = vcmp.eq.s32.totalorder %v7712_v36, %v19548_v25 }
 0x1f2   : > { %19494 = vst [vmem:[#allocation215_spill] sm:$0xff] %v8304_v48  ;;  %v8309_v54 = vmax.f32 %v19497_v63, %v2001_v42  ;;  %v8324_v21 = vmax.f32 %v19509_v20, %v2004_v5  ;;  %v19513_v43 = vmax.f32 %v19511_v41, %v19512_v40  ;;  %v19515_v42 = vld [vmem:[#allocation295_spill] sm:$0xff]  ;;  %v19525_v23 = vmax.f32 %v19523_v55, %v19524_v30  ;;  %v19529_v6 = vld [vmem:[#allocation73_spill] sm:$0xff]  ;;  %v19530_v47 = vld [vmem:[#allocation74_spill] sm:$0xff] }
 0x1f3   : > { %v19517_v46 = vmax.f32 %v19515_v42, %v19516_v61  ;;  %19522 = vst [vmem:[#allocation283_spill] sm:$0xff] %v8339_v49  ;;  %v2012_v20 = vsel %vm988_vm12, 1.0, %v19212_v31  ;;  %v19534_v42 = vld [vmem:[#allocation76_spill] sm:$0xff]  ;;  %vm1014_vm12 = vcmp.eq.s32.totalorder %v7712_v36, %v19288_v10  ;;  %v2015_v61 = vsel %vm991_vm15, 1.0, %v19212_v31  ;;  %v19535_v53 = vld [vmem:[#allocation17_spill] sm:$0xff]  ;;  %v19536_v55 = vld [vmem:[#allocation18_spill] sm:$0xff] }
 0x1f4   : > { %19498 = vst [vmem:[#allocation280_spill] sm:$0xff] %v8309_v54  ;;  %19510 = vst [vmem:[#allocation217_spill] sm:$0xff] %v8324_v21  ;;  %v8329_v63 = vmax.f32 %v19513_v43, %v2005_v17  ;;  %v8344_v5 = vmax.f32 %v19525_v23, %v2008_v34  ;;  %v2009_v17 = vsel %vm19527_vm9, 1.0, %v19212_v31  ;;  %v2011_v34 = vsel %vm987_vm11, 1.0, %v19212_v31  ;;  %v19533_v43 = vld [vmem:[#allocation75_spill] sm:$0xff]  ;;  %v19537_v30 = vld [vmem:[#allocation298_spill] sm:$0xff] }
 0x1f5   : > { %v8334_v8 = vmax.f32 %v19517_v46, %v2006_v57  ;;  %v2010_v57 = vsel %vm19528_vm8, 1.0, %v19212_v31  ;;  %vm19531_vm9 = vcmp.eq.s32.totalorder %v7712_v36, %v19411_v4  ;;  %vm19532_vm8 = vcmp.eq.s32.totalorder %v7712_v36, %v19412_v13  ;;  %v19538_v23 = vld [vmem:[#allocation234_spill] sm:$0xff]  ;;  %v19546_v48 = vld [vmem:[#allocation60_spill] sm:$0xff]  ;;  %v19685_v25 = vld [vmem:[#allocation327_spill] sm:$0xff] }
 0x1f6   : > { %19514 = vst [vmem:[#allocation282_spill] sm:$0xff] %v8329_v63  ;;  %19526 = vst [vmem:[#allocation219_spill] sm:$0xff] %v8344_v5  ;;  %v2013_v41 = vsel %vm19531_vm9, 1.0, %v19212_v31  ;;  %v2014_v40 = vsel %vm19532_vm8, 1.0, %v19212_v31  ;;  %vm1011_vm14 = vcmp.eq.s32.totalorder %v7712_v36, %v19533_v43  ;;  %vm1012_vm11 = vcmp.eq.s32.totalorder %v7712_v36, %v19534_v42  ;;  %v19542_v63 = vld [vmem:[#allocation235_spill] sm:$0xff]  ;;  %v19559_v38 = vld [vmem:[#allocation238_spill] sm:$0xff] }
 0x1f7   : > { %19518 = vst [vmem:[#allocation218_spill] sm:$0xff] %v8334_v8  ;;  %v2016_v46 = vsel %vm992_vm4, 1.0, %v19212_v31  ;;  %vm1015_vm9 = vcmp.eq.s32.totalorder %v7712_v36, %v19293_v22  ;;  %vm1016_vm15 = vcmp.eq.s32.totalorder %v7712_v36, %v19294_v26  ;;  %vm1017_vm8 = vcmp.eq.s32.totalorder %v7712_v36, %v19535_v53  ;;  %v19541_v8 = vld [vmem:[#allocation299_spill] sm:$0xff] }
 0x1f8   : > { %v19539_v5 = vmax.f32 %v19537_v30, %v19538_v23  ;;  %v19543_v21 = vmax.f32 %v19541_v8, %v19542_v63  ;;  %v2019_v54 = vsel %vm995_vm3, 1.0, %v19212_v31  ;;  %vm19547_vm1 = vcmp.eq.s32.totalorder %v7712_v36, %v19546_v48  ;;  %v19551_v63 = vld [vmem:[#allocation236_spill] sm:$0xff]  ;;  %v19555_v30 = vld [vmem:[#allocation237_spill] sm:$0xff]  ;;  %v19686_v53 = vld [vmem:[#allocation263_spill] sm:$0xff] }
 0x1f9   : > { %v2020_v16 = vsel %vm19547_vm1, 1.0, %v19212_v31  ;;  %v19564_v13 = vmax.f32 %v19562_v56, %v19563_v33  ;;  %vm19590_vm3 = vcmp.eq.s32.totalorder %v7712_v36, %v19471_v62  ;;  %v19687_v26 = vmax.f32 %v19685_v25, %v19686_v53  ;;  %v19698_v25 = vld [vmem:[#allocation272_spill] sm:$0xff] }
 0x1fa   : > { %v8409_v49 = vmax.f32 %v19539_v5, %v2009_v17  ;;  %v8414_v39 = vmax.f32 %v19543_v21, %v2010_v57  ;;  %v19549_v5 = vld [vmem:[#allocation78_spill] sm:$0xff]  ;;  %v19550_v17 = vld [vmem:[#allocation300_spill] sm:$0xff]  ;;  %v19554_v57 = vld [vmem:[#allocation301_spill] sm:$0xff] }
 0x1fb   : > { %v19552_v21 = vmax.f32 %v19550_v17, %v19551_v63  ;;  %v19556_v23 = vmax.f32 %v19554_v57, %v19555_v30  ;;  %v8446_v4 = vmax.f32 %v19564_v13, %v2014_v40  ;;  %v19568_v17 = vmax.f32 %v19566_v3, %v19567_v58  ;;  %v19570_v63 = vld [vmem:[#allocation305_spill] sm:$0xff]  ;;  %v19574_v30 = vld [vmem:[#allocation306_spill] sm:$0xff]  ;;  %v8468_v13 = vpop.permute.xlu0 %669  ;;  %v19582_v58 = vld [vmem:[#allocation308_spill] sm:$0xff] }
 0x1fc   : > { %19540 = vst [vmem:[#allocation284_spill] sm:$0xff] %v8409_v49  ;;  %19544 = vst [vmem:[#allocation220_spill] sm:$0xff] %v8414_v39  ;;  %v19558_v49 = vld [vmem:[#allocation302_spill] sm:$0xff]  ;;  %v19583_v3 = vld [vmem:[#allocation244_spill] sm:$0xff] }
 0x1fd   : > { %v8431_v8 = vmax.f32 %v19552_v21, %v2011_v34  ;;  %v8436_v39 = vmax.f32 %v19556_v23, %v2012_v20  ;;  %v19560_v48 = vmax.f32 %v19558_v49, %v19559_v38  ;;  %19565 = vst [vmem:[#allocation64_spill] sm:$0xff] %v8446_v4  ;;  %v8451_v34 = vmax.f32 %v19568_v17, %v2015_v61  ;;  %v19571_v21 = vld [vmem:[#allocation241_spill] sm:$0xff]  ;;  %v19575_v23 = vld [vmem:[#allocation242_spill] sm:$0xff]  ;;  %v19578_v49 = vld [vmem:[#allocation307_spill] sm:$0xff] }
 0x1fe   : > { %v19572_v57 = vmax.f32 %v19570_v63, %v19571_v21  ;;  %v19576_v38 = vmax.f32 %v19574_v30, %v19575_v23  ;;  %v19584_v40 = vmax.f32 %v19582_v58, %v19583_v3  ;;  %v19586_v17 = vld [vmem:[#allocation309_spill] sm:$0xff]  ;;  %v2024_v30 = vsel %vm1000_vm0, 1.0, %v19212_v31 }
 0x1ff   : > { %19553 = vst [vmem:[#allocation285_spill] sm:$0xff] %v8431_v8  ;;  %19557 = vst [vmem:[#allocation221_spill] sm:$0xff] %v8436_v39  ;;  %v8441_v59 = vmax.f32 %v19560_v48, %v2013_v41  ;;  %v19579_v41 = vld [vmem:[#allocation243_spill] sm:$0xff]  ;;  %v2028_v58 = vsel %vm1004_vm13, 1.0, %v19212_v31  ;;  %vm19597_vm0 = vcmp.eq.s32.totalorder %v7712_v36, %v18907_v18  ;;  %vm19609_vm13 = vcmp.eq.s32.totalorder %v7712_v36, %v18824_v14  ;;  %v19611_v8 = vld [vmem:[#allocation26_spill] sm:$0xff] }
 0x200   : > { %19569 = vst [vmem:[#allocation286_spill] sm:$0xff] %v8451_v34  ;;  %v8456_v20 = vmax.f32 %v19572_v57, %v2016_v46  ;;  %v8461_v48 = vmax.f32 %v19576_v38, %v2017_v27  ;;  %v19580_v33 = vmax.f32 %v19578_v49, %v19579_v41  ;;  %v8473_v61 = vmax.f32 %v19584_v40, %v2019_v54  ;;  %v19587_v46 = vld [vmem:[#allocation245_spill] sm:$0xff]  ;;  %v19591_v57 = vld [vmem:[#allocation20_spill] sm:$0xff]  ;;  %v19595_v49 = vld [vmem:[#allocation22_spill] sm:$0xff] }
 0x201   : > { %19561 = vst [vmem:[#allocation63_spill] sm:$0xff] %v8441_v59  ;;  %v19588_v63 = vmax.f32 %v19586_v17, %v19587_v46  ;;  %v2021_v27 = vsel %vm997_vm6, 1.0, %v19212_v31  ;;  %vm1021_vm1 = vcmp.eq.s32.totalorder %v8468_v13, %v19591_v57  ;;  %v19592_v54 = vld [vmem:[#allocation21_spill] sm:$0xff]  ;;  %vm19593_vm6 = vcmp.eq.s32.totalorder %v7712_v36, %v5728_v9  ;;  %v19596_v41 = vld [vmem:[#allocation23_spill] sm:$0xff]  ;;  %v19599_v17 = vld [vmem:[#allocation24_spill] sm:$0xff] }
 0x202   : > { %19573 = vst [vmem:[#allocation222_spill] sm:$0xff] %v8456_v20  ;;  %19577 = vst [vmem:[#allocation287_spill] sm:$0xff] %v8461_v48  ;;  %v8466_v56 = vmax.f32 %v19580_v33, %v2018_v35  ;;  %v2022_v35 = vsel %vm19590_vm3, 1.0, %v19212_v31  ;;  %v2025_v23 = vsel %vm19593_vm6, 1.0, %v19212_v31  ;;  %vm19594_vm3 = vcmp.eq.s32.totalorder %v7712_v36, %v19150_v19  ;;  %v19600_v46 = vld [vmem:[#allocation25_spill] sm:$0xff]  ;;  %v19605_v48 = vld [vmem:[#allocation311_spill] sm:$0xff] }
 0x203   : > { %19585 = vst [vmem:[#allocation288_spill] sm:$0xff] %v8473_v61  ;;  %v8478_v21 = vmax.f32 %v19588_v63, %v2020_v16  ;;  %v2023_v16 = vsel %vm999_vm10, 1.0, %v19212_v31  ;;  %v2026_v38 = vsel %vm19594_vm3, 1.0, %v19212_v31  ;;  %vm1023_vm4 = vcmp.eq.s32.totalorder %v8468_v13, %v19595_v49  ;;  %v19601_v63 = vld [vmem:[#allocation310_spill] sm:$0xff]  ;;  %v19606_v20 = vld [vmem:[#allocation247_spill] sm:$0xff]  ;;  %v19629_v9 = vld [vmem:[#allocation28_spill] sm:$0xff] }
 0x204   : > { %19581 = vst [vmem:[#allocation223_spill] sm:$0xff] %v8466_v56  ;;  %vm1024_vm10 = vcmp.eq.s32.totalorder %v8468_v13, %v19596_v41  ;;  %v2027_v33 = vsel %vm1003_vm5, 1.0, %v19212_v31  ;;  %v2029_v3 = vsel %vm19597_vm0, 1.0, %v19212_v31  ;;  %vm19598_vm6 = vcmp.eq.s32.totalorder %v7712_v36, %v19252_v29  ;;  %v19622_v14 = vld [vmem:[#allocation250_spill] sm:$0xff]  ;;  %v19625_v18 = vld [vmem:[#allocation315_spill] sm:$0xff] }
 0x205   : > { %19589 = vst [vmem:[#allocation224_spill] sm:$0xff] %v8478_v21  ;;  %v2030_v40 = vsel %vm19598_vm6, 1.0, %v19212_v31  ;;  %vm1025_vm3 = vcmp.eq.s32.totalorder %v8468_v13, %v19599_v17  ;;  %v19602_v21 = vld [vmem:[#allocation246_spill] sm:$0xff]  ;;  %v19607_v34 = vmax.f32 %v19605_v48, %v19606_v20  ;;  %v2031_v59 = vsel %vm19609_vm13, 1.0, %v19212_v31  ;;  %v19614_v20 = vld [vmem:[#allocation248_spill] sm:$0xff] }
 0x206   : > { %v19603_v61 = vmax.f32 %v19601_v63, %v19602_v21  ;;  %vm19610_vm0 = vcmp.eq.s32.totalorder %v7712_v36, %v19261_v45  ;;  %v19613_v21 = vld [vmem:[#allocation312_spill] sm:$0xff]  ;;  %v19627_v11 = vmax.f32 %v19625_v18, %v19626_v12  ;;  %v19640_v12 = vld [vmem:[#allocation254_spill] sm:$0xff]  ;;  %vm19657_vm5 = vcmp.eq.s32.totalorder %v7712_v36, %v19529_v6 }
 0x207   : > { %v8540_v4 = vmax.f32 %v19607_v34, %v2022_v35  ;;  %v2032_v39 = vsel %vm19610_vm0, 1.0, %v19212_v31  ;;  %v19615_v34 = vmax.f32 %v19613_v21, %v19614_v20  ;;  %v19618_v35 = vld [vmem:[#allocation249_spill] sm:$0xff]  ;;  %v19631_v21 = vld [vmem:[#allocation316_spill] sm:$0xff]  ;;  %vm19658_vm0 = vcmp.eq.s32.totalorder %v7712_v36, %v19530_v47 }
 0x208   : > { %v8535_v56 = vmax.f32 %v19603_v61, %v2021_v27  ;;  %v19612_v61 = vld [vmem:[#allocation27_spill] sm:$0xff]  ;;  %v19617_v27 = vld [vmem:[#allocation313_spill] sm:$0xff]  ;;  %v8572_v19 = vmax.f32 %v19627_v11, %v2026_v38  ;;  %v19632_v20 = vld [vmem:[#allocation252_spill] sm:$0xff] }
 0x209   : > { %19608 = vst [vmem:[#allocation225_spill] sm:$0xff] %v8540_v4  ;;  %v8557_v48 = vmax.f32 %v19615_v34, %v2023_v16  ;;  %v19619_v63 = vmax.f32 %v19617_v27, %v19618_v35  ;;  %v19630_v16 = vld [vmem:[#allocation29_spill] sm:$0xff]  ;;  %v19643_v38 = vld [vmem:[#allocation319_spill] sm:$0xff] }
 0x20a   : > { %19604 = vst [vmem:[#allocation289_spill] sm:$0xff] %v8535_v56  ;;  %v19621_v56 = vld [vmem:[#allocation314_spill] sm:$0xff]  ;;  %19628 = vst [vmem:[#allocation227_spill] sm:$0xff] %v8572_v19  ;;  %v19635_v27 = vld [vmem:[#allocation317_spill] sm:$0xff] }
 0x20b   : > { %19616 = vst [vmem:[#allocation290_spill] sm:$0xff] %v8557_v48  ;;  %v8562_v4 = vmax.f32 %v19619_v63, %v2024_v30  ;;  %v19623_v45 = vmax.f32 %v19621_v56, %v19622_v14  ;;  %v19633_v30 = vmax.f32 %v19631_v21, %v19632_v20  ;;  %v19636_v14 = vld [vmem:[#allocation253_spill] sm:$0xff]  ;;  %v19644_v35 = vld [vmem:[#allocation255_spill] sm:$0xff]  ;;  %v19649_v21 = vld [vmem:[#allocation320_spill] sm:$0xff]  ;;  %v2043_v48 = vsel %vm1019_vm2, 1.0, %v19212_v31 }
 0x20c   : > { %v19645_v63 = vmax.f32 %v19643_v38, %v19644_v35  ;;  %v19650_v20 = vld [vmem:[#allocation256_spill] sm:$0xff]  ;;  %v2037_v38 = vsel %vm1013_vm7, 1.0, %v19212_v31  ;;  %v2038_v35 = vsel %vm1014_vm12, 1.0, %v19212_v31  ;;  %vm19663_vm7 = vcmp.eq.s32.totalorder %v7712_v36, %v19536_v55 }
 0x20d   : > { %19620 = vst [vmem:[#allocation226_spill] sm:$0xff] %v8562_v4  ;;  %v8567_v29 = vmax.f32 %v19623_v45, %v2025_v23  ;;  %v8581_v34 = vmax.f32 %v19633_v30, %v2027_v33  ;;  %v19637_v45 = vmax.f32 %v19635_v27, %v19636_v14  ;;  %v19639_v23 = vld [vmem:[#allocation318_spill] sm:$0xff]  ;;  %v19648_v33 = vld [vmem:[#allocation31_spill] sm:$0xff]  ;;  %v19653_v27 = vld [vmem:[#allocation321_spill] sm:$0xff]  ;;  %vm1038_vm12 = vcmp.eq.s32.totalorder %v8468_v13, %v19362_v60 }
 0x20e   : > { %v19641_v11 = vmax.f32 %v19639_v23, %v19640_v12  ;;  %v8596_v19 = vmax.f32 %v19645_v63, %v2030_v40  ;;  %v19654_v14 = vld [vmem:[#allocation257_spill] sm:$0xff]  ;;  %v2033_v40 = vsel %vm19657_vm5, 1.0, %v19212_v31  ;;  %v2034_v23 = vsel %vm19658_vm0, 1.0, %v19212_v31  ;;  %v19659_v12 = vld [vmem:[#allocation32_spill] sm:$0xff]  ;;  %v19661_v63 = vld [vmem:[#allocation34_spill] sm:$0xff] }
 0x20f   : > { %19624 = vst [vmem:[#allocation291_spill] sm:$0xff] %v8567_v29  ;;  %19634 = vst [vmem:[#allocation292_spill] sm:$0xff] %v8581_v34  ;;  %v8586_v56 = vmax.f32 %v19637_v45, %v2028_v58  ;;  %v19647_v29 = vld [vmem:[#allocation30_spill] sm:$0xff]  ;;  %v19651_v58 = vmax.f32 %v19649_v21, %v19650_v20  ;;  %vm1033_vm13 = vcmp.eq.s32.totalorder %v8468_v13, %v19659_v12  ;;  %v19662_v21 = vld [vmem:[#allocation35_spill] sm:$0xff]  ;;  %v2039_v20 = vsel %vm1015_vm9, 1.0, %v19212_v31 }
 0x210   : > { %v8591_v18 = vmax.f32 %v19641_v11, %v2029_v3  ;;  %19646 = vst [vmem:[#allocation229_spill] sm:$0xff] %v8596_v19  ;;  %v19655_v3 = vmax.f32 %v19653_v27, %v19654_v14  ;;  %v2036_v11 = vsel %vm1012_vm11, 1.0, %v19212_v31  ;;  %vm1035_vm5 = vcmp.eq.s32.totalorder %v8468_v13, %v19661_v63 }
 0x211   : > { %19638 = vst [vmem:[#allocation228_spill] sm:$0xff] %v8586_v56  ;;  %v8605_v30 = vmax.f32 %v19651_v58, %v2031_v59  ;;  %v19660_v59 = vld [vmem:[#allocation33_spill] sm:$0xff]  ;;  %v2040_v58 = vsel %vm1016_vm15, 1.0, %v19212_v31  ;;  %v2041_v27 = vsel %vm1017_vm8, 1.0, %v19212_v31  ;;  %v2042_v14 = vsel %vm19663_vm7, 1.0, %v19212_v31  ;;  %v19669_v56 = vld [vmem:[#allocation259_spill] sm:$0xff] }
 0x212   : > { %19642 = vst [vmem:[#allocation293_spill] sm:$0xff] %v8591_v18  ;;  %v8610_v45 = vmax.f32 %v19655_v3, %v2032_v39  ;;  %vm1034_vm6 = vcmp.eq.s32.totalorder %v8468_v13, %v19660_v59  ;;  %v2035_v39 = vsel %vm1011_vm14, 1.0, %v19212_v31  ;;  %vm1036_vm14 = vcmp.eq.s32.totalorder %v8468_v13, %v19662_v21  ;;  %v19664_v3 = vld [vmem:[#allocation322_spill] sm:$0xff]  ;;  %v19668_v18 = vld [vmem:[#allocation323_spill] sm:$0xff] }
 0x213   : > { %19652 = vst [vmem:[#allocation294_spill] sm:$0xff] %v8605_v30  ;;  %vm1037_vm11 = vcmp.eq.s32.totalorder %v8468_v13, %v19361_v2  ;;  %v19670_v34 = vmax.f32 %v19668_v18, %v19669_v56  ;;  %vm19672_vm9 = vcmp.eq.s32.totalorder %v7712_v36, %v19549_v5  ;;  %vm1039_vm15 = vcmp.eq.s32.totalorder %v8468_v13, %v19368_v7  ;;  %v19674_v56 = vld [vmem:[#allocation260_spill] sm:$0xff]  ;;  %v19779_v7 = vld [vmem:[#allocation66_spill] sm:$0xff] }
 0x214   : > { %19656 = vst [vmem:[#allocation230_spill] sm:$0xff] %v8610_v45  ;;  %v19665_v45 = vld [vmem:[#allocation258_spill] sm:$0xff]  ;;  %v2044_v55 = vsel %vm19672_vm9, 1.0, %v19212_v31  ;;  %vm1040_vm8 = vcmp.eq.s32.totalorder %v8468_v13, %v19369_v0  ;;  %v8704_v22 = vmax.f32 %v19687_v26, %v2038_v35  ;;  %vm1041_vm2 = vcmp.eq.s32.totalorder %v8468_v13, %v18817_v24  ;;  %v19701_v35 = vld [vmem:[#allocation329_spill] sm:$0xff]  ;;  %v19787_v24 = vld [vmem:[#allocation68_spill] sm:$0xff] }
 0x215   : > { %v19666_v30 = vmax.f32 %v19664_v3, %v19665_v45  ;;  %v8672_v4 = vmax.f32 %v19670_v34, %v2034_v23  ;;  %v19677_v45 = vld [vmem:[#allocation325_spill] sm:$0xff]  ;;  %vm19714_vm9 = vcmp.eq.s32.totalorder %v8468_v13, %v19592_v54 }
 0x216   : > { %19688 = vst [vmem:[#allocation233_spill] sm:$0xff] %v8704_v22  ;;  %v19778_v0 = vld [vmem:[#allocation65_spill] sm:$0xff]  ;;  %v19893_v22 = vld [vmem:[#allocation44_spill] sm:$0xff] }
 0x217   : > { %v8667_v19 = vmax.f32 %v19666_v30, %v2033_v40  ;;  %19671 = vst [vmem:[#allocation231_spill] sm:$0xff] %v8672_v4  ;;  %v19673_v30 = vld [vmem:[#allocation324_spill] sm:$0xff]  ;;  %v19678_v40 = vld [vmem:[#allocation261_spill] sm:$0xff]  ;;  %v19681_v4 = vld [vmem:[#allocation326_spill] sm:$0xff] }
 0x218   : > { %v19675_v34 = vmax.f32 %v19673_v30, %v19674_v56  ;;  %v19679_v23 = vmax.f32 %v19677_v45, %v19678_v40  ;;  %v19690_v30 = vld [vmem:[#allocation264_spill] sm:$0xff]  ;;  %v19702_v40 = vld [vmem:[#allocation273_spill] sm:$0xff] }
 0x219   : > { %19667 = vst [vmem:[#allocation295_spill] sm:$0xff] %v8667_v19  ;;  %v19682_v19 = vld [vmem:[#allocation262_spill] sm:$0xff]  ;;  %v19697_v45 = vld [vmem:[#allocation328_spill] sm:$0xff] }
 0x21a   : > { %v8689_v18 = vmax.f32 %v19675_v34, %v2035_v39  ;;  %v8694_v3 = vmax.f32 %v19679_v23, %v2036_v11  ;;  %v19683_v36 = vmax.f32 %v19681_v4, %v19682_v19  ;;  %v19689_v39 = vld [vmem:[#allocation36_spill] sm:$0xff]  ;;  %v19693_v34 = vld [vmem:[#allocation37_spill] sm:$0xff]  ;;  %v19699_v26 = vmax.f32 %v19697_v45, %v19698_v25 }
 0x21b   : > { %v19691_v11 = vmax.f32 %v19689_v39, %v19690_v30  ;;  %v19694_v19 = vld [vmem:[#allocation265_spill] sm:$0xff]  ;;  %v19703_v23 = vmax.f32 %v19701_v35, %v19702_v40  ;;  %v19706_v39 = vld [vmem:[#allocation276_spill] sm:$0xff]  ;;  %v8768_v40 = vsel %vm1023_vm4, 1.0, %v19212_v31  ;;  %v8788_v35 = vsel %vm1025_vm3, 1.0, %v19212_v31 }
 0x21c   : > { %19676 = vst [vmem:[#allocation296_spill] sm:$0xff] %v8689_v18  ;;  %19680 = vst [vmem:[#allocation232_spill] sm:$0xff] %v8694_v3  ;;  %v8699_v5 = vmax.f32 %v19683_v36, %v2037_v38  ;;  %v19695_v4 = vmax.f32 %v19693_v34, %v19694_v19  ;;  %v8723_v53 = vmax.f32 %v19699_v26, %v2041_v27  ;;  %v19710_v34 = vld [vmem:[#allocation277_spill] sm:$0xff]  ;;  %v19716_v45 = vld [vmem:[#allocation44_spill] sm:$0xff] }
 0x21d   : > { %v8713_v56 = vmax.f32 %v19691_v11, %v2039_v20  ;;  %v8728_v36 = vmax.f32 %v19703_v23, %v2042_v14  ;;  %v19705_v20 = vld [vmem:[#allocation330_spill] sm:$0xff]  ;;  %v19709_v11 = vld [vmem:[#allocation331_spill] sm:$0xff]  ;;  %v8748_v14 = vsel %vm1021_vm1, 1.0, %v19212_v31  ;;  %vm1045_vm7 = vcmp.eq.s32.totalorder %v8468_v13, %v19716_v45  ;;  %19720 = vst [vmem:[#allocation302_spill] sm:$0xff] %v8768_v40  ;;  %19726 = vst [vmem:[#allocation303_spill] sm:$0xff] %v8788_v35 }
 0x21e   : > { %19684 = vst [vmem:[#allocation297_spill] sm:$0xff] %v8699_v5  ;;  %v8718_v38 = vmax.f32 %v19695_v4, %v2040_v58  ;;  %19700 = vst [vmem:[#allocation299_spill] sm:$0xff] %v8723_v53  ;;  %v19707_v58 = vmax.f32 %v19705_v20, %v19706_v39  ;;  %v19711_v27 = vmax.f32 %v19709_v11, %v19710_v34  ;;  %v8754_v4 = vsel %vm19714_vm9, 1.0, %v19212_v31  ;;  %v19722_v20 = vld [vmem:[#allocation47_spill] sm:$0xff]  ;;  %v19723_v39 = vld [vmem:[#allocation48_spill] sm:$0xff] }
 0x21f   : > { %19692 = vst [vmem:[#allocation298_spill] sm:$0xff] %v8713_v56  ;;  %19704 = vst [vmem:[#allocation235_spill] sm:$0xff] %v8728_v36  ;;  %v8774_v23 = vsel %vm1024_vm10, 1.0, %v19212_v31  ;;  %vm1047_vm1 = vcmp.eq.s32.totalorder %v8468_v13, %v19722_v20  ;;  %vm19727_vm4 = vcmp.eq.s32.totalorder %v8468_v13, %v19600_v46  ;;  %vm19731_vm3 = vcmp.eq.s32.totalorder %v8468_v13, %v19611_v8  ;;  %v19736_v26 = vld [vmem:[#allocation52_spill] sm:$0xff]  ;;  %v19757_v36 = vld [vmem:[#allocation57_spill] sm:$0xff] }
 0x220   : > { %19696 = vst [vmem:[#allocation234_spill] sm:$0xff] %v8718_v38  ;;  %v8737_v30 = vmax.f32 %v19707_v58, %v2043_v48  ;;  %v8742_v19 = vmax.f32 %v19711_v27, %v2044_v55  ;;  %19713 = vst [vmem:[#allocation301_spill] sm:$0xff] %v8748_v14  ;;  %v19717_v48 = vld [vmem:[#allocation45_spill] sm:$0xff]  ;;  %v8794_v25 = vsel %vm19727_vm4, 1.0, %v19212_v31  ;;  %v8808_v40 = vsel %vm19731_vm3, 1.0, %v19212_v31  ;;  %v19744_v55 = vld [vmem:[#allocation54_spill] sm:$0xff] }
 0x221   : > { %19715 = vst [vmem:[#allocation237_spill] sm:$0xff] %v8754_v4  ;;  %vm1046_vm0 = vcmp.eq.s32.totalorder %v8468_v13, %v19717_v48  ;;  %19721 = vst [vmem:[#allocation238_spill] sm:$0xff] %v8774_v23  ;;  %vm19733_vm4 = vcmp.eq.s32.totalorder %v8468_v13, %v19612_v61  ;;  %v19735_v4 = vld [vmem:[#allocation51_spill] sm:$0xff]  ;;  %vm19739_vm3 = vcmp.eq.s32.totalorder %v8468_v13, %v19629_v9  ;;  %v19743_v14 = vld [vmem:[#allocation53_spill] sm:$0xff]  ;;  %v8874_v23 = vsel %vm1034_vm6, 1.0, %v19212_v31 }
 0x222   : > { %19708 = vst [vmem:[#allocation300_spill] sm:$0xff] %v8737_v30  ;;  %19712 = vst [vmem:[#allocation236_spill] sm:$0xff] %v8742_v19  ;;  %v8814_v58 = vsel %vm19733_vm4, 1.0, %v19212_v31  ;;  %v8828_v35 = vsel %vm19739_vm3, 1.0, %v19212_v31  ;;  %vm19741_vm4 = vcmp.eq.s32.totalorder %v8468_v13, %v19630_v16  ;;  %vm19747_vm3 = vcmp.eq.s32.totalorder %v8468_v13, %v19647_v29  ;;  %v19751_v19 = vld [vmem:[#allocation55_spill] sm:$0xff]  ;;  %v19752_v30 = vld [vmem:[#allocation56_spill] sm:$0xff] }
 0x223   : > { %19728 = vst [vmem:[#allocation239_spill] sm:$0xff] %v8794_v25  ;;  %19732 = vst [vmem:[#allocation304_spill] sm:$0xff] %v8808_v40  ;;  %v8834_v27 = vsel %vm19741_vm4, 1.0, %v19212_v31  ;;  %v8848_v40 = vsel %vm19747_vm3, 1.0, %v19212_v31  ;;  %vm19749_vm4 = vcmp.eq.s32.totalorder %v8468_v13, %v19648_v33  ;;  %vm1055_vm9 = vcmp.eq.s32.totalorder %v8468_v13, %v19751_v19  ;;  %v19758_v53 = vld [vmem:[#allocation58_spill] sm:$0xff]  ;;  %v19763_v38 = vld [vmem:[#allocation59_spill] sm:$0xff] }
 0x224   : > { %19734 = vst [vmem:[#allocation240_spill] sm:$0xff] %v8814_v58  ;;  %19740 = vst [vmem:[#allocation305_spill] sm:$0xff] %v8828_v35  ;;  %v8854_v34 = vsel %vm19749_vm4, 1.0, %v19212_v31  ;;  %vm1056_vm10 = vcmp.eq.s32.totalorder %v8468_v13, %v19752_v30  ;;  %v8868_v35 = vsel %vm1033_vm13, 1.0, %v19212_v31  ;;  %vm1057_vm3 = vcmp.eq.s32.totalorder %v8468_v13, %v19757_v36  ;;  %v19764_v56 = vld [vmem:[#allocation60_spill] sm:$0xff]  ;;  %v19799_v48 = vld [vmem:[#allocation71_spill] sm:$0xff] }
 0x225   : > { %19742 = vst [vmem:[#allocation241_spill] sm:$0xff] %v8834_v27  ;;  %19748 = vst [vmem:[#allocation306_spill] sm:$0xff] %v8848_v40  ;;  %vm1058_vm4 = vcmp.eq.s32.totalorder %v8468_v13, %v19758_v53  ;;  %v8888_v40 = vsel %vm1035_vm5, 1.0, %v19212_v31  ;;  %v8894_v25 = vsel %vm1036_vm14, 1.0, %v19212_v31  ;;  %vm1059_vm6 = vcmp.eq.s32.totalorder %v8468_v13, %v19763_v38  ;;  %v19800_v45 = vld [vmem:[#allocation72_spill] sm:$0xff]  ;;  %v19833_v53 = vld [vmem:[#allocation17_spill] sm:$0xff] }
 0x226   : > { %19750 = vst [vmem:[#allocation242_spill] sm:$0xff] %v8854_v34  ;;  %19755 = vst [vmem:[#allocation307_spill] sm:$0xff] %v8868_v35  ;;  %vm1060_vm13 = vcmp.eq.s32.totalorder %v8468_v13, %v19764_v56  ;;  %v8908_v35 = vsel %vm1037_vm11, 1.0, %v19212_v31  ;;  %v8914_v58 = vsel %vm1038_vm12, 1.0, %v19212_v31  ;;  %vm1061_vm5 = vcmp.eq.s32.totalorder %v8468_v13, %v19470_v1  ;;  %v19834_v36 = vld [vmem:[#allocation18_spill] sm:$0xff]  ;;  %v19839_v56 = vld [vmem:[#allocation19_spill] sm:$0xff] }
 0x227   : > { %19756 = vst [vmem:[#allocation243_spill] sm:$0xff] %v8874_v23  ;;  %19761 = vst [vmem:[#allocation308_spill] sm:$0xff] %v8888_v40  ;;  %vm1062_vm14 = vcmp.eq.s32.totalorder %v8468_v13, %v19471_v62  ;;  %v8928_v40 = vsel %vm1039_vm15, 1.0, %v19212_v31  ;;  %v8934_v27 = vsel %vm1040_vm8, 1.0, %v19212_v31  ;;  %vm1063_vm11 = vcmp.eq.s32.totalorder %v8468_v13, %v19473_v28  ;;  %v19840_v38 = vld [vmem:[#allocation78_spill] sm:$0xff]  ;;  %v19884_v18 = vld [vmem:[#allocation39_spill] sm:$0xff] }
 0x228   : > { %19762 = vst [vmem:[#allocation244_spill] sm:$0xff] %v8894_v25  ;;  %19767 = vst [vmem:[#allocation309_spill] sm:$0xff] %v8908_v35  ;;  %v8948_v35 = vsel %vm1041_vm2, 1.0, %v19212_v31  ;;  %vm19776_vm15 = vcmp.eq.s32.totalorder %v8468_v13, %v5634_v50  ;;  %vm19782_vm2 = vcmp.eq.s32.totalorder %v8468_v13, %v5638_v51  ;;  %v19786_v50 = vld [vmem:[#allocation67_spill] sm:$0xff]  ;;  %vm1068_vm8 = vcmp.eq.s32.totalorder %v8468_v13, %v19787_v24  ;;  %v19793_v51 = vld [vmem:[#allocation70_spill] sm:$0xff] }
 0x229   : > { %19768 = vst [vmem:[#allocation245_spill] sm:$0xff] %v8914_v58  ;;  %19771 = vst [vmem:[#allocation310_spill] sm:$0xff] %v8928_v40  ;;  %v8954_v34 = vsel %vm19776_vm15, 1.0, %v19212_v31  ;;  %v8968_v40 = vsel %vm19782_vm2, 1.0, %v19212_v31  ;;  %vm19784_vm15 = vcmp.eq.s32.totalorder %v8468_v13, %v5642_v52  ;;  %vm1067_vm12 = vcmp.eq.s32.totalorder %v8468_v13, %v19786_v50  ;;  %v19792_v52 = vld [vmem:[#allocation69_spill] sm:$0xff] }
 0x22a   : > { %19772 = vst [vmem:[#allocation246_spill] sm:$0xff] %v8934_v27  ;;  %19775 = vst [vmem:[#allocation311_spill] sm:$0xff] %v8948_v35  ;;  %v8974_v23 = vsel %vm19784_vm15, 1.0, %v19212_v31  ;;  %v8988_v35 = vsel %vm1045_vm7, 1.0, %v19212_v31  ;;  %v8994_v25 = vsel %vm1046_vm0, 1.0, %v19212_v31  ;;  %vm1069_vm2 = vcmp.eq.s32.totalorder %v8468_v13, %v19792_v52  ;;  %v19894_v5 = vld [vmem:[#allocation45_spill] sm:$0xff] }
 0x22b   : > { %19777 = vst [vmem:[#allocation247_spill] sm:$0xff] %v8954_v34  ;;  %19783 = vst [vmem:[#allocation312_spill] sm:$0xff] %v8968_v40  ;;  %v9008_v40 = vsel %vm1047_vm1, 1.0, %v19212_v31  ;;  %vm19797_vm0 = vcmp.eq.s32.totalorder %v8468_v13, %v19723_v39  ;;  %vm19803_vm1 = vcmp.eq.s32.totalorder %v8468_v13, %v19405_v37  ;;  %vm1077_vm15 = vcmp.eq.s32.totalorder %v8468_v13, %v19287_v15 }
 0x22c   : > { %19785 = vst [vmem:[#allocation248_spill] sm:$0xff] %v8974_v23  ;;  %19790 = vst [vmem:[#allocation313_spill] sm:$0xff] %v8988_v35  ;;  %v9014_v58 = vsel %vm19797_vm0, 1.0, %v19212_v31  ;;  %v9028_v35 = vsel %vm19803_vm1, 1.0, %v19212_v31  ;;  %vm19805_vm0 = vcmp.eq.s32.totalorder %v8468_v13, %v19406_v32  ;;  %vm19809_vm1 = vcmp.eq.s32.totalorder %v8468_v13, %v19735_v4  ;;  %v9056_v32 = vpop.permute.xlu1 %672 }
 0x22d   : > { %19791 = vst [vmem:[#allocation249_spill] sm:$0xff] %v8994_v25  ;;  %19796 = vst [vmem:[#allocation314_spill] sm:$0xff] %v9008_v40  ;;  %v9034_v27 = vsel %vm19805_vm0, 1.0, %v19212_v31  ;;  %v9048_v40 = vsel %vm19809_vm1, 1.0, %v19212_v31  ;;  %vm19811_vm0 = vcmp.eq.s32.totalorder %v8468_v13, %v19736_v26  ;;  %vm19815_vm1 = vcmp.eq.s32.totalorder %v8468_v13, %v19743_v14  ;;  %v19824_v14 = vld [vmem:[#allocation77_spill] sm:$0xff] }
 0x22e   : > { %19798 = vst [vmem:[#allocation250_spill] sm:$0xff] %v9014_v58  ;;  %19804 = vst [vmem:[#allocation315_spill] sm:$0xff] %v9028_v35  ;;  %v9054_v34 = vsel %vm19811_vm0, 1.0, %v19212_v31  ;;  %v9070_v35 = vsel %vm19815_vm1, 1.0, %v19212_v31  ;;  %vm19817_vm0 = vcmp.eq.s32.totalorder %v8468_v13, %v19744_v55  ;;  %vm1078_vm7 = vcmp.eq.s32.totalorder %v8468_v13, %v19288_v10  ;;  %v19823_v55 = vld [vmem:[#allocation16_spill] sm:$0xff]  ;;  %v19909_v10 = vld [vmem:[#allocation237_spill] sm:$0xff] }
 0x22f   : > { %19806 = vst [vmem:[#allocation251_spill] sm:$0xff] %v9034_v27  ;;  %19810 = vst [vmem:[#allocation316_spill] sm:$0xff] %v9048_v40  ;;  %v9076_v23 = vsel %vm19817_vm0, 1.0, %v19212_v31  ;;  %v9090_v40 = vsel %vm1055_vm9, 1.0, %v19212_v31  ;;  %v9096_v25 = vsel %vm1056_vm10, 1.0, %v19212_v31  ;;  %vm1079_vm1 = vcmp.eq.s32.totalorder %v8468_v13, %v19823_v55  ;;  %v19917_v55 = vld [vmem:[#allocation238_spill] sm:$0xff] }
 0x230   : > { %19812 = vst [vmem:[#allocation252_spill] sm:$0xff] %v9054_v34  ;;  %19816 = vst [vmem:[#allocation317_spill] sm:$0xff] %v9070_v35  ;;  %vm1080_vm0 = vcmp.eq.s32.totalorder %v8468_v13, %v19824_v14  ;;  %v9110_v35 = vsel %vm1057_vm3, 1.0, %v19212_v31  ;;  %v9116_v58 = vsel %vm1058_vm4, 1.0, %v19212_v31  ;;  %v9136_v27 = vsel %vm1060_vm13, 1.0, %v19212_v31 }
 0x231   : > { %19818 = vst [vmem:[#allocation253_spill] sm:$0xff] %v9076_v23  ;;  %19821 = vst [vmem:[#allocation318_spill] sm:$0xff] %v9090_v40  ;;  %v9130_v40 = vsel %vm1059_vm6, 1.0, %v19212_v31  ;;  %vm1081_vm3 = vcmp.eq.s32.totalorder %v8468_v13, %v19833_v53  ;;  %vm1082_vm4 = vcmp.eq.s32.totalorder %v8468_v13, %v19834_v36  ;;  %vm1087_vm10 = vcmp.eq.s32.totalorder %v9056_v32, %v19595_v49  ;;  %v19905_v53 = vld [vmem:[#allocation301_spill] sm:$0xff] }
 0x232   : > { %19822 = vst [vmem:[#allocation254_spill] sm:$0xff] %v9096_v25  ;;  %19827 = vst [vmem:[#allocation319_spill] sm:$0xff] %v9110_v35  ;;  %vm1088_vm9 = vcmp.eq.s32.totalorder %v9056_v32, %v19596_v41  ;;  %v9154_v35 = vsel %vm1061_vm5, 1.0, %v19212_v31  ;;  %v9160_v34 = vsel %vm1062_vm14, 1.0, %v19212_v31  ;;  %vm1083_vm6 = vcmp.eq.s32.totalorder %v8468_v13, %v19839_v56  ;;  %v19885_v25 = vld [vmem:[#allocation40_spill] sm:$0xff]  ;;  %v19908_v56 = vld [vmem:[#allocation206_spill] sm:$0xff] }
 0x233   : > { %19828 = vst [vmem:[#allocation255_spill] sm:$0xff] %v9116_v58  ;;  %19831 = vst [vmem:[#allocation320_spill] sm:$0xff] %v9130_v40  ;;  %v9174_v40 = vsel %vm1063_vm11, 1.0, %v19212_v31  ;;  %vm19844_vm5 = vcmp.eq.s32.totalorder %v8468_v13, %v19474_v44  ;;  %vm19848_vm14 = vcmp.eq.s32.totalorder %v8468_v13, %v19778_v0  ;;  %vm19850_vm11 = vcmp.eq.s32.totalorder %v8468_v13, %v19779_v7 }
 0x234   : > { %19832 = vst [vmem:[#allocation256_spill] sm:$0xff] %v9136_v27  ;;  %19837 = vst [vmem:[#allocation321_spill] sm:$0xff] %v9154_v35  ;;  %v9180_v23 = vsel %vm19844_vm5, 1.0, %v19212_v31  ;;  %v9190_v58 = vsel %vm19848_vm14, 1.0, %v19212_v31  ;;  %v9216_v62 = vsel %vm1068_vm8, 1.0, %v19212_v31  ;;  %vm1091_vm14 = vcmp.eq.s32.totalorder %v9056_v32, %v19611_v8  ;;  %v19891_v27 = vld [vmem:[#allocation42_spill] sm:$0xff] }
 0x235   : > { %19838 = vst [vmem:[#allocation257_spill] sm:$0xff] %v9160_v34  ;;  %19843 = vst [vmem:[#allocation322_spill] sm:$0xff] %v9174_v40  ;;  %v9196_v34 = vsel %vm19850_vm11, 1.0, %v19212_v31  ;;  %v9210_v40 = vsel %vm1067_vm12, 1.0, %v19212_v31  ;;  %vm19859_vm12 = vcmp.eq.s32.totalorder %v8468_v13, %v19793_v51  ;;  %vm1095_vm8 = vcmp.eq.s32.totalorder %v9056_v32, %v19647_v29 }
 0x236   : > { %19845 = vst [vmem:[#allocation258_spill] sm:$0xff] %v9180_v23  ;;  %19849 = vst [vmem:[#allocation323_spill] sm:$0xff] %v9190_v58  ;;  %v9234_v58 = vsel %vm1069_vm2, 1.0, %v19212_v31  ;;  %v9240_v35 = vsel %vm19859_vm12, 1.0, %v19212_v31  ;;  %vm1096_vm5 = vcmp.eq.s32.totalorder %v9056_v32, %v19648_v33  ;;  %vm19863_vm2 = vcmp.eq.s32.totalorder %v8468_v13, %v19799_v48  ;;  %v19941_v33 = vld [vmem:[#allocation59_spill] sm:$0xff] }
 0x237   : > { %19851 = vst [vmem:[#allocation259_spill] sm:$0xff] %v9196_v34  ;;  %19854 = vst [vmem:[#allocation324_spill] sm:$0xff] %v9210_v40  ;;  %v9258_v40 = vsel %vm19863_vm2, 1.0, %v19212_v31  ;;  %vm19865_vm12 = vcmp.eq.s32.totalorder %v8468_v13, %v19800_v45  ;;  %vm1099_vm11 = vcmp.eq.s32.totalorder %v9056_v32, %v19661_v63  ;;  %vm19869_vm2 = vcmp.eq.s32.totalorder %v8468_v13, %v19529_v6  ;;  %v19892_v34 = vld [vmem:[#allocation43_spill] sm:$0xff]  ;;  %v19952_v63 = vld [vmem:[#allocation305_spill] sm:$0xff] }
 0x238   : > { %19855 = vst [vmem:[#allocation260_spill] sm:$0xff] %v9216_v62  ;;  %19858 = vst [vmem:[#allocation325_spill] sm:$0xff] %v9234_v58  ;;  %v9264_v11 = vsel %vm19865_vm12, 1.0, %v19212_v31  ;;  %v9278_v58 = vsel %vm19869_vm2, 1.0, %v19212_v31  ;;  %vm19871_vm12 = vcmp.eq.s32.totalorder %v8468_v13, %v19530_v47  ;;  %vm19875_vm13 = vcmp.eq.s32.totalorder %v8468_v13, %v19533_v43  ;;  %v19912_v43 = vld [vmem:[#allocation267_spill] sm:$0xff] }
 0x239   : > { %19860 = vst [vmem:[#allocation261_spill] sm:$0xff] %v9240_v35  ;;  %19864 = vst [vmem:[#allocation326_spill] sm:$0xff] %v9258_v40  ;;  %v9284_v23 = vsel %vm19871_vm12, 1.0, %v19212_v31  ;;  %v9294_v62 = vsel %vm19875_vm13, 1.0, %v19212_v31  ;;  %vm19877_vm2 = vcmp.eq.s32.totalorder %v8468_v13, %v19534_v42  ;;  %v9310_v40 = vsel %vm1077_vm15, 1.0, %v19212_v31  ;;  %v19886_v35 = vld [vmem:[#allocation41_spill] sm:$0xff] }
 0x23a   : > { %19866 = vst [vmem:[#allocation262_spill] sm:$0xff] %v9264_v11  ;;  %19870 = vst [vmem:[#allocation327_spill] sm:$0xff] %v9278_v58  ;;  %v9300_v11 = vsel %vm19877_vm2, 1.0, %v19212_v31  ;;  %vm1101_vm13 = vcmp.eq.s32.totalorder %v9056_v32, %v19361_v2  ;;  %v9336_v3 = vsel %vm1080_vm0, 1.0, %v19212_v31  ;;  %vm19890_vm0 = vcmp.eq.s32.totalorder %v9056_v32, %v19592_v54  ;;  %v19904_v54 = vld [vmem:[#allocation266_spill] sm:$0xff]  ;;  %v19916_v6 = vld [vmem:[#allocation207_spill] sm:$0xff] }
 0x23b   : > { %19872 = vst [vmem:[#allocation263_spill] sm:$0xff] %v9284_v23  ;;  %19876 = vst [vmem:[#allocation36_spill] sm:$0xff] %v9294_v62  ;;  %v9316_v23 = vsel %vm1078_vm7, 1.0, %v19212_v31  ;;  %v19883_v62 = vld [vmem:[#allocation38_spill] sm:$0xff]  ;;  %v2110_v58 = vsel %vm19890_vm0, 1.0, %v19212_v31  ;;  %vm1107_vm2 = vcmp.eq.s32.totalorder %v9056_v32, %v19891_v27  ;;  %vm1108_vm12 = vcmp.eq.s32.totalorder %v9056_v32, %v19892_v34 }
 0x23c   : > { %19878 = vst [vmem:[#allocation264_spill] sm:$0xff] %v9300_v11  ;;  %19879 = vst [vmem:[#allocation37_spill] sm:$0xff] %v9310_v40  ;;  %v9330_v11 = vsel %vm1079_vm1, 1.0, %v19212_v31  ;;  %vm19889_vm1 = vcmp.eq.s32.totalorder %v9056_v32, %v19591_v57  ;;  %vm1109_vm7 = vcmp.eq.s32.totalorder %v9056_v32, %v19893_v22  ;;  %vm1110_vm15 = vcmp.eq.s32.totalorder %v9056_v32, %v19894_v5 }
 0x23d   : > { %19880 = vst [vmem:[#allocation265_spill] sm:$0xff] %v9316_v23  ;;  %19881 = vst [vmem:[#allocation328_spill] sm:$0xff] %v9330_v11  ;;  %v2109_v1 = vsel %vm19889_vm1, 1.0, %v19212_v31  ;;  %v9376_v40 = vsel %vm1082_vm4, 1.0, %v19212_v31  ;;  %v2111_v11 = vsel %vm1087_vm10, 1.0, %v19212_v31  ;;  %v2112_v23 = vsel %vm1088_vm9, 1.0, %v19212_v31 }
 0x23e   : > { %19882 = vst [vmem:[#allocation272_spill] sm:$0xff] %v9336_v3  ;;  %v9370_v3 = vsel %vm1081_vm3, 1.0, %v19212_v31  ;;  %19896 = vst [vmem:[#allocation273_spill] sm:$0xff] %v9376_v40  ;;  %vm1111_vm3 = vcmp.eq.s32.totalorder %v9056_v32, %v19722_v20  ;;  %vm1112_vm1 = vcmp.eq.s32.totalorder %v9056_v32, %v19723_v39  ;;  %v9398_v49 = vsel %vm1083_vm6, 1.0, %v19212_v31  ;;  %v20014_v39 = vld [vmem:[#allocation281_spill] sm:$0xff]  ;;  %v20015_v20 = vld [vmem:[#allocation312_spill] sm:$0xff] }
 0x23f   : > { %19895 = vst [vmem:[#allocation329_spill] sm:$0xff] %v9370_v3  ;;  %19899 = vst [vmem:[#allocation330_spill] sm:$0xff] %v9398_v49  ;;  %vm19900_vm9 = vcmp.eq.s32.totalorder %v8468_v13, %v19840_v38  ;;  %v19906_v40 = vmax.f32 %v19904_v54, %v19905_v53  ;;  %v19910_v15 = vmax.f32 %v19908_v56, %v19909_v10  ;;  %v19913_v13 = vld [vmem:[#allocation302_spill] sm:$0xff]  ;;  %v19926_v56 = vld [vmem:[#allocation53_spill] sm:$0xff]  ;;  %v2119_v53 = vsel %vm1095_vm8, 1.0, %v19212_v31 }
 0x240   : > { %v9404_v41 = vsel %vm19900_vm9, 1.0, %v19212_v31  ;;  %v19914_v38 = vmax.f32 %v19912_v43, %v19913_v13  ;;  %v19918_v49 = vmax.f32 %v19916_v6, %v19917_v55  ;;  %vm19920_vm10 = vcmp.eq.s32.totalorder %v9056_v32, %v19599_v17  ;;  %v19932_v13 = vld [vmem:[#allocation268_spill] sm:$0xff]  ;;  %v19933_v3 = vld [vmem:[#allocation303_spill] sm:$0xff]  ;;  %v19960_v17 = vld [vmem:[#allocation306_spill] sm:$0xff] }
 0x241   : > { %19901 = vst [vmem:[#allocation276_spill] sm:$0xff] %v9404_v41  ;;  %v9413_v36 = vmax.f32 %v19906_v40, %v2109_v1  ;;  %v9418_v42 = vmax.f32 %v19910_v15, %v2110_v58  ;;  %v2113_v1 = vsel %vm19920_vm10, 1.0, %v19212_v31  ;;  %vm19921_vm4 = vcmp.eq.s32.totalorder %v9056_v32, %v19600_v46  ;;  %v19922_v15 = vld [vmem:[#allocation50_spill] sm:$0xff]  ;;  %v19930_v58 = vld [vmem:[#allocation57_spill] sm:$0xff]  ;;  %v19959_v46 = vld [vmem:[#allocation271_spill] sm:$0xff] }
 0x242   : > { %v9423_v47 = vmax.f32 %v19914_v38, %v2111_v11  ;;  %v9428_v14 = vmax.f32 %v19918_v49, %v2112_v23  ;;  %v2114_v10 = vsel %vm19921_vm4, 1.0, %v19212_v31  ;;  %v2115_v6 = vsel %vm1091_vm14, 1.0, %v19212_v31  ;;  %v19927_v38 = vld [vmem:[#allocation54_spill] sm:$0xff] }
 0x243   : > { %19907 = vst [vmem:[#allocation331_spill] sm:$0xff] %v9413_v36  ;;  %19911 = vst [vmem:[#allocation277_spill] sm:$0xff] %v9418_v42  ;;  %vm19923_vm9 = vcmp.eq.s32.totalorder %v9056_v32, %v19612_v61  ;;  %vm19924_vm10 = vcmp.eq.s32.totalorder %v9056_v32, %v19629_v9  ;;  %vm19925_vm4 = vcmp.eq.s32.totalorder %v9056_v32, %v19630_v16  ;;  %v2120_v55 = vsel %vm1096_vm5, 1.0, %v19212_v31  ;;  %v19931_v11 = vld [vmem:[#allocation58_spill] sm:$0xff]  ;;  %v19936_v42 = vld [vmem:[#allocation208_spill] sm:$0xff] }
 0x244   : > { %19915 = vst [vmem:[#allocation266_spill] sm:$0xff] %v9423_v47  ;;  %19919 = vst [vmem:[#allocation301_spill] sm:$0xff] %v9428_v14  ;;  %v2116_v43 = vsel %vm19923_vm9, 1.0, %v19212_v31  ;;  %v2117_v54 = vsel %vm19924_vm10, 1.0, %v19212_v31  ;;  %v2118_v49 = vsel %vm19925_vm4, 1.0, %v19212_v31  ;;  %vm1115_vm0 = vcmp.eq.s32.totalorder %v9056_v32, %v19735_v4  ;;  %v19937_v36 = vld [vmem:[#allocation239_spill] sm:$0xff] }
 0x245   : > { %vm1116_vm14 = vcmp.eq.s32.totalorder %v9056_v32, %v19736_v26  ;;  %vm19928_vm10 = vcmp.eq.s32.totalorder %v9056_v32, %v19659_v12  ;;  %vm19929_vm4 = vcmp.eq.s32.totalorder %v9056_v32, %v19660_v59  ;;  %vm1119_vm9 = vcmp.eq.s32.totalorder %v9056_v32, %v19751_v19  ;;  %v19955_v16 = vld [vmem:[#allocation210_spill] sm:$0xff]  ;;  %v19956_v9 = vld [vmem:[#allocation241_spill] sm:$0xff] }
 0x246   : > { %v2121_v40 = vsel %vm19928_vm10, 1.0, %v19212_v31  ;;  %v2122_v23 = vsel %vm19929_vm4, 1.0, %v19212_v31  ;;  %vm1120_vm8 = vcmp.eq.s32.totalorder %v9056_v32, %v19752_v30  ;;  %v19934_v14 = vmax.f32 %v19932_v13, %v19933_v3  ;;  %v19942_v3 = vld [vmem:[#allocation60_spill] sm:$0xff]  ;;  %v20064_v30 = vld [vmem:[#allocation19_spill] sm:$0xff] }
 0x247   : > { %v19938_v41 = vmax.f32 %v19936_v42, %v19937_v36  ;;  %v2123_v59 = vsel %vm1099_vm11, 1.0, %v19212_v31  ;;  %vm19940_vm10 = vcmp.eq.s32.totalorder %v9056_v32, %v19662_v21  ;;  %v19944_v42 = vld [vmem:[#allocation304_spill] sm:$0xff]  ;;  %v19957_v61 = vmax.f32 %v19955_v16, %v19956_v9  ;;  %v19975_v16 = vld [vmem:[#allocation275_spill] sm:$0xff] }
 0x248   : > { %v9493_v47 = vmax.f32 %v19934_v14, %v2113_v1  ;;  %v2124_v12 = vsel %vm19940_vm10, 1.0, %v19212_v31  ;;  %v19943_v14 = vld [vmem:[#allocation269_spill] sm:$0xff]  ;;  %vm19983_vm11 = vcmp.eq.s32.totalorder %v9056_v32, %v19362_v60  ;;  %vm19986_vm4 = vcmp.eq.s32.totalorder %v9056_v32, %v19883_v62 }
 0x249   : > { %v9498_v57 = vmax.f32 %v19938_v41, %v2114_v10  ;;  %v19945_v41 = vmax.f32 %v19943_v14, %v19944_v42  ;;  %v19947_v1 = vld [vmem:[#allocation209_spill] sm:$0xff]  ;;  %v19948_v10 = vld [vmem:[#allocation240_spill] sm:$0xff]  ;;  %v9530_v8 = vmax.f32 %v19957_v61, %v2118_v49  ;;  %v19961_v14 = vmax.f32 %v19959_v46, %v19960_v17  ;;  %v19963_v42 = vld [vmem:[#allocation211_spill] sm:$0xff] }
 0x24a   : > { %19935 = vst [vmem:[#allocation206_spill] sm:$0xff] %v9493_v47  ;;  %v19949_v13 = vmax.f32 %v19947_v1, %v19948_v10  ;;  %v19951_v47 = vld [vmem:[#allocation270_spill] sm:$0xff]  ;;  %v19976_v49 = vld [vmem:[#allocation308_spill] sm:$0xff]  ;;  %vm19989_vm10 = vcmp.eq.s32.totalorder %v9056_v32, %v19886_v35  ;;  %vm1127_vm5 = vcmp.eq.s32.totalorder %v9056_v32, %v19473_v28  ;;  %vm1129_vm6 = vcmp.eq.s32.totalorder %v9056_v32, %v19778_v0 }
 0x24b   : > { %19939 = vst [vmem:[#allocation237_spill] sm:$0xff] %v9498_v57  ;;  %v9515_v36 = vmax.f32 %v19945_v41, %v2115_v6  ;;  %v19953_v21 = vmax.f32 %v19951_v47, %v19952_v63  ;;  %19958 = vst [vmem:[#allocation238_spill] sm:$0xff] %v9530_v8  ;;  %v9535_v6 = vmax.f32 %v19961_v14, %v2119_v53  ;;  %v19964_v41 = vld [vmem:[#allocation242_spill] sm:$0xff]  ;;  %v19979_v53 = vld [vmem:[#allocation213_spill] sm:$0xff] }
 0x24c   : > { %v9520_v57 = vmax.f32 %v19949_v13, %v2116_v43  ;;  %v19965_v1 = vmax.f32 %v19963_v42, %v19964_v41  ;;  %v19967_v10 = vld [vmem:[#allocation274_spill] sm:$0xff]  ;;  %v19968_v13 = vld [vmem:[#allocation307_spill] sm:$0xff]  ;;  %v19977_v17 = vmax.f32 %v19975_v16, %v19976_v49  ;;  %v19980_v14 = vld [vmem:[#allocation244_spill] sm:$0xff] }
 0x24d   : > { %19946 = vst [vmem:[#allocation267_spill] sm:$0xff] %v9515_v36  ;;  %v9525_v29 = vmax.f32 %v19953_v21, %v2117_v54  ;;  %19962 = vst [vmem:[#allocation268_spill] sm:$0xff] %v9535_v6  ;;  %v19969_v47 = vmax.f32 %v19967_v10, %v19968_v13  ;;  %v19971_v21 = vld [vmem:[#allocation212_spill] sm:$0xff]  ;;  %v19972_v54 = vld [vmem:[#allocation243_spill] sm:$0xff]  ;;  %v19981_v42 = vmax.f32 %v19979_v53, %v19980_v14  ;;  %v2130_v13 = vsel %vm19989_vm10, 1.0, %v19212_v31 }
 0x24e   : > { %19950 = vst [vmem:[#allocation302_spill] sm:$0xff] %v9520_v57  ;;  %v9540_v43 = vmax.f32 %v19965_v1, %v2120_v55  ;;  %v19973_v9 = vmax.f32 %v19971_v21, %v19972_v54  ;;  %v9555_v46 = vmax.f32 %v19977_v17, %v2123_v59  ;;  %v19984_v41 = vld [vmem:[#allocation61_spill] sm:$0xff]  ;;  %v19985_v59 = vld [vmem:[#allocation62_spill] sm:$0xff]  ;;  %v2132_v21 = vsel %vm1108_vm12, 1.0, %v19212_v31  ;;  %v20010_v8 = vld [vmem:[#allocation216_spill] sm:$0xff] }
 0x24f   : > { %19954 = vst [vmem:[#allocation207_spill] sm:$0xff] %v9525_v29  ;;  %v9545_v63 = vmax.f32 %v19969_v47, %v2121_v40  ;;  %v9560_v55 = vmax.f32 %v19981_v42, %v2124_v12  ;;  %v2125_v40 = vsel %vm1101_vm13, 1.0, %v19212_v31  ;;  %v2127_v12 = vsel %vm19986_vm4, 1.0, %v19212_v31  ;;  %v19990_v16 = vld [vmem:[#allocation278_spill] sm:$0xff]  ;;  %v19991_v49 = vld [vmem:[#allocation309_spill] sm:$0xff]  ;;  %v20011_v29 = vld [vmem:[#allocation247_spill] sm:$0xff] }
 0x250   : > { %19966 = vst [vmem:[#allocation303_spill] sm:$0xff] %v9540_v43  ;;  %v9550_v61 = vmax.f32 %v19973_v9, %v2122_v23  ;;  %19978 = vst [vmem:[#allocation269_spill] sm:$0xff] %v9555_v46  ;;  %v2126_v23 = vsel %vm19983_vm11, 1.0, %v19212_v31  ;;  %vm19987_vm13 = vcmp.eq.s32.totalorder %v9056_v32, %v19884_v18  ;;  %vm19988_vm11 = vcmp.eq.s32.totalorder %v9056_v32, %v19885_v25  ;;  %v19994_v14 = vld [vmem:[#allocation214_spill] sm:$0xff]  ;;  %v19995_v42 = vld [vmem:[#allocation245_spill] sm:$0xff] }
 0x251   : > { %19970 = vst [vmem:[#allocation208_spill] sm:$0xff] %v9545_v63  ;;  %19982 = vst [vmem:[#allocation304_spill] sm:$0xff] %v9560_v55  ;;  %v2128_v1 = vsel %vm19987_vm13, 1.0, %v19212_v31  ;;  %v2129_v10 = vsel %vm19988_vm11, 1.0, %v19212_v31  ;;  %vm1128_vm4 = vcmp.eq.s32.totalorder %v9056_v32, %v19474_v44  ;;  %vm1130_vm13 = vcmp.eq.s32.totalorder %v9056_v32, %v19779_v7  ;;  %v20142_v0 = vld [vmem:[#allocation28_spill] sm:$0xff] }
 0x252   : > { %19974 = vst [vmem:[#allocation239_spill] sm:$0xff] %v9550_v61  ;;  %v2131_v47 = vsel %vm1107_vm2, 1.0, %v19212_v31  ;;  %v2133_v54 = vsel %vm1109_vm7, 1.0, %v19212_v31  ;;  %v2134_v9 = vsel %vm1110_vm15, 1.0, %v19212_v31  ;;  %vm1131_vm10 = vcmp.eq.s32.totalorder %v9056_v32, %v19786_v50 }
 0x253   : > { %vm1132_vm2 = vcmp.eq.s32.totalorder %v9056_v32, %v19787_v24  ;;  %vm1133_vm11 = vcmp.eq.s32.totalorder %v9056_v32, %v19792_v52  ;;  %vm1134_vm12 = vcmp.eq.s32.totalorder %v9056_v32, %v19793_v51  ;;  %v19992_v17 = vmax.f32 %v19990_v16, %v19991_v49  ;;  %v19999_v16 = vld [vmem:[#allocation310_spill] sm:$0xff]  ;;  %v20002_v49 = vld [vmem:[#allocation215_spill] sm:$0xff] }
 0x254   : > { %v19996_v55 = vmax.f32 %v19994_v14, %v19995_v42  ;;  %v2135_v61 = vsel %vm1111_vm3, 1.0, %v19212_v31  ;;  %v2136_v63 = vsel %vm1112_vm1, 1.0, %v19212_v31  ;;  %v20012_v57 = vmax.f32 %v20010_v8, %v20011_v29  ;;  %v20138_v52 = vld [vmem:[#allocation227_spill] sm:$0xff] }
 0x255   : > { %v9625_v53 = vmax.f32 %v19992_v17, %v2125_v40  ;;  %v19998_v40 = vld [vmem:[#allocation279_spill] sm:$0xff]  ;;  %v20003_v17 = vld [vmem:[#allocation246_spill] sm:$0xff]  ;;  %vm20038_vm3 = vcmp.eq.s32.totalorder %v9056_v32, %v19405_v37  ;;  %vm20039_vm1 = vcmp.eq.s32.totalorder %v9056_v32, %v19922_v15 }
 0x256   : > { %v9630_v46 = vmax.f32 %v19996_v55, %v2126_v23  ;;  %v20000_v55 = vmax.f32 %v19998_v40, %v19999_v16  ;;  %v20004_v14 = vmax.f32 %v20002_v49, %v20003_v17  ;;  %v9662_v36 = vmax.f32 %v20012_v57, %v2130_v13  ;;  %v20018_v16 = vld [vmem:[#allocation217_spill] sm:$0xff]  ;;  %v20022_v17 = vld [vmem:[#allocation282_spill] sm:$0xff]  ;;  %v20030_v57 = vld [vmem:[#allocation283_spill] sm:$0xff] }
 0x257   : > { %19993 = vst [vmem:[#allocation209_spill] sm:$0xff] %v9625_v53  ;;  %v20007_v53 = vld [vmem:[#allocation311_spill] sm:$0xff]  ;;  %v20016_v40 = vmax.f32 %v20014_v39, %v20015_v20  ;;  %v20031_v13 = vld [vmem:[#allocation314_spill] sm:$0xff] }
 0x258   : > { %19997 = vst [vmem:[#allocation240_spill] sm:$0xff] %v9630_v46  ;;  %v9647_v23 = vmax.f32 %v20000_v55, %v2127_v12  ;;  %v9652_v42 = vmax.f32 %v20004_v14, %v2128_v1  ;;  %v20006_v46 = vld [vmem:[#allocation280_spill] sm:$0xff]  ;;  %20013 = vst [vmem:[#allocation241_spill] sm:$0xff] %v9662_v36  ;;  %v20023_v14 = vld [vmem:[#allocation313_spill] sm:$0xff]  ;;  %v20032_v20 = vmax.f32 %v20030_v57, %v20031_v13  ;;  %v2143_v57 = vsel %vm1119_vm9, 1.0, %v19212_v31 }
 0x259   : > { %v20008_v43 = vmax.f32 %v20006_v46, %v20007_v53  ;;  %v9667_v12 = vmax.f32 %v20016_v40, %v2131_v47  ;;  %v20019_v55 = vld [vmem:[#allocation248_spill] sm:$0xff]  ;;  %v20024_v46 = vmax.f32 %v20022_v17, %v20023_v14  ;;  %v20027_v53 = vld [vmem:[#allocation249_spill] sm:$0xff]  ;;  %v20034_v47 = vld [vmem:[#allocation219_spill] sm:$0xff]  ;;  %v2144_v13 = vsel %vm1120_vm8, 1.0, %v19212_v31 }
 0x25a   : > { %20001 = vst [vmem:[#allocation270_spill] sm:$0xff] %v9647_v23  ;;  %20005 = vst [vmem:[#allocation305_spill] sm:$0xff] %v9652_v42  ;;  %v20020_v49 = vmax.f32 %v20018_v16, %v20019_v55  ;;  %v9687_v39 = vmax.f32 %v20032_v20, %v2135_v61  ;;  %v20035_v40 = vld [vmem:[#allocation250_spill] sm:$0xff]  ;;  %v20040_v55 = vld [vmem:[#allocation73_spill] sm:$0xff] }
 0x25b   : > { %v9657_v6 = vmax.f32 %v20008_v43, %v2129_v10  ;;  %20017 = vst [vmem:[#allocation271_spill] sm:$0xff] %v9667_v12  ;;  %v9677_v43 = vmax.f32 %v20024_v46, %v2133_v54  ;;  %v20026_v10 = vld [vmem:[#allocation218_spill] sm:$0xff]  ;;  %v20036_v16 = vmax.f32 %v20034_v47, %v20035_v40  ;;  %v2137_v54 = vsel %vm20038_vm3, 1.0, %v19212_v31  ;;  %v20044_v46 = vld [vmem:[#allocation75_spill] sm:$0xff]  ;;  %v20050_v40 = vld [vmem:[#allocation16_spill] sm:$0xff] }
 0x25c   : > { %v9672_v1 = vmax.f32 %v20020_v49, %v2132_v21  ;;  %v20028_v29 = vmax.f32 %v20026_v10, %v20027_v53  ;;  %20033 = vst [vmem:[#allocation274_spill] sm:$0xff] %v9687_v39  ;;  %v20041_v61 = vld [vmem:[#allocation74_spill] sm:$0xff]  ;;  %v2140_v49 = vsel %vm1116_vm14, 1.0, %v19212_v31  ;;  %vm20042_vm3 = vcmp.eq.s32.totalorder %v9056_v32, %v19926_v56  ;;  %v20045_v10 = vld [vmem:[#allocation76_spill] sm:$0xff]  ;;  %v20079_v56 = vld [vmem:[#allocation253_spill] sm:$0xff] }
 0x25d   : > { %20009 = vst [vmem:[#allocation210_spill] sm:$0xff] %v9657_v6  ;;  %20025 = vst [vmem:[#allocation211_spill] sm:$0xff] %v9677_v43  ;;  %v9692_v21 = vmax.f32 %v20036_v16, %v2136_v63  ;;  %v2139_v63 = vsel %vm1115_vm0, 1.0, %v19212_v31  ;;  %v2141_v17 = vsel %vm20042_vm3, 1.0, %v19212_v31  ;;  %vm1139_vm15 = vcmp.eq.s32.totalorder %v9056_v32, %v20044_v46  ;;  %v20046_v53 = vld [vmem:[#allocation14_spill] sm:$0xff]  ;;  %v20051_v16 = vld [vmem:[#allocation77_spill] sm:$0xff] }
 0x25e   : > { %20021 = vst [vmem:[#allocation306_spill] sm:$0xff] %v9672_v1  ;;  %v9682_v8 = vmax.f32 %v20028_v29, %v2134_v9  ;;  %v2138_v9 = vsel %vm20039_vm1, 1.0, %v19212_v31  ;;  %vm20043_vm1 = vcmp.eq.s32.totalorder %v9056_v32, %v19927_v38  ;;  %vm1140_vm0 = vcmp.eq.s32.totalorder %v9056_v32, %v20045_v10  ;;  %v20047_v29 = vld [vmem:[#allocation15_spill] sm:$0xff]  ;;  %v20053_v39 = vld [vmem:[#allocation18_spill] sm:$0xff]  ;;  %v20058_v36 = vld [vmem:[#allocation220_spill] sm:$0xff] }
 0x25f   : > { %20037 = vst [vmem:[#allocation307_spill] sm:$0xff] %v9692_v21  ;;  %v2142_v14 = vsel %vm20043_vm1, 1.0, %v19212_v31  ;;  %vm20048_vm3 = vcmp.eq.s32.totalorder %v9056_v32, %v19930_v58  ;;  %vm20049_vm1 = vcmp.eq.s32.totalorder %v9056_v32, %v19931_v11  ;;  %vm1143_vm14 = vcmp.eq.s32.totalorder %v9056_v32, %v20050_v40  ;;  %v20052_v21 = vld [vmem:[#allocation17_spill] sm:$0xff]  ;;  %v20055_v43 = vld [vmem:[#allocation315_spill] sm:$0xff]  ;;  %v20078_v38 = vld [vmem:[#allocation64_spill] sm:$0xff] }
 0x260   : > { %20029 = vst [vmem:[#allocation242_spill] sm:$0xff] %v9682_v8  ;;  %v2145_v20 = vsel %vm20048_vm3, 1.0, %v19212_v31  ;;  %v2146_v47 = vsel %vm20049_vm1, 1.0, %v19212_v31  ;;  %vm1144_vm9 = vcmp.eq.s32.totalorder %v9056_v32, %v20051_v16  ;;  %v20054_v8 = vld [vmem:[#allocation284_spill] sm:$0xff]  ;;  %v20059_v6 = vld [vmem:[#allocation251_spill] sm:$0xff]  ;;  %vm20062_vm3 = vcmp.eq.s32.totalorder %v9056_v32, %v19941_v33  ;;  %v20075_v33 = vld [vmem:[#allocation317_spill] sm:$0xff] }
 0x261   : > { %v20056_v1 = vmax.f32 %v20054_v8, %v20055_v43  ;;  %v20060_v42 = vmax.f32 %v20058_v36, %v20059_v6  ;;  %v2147_v11 = vsel %vm20062_vm3, 1.0, %v19212_v31  ;;  %vm20063_vm1 = vcmp.eq.s32.totalorder %v9056_v32, %v19942_v3  ;;  %v20066_v43 = vld [vmem:[#allocation285_spill] sm:$0xff]  ;;  %v20067_v36 = vld [vmem:[#allocation316_spill] sm:$0xff]  ;;  %v20082_v15 = vld [vmem:[#allocation286_spill] sm:$0xff] }
 0x262   : > { %v2148_v58 = vsel %vm20063_vm1, 1.0, %v19212_v31  ;;  %v20068_v6 = vmax.f32 %v20066_v43, %v20067_v36  ;;  %v20070_v8 = vld [vmem:[#allocation221_spill] sm:$0xff]  ;;  %v20080_v26 = vmax.f32 %v20078_v38, %v20079_v56  ;;  %v20083_v37 = vld [vmem:[#allocation318_spill] sm:$0xff]  ;;  %v9816_v38 = vpop.permute.xlu0 %675  ;;  %vm20106_vm3 = vcmp.eq.s32.totalorder %v9056_v32, %v19984_v41  ;;  %v20139_v24 = vld [vmem:[#allocation259_spill] sm:$0xff] }
 0x263   : > { %v9757_v12 = vmax.f32 %v20056_v1, %v2137_v54  ;;  %v9762_v23 = vmax.f32 %v20060_v42, %v2138_v9  ;;  %v20065_v1 = vld [vmem:[#allocation78_spill] sm:$0xff]  ;;  %v20071_v54 = vld [vmem:[#allocation252_spill] sm:$0xff]  ;;  %v20084_v43 = vmax.f32 %v20082_v15, %v20083_v37  ;;  %vm20107_vm1 = vcmp.eq.s32.totalorder %v9056_v32, %v19985_v59 }
 0x264   : > { %v9779_v42 = vmax.f32 %v20068_v6, %v2139_v63  ;;  %v20072_v9 = vmax.f32 %v20070_v8, %v20071_v54  ;;  %v9794_v4 = vmax.f32 %v20080_v26, %v2142_v14  ;;  %v20086_v36 = vld [vmem:[#allocation222_spill] sm:$0xff]  ;;  %v20090_v54 = vld [vmem:[#allocation287_spill] sm:$0xff]  ;;  %v20098_v37 = vld [vmem:[#allocation288_spill] sm:$0xff]  ;;  %v20140_v50 = vmax.f32 %v20138_v52, %v20139_v24 }
 0x265   : > { %20057 = vst [vmem:[#allocation212_spill] sm:$0xff] %v9757_v12  ;;  %20061 = vst [vmem:[#allocation243_spill] sm:$0xff] %v9762_v23  ;;  %v20074_v12 = vld [vmem:[#allocation63_spill] sm:$0xff]  ;;  %v9799_v63 = vmax.f32 %v20084_v43, %v2143_v57  ;;  %v20087_v6 = vld [vmem:[#allocation254_spill] sm:$0xff] }
 0x266   : > { %20069 = vst [vmem:[#allocation275_spill] sm:$0xff] %v9779_v42  ;;  %v9784_v23 = vmax.f32 %v20072_v9, %v2140_v49  ;;  %v20076_v3 = vmax.f32 %v20074_v12, %v20075_v33  ;;  %20081 = vst [vmem:[#allocation244_spill] sm:$0xff] %v9794_v4  ;;  %v20088_v8 = vmax.f32 %v20086_v36, %v20087_v6  ;;  %v20091_v9 = vld [vmem:[#allocation319_spill] sm:$0xff]  ;;  %v20099_v15 = vld [vmem:[#allocation320_spill] sm:$0xff] }
 0x267   : > { %20085 = vst [vmem:[#allocation278_spill] sm:$0xff] %v9799_v63  ;;  %v20092_v33 = vmax.f32 %v20090_v54, %v20091_v9  ;;  %v20094_v12 = vld [vmem:[#allocation223_spill] sm:$0xff]  ;;  %v20100_v14 = vmax.f32 %v20098_v37, %v20099_v15  ;;  %v20102_v43 = vld [vmem:[#allocation224_spill] sm:$0xff]  ;;  %v2152_v54 = vsel %vm1128_vm4, 1.0, %v19212_v31  ;;  %v2153_v9 = vsel %vm1129_vm6, 1.0, %v19212_v31  ;;  %v20124_v42 = vld [vmem:[#allocation26_spill] sm:$0xff] }
 0x268   : > { %20073 = vst [vmem:[#allocation308_spill] sm:$0xff] %v9784_v23  ;;  %v9789_v19 = vmax.f32 %v20076_v3, %v2141_v17  ;;  %v9804_v49 = vmax.f32 %v20088_v8, %v2144_v13  ;;  %v20095_v17 = vld [vmem:[#allocation255_spill] sm:$0xff]  ;;  %v20103_v13 = vld [vmem:[#allocation256_spill] sm:$0xff]  ;;  %v2156_v37 = vsel %vm1132_vm2, 1.0, %v19212_v31  ;;  %v2157_v15 = vsel %vm1133_vm11, 1.0, %v19212_v31  ;;  %v20153_v52 = vld [vmem:[#allocation325_spill] sm:$0xff] }
 0x269   : > { %v9809_v3 = vmax.f32 %v20092_v33, %v2145_v20  ;;  %v20096_v56 = vmax.f32 %v20094_v12, %v20095_v17  ;;  %v9821_v57 = vmax.f32 %v20100_v14, %v2147_v11  ;;  %v20104_v36 = vmax.f32 %v20102_v43, %v20103_v13  ;;  %v20108_v8 = vld [vmem:[#allocation20_spill] sm:$0xff]  ;;  %v20109_v11 = vld [vmem:[#allocation21_spill] sm:$0xff]  ;;  %v20110_v12 = vld [vmem:[#allocation22_spill] sm:$0xff] }
 0x26a   : > { %20077 = vst [vmem:[#allocation213_spill] sm:$0xff] %v9789_v19  ;;  %20089 = vst [vmem:[#allocation309_spill] sm:$0xff] %v9804_v49  ;;  %v2149_v20 = vsel %vm20106_vm3, 1.0, %v19212_v31  ;;  %vm1149_vm7 = vcmp.eq.s32.totalorder %v9816_v38, %v20108_v8  ;;  %vm1150_vm8 = vcmp.eq.s32.totalorder %v9816_v38, %v20109_v11  ;;  %v2154_v33 = vsel %vm1130_vm13, 1.0, %v19212_v31  ;;  %v20111_v17 = vld [vmem:[#allocation23_spill] sm:$0xff]  ;;  %v20112_v43 = vld [vmem:[#allocation24_spill] sm:$0xff] }
 0x26b   : > { %20093 = vst [vmem:[#allocation214_spill] sm:$0xff] %v9809_v3  ;;  %v9814_v26 = vmax.f32 %v20096_v56, %v2146_v47  ;;  %20101 = vst [vmem:[#allocation279_spill] sm:$0xff] %v9821_v57  ;;  %v9826_v6 = vmax.f32 %v20104_v36, %v2148_v58  ;;  %v2150_v47 = vsel %vm20107_vm1, 1.0, %v19212_v31  ;;  %v2151_v58 = vsel %vm1127_vm5, 1.0, %v19212_v31  ;;  %v20113_v13 = vld [vmem:[#allocation25_spill] sm:$0xff] }
 0x26c   : > { %vm1151_vm3 = vcmp.eq.s32.totalorder %v9816_v38, %v20110_v12  ;;  %vm1152_vm5 = vcmp.eq.s32.totalorder %v9816_v38, %v20111_v17  ;;  %v2155_v56 = vsel %vm1131_vm10, 1.0, %v19212_v31  ;;  %v2158_v14 = vsel %vm1134_vm12, 1.0, %v19212_v31  ;;  %v20114_v36 = vld [vmem:[#allocation289_spill] sm:$0xff] }
 0x26d   : > { %20097 = vst [vmem:[#allocation245_spill] sm:$0xff] %v9814_v26  ;;  %20105 = vst [vmem:[#allocation310_spill] sm:$0xff] %v9826_v6  ;;  %vm1153_vm6 = vcmp.eq.s32.totalorder %v9816_v38, %v20112_v43  ;;  %vm1154_vm4 = vcmp.eq.s32.totalorder %v9816_v38, %v20113_v13  ;;  %v20115_v6 = vld [vmem:[#allocation321_spill] sm:$0xff]  ;;  %vm20122_vm13 = vcmp.eq.s32.totalorder %v9056_v32, %v19799_v48  ;;  %v20135_v48 = vld [vmem:[#allocation323_spill] sm:$0xff] }
 0x26e   : > { %v20116_v57 = vmax.f32 %v20114_v36, %v20115_v6  ;;  %v20118_v3 = vld [vmem:[#allocation225_spill] sm:$0xff]  ;;  %v2159_v19 = vsel %vm20122_vm13, 1.0, %v19212_v31  ;;  %vm20123_vm10 = vcmp.eq.s32.totalorder %v9056_v32, %v19800_v45  ;;  %vm1155_vm2 = vcmp.eq.s32.totalorder %v9816_v38, %v20124_v42  ;;  %v20126_v6 = vld [vmem:[#allocation290_spill] sm:$0xff] }
 0x26f   : > { %v20119_v49 = vld [vmem:[#allocation257_spill] sm:$0xff]  ;;  %v2160_v23 = vsel %vm20123_vm10, 1.0, %v19212_v31  ;;  %v9920_v7 = vmax.f32 %v20140_v50, %v2154_v33  ;;  %vm20170_vm1 = vcmp.eq.s32.totalorder %v9056_v32, %v20040_v55  ;;  %vm20171_vm13 = vcmp.eq.s32.totalorder %v9056_v32, %v20041_v61 }
 0x270   : > { %v9883_v26 = vmax.f32 %v20116_v57, %v2149_v20  ;;  %v20120_v63 = vmax.f32 %v20118_v3, %v20119_v49  ;;  %v20125_v57 = vld [vmem:[#allocation27_spill] sm:$0xff]  ;;  %v20127_v49 = vld [vmem:[#allocation322_spill] sm:$0xff]  ;;  %v20156_v33 = vld [vmem:[#allocation229_spill] sm:$0xff] }
 0x271   : > { %vm1156_vm11 = vcmp.eq.s32.totalorder %v9816_v38, %v20125_v57  ;;  %v20130_v20 = vld [vmem:[#allocation226_spill] sm:$0xff]  ;;  %20141 = vst [vmem:[#allocation247_spill] sm:$0xff] %v9920_v7 }
 0x272   : > { %20117 = vst [vmem:[#allocation215_spill] sm:$0xff] %v9883_v26  ;;  %v9888_v4 = vmax.f32 %v20120_v63, %v2150_v47  ;;  %v20128_v63 = vmax.f32 %v20126_v6, %v20127_v49  ;;  %v20131_v47 = vld [vmem:[#allocation258_spill] sm:$0xff]  ;;  %v20134_v26 = vld [vmem:[#allocation291_spill] sm:$0xff]  ;;  %v20144_v6 = vld [vmem:[#allocation292_spill] sm:$0xff] }
 0x273   : > { %v20132_v36 = vmax.f32 %v20130_v20, %v20131_v47  ;;  %v20136_v45 = vmax.f32 %v20134_v26, %v20135_v48  ;;  %v20145_v49 = vld [vmem:[#allocation324_spill] sm:$0xff]  ;;  %v20157_v47 = vld [vmem:[#allocation261_spill] sm:$0xff] }
 0x274   : > { %20121 = vst [vmem:[#allocation246_spill] sm:$0xff] %v9888_v4  ;;  %v9905_v3 = vmax.f32 %v20128_v63, %v2151_v58  ;;  %v20143_v58 = vld [vmem:[#allocation29_spill] sm:$0xff]  ;;  %v20148_v20 = vld [vmem:[#allocation228_spill] sm:$0xff] }
 0x275   : > { %v9910_v4 = vmax.f32 %v20132_v36, %v2152_v54  ;;  %v9915_v51 = vmax.f32 %v20136_v45, %v2153_v9  ;;  %v20146_v54 = vmax.f32 %v20144_v6, %v20145_v49  ;;  %v20149_v48 = vld [vmem:[#allocation260_spill] sm:$0xff]  ;;  %v20152_v9 = vld [vmem:[#allocation293_spill] sm:$0xff]  ;;  %v20158_v36 = vmax.f32 %v20156_v33, %v20157_v47  ;;  %v20162_v6 = vld [vmem:[#allocation294_spill] sm:$0xff] }
 0x276   : > { %20129 = vst [vmem:[#allocation280_spill] sm:$0xff] %v9905_v3  ;;  %v20150_v45 = vmax.f32 %v20148_v20, %v20149_v48  ;;  %v20154_v50 = vmax.f32 %v20152_v9, %v20153_v52  ;;  %v20163_v49 = vld [vmem:[#allocation326_spill] sm:$0xff]  ;;  %v2162_v9 = vsel %vm20171_vm13, 1.0, %v19212_v31  ;;  %v20172_v52 = vld [vmem:[#allocation32_spill] sm:$0xff]  ;;  %vm20175_vm13 = vcmp.eq.s32.totalorder %v9056_v32, %v20047_v29 }
 0x277   : > { %20133 = vst [vmem:[#allocation311_spill] sm:$0xff] %v9910_v4  ;;  %20137 = vst [vmem:[#allocation216_spill] sm:$0xff] %v9915_v51  ;;  %v9929_v63 = vmax.f32 %v20146_v54, %v2155_v56  ;;  %v9944_v7 = vmax.f32 %v20158_v36, %v2158_v14  ;;  %v20160_v51 = vld [vmem:[#allocation30_spill] sm:$0xff]  ;;  %v20161_v56 = vld [vmem:[#allocation31_spill] sm:$0xff]  ;;  %v2161_v14 = vsel %vm20170_vm1, 1.0, %v19212_v31  ;;  %vm1161_vm10 = vcmp.eq.s32.totalorder %v9816_v38, %v20172_v52 }
 0x278   : > { %v9934_v26 = vmax.f32 %v20150_v45, %v2156_v37  ;;  %v9939_v24 = vmax.f32 %v20154_v50, %v2157_v15  ;;  %v20164_v37 = vmax.f32 %v20162_v6, %v20163_v49  ;;  %v20166_v20 = vld [vmem:[#allocation230_spill] sm:$0xff]  ;;  %v2164_v50 = vsel %vm1140_vm0, 1.0, %v19212_v31  ;;  %v20177_v6 = vld [vmem:[#allocation35_spill] sm:$0xff] }
 0x279   : > { %20147 = vst [vmem:[#allocation281_spill] sm:$0xff] %v9929_v63  ;;  %20159 = vst [vmem:[#allocation248_spill] sm:$0xff] %v9944_v7  ;;  %v20167_v48 = vld [vmem:[#allocation262_spill] sm:$0xff]  ;;  %vm20174_vm1 = vcmp.eq.s32.totalorder %v9056_v32, %v20046_v53  ;;  %v2166_v47 = vsel %vm20175_vm13, 1.0, %v19212_v31  ;;  %v2167_v49 = vsel %vm1143_vm14, 1.0, %v19212_v31  ;;  %vm20178_vm0 = vcmp.eq.s32.totalorder %v9056_v32, %v20052_v21  ;;  %v20203_v21 = vld [vmem:[#allocation265_spill] sm:$0xff] }
 0x27a   : > { %20151 = vst [vmem:[#allocation312_spill] sm:$0xff] %v9934_v26  ;;  %20155 = vst [vmem:[#allocation217_spill] sm:$0xff] %v9939_v24  ;;  %v9953_v54 = vmax.f32 %v20164_v37, %v2159_v19  ;;  %v20168_v15 = vmax.f32 %v20166_v20, %v20167_v48  ;;  %v20173_v19 = vld [vmem:[#allocation33_spill] sm:$0xff]  ;;  %v2165_v33 = vsel %vm20174_vm1, 1.0, %v19212_v31  ;;  %v20176_v36 = vld [vmem:[#allocation34_spill] sm:$0xff]  ;;  %v2168_v37 = vsel %vm1144_vm9, 1.0, %v19212_v31 }
 0x27b   : > { %vm1163_vm12 = vcmp.eq.s32.totalorder %v9816_v38, %v20176_v36  ;;  %v2169_v20 = vsel %vm20178_vm0, 1.0, %v19212_v31  ;;  %vm20179_vm1 = vcmp.eq.s32.totalorder %v9056_v32, %v20053_v39  ;;  %vm1165_vm13 = vcmp.eq.s32.totalorder %v9816_v38, %v19361_v2  ;;  %v20184_v24 = vld [vmem:[#allocation231_spill] sm:$0xff] }
 0x27c   : > { %20165 = vst [vmem:[#allocation282_spill] sm:$0xff] %v9953_v54  ;;  %v9958_v45 = vmax.f32 %v20168_v15, %v2160_v23  ;;  %v2163_v23 = vsel %vm1139_vm15, 1.0, %v19212_v31  ;;  %vm1164_vm15 = vcmp.eq.s32.totalorder %v9816_v38, %v20177_v6  ;;  %v2170_v48 = vsel %vm20179_vm1, 1.0, %v19212_v31  ;;  %v20180_v15 = vld [vmem:[#allocation295_spill] sm:$0xff] }
 0x27d   : > { %v20185_v26 = vld [vmem:[#allocation263_spill] sm:$0xff]  ;;  %vm20188_vm9 = vcmp.eq.s32.totalorder %v9056_v32, %v20064_v30  ;;  %vm20189_vm0 = vcmp.eq.s32.totalorder %v9056_v32, %v20065_v1  ;;  %vm1167_vm1 = vcmp.eq.s32.totalorder %v9816_v38, %v19883_v62  ;;  %vm1168_vm14 = vcmp.eq.s32.totalorder %v9816_v38, %v19884_v18  ;;  %v20202_v30 = vld [vmem:[#allocation233_spill] sm:$0xff]  ;;  %v20295_v62 = vld [vmem:[#allocation66_spill] sm:$0xff] }
 0x27e   : > { %20169 = vst [vmem:[#allocation313_spill] sm:$0xff] %v9958_v45  ;;  %v20181_v45 = vld [vmem:[#allocation327_spill] sm:$0xff]  ;;  %v20186_v63 = vmax.f32 %v20184_v24, %v20185_v26  ;;  %v2171_v3 = vsel %vm20188_vm9, 1.0, %v19212_v31  ;;  %v2172_v39 = vsel %vm20189_vm0, 1.0, %v19212_v31  ;;  %v20191_v26 = vld [vmem:[#allocation36_spill] sm:$0xff]  ;;  %v20204_v16 = vmax.f32 %v20202_v30, %v20203_v21  ;;  %v20215_v30 = vld [vmem:[#allocation329_spill] sm:$0xff] }
 0x27f   : > { %v20182_v54 = vmax.f32 %v20180_v15, %v20181_v45  ;;  %v20194_v45 = vld [vmem:[#allocation232_spill] sm:$0xff]  ;;  %vm1173_vm9 = vcmp.eq.s32.totalorder %v9816_v38, %v19893_v22  ;;  %vm1174_vm0 = vcmp.eq.s32.totalorder %v9816_v38, %v19894_v5  ;;  %v20294_v18 = vld [vmem:[#allocation65_spill] sm:$0xff]  ;;  %v20314_v5 = vld [vmem:[#allocation71_spill] sm:$0xff] }
 0x280   : > { %v10020_v4 = vmax.f32 %v20186_v63, %v2162_v9  ;;  %v10052_v40 = vmax.f32 %v20204_v16, %v2166_v47  ;;  %v20218_v47 = vld [vmem:[#allocation235_spill] sm:$0xff]  ;;  %v20315_v22 = vld [vmem:[#allocation72_spill] sm:$0xff] }
 0x281   : > { %v10015_v7 = vmax.f32 %v20182_v54, %v2161_v14  ;;  %v20190_v54 = vld [vmem:[#allocation296_spill] sm:$0xff] }
 0x282   : > { %20187 = vst [vmem:[#allocation249_spill] sm:$0xff] %v10020_v4  ;;  %v20192_v63 = vmax.f32 %v20190_v54, %v20191_v26  ;;  %v20195_v14 = vld [vmem:[#allocation264_spill] sm:$0xff]  ;;  %v20198_v4 = vld [vmem:[#allocation297_spill] sm:$0xff]  ;;  %20205 = vst [vmem:[#allocation250_spill] sm:$0xff] %v10052_v40 }
 0x283   : > { %20183 = vst [vmem:[#allocation218_spill] sm:$0xff] %v10015_v7  ;;  %v20196_v9 = vmax.f32 %v20194_v45, %v20195_v14  ;;  %v20199_v7 = vld [vmem:[#allocation37_spill] sm:$0xff]  ;;  %v20207_v54 = vld [vmem:[#allocation328_spill] sm:$0xff]  ;;  %v20214_v45 = vld [vmem:[#allocation299_spill] sm:$0xff] }
 0x284   : > { %v10037_v24 = vmax.f32 %v20192_v63, %v2163_v23  ;;  %v20200_v32 = vmax.f32 %v20198_v4, %v20199_v7  ;;  %v20206_v23 = vld [vmem:[#allocation298_spill] sm:$0xff]  ;;  %v20211_v7 = vld [vmem:[#allocation272_spill] sm:$0xff]  ;;  %v20216_v21 = vmax.f32 %v20214_v45, %v20215_v30  ;;  %v20219_v14 = vld [vmem:[#allocation273_spill] sm:$0xff] }
 0x285   : > { %v10042_v15 = vmax.f32 %v20196_v9, %v2164_v50  ;;  %v20208_v50 = vmax.f32 %v20206_v23, %v20207_v54  ;;  %v20210_v63 = vld [vmem:[#allocation234_spill] sm:$0xff]  ;;  %v20220_v9 = vmax.f32 %v20218_v47, %v20219_v14  ;;  %v10122_v47 = vsel %vm1152_vm5, 1.0, %v19212_v31  ;;  %v20236_v14 = vld [vmem:[#allocation47_spill] sm:$0xff]  ;;  %v20242_v30 = vld [vmem:[#allocation49_spill] sm:$0xff] }
 0x286   : > { %20193 = vst [vmem:[#allocation283_spill] sm:$0xff] %v10037_v24  ;;  %v10047_v1 = vmax.f32 %v20200_v32, %v2165_v33  ;;  %v20212_v4 = vmax.f32 %v20210_v63, %v20211_v7  ;;  %v10071_v16 = vmax.f32 %v20216_v21, %v2169_v20  ;;  %v20223_v23 = vld [vmem:[#allocation330_spill] sm:$0xff]  ;;  %v20227_v63 = vld [vmem:[#allocation276_spill] sm:$0xff]  ;;  %v10116_v21 = vsel %vm1151_vm3, 1.0, %v19212_v31  ;;  %20235 = vst [vmem:[#allocation317_spill] sm:$0xff] %v10122_v47 }
 0x287   : > { %20197 = vst [vmem:[#allocation314_spill] sm:$0xff] %v10042_v15  ;;  %v10061_v26 = vmax.f32 %v20208_v50, %v2167_v49  ;;  %v10076_v32 = vmax.f32 %v20220_v9, %v2170_v48  ;;  %v20222_v49 = vld [vmem:[#allocation300_spill] sm:$0xff]  ;;  %v10096_v48 = vsel %vm1149_vm7, 1.0, %v19212_v31  ;;  %20234 = vst [vmem:[#allocation63_spill] sm:$0xff] %v10116_v21  ;;  %vm1175_vm7 = vcmp.eq.s32.totalorder %v9816_v38, %v20236_v14  ;;  %v20399_v24 = vld [vmem:[#allocation39_spill] sm:$0xff] }
 0x288   : > { %20201 = vst [vmem:[#allocation219_spill] sm:$0xff] %v10047_v1  ;;  %v10066_v33 = vmax.f32 %v20212_v4, %v2168_v37  ;;  %20217 = vst [vmem:[#allocation220_spill] sm:$0xff] %v10071_v16  ;;  %v20224_v37 = vmax.f32 %v20222_v49, %v20223_v23  ;;  %v20226_v50 = vld [vmem:[#allocation236_spill] sm:$0xff]  ;;  %v10102_v4 = vsel %vm1150_vm8, 1.0, %v19212_v31  ;;  %vm1177_vm3 = vcmp.eq.s32.totalorder %v9816_v38, %v20242_v30  ;;  %v20272_v16 = vld [vmem:[#allocation58_spill] sm:$0xff] }
 0x289   : > { %20209 = vst [vmem:[#allocation284_spill] sm:$0xff] %v10061_v26  ;;  %20221 = vst [vmem:[#allocation251_spill] sm:$0xff] %v10076_v32  ;;  %v20228_v20 = vmax.f32 %v20226_v50, %v20227_v63  ;;  %v20237_v9 = vld [vmem:[#allocation48_spill] sm:$0xff]  ;;  %v10136_v63 = vsel %vm1153_vm6, 1.0, %v19212_v31  ;;  %v10156_v21 = vsel %vm1155_vm2, 1.0, %v19212_v31  ;;  %v10162_v49 = vsel %vm1156_vm11, 1.0, %v19212_v31 }
 0x28a   : > { %20213 = vst [vmem:[#allocation315_spill] sm:$0xff] %v10066_v33  ;;  %v10085_v54 = vmax.f32 %v20224_v37, %v2171_v3  ;;  %20230 = vst [vmem:[#allocation221_spill] sm:$0xff] %v10096_v48  ;;  %vm1176_vm8 = vcmp.eq.s32.totalorder %v9816_v38, %v20237_v9  ;;  %v20243_v3 = vld [vmem:[#allocation50_spill] sm:$0xff]  ;;  %v20249_v45 = vld [vmem:[#allocation52_spill] sm:$0xff]  ;;  %vm20252_vm2 = vcmp.eq.s32.totalorder %v9816_v38, %v20142_v0 }
 0x28b   : > { %v10090_v7 = vmax.f32 %v20228_v20, %v2172_v39  ;;  %20231 = vst [vmem:[#allocation252_spill] sm:$0xff] %v10102_v4  ;;  %20240 = vst [vmem:[#allocation64_spill] sm:$0xff] %v10136_v63  ;;  %v10142_v20 = vsel %vm1154_vm4, 1.0, %v19212_v31  ;;  %vm1178_vm5 = vcmp.eq.s32.totalorder %v9816_v38, %v20243_v3  ;;  %v20248_v4 = vld [vmem:[#allocation51_spill] sm:$0xff]  ;;  %v10176_v63 = vsel %vm20252_vm2, 1.0, %v19212_v31  ;;  %v20256_v48 = vld [vmem:[#allocation53_spill] sm:$0xff]  ;;  %v10404_v3 = vpop.permute.xlu1 %678 }
 0x28c   : > { %20225 = vst [vmem:[#allocation285_spill] sm:$0xff] %v10085_v54  ;;  %20241 = vst [vmem:[#allocation253_spill] sm:$0xff] %v10142_v20  ;;  %vm20254_vm11 = vcmp.eq.s32.totalorder %v9816_v38, %v20143_v58  ;;  %v20257_v39 = vld [vmem:[#allocation54_spill] sm:$0xff]  ;;  %vm20260_vm2 = vcmp.eq.s32.totalorder %v9816_v38, %v20160_v51  ;;  %v20265_v54 = vld [vmem:[#allocation56_spill] sm:$0xff]  ;;  %vm1186_vm4 = vcmp.eq.s32.totalorder %v9816_v38, %v20272_v16  ;;  %v10242_v20 = vsel %vm1164_vm15, 1.0, %v19212_v31 }
 0x28d   : > { %20229 = vst [vmem:[#allocation316_spill] sm:$0xff] %v10090_v7  ;;  %20246 = vst [vmem:[#allocation286_spill] sm:$0xff] %v10156_v21  ;;  %v10182_v50 = vsel %vm20254_vm11, 1.0, %v19212_v31  ;;  %v10196_v21 = vsel %vm20260_vm2, 1.0, %v19212_v31  ;;  %vm20262_vm11 = vcmp.eq.s32.totalorder %v9816_v38, %v20161_v56  ;;  %v20264_v7 = vld [vmem:[#allocation55_spill] sm:$0xff]  ;;  %vm20269_vm2 = vcmp.eq.s32.totalorder %v9816_v38, %v20173_v19  ;;  %v20271_v32 = vld [vmem:[#allocation57_spill] sm:$0xff] }
 0x28e   : > { %20247 = vst [vmem:[#allocation318_spill] sm:$0xff] %v10162_v49  ;;  %20253 = vst [vmem:[#allocation222_spill] sm:$0xff] %v10176_v63  ;;  %v10202_v37 = vsel %vm20262_vm11, 1.0, %v19212_v31  ;;  %vm1183_vm6 = vcmp.eq.s32.totalorder %v9816_v38, %v20264_v7  ;;  %v10216_v63 = vsel %vm1161_vm10, 1.0, %v19212_v31  ;;  %v10222_v47 = vsel %vm20269_vm2, 1.0, %v19212_v31  ;;  %v20277_v33 = vld [vmem:[#allocation59_spill] sm:$0xff] }
 0x28f   : > { %20255 = vst [vmem:[#allocation254_spill] sm:$0xff] %v10182_v50  ;;  %20261 = vst [vmem:[#allocation287_spill] sm:$0xff] %v10196_v21  ;;  %vm1185_vm11 = vcmp.eq.s32.totalorder %v9816_v38, %v20271_v32  ;;  %v10236_v21 = vsel %vm1163_vm12, 1.0, %v19212_v31  ;;  %vm1187_vm10 = vcmp.eq.s32.totalorder %v9816_v38, %v20277_v33  ;;  %v20278_v26 = vld [vmem:[#allocation60_spill] sm:$0xff]  ;;  %vm20282_vm12 = vcmp.eq.s32.totalorder %v9816_v38, %v19362_v60  ;;  %v20348_v16 = vld [vmem:[#allocation17_spill] sm:$0xff] }
 0x290   : > { %20263 = vst [vmem:[#allocation319_spill] sm:$0xff] %v10202_v37  ;;  %20268 = vst [vmem:[#allocation223_spill] sm:$0xff] %v10216_v63  ;;  %v10256_v63 = vsel %vm1165_vm13, 1.0, %v19212_v31  ;;  %v10262_v49 = vsel %vm20282_vm12, 1.0, %v19212_v31  ;;  %vm1189_vm15 = vcmp.eq.s32.totalorder %v9816_v38, %v19984_v41  ;;  %vm1190_vm2 = vcmp.eq.s32.totalorder %v9816_v38, %v19985_v59  ;;  %v20349_v32 = vld [vmem:[#allocation18_spill] sm:$0xff]  ;;  %v20408_v40 = vld [vmem:[#allocation44_spill] sm:$0xff] }
 0x291   : > { %20270 = vst [vmem:[#allocation255_spill] sm:$0xff] %v10222_v47  ;;  %20275 = vst [vmem:[#allocation288_spill] sm:$0xff] %v10236_v21  ;;  %v10276_v21 = vsel %vm1167_vm1, 1.0, %v19212_v31  ;;  %v10282_v50 = vsel %vm1168_vm14, 1.0, %v19212_v31  ;;  %vm20290_vm1 = vcmp.eq.s32.totalorder %v9816_v38, %v19885_v25  ;;  %vm20292_vm14 = vcmp.eq.s32.totalorder %v9816_v38, %v19886_v35  ;;  %v20302_v35 = vld [vmem:[#allocation67_spill] sm:$0xff]  ;;  %v20303_v25 = vld [vmem:[#allocation68_spill] sm:$0xff] }
 0x292   : > { %20276 = vst [vmem:[#allocation320_spill] sm:$0xff] %v10242_v20  ;;  %20281 = vst [vmem:[#allocation224_spill] sm:$0xff] %v10256_v63  ;;  %v10296_v63 = vsel %vm20290_vm1, 1.0, %v19212_v31  ;;  %v10302_v37 = vsel %vm20292_vm14, 1.0, %v19212_v31  ;;  %vm20298_vm1 = vcmp.eq.s32.totalorder %v9816_v38, %v19891_v27  ;;  %vm20300_vm14 = vcmp.eq.s32.totalorder %v9816_v38, %v19892_v34  ;;  %v20308_v34 = vld [vmem:[#allocation69_spill] sm:$0xff]  ;;  %v20309_v27 = vld [vmem:[#allocation70_spill] sm:$0xff] }
 0x293   : > { %20283 = vst [vmem:[#allocation256_spill] sm:$0xff] %v10262_v49  ;;  %20286 = vst [vmem:[#allocation289_spill] sm:$0xff] %v10276_v21  ;;  %v10316_v21 = vsel %vm20298_vm1, 1.0, %v19212_v31  ;;  %v10322_v47 = vsel %vm20300_vm14, 1.0, %v19212_v31  ;;  %vm1195_vm13 = vcmp.eq.s32.totalorder %v9816_v38, %v20302_v35  ;;  %vm1196_vm12 = vcmp.eq.s32.totalorder %v9816_v38, %v20303_v25  ;;  %v20355_v33 = vld [vmem:[#allocation78_spill] sm:$0xff]  ;;  %v20409_v1 = vld [vmem:[#allocation45_spill] sm:$0xff] }
 0x294   : > { %20287 = vst [vmem:[#allocation321_spill] sm:$0xff] %v10282_v50  ;;  %20291 = vst [vmem:[#allocation225_spill] sm:$0xff] %v10296_v63  ;;  %v10336_v63 = vsel %vm1173_vm9, 1.0, %v19212_v31  ;;  %v10342_v20 = vsel %vm1174_vm0, 1.0, %v19212_v31  ;;  %vm1197_vm1 = vcmp.eq.s32.totalorder %v9816_v38, %v20308_v34  ;;  %vm1198_vm14 = vcmp.eq.s32.totalorder %v9816_v38, %v20309_v27 }
 0x295   : > { %20293 = vst [vmem:[#allocation257_spill] sm:$0xff] %v10302_v37  ;;  %20299 = vst [vmem:[#allocation290_spill] sm:$0xff] %v10316_v21  ;;  %v10356_v21 = vsel %vm1175_vm7, 1.0, %v19212_v31  ;;  %v10362_v49 = vsel %vm1176_vm8, 1.0, %v19212_v31  ;;  %vm1199_vm9 = vcmp.eq.s32.totalorder %v9816_v38, %v20314_v5  ;;  %vm1200_vm0 = vcmp.eq.s32.totalorder %v9816_v38, %v20315_v22 }
 0x296   : > { %20301 = vst [vmem:[#allocation322_spill] sm:$0xff] %v10322_v47  ;;  %20306 = vst [vmem:[#allocation226_spill] sm:$0xff] %v10336_v63  ;;  %v10376_v63 = vsel %vm1177_vm3, 1.0, %v19212_v31  ;;  %v10382_v50 = vsel %vm1178_vm5, 1.0, %v19212_v31  ;;  %vm20322_vm3 = vcmp.eq.s32.totalorder %v9816_v38, %v20248_v4  ;;  %vm20324_vm5 = vcmp.eq.s32.totalorder %v9816_v38, %v20249_v45 }
 0x297   : > { %20307 = vst [vmem:[#allocation258_spill] sm:$0xff] %v10342_v20  ;;  %20312 = vst [vmem:[#allocation291_spill] sm:$0xff] %v10356_v21  ;;  %v10396_v21 = vsel %vm20322_vm3, 1.0, %v19212_v31  ;;  %v10402_v37 = vsel %vm20324_vm5, 1.0, %v19212_v31  ;;  %vm20328_vm3 = vcmp.eq.s32.totalorder %v9816_v38, %v20256_v48  ;;  %vm20330_vm5 = vcmp.eq.s32.totalorder %v9816_v38, %v20257_v39  ;;  %v20337_v39 = vld [vmem:[#allocation16_spill] sm:$0xff]  ;;  %v20338_v48 = vld [vmem:[#allocation77_spill] sm:$0xff] }
 0x298   : > { %20313 = vst [vmem:[#allocation323_spill] sm:$0xff] %v10362_v49  ;;  %20318 = vst [vmem:[#allocation227_spill] sm:$0xff] %v10376_v63  ;;  %v10418_v63 = vsel %vm20328_vm3, 1.0, %v19212_v31  ;;  %v10424_v47 = vsel %vm20330_vm5, 1.0, %v19212_v31  ;;  %vm1205_vm7 = vcmp.eq.s32.totalorder %v9816_v38, %v20046_v53  ;;  %vm20335_vm3 = vcmp.eq.s32.totalorder %v9816_v38, %v20265_v54 }
 0x299   : > { %20319 = vst [vmem:[#allocation259_spill] sm:$0xff] %v10382_v50  ;;  %20323 = vst [vmem:[#allocation292_spill] sm:$0xff] %v10396_v21  ;;  %v10438_v21 = vsel %vm1183_vm6, 1.0, %v19212_v31  ;;  %v10444_v20 = vsel %vm20335_vm3, 1.0, %v19212_v31  ;;  %vm1207_vm5 = vcmp.eq.s32.totalorder %v9816_v38, %v20337_v39  ;;  %v10464_v49 = vsel %vm1186_vm4, 1.0, %v19212_v31  ;;  %v20433_v39 = vld [vmem:[#allocation317_spill] sm:$0xff] }
 0x29a   : > { %20325 = vst [vmem:[#allocation324_spill] sm:$0xff] %v10402_v37  ;;  %20329 = vst [vmem:[#allocation228_spill] sm:$0xff] %v10418_v63  ;;  %v10458_v63 = vsel %vm1185_vm11, 1.0, %v19212_v31  ;;  %vm20346_vm4 = vcmp.eq.s32.totalorder %v9816_v38, %v20278_v26  ;;  %vm1209_vm11 = vcmp.eq.s32.totalorder %v9816_v38, %v20348_v16  ;;  %vm1210_vm3 = vcmp.eq.s32.totalorder %v9816_v38, %v20349_v32  ;;  %v20354_v26 = vld [vmem:[#allocation19_spill] sm:$0xff]  ;;  %v20421_v16 = vld [vmem:[#allocation221_spill] sm:$0xff] }
 0x29b   : > { %20331 = vst [vmem:[#allocation260_spill] sm:$0xff] %v10424_v47  ;;  %20334 = vst [vmem:[#allocation293_spill] sm:$0xff] %v10438_v21  ;;  %v10478_v21 = vsel %vm1187_vm10, 1.0, %v19212_v31  ;;  %v10484_v50 = vsel %vm20346_vm4, 1.0, %v19212_v31  ;;  %vm1215_vm6 = vcmp.eq.s32.totalorder %v10404_v3, %v20110_v12  ;;  %vm1216_vm8 = vcmp.eq.s32.totalorder %v10404_v3, %v20111_v17 }
 0x29c   : > { %20336 = vst [vmem:[#allocation325_spill] sm:$0xff] %v10444_v20  ;;  %20341 = vst [vmem:[#allocation229_spill] sm:$0xff] %v10458_v63  ;;  %v10502_v63 = vsel %vm1189_vm15, 1.0, %v19212_v31  ;;  %v10508_v37 = vsel %vm1190_vm2, 1.0, %v19212_v31  ;;  %vm20358_vm15 = vcmp.eq.s32.totalorder %v9816_v38, %v19473_v28  ;;  %vm20360_vm2 = vcmp.eq.s32.totalorder %v9816_v38, %v19474_v44  ;;  %v20400_v20 = vld [vmem:[#allocation40_spill] sm:$0xff] }
 0x29d   : > { %20342 = vst [vmem:[#allocation261_spill] sm:$0xff] %v10464_v49  ;;  %20345 = vst [vmem:[#allocation294_spill] sm:$0xff] %v10478_v21  ;;  %v10522_v21 = vsel %vm20358_vm15, 1.0, %v19212_v31  ;;  %v10528_v47 = vsel %vm20360_vm2, 1.0, %v19212_v31  ;;  %vm20364_vm4 = vcmp.eq.s32.totalorder %v9816_v38, %v20294_v18  ;;  %vm20366_vm15 = vcmp.eq.s32.totalorder %v9816_v38, %v20295_v62 }
 0x29e   : > { %20347 = vst [vmem:[#allocation326_spill] sm:$0xff] %v10484_v50  ;;  %20352 = vst [vmem:[#allocation230_spill] sm:$0xff] %v10502_v63  ;;  %v10538_v49 = vsel %vm20364_vm4, 1.0, %v19212_v31  ;;  %v10564_v59 = vsel %vm1196_vm12, 1.0, %v19212_v31  ;;  %vm1219_vm4 = vcmp.eq.s32.totalorder %v10404_v3, %v20124_v42  ;;  %v10588_v63 = vsel %vm1198_vm14, 1.0, %v19212_v31  ;;  %v20406_v50 = vld [vmem:[#allocation42_spill] sm:$0xff] }
 0x29f   : > { %20353 = vst [vmem:[#allocation262_spill] sm:$0xff] %v10508_v37  ;;  %20359 = vst [vmem:[#allocation295_spill] sm:$0xff] %v10522_v21  ;;  %v10544_v37 = vsel %vm20366_vm15, 1.0, %v19212_v31  ;;  %v10558_v21 = vsel %vm1195_vm13, 1.0, %v19212_v31  ;;  %vm1220_vm15 = vcmp.eq.s32.totalorder %v10404_v3, %v20125_v57  ;;  %vm1223_vm13 = vcmp.eq.s32.totalorder %v10404_v3, %v20160_v51 }
 0x2a0   : > { %20361 = vst [vmem:[#allocation327_spill] sm:$0xff] %v10528_v47  ;;  %20365 = vst [vmem:[#allocation231_spill] sm:$0xff] %v10538_v49  ;;  %v10582_v49 = vsel %vm1197_vm1, 1.0, %v19212_v31  ;;  %vm1224_vm12 = vcmp.eq.s32.totalorder %v10404_v3, %v20161_v56  ;;  %vm1225_vm2 = vcmp.eq.s32.totalorder %v10404_v3, %v20172_v52  ;;  %vm1226_vm10 = vcmp.eq.s32.totalorder %v10404_v3, %v20173_v19  ;;  %v20455_v56 = vld [vmem:[#allocation59_spill] sm:$0xff] }
 0x2a1   : > { %20367 = vst [vmem:[#allocation263_spill] sm:$0xff] %v10544_v37  ;;  %20370 = vst [vmem:[#allocation296_spill] sm:$0xff] %v10558_v21  ;;  %v10606_v21 = vsel %vm1199_vm9, 1.0, %v19212_v31  ;;  %v10612_v23 = vsel %vm1200_vm0, 1.0, %v19212_v31  ;;  %vm20382_vm9 = vcmp.eq.s32.totalorder %v9816_v38, %v20040_v55  ;;  %vm20384_vm0 = vcmp.eq.s32.totalorder %v9816_v38, %v20041_v61  ;;  %v20407_v37 = vld [vmem:[#allocation43_spill] sm:$0xff]  ;;  %v20432_v55 = vld [vmem:[#allocation301_spill] sm:$0xff] }
 0x2a2   : > { %20371 = vst [vmem:[#allocation36_spill] sm:$0xff] %v10564_v59  ;;  %20374 = vst [vmem:[#allocation232_spill] sm:$0xff] %v10582_v49  ;;  %v10626_v49 = vsel %vm20382_vm9, 1.0, %v19212_v31  ;;  %v10632_v47 = vsel %vm20384_vm0, 1.0, %v19212_v31  ;;  %vm20388_vm14 = vcmp.eq.s32.totalorder %v9816_v38, %v20044_v46  ;;  %vm20390_vm9 = vcmp.eq.s32.totalorder %v9816_v38, %v20045_v10  ;;  %v20428_v46 = vld [vmem:[#allocation266_spill] sm:$0xff] }
 0x2a3   : > { %20375 = vst [vmem:[#allocation264_spill] sm:$0xff] %v10588_v63  ;;  %20378 = vst [vmem:[#allocation297_spill] sm:$0xff] %v10606_v21  ;;  %v10642_v59 = vsel %vm20388_vm14, 1.0, %v19212_v31  ;;  %v10658_v21 = vsel %vm1205_vm7, 1.0, %v19212_v31  ;;  %vm20393_vm14 = vcmp.eq.s32.totalorder %v9816_v38, %v20047_v29  ;;  %vm20396_vm7 = vcmp.eq.s32.totalorder %v9816_v38, %v20338_v48  ;;  %v20401_v63 = vld [vmem:[#allocation41_spill] sm:$0xff]  ;;  %v20425_v29 = vld [vmem:[#allocation252_spill] sm:$0xff] }
 0x2a4   : > { %20379 = vst [vmem:[#allocation37_spill] sm:$0xff] %v10612_v23  ;;  %20383 = vst [vmem:[#allocation233_spill] sm:$0xff] %v10626_v49  ;;  %v10648_v23 = vsel %vm20390_vm9, 1.0, %v19212_v31  ;;  %v10684_v15 = vsel %vm20396_vm7, 1.0, %v19212_v31  ;;  %vm20405_vm7 = vcmp.eq.s32.totalorder %v10404_v3, %v20109_v11  ;;  %vm1235_vm0 = vcmp.eq.s32.totalorder %v10404_v3, %v20406_v50  ;;  %v20420_v11 = vld [vmem:[#allocation331_spill] sm:$0xff] }
 0x2a5   : > { %20385 = vst [vmem:[#allocation265_spill] sm:$0xff] %v10632_v47  ;;  %20389 = vst [vmem:[#allocation298_spill] sm:$0xff] %v10642_v59  ;;  %v10664_v47 = vsel %vm20393_vm14, 1.0, %v19212_v31  ;;  %v20398_v59 = vld [vmem:[#allocation38_spill] sm:$0xff]  ;;  %v2238_v49 = vsel %vm20405_vm7, 1.0, %v19212_v31  ;;  %vm1236_vm1 = vcmp.eq.s32.totalorder %v10404_v3, %v20407_v37  ;;  %vm1237_vm9 = vcmp.eq.s32.totalorder %v10404_v3, %v20408_v40 }
 0x2a6   : > { %20391 = vst [vmem:[#allocation328_spill] sm:$0xff] %v10648_v23  ;;  %20392 = vst [vmem:[#allocation234_spill] sm:$0xff] %v10658_v21  ;;  %v10678_v23 = vsel %vm1207_vm5, 1.0, %v19212_v31  ;;  %vm20404_vm5 = vcmp.eq.s32.totalorder %v10404_v3, %v20108_v8  ;;  %vm1238_vm14 = vcmp.eq.s32.totalorder %v10404_v3, %v20409_v1  ;;  %v10724_v21 = vsel %vm1210_vm3, 1.0, %v19212_v31 }
 0x2a7   : > { %20394 = vst [vmem:[#allocation272_spill] sm:$0xff] %v10664_v47  ;;  %20395 = vst [vmem:[#allocation299_spill] sm:$0xff] %v10678_v23  ;;  %v2237_v41 = vsel %vm20404_vm5, 1.0, %v19212_v31  ;;  %v2239_v23 = vsel %vm1215_vm6, 1.0, %v19212_v31  ;;  %v2240_v47 = vsel %vm1216_vm8, 1.0, %v19212_v31  ;;  %vm1240_vm5 = vcmp.eq.s32.totalorder %v10404_v3, %v20237_v9  ;;  %v20529_v9 = vld [vmem:[#allocation271_spill] sm:$0xff] }
 0x2a8   : > { %20397 = vst [vmem:[#allocation329_spill] sm:$0xff] %v10684_v15  ;;  %v10718_v15 = vsel %vm1209_vm11, 1.0, %v19212_v31  ;;  %20411 = vst [vmem:[#allocation273_spill] sm:$0xff] %v10724_v21  ;;  %vm1239_vm11 = vcmp.eq.s32.totalorder %v10404_v3, %v20236_v14  ;;  %vm20414_vm6 = vcmp.eq.s32.totalorder %v9816_v38, %v20354_v26  ;;  %vm20416_vm8 = vcmp.eq.s32.totalorder %v9816_v38, %v20355_v33  ;;  %v20424_v26 = vld [vmem:[#allocation277_spill] sm:$0xff]  ;;  %v20429_v38 = vld [vmem:[#allocation63_spill] sm:$0xff] }
 0x2a9   : > { %20410 = vst [vmem:[#allocation235_spill] sm:$0xff] %v10718_v15  ;;  %v10746_v12 = vsel %vm20414_vm6, 1.0, %v19212_v31  ;;  %v10752_v17 = vsel %vm20416_vm8, 1.0, %v19212_v31  ;;  %v20422_v21 = vmax.f32 %v20420_v11, %v20421_v16  ;;  %v20426_v53 = vmax.f32 %v20424_v26, %v20425_v29  ;;  %v20441_v26 = vld [vmem:[#allocation53_spill] sm:$0xff]  ;;  %v20446_v15 = vld [vmem:[#allocation64_spill] sm:$0xff]  ;;  %v20530_v14 = vld [vmem:[#allocation290_spill] sm:$0xff] }
 0x2aa   : > { %20415 = vst [vmem:[#allocation300_spill] sm:$0xff] %v10746_v12  ;;  %20417 = vst [vmem:[#allocation330_spill] sm:$0xff] %v10752_v17  ;;  %v20430_v33 = vmax.f32 %v20428_v46, %v20429_v38  ;;  %v20434_v12 = vmax.f32 %v20432_v55, %v20433_v39  ;;  %vm20436_vm3 = vcmp.eq.s32.totalorder %v10404_v3, %v20112_v43  ;;  %v20438_v46 = vld [vmem:[#allocation50_spill] sm:$0xff]  ;;  %v2243_v55 = vsel %vm1219_vm4, 1.0, %v19212_v31  ;;  %v20474_v43 = vld [vmem:[#allocation287_spill] sm:$0xff] }
 0x2ab   : > { %v10761_v32 = vmax.f32 %v20422_v21, %v2237_v41  ;;  %v10766_v10 = vmax.f32 %v20426_v53, %v2238_v49  ;;  %v2241_v41 = vsel %vm20436_vm3, 1.0, %v19212_v31  ;;  %vm20437_vm7 = vcmp.eq.s32.totalorder %v10404_v3, %v20113_v13  ;;  %v20443_v49 = vld [vmem:[#allocation57_spill] sm:$0xff]  ;;  %v20445_v38 = vld [vmem:[#allocation206_spill] sm:$0xff]  ;;  %v20473_v13 = vld [vmem:[#allocation268_spill] sm:$0xff] }
 0x2ac   : > { %v10771_v61 = vmax.f32 %v20430_v33, %v2239_v23  ;;  %v10776_v48 = vmax.f32 %v20434_v12, %v2240_v47  ;;  %v2242_v53 = vsel %vm20437_vm7, 1.0, %v19212_v31  ;;  %v2244_v29 = vsel %vm1220_vm15, 1.0, %v19212_v31  ;;  %v20442_v33 = vld [vmem:[#allocation54_spill] sm:$0xff] }
 0x2ad   : > { %20423 = vst [vmem:[#allocation236_spill] sm:$0xff] %v10761_v32  ;;  %20427 = vst [vmem:[#allocation276_spill] sm:$0xff] %v10766_v10  ;;  %vm20439_vm3 = vcmp.eq.s32.totalorder %v10404_v3, %v20142_v0  ;;  %vm20440_vm7 = vcmp.eq.s32.totalorder %v10404_v3, %v20143_v58  ;;  %vm1243_vm8 = vcmp.eq.s32.totalorder %v10404_v3, %v20248_v4  ;;  %v2247_v16 = vsel %vm1223_vm13, 1.0, %v19212_v31  ;;  %v20444_v23 = vld [vmem:[#allocation58_spill] sm:$0xff]  ;;  %v20449_v10 = vld [vmem:[#allocation237_spill] sm:$0xff] }
 0x2ae   : > { %20431 = vst [vmem:[#allocation331_spill] sm:$0xff] %v10771_v61  ;;  %20435 = vst [vmem:[#allocation221_spill] sm:$0xff] %v10776_v48  ;;  %v2245_v11 = vsel %vm20439_vm3, 1.0, %v19212_v31  ;;  %v2246_v12 = vsel %vm20440_vm7, 1.0, %v19212_v31  ;;  %vm1244_vm4 = vcmp.eq.s32.totalorder %v10404_v3, %v20249_v45  ;;  %vm1245_vm6 = vcmp.eq.s32.totalorder %v10404_v3, %v20441_v26  ;;  %v20450_v32 = vld [vmem:[#allocation253_spill] sm:$0xff]  ;;  %v20469_v58 = vld [vmem:[#allocation238_spill] sm:$0xff] }
 0x2af   : > { %vm1246_vm15 = vcmp.eq.s32.totalorder %v10404_v3, %v20442_v33  ;;  %v2248_v39 = vsel %vm1224_vm12, 1.0, %v19212_v31  ;;  %v2249_v21 = vsel %vm1225_vm2, 1.0, %v19212_v31  ;;  %v2250_v47 = vsel %vm1226_vm10, 1.0, %v19212_v31  ;;  %v20470_v0 = vld [vmem:[#allocation254_spill] sm:$0xff]  ;;  %v20593_v33 = vld [vmem:[#allocation244_spill] sm:$0xff] }
 0x2b0   : > { %v20447_v48 = vmax.f32 %v20445_v38, %v20446_v15  ;;  %v20451_v17 = vmax.f32 %v20449_v10, %v20450_v32  ;;  %vm20453_vm10 = vcmp.eq.s32.totalorder %v10404_v3, %v20176_v36  ;;  %vm20454_vm2 = vcmp.eq.s32.totalorder %v10404_v3, %v20177_v6  ;;  %v20456_v15 = vld [vmem:[#allocation60_spill] sm:$0xff]  ;;  %v20458_v10 = vld [vmem:[#allocation286_spill] sm:$0xff] }
 0x2b1   : > { %v2251_v19 = vsel %vm20453_vm10, 1.0, %v19212_v31  ;;  %v2252_v52 = vsel %vm20454_vm2, 1.0, %v19212_v31  ;;  %v20466_v36 = vld [vmem:[#allocation222_spill] sm:$0xff]  ;;  %v20471_v57 = vmax.f32 %v20469_v58, %v20470_v0  ;;  %v20489_v58 = vld [vmem:[#allocation269_spill] sm:$0xff]  ;;  %vm20497_vm10 = vcmp.eq.s32.totalorder %v10404_v3, %v19361_v2  ;;  %v20594_v26 = vld [vmem:[#allocation260_spill] sm:$0xff] }
 0x2b2   : > { %v10841_v61 = vmax.f32 %v20447_v48, %v2241_v41  ;;  %v10846_v8 = vmax.f32 %v20451_v17, %v2242_v53  ;;  %v20457_v48 = vld [vmem:[#allocation267_spill] sm:$0xff]  ;;  %v20461_v41 = vld [vmem:[#allocation302_spill] sm:$0xff]  ;;  %vm20498_vm2 = vcmp.eq.s32.totalorder %v10404_v3, %v19362_v60  ;;  %vm20501_vm13 = vcmp.eq.s32.totalorder %v10404_v3, %v20398_v59 }
 0x2b3   : > { %v20459_v17 = vmax.f32 %v20457_v48, %v20458_v10  ;;  %v20462_v53 = vld [vmem:[#allocation318_spill] sm:$0xff]  ;;  %v10878_v42 = vmax.f32 %v20471_v57, %v2246_v12  ;;  %v20475_v48 = vmax.f32 %v20473_v13, %v20474_v43  ;;  %v20477_v10 = vld [vmem:[#allocation303_spill] sm:$0xff]  ;;  %v20490_v12 = vld [vmem:[#allocation288_spill] sm:$0xff]  ;;  %vm20504_vm7 = vcmp.eq.s32.totalorder %v10404_v3, %v20401_v63 }
 0x2b4   : > { %20448 = vst [vmem:[#allocation277_spill] sm:$0xff] %v10841_v61  ;;  %20452 = vst [vmem:[#allocation252_spill] sm:$0xff] %v10846_v8  ;;  %v20463_v38 = vmax.f32 %v20461_v41, %v20462_v53  ;;  %v20465_v61 = vld [vmem:[#allocation207_spill] sm:$0xff]  ;;  %v20481_v53 = vld [vmem:[#allocation208_spill] sm:$0xff]  ;;  %v20491_v43 = vmax.f32 %v20489_v58, %v20490_v12  ;;  %vm1255_vm12 = vcmp.eq.s32.totalorder %v10404_v3, %v19473_v28 }
 0x2b5   : > { %v10863_v32 = vmax.f32 %v20459_v17, %v2243_v55  ;;  %v20467_v6 = vmax.f32 %v20465_v61, %v20466_v36  ;;  %20472 = vst [vmem:[#allocation317_spill] sm:$0xff] %v10878_v42  ;;  %v10883_v55 = vmax.f32 %v20475_v48, %v2247_v16  ;;  %v20478_v17 = vld [vmem:[#allocation319_spill] sm:$0xff]  ;;  %v20493_v16 = vld [vmem:[#allocation304_spill] sm:$0xff]  ;;  %vm1257_vm3 = vcmp.eq.s32.totalorder %v10404_v3, %v20294_v18  ;;  %v20505_v58 = vld [vmem:[#allocation209_spill] sm:$0xff] }
 0x2b6   : > { %v10868_v8 = vmax.f32 %v20463_v38, %v2244_v29  ;;  %v20479_v41 = vmax.f32 %v20477_v10, %v20478_v17  ;;  %v20482_v38 = vld [vmem:[#allocation223_spill] sm:$0xff]  ;;  %v10903_v13 = vmax.f32 %v20491_v43, %v2251_v19  ;;  %v20494_v48 = vld [vmem:[#allocation320_spill] sm:$0xff]  ;;  %v20499_v17 = vld [vmem:[#allocation61_spill] sm:$0xff]  ;;  %v20595_v45 = vmax.f32 %v20593_v33, %v20594_v26  ;;  %v11164_v33 = vpop.permute.xlu0 %681 }
 0x2b7   : > { %20460 = vst [vmem:[#allocation266_spill] sm:$0xff] %v10863_v32  ;;  %v10873_v51 = vmax.f32 %v20467_v6, %v2245_v11  ;;  %20476 = vst [vmem:[#allocation206_spill] sm:$0xff] %v10883_v55  ;;  %v20483_v61 = vmax.f32 %v20481_v53, %v20482_v38  ;;  %v20485_v6 = vld [vmem:[#allocation239_spill] sm:$0xff]  ;;  %v20495_v10 = vmax.f32 %v20493_v16, %v20494_v48  ;;  %v20500_v19 = vld [vmem:[#allocation62_spill] sm:$0xff]  ;;  %v2258_v38 = vsel %vm20504_vm7, 1.0, %v19212_v31 }
 0x2b8   : > { %20464 = vst [vmem:[#allocation63_spill] sm:$0xff] %v10868_v8  ;;  %v10888_v29 = vmax.f32 %v20479_v41, %v2248_v39  ;;  %v20486_v11 = vld [vmem:[#allocation255_spill] sm:$0xff]  ;;  %20492 = vst [vmem:[#allocation267_spill] sm:$0xff] %v10903_v13  ;;  %vm1259_vm7 = vcmp.eq.s32.totalorder %v10404_v3, %v20302_v35  ;;  %v20506_v12 = vld [vmem:[#allocation224_spill] sm:$0xff] }
 0x2b9   : > { %20468 = vst [vmem:[#allocation301_spill] sm:$0xff] %v10873_v51  ;;  %v10893_v36 = vmax.f32 %v20483_v61, %v2249_v21  ;;  %v20487_v0 = vmax.f32 %v20485_v6, %v20486_v11  ;;  %v10908_v39 = vmax.f32 %v20495_v10, %v2252_v52  ;;  %v2253_v21 = vsel %vm20497_vm10, 1.0, %v19212_v31  ;;  %v20509_v48 = vld [vmem:[#allocation240_spill] sm:$0xff]  ;;  %v20525_v42 = vld [vmem:[#allocation241_spill] sm:$0xff] }
 0x2ba   : > { %20480 = vst [vmem:[#allocation64_spill] sm:$0xff] %v10888_v29  ;;  %v2255_v52 = vsel %vm20501_vm13, 1.0, %v19212_v31  ;;  %vm20502_vm10 = vcmp.eq.s32.totalorder %v10404_v3, %v20399_v24  ;;  %vm1256_vm13 = vcmp.eq.s32.totalorder %v10404_v3, %v19474_v44  ;;  %v2259_v61 = vsel %vm1235_vm0, 1.0, %v19212_v31  ;;  %v20510_v10 = vld [vmem:[#allocation256_spill] sm:$0xff]  ;;  %v20526_v51 = vld [vmem:[#allocation257_spill] sm:$0xff] }
 0x2bb   : > { %20484 = vst [vmem:[#allocation237_spill] sm:$0xff] %v10893_v36  ;;  %v10898_v57 = vmax.f32 %v20487_v0, %v2250_v47  ;;  %20496 = vst [vmem:[#allocation286_spill] sm:$0xff] %v10908_v39  ;;  %v2254_v47 = vsel %vm20498_vm2, 1.0, %v19212_v31  ;;  %v2256_v41 = vsel %vm20502_vm10, 1.0, %v19212_v31  ;;  %vm20503_vm2 = vcmp.eq.s32.totalorder %v10404_v3, %v20400_v20  ;;  %v20657_v18 = vld [vmem:[#allocation28_spill] sm:$0xff] }
 0x2bc   : > { %v2257_v53 = vsel %vm20503_vm2, 1.0, %v19212_v31  ;;  %vm1258_vm10 = vcmp.eq.s32.totalorder %v10404_v3, %v20295_v62  ;;  %v2260_v6 = vsel %vm1236_vm1, 1.0, %v19212_v31  ;;  %v2261_v11 = vsel %vm1237_vm9, 1.0, %v19212_v31 }
 0x2bd   : > { %20488 = vst [vmem:[#allocation253_spill] sm:$0xff] %v10898_v57  ;;  %v2262_v0 = vsel %vm1238_vm14, 1.0, %v19212_v31  ;;  %vm1260_vm0 = vcmp.eq.s32.totalorder %v10404_v3, %v20303_v25  ;;  %vm1261_vm2 = vcmp.eq.s32.totalorder %v10404_v3, %v20308_v34  ;;  %vm1262_vm1 = vcmp.eq.s32.totalorder %v10404_v3, %v20309_v27  ;;  %v20653_v34 = vld [vmem:[#allocation247_spill] sm:$0xff] }
 0x2be   : > { %v20507_v43 = vmax.f32 %v20505_v58, %v20506_v12  ;;  %v20511_v39 = vmax.f32 %v20509_v48, %v20510_v10  ;;  %v2263_v57 = vsel %vm1239_vm11, 1.0, %v19212_v31  ;;  %v2264_v36 = vsel %vm1240_vm5, 1.0, %v19212_v31  ;;  %v20514_v58 = vld [vmem:[#allocation289_spill] sm:$0xff]  ;;  %v20654_v25 = vld [vmem:[#allocation263_spill] sm:$0xff] }
 0x2bf   : > { %v20517_v12 = vld [vmem:[#allocation305_spill] sm:$0xff]  ;;  %v20527_v8 = vmax.f32 %v20525_v42, %v20526_v51  ;;  %vm20553_vm11 = vcmp.eq.s32.totalorder %v10404_v3, %v20242_v30  ;;  %vm20554_vm5 = vcmp.eq.s32.totalorder %v10404_v3, %v20438_v46  ;;  %v20597_v46 = vld [vmem:[#allocation278_spill] sm:$0xff]  ;;  %v20655_v35 = vmax.f32 %v20653_v34, %v20654_v25  ;;  %v20668_v25 = vld [vmem:[#allocation232_spill] sm:$0xff] }
 0x2c0   : > { %v10973_v16 = vmax.f32 %v20507_v43, %v2253_v21  ;;  %v10978_v13 = vmax.f32 %v20511_v39, %v2254_v47  ;;  %v20513_v21 = vld [vmem:[#allocation270_spill] sm:$0xff]  ;;  %v20518_v43 = vld [vmem:[#allocation321_spill] sm:$0xff] }
 0x2c1   : > { %v20515_v39 = vmax.f32 %v20513_v21, %v20514_v58  ;;  %v20519_v48 = vmax.f32 %v20517_v12, %v20518_v43  ;;  %v11010_v32 = vmax.f32 %v20527_v8, %v2258_v38  ;;  %v20531_v21 = vmax.f32 %v20529_v9, %v20530_v14  ;;  %v20533_v58 = vld [vmem:[#allocation306_spill] sm:$0xff]  ;;  %v20537_v43 = vld [vmem:[#allocation211_spill] sm:$0xff]  ;;  %v20598_v30 = vld [vmem:[#allocation293_spill] sm:$0xff] }
 0x2c2   : > { %20508 = vst [vmem:[#allocation302_spill] sm:$0xff] %v10973_v16  ;;  %20512 = vst [vmem:[#allocation318_spill] sm:$0xff] %v10978_v13  ;;  %v20521_v13 = vld [vmem:[#allocation210_spill] sm:$0xff]  ;;  %v20522_v16 = vld [vmem:[#allocation225_spill] sm:$0xff] }
 0x2c3   : > { %v10995_v47 = vmax.f32 %v20515_v39, %v2255_v52  ;;  %v11000_v10 = vmax.f32 %v20519_v48, %v2256_v41  ;;  %v20523_v29 = vmax.f32 %v20521_v13, %v20522_v16  ;;  %20528 = vst [vmem:[#allocation254_spill] sm:$0xff] %v11010_v32  ;;  %v11015_v52 = vmax.f32 %v20531_v21, %v2259_v61  ;;  %v20534_v39 = vld [vmem:[#allocation322_spill] sm:$0xff]  ;;  %v20546_v38 = vld [vmem:[#allocation291_spill] sm:$0xff] }
 0x2c4   : > { %v20535_v12 = vmax.f32 %v20533_v58, %v20534_v39  ;;  %v20538_v48 = vld [vmem:[#allocation226_spill] sm:$0xff]  ;;  %v20549_v61 = vld [vmem:[#allocation307_spill] sm:$0xff]  ;;  %v20555_v39 = vld [vmem:[#allocation73_spill] sm:$0xff] }
 0x2c5   : > { %20516 = vst [vmem:[#allocation207_spill] sm:$0xff] %v10995_v47  ;;  %20520 = vst [vmem:[#allocation222_spill] sm:$0xff] %v11000_v10  ;;  %v11005_v55 = vmax.f32 %v20523_v29, %v2257_v53  ;;  %v20539_v13 = vmax.f32 %v20537_v43, %v20538_v48  ;;  %v20541_v53 = vld [vmem:[#allocation242_spill] sm:$0xff]  ;;  %v20550_v21 = vld [vmem:[#allocation323_spill] sm:$0xff]  ;;  %vm1265_vm14 = vcmp.eq.s32.totalorder %v10404_v3, %v20555_v39  ;;  %v2269_v43 = vsel %vm1245_vm6, 1.0, %v19212_v31 }
 0x2c6   : > { %20532 = vst [vmem:[#allocation268_spill] sm:$0xff] %v11015_v52  ;;  %v11020_v41 = vmax.f32 %v20535_v12, %v2260_v6  ;;  %v20542_v16 = vld [vmem:[#allocation258_spill] sm:$0xff]  ;;  %v20551_v58 = vmax.f32 %v20549_v61, %v20550_v21  ;;  %v2268_v12 = vsel %vm1244_vm4, 1.0, %v19212_v31  ;;  %v2270_v48 = vsel %vm1246_vm15, 1.0, %v19212_v31  ;;  %v20565_v21 = vld [vmem:[#allocation16_spill] sm:$0xff]  ;;  %v20573_v32 = vld [vmem:[#allocation243_spill] sm:$0xff] }
 0x2c7   : > { %20524 = vst [vmem:[#allocation238_spill] sm:$0xff] %v11005_v55  ;;  %v11025_v29 = vmax.f32 %v20539_v13, %v2261_v11  ;;  %v20543_v51 = vmax.f32 %v20541_v53, %v20542_v16  ;;  %v20545_v8 = vld [vmem:[#allocation274_spill] sm:$0xff]  ;;  %v2265_v11 = vsel %vm20553_vm11, 1.0, %v19212_v31  ;;  %v20557_v13 = vld [vmem:[#allocation75_spill] sm:$0xff]  ;;  %v20558_v53 = vld [vmem:[#allocation76_spill] sm:$0xff]  ;;  %vm20561_vm6 = vcmp.eq.s32.totalorder %v10404_v3, %v20264_v7 }
 0x2c8   : > { %20536 = vst [vmem:[#allocation287_spill] sm:$0xff] %v11020_v41  ;;  %v20547_v14 = vmax.f32 %v20545_v8, %v20546_v38  ;;  %v11040_v6 = vmax.f32 %v20551_v58, %v2264_v36  ;;  %v2267_v36 = vsel %vm1243_vm8, 1.0, %v19212_v31  ;;  %v20559_v16 = vld [vmem:[#allocation14_spill] sm:$0xff]  ;;  %v2271_v8 = vsel %vm20561_vm6, 1.0, %v19212_v31  ;;  %v20566_v58 = vld [vmem:[#allocation77_spill] sm:$0xff]  ;;  %v20574_v55 = vld [vmem:[#allocation259_spill] sm:$0xff] }
 0x2c9   : > { %20540 = vst [vmem:[#allocation303_spill] sm:$0xff] %v11025_v29  ;;  %v11030_v42 = vmax.f32 %v20543_v51, %v2262_v0  ;;  %v2266_v0 = vsel %vm20554_vm5, 1.0, %v19212_v31  ;;  %v20560_v51 = vld [vmem:[#allocation15_spill] sm:$0xff]  ;;  %vm20562_vm15 = vcmp.eq.s32.totalorder %v10404_v3, %v20265_v54  ;;  %vm20563_vm8 = vcmp.eq.s32.totalorder %v10404_v3, %v20443_v49 }
 0x2ca   : > { %v11035_v9 = vmax.f32 %v20547_v14, %v2263_v57  ;;  %20552 = vst [vmem:[#allocation223_spill] sm:$0xff] %v11040_v6  ;;  %v20556_v57 = vld [vmem:[#allocation74_spill] sm:$0xff]  ;;  %v2272_v38 = vsel %vm20562_vm15, 1.0, %v19212_v31  ;;  %v2273_v14 = vsel %vm20563_vm8, 1.0, %v19212_v31  ;;  %vm20564_vm5 = vcmp.eq.s32.totalorder %v10404_v3, %v20444_v23  ;;  %v20567_v6 = vld [vmem:[#allocation17_spill] sm:$0xff]  ;;  %v20570_v29 = vld [vmem:[#allocation227_spill] sm:$0xff] }
 0x2cb   : > { %20544 = vst [vmem:[#allocation319_spill] sm:$0xff] %v11030_v42  ;;  %vm1266_vm9 = vcmp.eq.s32.totalorder %v10404_v3, %v20556_v57  ;;  %v2274_v61 = vsel %vm20564_vm5, 1.0, %v19212_v31  ;;  %vm1271_vm4 = vcmp.eq.s32.totalorder %v10404_v3, %v20565_v21  ;;  %vm1272_vm6 = vcmp.eq.s32.totalorder %v10404_v3, %v20566_v58  ;;  %v20569_v42 = vld [vmem:[#allocation212_spill] sm:$0xff]  ;;  %v20579_v54 = vld [vmem:[#allocation19_spill] sm:$0xff] }
 0x2cc   : > { %20548 = vst [vmem:[#allocation208_spill] sm:$0xff] %v11035_v9  ;;  %v20568_v9 = vld [vmem:[#allocation18_spill] sm:$0xff]  ;;  %v20571_v41 = vmax.f32 %v20569_v42, %v20570_v29  ;;  %v20575_v10 = vmax.f32 %v20573_v32, %v20574_v55  ;;  %vm20577_vm8 = vcmp.eq.s32.totalorder %v10404_v3, %v20455_v56  ;;  %vm20578_vm5 = vcmp.eq.s32.totalorder %v10404_v3, %v20456_v15  ;;  %v20581_v29 = vld [vmem:[#allocation275_spill] sm:$0xff]  ;;  %v20582_v32 = vld [vmem:[#allocation292_spill] sm:$0xff] }
 0x2cd   : > { %v2275_v23 = vsel %vm20577_vm8, 1.0, %v19212_v31  ;;  %v2276_v49 = vsel %vm20578_vm5, 1.0, %v19212_v31  ;;  %v20583_v55 = vmax.f32 %v20581_v29, %v20582_v32  ;;  %v20585_v42 = vld [vmem:[#allocation308_spill] sm:$0xff]  ;;  %v11142_v4 = vmax.f32 %v20595_v45, %v2270_v48  ;;  %v20601_v32 = vld [vmem:[#allocation309_spill] sm:$0xff] }
 0x2ce   : > { %v11105_v52 = vmax.f32 %v20571_v41, %v2265_v11  ;;  %v11110_v47 = vmax.f32 %v20575_v10, %v2266_v0  ;;  %v20580_v41 = vld [vmem:[#allocation78_spill] sm:$0xff]  ;;  %v20586_v11 = vld [vmem:[#allocation324_spill] sm:$0xff]  ;;  %v20599_v29 = vmax.f32 %v20597_v46, %v20598_v30  ;;  %v20613_v30 = vld [vmem:[#allocation279_spill] sm:$0xff]  ;;  %vm20621_vm8 = vcmp.eq.s32.totalorder %v10404_v3, %v20499_v17 }
 0x2cf   : > { %v11127_v10 = vmax.f32 %v20583_v55, %v2267_v36  ;;  %v20587_v0 = vmax.f32 %v20585_v42, %v20586_v11  ;;  %v20590_v56 = vld [vmem:[#allocation228_spill] sm:$0xff]  ;;  %20596 = vst [vmem:[#allocation320_spill] sm:$0xff] %v11142_v4  ;;  %v20602_v55 = vld [vmem:[#allocation325_spill] sm:$0xff]  ;;  %v20605_v11 = vld [vmem:[#allocation214_spill] sm:$0xff]  ;;  %vm20622_vm5 = vcmp.eq.s32.totalorder %v10404_v3, %v20500_v19 }
 0x2d0   : > { %20572 = vst [vmem:[#allocation239_spill] sm:$0xff] %v11105_v52  ;;  %20576 = vst [vmem:[#allocation255_spill] sm:$0xff] %v11110_v47  ;;  %v20589_v52 = vld [vmem:[#allocation213_spill] sm:$0xff]  ;;  %v11147_v36 = vmax.f32 %v20599_v29, %v2271_v8  ;;  %v20603_v42 = vmax.f32 %v20601_v32, %v20602_v55  ;;  %v20614_v46 = vld [vmem:[#allocation294_spill] sm:$0xff] }
 0x2d1   : > { %20584 = vst [vmem:[#allocation269_spill] sm:$0xff] %v11127_v10  ;;  %v11132_v47 = vmax.f32 %v20587_v0, %v2268_v12  ;;  %v20591_v15 = vmax.f32 %v20589_v52, %v20590_v56  ;;  %v20606_v0 = vld [vmem:[#allocation229_spill] sm:$0xff]  ;;  %v20615_v48 = vmax.f32 %v20613_v30, %v20614_v46  ;;  %v20617_v29 = vld [vmem:[#allocation310_spill] sm:$0xff]  ;;  %v2284_v30 = vsel %vm1260_vm0, 1.0, %v19212_v31 }
 0x2d2   : > { %20600 = vst [vmem:[#allocation209_spill] sm:$0xff] %v11147_v36  ;;  %v11152_v12 = vmax.f32 %v20603_v42, %v2272_v38  ;;  %v20607_v56 = vmax.f32 %v20605_v11, %v20606_v0  ;;  %v20609_v52 = vld [vmem:[#allocation245_spill] sm:$0xff]  ;;  %v20618_v38 = vld [vmem:[#allocation326_spill] sm:$0xff]  ;;  %v20623_v42 = vld [vmem:[#allocation20_spill] sm:$0xff]  ;;  %v2280_v11 = vsel %vm1256_vm13, 1.0, %v19212_v31  ;;  %v2281_v0 = vsel %vm1257_vm3, 1.0, %v19212_v31 }
 0x2d3   : > { %20588 = vst [vmem:[#allocation288_spill] sm:$0xff] %v11132_v47  ;;  %v11137_v7 = vmax.f32 %v20591_v15, %v2269_v43  ;;  %v20610_v43 = vld [vmem:[#allocation261_spill] sm:$0xff]  ;;  %v11169_v8 = vmax.f32 %v20615_v48, %v2275_v23  ;;  %v20619_v32 = vmax.f32 %v20617_v29, %v20618_v38  ;;  %vm1277_vm11 = vcmp.eq.s32.totalorder %v11164_v33, %v20623_v42  ;;  %v20627_v29 = vld [vmem:[#allocation24_spill] sm:$0xff]  ;;  %v20639_v10 = vld [vmem:[#allocation26_spill] sm:$0xff] }
 0x2d4   : > { %20604 = vst [vmem:[#allocation224_spill] sm:$0xff] %v11152_v12  ;;  %v11157_v15 = vmax.f32 %v20607_v56, %v2273_v14  ;;  %v20611_v26 = vmax.f32 %v20609_v52, %v20610_v43  ;;  %v2277_v14 = vsel %vm20621_vm8, 1.0, %v19212_v31  ;;  %v20624_v23 = vld [vmem:[#allocation21_spill] sm:$0xff]  ;;  %v2282_v56 = vsel %vm1258_vm10, 1.0, %v19212_v31  ;;  %v20625_v52 = vld [vmem:[#allocation22_spill] sm:$0xff]  ;;  %v20626_v43 = vld [vmem:[#allocation23_spill] sm:$0xff] }
 0x2d5   : > { %20592 = vst [vmem:[#allocation304_spill] sm:$0xff] %v11137_v7  ;;  %20616 = vst [vmem:[#allocation270_spill] sm:$0xff] %v11169_v8  ;;  %v11174_v55 = vmax.f32 %v20619_v32, %v2276_v49  ;;  %vm1278_vm15 = vcmp.eq.s32.totalorder %v11164_v33, %v20624_v23  ;;  %v2279_v49 = vsel %vm1255_vm12, 1.0, %v19212_v31  ;;  %vm1279_vm8 = vcmp.eq.s32.totalorder %v11164_v33, %v20625_v52  ;;  %v20628_v38 = vld [vmem:[#allocation25_spill] sm:$0xff]  ;;  %v20629_v32 = vld [vmem:[#allocation215_spill] sm:$0xff] }
 0x2d6   : > { %20608 = vst [vmem:[#allocation240_spill] sm:$0xff] %v11157_v15  ;;  %v11162_v45 = vmax.f32 %v20611_v26, %v2274_v61  ;;  %v2278_v61 = vsel %vm20622_vm5, 1.0, %v19212_v31  ;;  %vm1280_vm12 = vcmp.eq.s32.totalorder %v11164_v33, %v20626_v43  ;;  %v2283_v26 = vsel %vm1259_vm7, 1.0, %v19212_v31  ;;  %v20633_v15 = vld [vmem:[#allocation246_spill] sm:$0xff] }
 0x2d7   : > { %20620 = vst [vmem:[#allocation289_spill] sm:$0xff] %v11174_v55  ;;  %v2285_v46 = vsel %vm1261_vm2, 1.0, %v19212_v31  ;;  %v2286_v48 = vsel %vm1262_vm1, 1.0, %v19212_v31  ;;  %vm1281_vm3 = vcmp.eq.s32.totalorder %v11164_v33, %v20627_v29  ;;  %vm1282_vm13 = vcmp.eq.s32.totalorder %v11164_v33, %v20628_v38  ;;  %v20630_v55 = vld [vmem:[#allocation230_spill] sm:$0xff] }
 0x2d8   : > { %20612 = vst [vmem:[#allocation256_spill] sm:$0xff] %v11162_v45  ;;  %v20631_v8 = vmax.f32 %v20629_v32, %v20630_v55  ;;  %v20634_v12 = vld [vmem:[#allocation262_spill] sm:$0xff]  ;;  %vm20637_vm10 = vcmp.eq.s32.totalorder %v10404_v3, %v20314_v5  ;;  %vm20638_vm7 = vcmp.eq.s32.totalorder %v10404_v3, %v20315_v22  ;;  %vm1283_vm0 = vcmp.eq.s32.totalorder %v11164_v33, %v20639_v10  ;;  %v20641_v55 = vld [vmem:[#allocation280_spill] sm:$0xff]  ;;  %v20650_v5 = vld [vmem:[#allocation231_spill] sm:$0xff] }
 0x2d9   : > { %v20635_v36 = vmax.f32 %v20633_v15, %v20634_v12  ;;  %v2287_v7 = vsel %vm20637_vm10, 1.0, %v19212_v31  ;;  %v2288_v47 = vsel %vm20638_vm7, 1.0, %v19212_v31  ;;  %v20642_v12 = vld [vmem:[#allocation295_spill] sm:$0xff]  ;;  %v11268_v62 = vmax.f32 %v20655_v35, %v2282_v56  ;;  %v20671_v56 = vld [vmem:[#allocation248_spill] sm:$0xff] }
 0x2da   : > { %v11231_v45 = vmax.f32 %v20631_v8, %v2277_v14  ;;  %v20640_v8 = vld [vmem:[#allocation27_spill] sm:$0xff]  ;;  %vm1285_vm1 = vcmp.eq.s32.totalorder %v11164_v33, %v20657_v18  ;;  %vm20687_vm5 = vcmp.eq.s32.totalorder %v10404_v3, %v20557_v13  ;;  %vm20690_vm7 = vcmp.eq.s32.totalorder %v10404_v3, %v20560_v51 }
 0x2db   : > { %v11236_v4 = vmax.f32 %v20635_v36, %v2278_v61  ;;  %vm1284_vm2 = vcmp.eq.s32.totalorder %v11164_v33, %v20640_v8  ;;  %v20643_v36 = vmax.f32 %v20641_v55, %v20642_v12  ;;  %v20645_v14 = vld [vmem:[#allocation311_spill] sm:$0xff]  ;;  %20656 = vst [vmem:[#allocation257_spill] sm:$0xff] %v11268_v62  ;;  %v20659_v55 = vld [vmem:[#allocation281_spill] sm:$0xff]  ;;  %v20660_v12 = vld [vmem:[#allocation296_spill] sm:$0xff] }
 0x2dc   : > { %20632 = vst [vmem:[#allocation305_spill] sm:$0xff] %v11231_v45  ;;  %v20646_v61 = vld [vmem:[#allocation327_spill] sm:$0xff]  ;;  %v20649_v45 = vld [vmem:[#allocation216_spill] sm:$0xff] }
 0x2dd   : > { %20636 = vst [vmem:[#allocation321_spill] sm:$0xff] %v11236_v4  ;;  %v11253_v15 = vmax.f32 %v20643_v36, %v2279_v49  ;;  %v20647_v32 = vmax.f32 %v20645_v14, %v20646_v61  ;;  %v20651_v22 = vmax.f32 %v20649_v45, %v20650_v5  ;;  %v20658_v49 = vld [vmem:[#allocation29_spill] sm:$0xff]  ;;  %v20663_v14 = vld [vmem:[#allocation312_spill] sm:$0xff] }
 0x2de   : > { %v20664_v5 = vld [vmem:[#allocation36_spill] sm:$0xff] }
 0x2df   : > { %20644 = vst [vmem:[#allocation210_spill] sm:$0xff] %v11253_v15  ;;  %v11258_v4 = vmax.f32 %v20647_v32, %v2280_v11  ;;  %v11263_v27 = vmax.f32 %v20651_v22, %v2281_v0  ;;  %v20661_v11 = vmax.f32 %v20659_v55, %v20660_v12  ;;  %v20665_v22 = vmax.f32 %v20663_v14, %v20664_v5  ;;  %v20667_v0 = vld [vmem:[#allocation217_spill] sm:$0xff]  ;;  %v20672_v61 = vld [vmem:[#allocation264_spill] sm:$0xff]  ;;  %v20677_v55 = vld [vmem:[#allocation282_spill] sm:$0xff] }
 0x2e0   : > { %v20669_v35 = vmax.f32 %v20667_v0, %v20668_v25  ;;  %v20673_v32 = vmax.f32 %v20671_v56, %v20672_v61  ;;  %v20678_v12 = vld [vmem:[#allocation297_spill] sm:$0xff]  ;;  %v2290_v0 = vsel %vm1266_vm9, 1.0, %v19212_v31  ;;  %v20685_v25 = vld [vmem:[#allocation32_spill] sm:$0xff]  ;;  %vm20689_vm9 = vcmp.eq.s32.totalorder %v10404_v3, %v20559_v16 }
 0x2e1   : > { %20648 = vst [vmem:[#allocation225_spill] sm:$0xff] %v11258_v4  ;;  %20652 = vst [vmem:[#allocation241_spill] sm:$0xff] %v11263_v27  ;;  %v11277_v36 = vmax.f32 %v20661_v11, %v2283_v26  ;;  %v11282_v45 = vmax.f32 %v20665_v22, %v2284_v30  ;;  %v20675_v27 = vld [vmem:[#allocation30_spill] sm:$0xff]  ;;  %v20676_v26 = vld [vmem:[#allocation31_spill] sm:$0xff]  ;;  %v20679_v30 = vmax.f32 %v20677_v55, %v20678_v12  ;;  %v2293_v56 = vsel %vm20689_vm9, 1.0, %v19212_v31 }
 0x2e2   : > { %v11287_v34 = vmax.f32 %v20669_v35, %v2285_v46  ;;  %v11292_v62 = vmax.f32 %v20673_v32, %v2286_v48  ;;  %v20681_v14 = vld [vmem:[#allocation313_spill] sm:$0xff]  ;;  %v2289_v48 = vsel %vm1265_vm14, 1.0, %v19212_v31  ;;  %vm20688_vm14 = vcmp.eq.s32.totalorder %v10404_v3, %v20558_v53  ;;  %v20691_v32 = vld [vmem:[#allocation34_spill] sm:$0xff]  ;;  %v20692_v55 = vld [vmem:[#allocation35_spill] sm:$0xff] }
 0x2e3   : > { %20662 = vst [vmem:[#allocation271_spill] sm:$0xff] %v11277_v36  ;;  %20666 = vst [vmem:[#allocation290_spill] sm:$0xff] %v11282_v45  ;;  %v11301_v11 = vmax.f32 %v20679_v30, %v2287_v7  ;;  %v20682_v5 = vld [vmem:[#allocation37_spill] sm:$0xff]  ;;  %v2292_v35 = vsel %vm20688_vm14, 1.0, %v19212_v31  ;;  %v2294_v61 = vsel %vm20690_vm7, 1.0, %v19212_v31  ;;  %vm1291_vm10 = vcmp.eq.s32.totalorder %v11164_v33, %v20691_v32 }
 0x2e4   : > { %20670 = vst [vmem:[#allocation306_spill] sm:$0xff] %v11287_v34  ;;  %20674 = vst [vmem:[#allocation322_spill] sm:$0xff] %v11292_v62  ;;  %v20683_v46 = vmax.f32 %v20681_v14, %v20682_v5  ;;  %v20686_v7 = vld [vmem:[#allocation33_spill] sm:$0xff]  ;;  %v2295_v12 = vsel %vm1271_vm4, 1.0, %v19212_v31  ;;  %v2296_v30 = vsel %vm1272_vm6, 1.0, %v19212_v31  ;;  %vm20693_vm7 = vcmp.eq.s32.totalorder %v10404_v3, %v20567_v6  ;;  %v20718_v6 = vld [vmem:[#allocation272_spill] sm:$0xff] }
 0x2e5   : > { %20680 = vst [vmem:[#allocation211_spill] sm:$0xff] %v11301_v11  ;;  %v2297_v14 = vsel %vm20693_vm7, 1.0, %v19212_v31  ;;  %vm20694_vm14 = vcmp.eq.s32.totalorder %v10404_v3, %v20568_v9  ;;  %vm1293_vm9 = vcmp.eq.s32.totalorder %v11164_v33, %v19361_v2  ;;  %v20699_v34 = vld [vmem:[#allocation249_spill] sm:$0xff]  ;;  %vm20703_vm6 = vcmp.eq.s32.totalorder %v10404_v3, %v20579_v54  ;;  %v20717_v54 = vld [vmem:[#allocation250_spill] sm:$0xff] }
 0x2e6   : > { %v11306_v22 = vmax.f32 %v20683_v46, %v2288_v47  ;;  %v2291_v47 = vsel %vm20687_vm5, 1.0, %v19212_v31  ;;  %vm1292_vm5 = vcmp.eq.s32.totalorder %v11164_v33, %v20692_v55  ;;  %v2298_v5 = vsel %vm20694_vm14, 1.0, %v19212_v31  ;;  %v20695_v46 = vld [vmem:[#allocation218_spill] sm:$0xff]  ;;  %v20700_v45 = vld [vmem:[#allocation265_spill] sm:$0xff] }
 0x2e7   : > { %v20701_v36 = vmax.f32 %v20699_v34, %v20700_v45  ;;  %v2299_v15 = vsel %vm20703_vm6, 1.0, %v19212_v31  ;;  %vm20704_vm7 = vcmp.eq.s32.totalorder %v10404_v3, %v20580_v41  ;;  %vm1295_vm14 = vcmp.eq.s32.totalorder %v11164_v33, %v20398_v59  ;;  %v20706_v45 = vld [vmem:[#allocation298_spill] sm:$0xff] }
 0x2e8   : > { %20684 = vst [vmem:[#allocation226_spill] sm:$0xff] %v11306_v22  ;;  %v20696_v22 = vld [vmem:[#allocation233_spill] sm:$0xff]  ;;  %v2300_v9 = vsel %vm20704_vm7, 1.0, %v19212_v31  ;;  %vm1296_vm4 = vcmp.eq.s32.totalorder %v11164_v33, %v20399_v24  ;;  %v20719_v58 = vmax.f32 %v20717_v54, %v20718_v6  ;;  %v20730_v54 = vld [vmem:[#allocation235_spill] sm:$0xff]  ;;  %vm1301_vm6 = vcmp.eq.s32.totalorder %v11164_v33, %v20408_v40  ;;  %v20810_v59 = vld [vmem:[#allocation66_spill] sm:$0xff] }
 0x2e9   : > { %v20697_v11 = vmax.f32 %v20695_v46, %v20696_v22  ;;  %v11368_v4 = vmax.f32 %v20701_v36, %v2290_v0  ;;  %v20709_v22 = vld [vmem:[#allocation314_spill] sm:$0xff]  ;;  %vm1302_vm7 = vcmp.eq.s32.totalorder %v11164_v33, %v20409_v1  ;;  %v20809_v24 = vld [vmem:[#allocation65_spill] sm:$0xff]  ;;  %v20829_v1 = vld [vmem:[#allocation71_spill] sm:$0xff] }
 0x2ea   : > { %v11400_v21 = vmax.f32 %v20719_v58, %v2294_v61  ;;  %v20733_v61 = vld [vmem:[#allocation251_spill] sm:$0xff]  ;;  %v20830_v40 = vld [vmem:[#allocation72_spill] sm:$0xff] }
 0x2eb   : > { %v11363_v62 = vmax.f32 %v20697_v11, %v2289_v48  ;;  %20702 = vst [vmem:[#allocation258_spill] sm:$0xff] %v11368_v4  ;;  %v20705_v11 = vld [vmem:[#allocation283_spill] sm:$0xff]  ;;  %v20710_v48 = vld [vmem:[#allocation328_spill] sm:$0xff] }
 0x2ec   : > { %v20707_v36 = vmax.f32 %v20705_v11, %v20706_v45  ;;  %v20711_v0 = vmax.f32 %v20709_v22, %v20710_v48  ;;  %v20713_v4 = vld [vmem:[#allocation219_spill] sm:$0xff]  ;;  %20720 = vst [vmem:[#allocation323_spill] sm:$0xff] %v11400_v21  ;;  %v20729_v22 = vld [vmem:[#allocation220_spill] sm:$0xff]  ;;  %v20734_v48 = vld [vmem:[#allocation273_spill] sm:$0xff] }
 0x2ed   : > { %20698 = vst [vmem:[#allocation242_spill] sm:$0xff] %v11363_v62  ;;  %v20714_v62 = vld [vmem:[#allocation234_spill] sm:$0xff]  ;;  %v20722_v11 = vld [vmem:[#allocation299_spill] sm:$0xff]  ;;  %v20731_v6 = vmax.f32 %v20729_v22, %v20730_v54  ;;  %v20757_v54 = vld [vmem:[#allocation49_spill] sm:$0xff] }
 0x2ee   : > { %v11385_v34 = vmax.f32 %v20707_v36, %v2291_v47  ;;  %v11390_v46 = vmax.f32 %v20711_v0, %v2292_v35  ;;  %v20715_v3 = vmax.f32 %v20713_v4, %v20714_v62  ;;  %v20721_v47 = vld [vmem:[#allocation284_spill] sm:$0xff]  ;;  %v20725_v36 = vld [vmem:[#allocation315_spill] sm:$0xff]  ;;  %v20726_v62 = vld [vmem:[#allocation329_spill] sm:$0xff]  ;;  %v20735_v0 = vmax.f32 %v20733_v61, %v20734_v48 }
 0x2ef   : > { %v20723_v35 = vmax.f32 %v20721_v47, %v20722_v11  ;;  %v20727_v4 = vmax.f32 %v20725_v36, %v20726_v62  ;;  %v11419_v58 = vmax.f32 %v20731_v6, %v2297_v14  ;;  %v20738_v47 = vld [vmem:[#allocation300_spill] sm:$0xff]  ;;  %v20742_v36 = vld [vmem:[#allocation330_spill] sm:$0xff]  ;;  %v11464_v6 = vsel %vm1279_vm8, 1.0, %v19212_v31  ;;  %v20751_v48 = vld [vmem:[#allocation47_spill] sm:$0xff] }
 0x2f0   : > { %20708 = vst [vmem:[#allocation274_spill] sm:$0xff] %v11385_v34  ;;  %20712 = vst [vmem:[#allocation291_spill] sm:$0xff] %v11390_v46  ;;  %v11395_v41 = vmax.f32 %v20715_v3, %v2293_v56  ;;  %v11424_v3 = vmax.f32 %v20735_v0, %v2298_v5  ;;  %v11444_v5 = vsel %vm1277_vm11, 1.0, %v19212_v31  ;;  %v11470_v61 = vsel %vm1280_vm12, 1.0, %v19212_v31  ;;  %v20752_v0 = vld [vmem:[#allocation48_spill] sm:$0xff]  ;;  %v20914_v34 = vld [vmem:[#allocation39_spill] sm:$0xff] }
 0x2f1   : > { %v11409_v45 = vmax.f32 %v20723_v35, %v2295_v12  ;;  %v11414_v56 = vmax.f32 %v20727_v4, %v2296_v30  ;;  %20732 = vst [vmem:[#allocation243_spill] sm:$0xff] %v11419_v58  ;;  %v20737_v12 = vld [vmem:[#allocation285_spill] sm:$0xff]  ;;  %v20741_v35 = vld [vmem:[#allocation316_spill] sm:$0xff]  ;;  %20745 = vst [vmem:[#allocation308_spill] sm:$0xff] %v11444_v5  ;;  %v11450_v4 = vsel %vm1278_vm15, 1.0, %v19212_v31  ;;  %vm1303_vm11 = vcmp.eq.s32.totalorder %v11164_v33, %v20751_v48 }
 0x2f2   : > { %20716 = vst [vmem:[#allocation307_spill] sm:$0xff] %v11395_v41  ;;  %20736 = vst [vmem:[#allocation259_spill] sm:$0xff] %v11424_v3  ;;  %v20739_v30 = vmax.f32 %v20737_v12, %v20738_v47  ;;  %v20743_v14 = vmax.f32 %v20741_v35, %v20742_v36  ;;  %vm1304_vm15 = vcmp.eq.s32.totalorder %v11164_v33, %v20752_v0  ;;  %v11484_v36 = vsel %vm1281_vm3, 1.0, %v19212_v31  ;;  %v20764_v22 = vld [vmem:[#allocation52_spill] sm:$0xff]  ;;  %v20770_v5 = vld [vmem:[#allocation53_spill] sm:$0xff] }
 0x2f3   : > { %20724 = vst [vmem:[#allocation212_spill] sm:$0xff] %v11409_v45  ;;  %20728 = vst [vmem:[#allocation227_spill] sm:$0xff] %v11414_v56  ;;  %vm1305_vm8 = vcmp.eq.s32.totalorder %v11164_v33, %v20757_v54  ;;  %v11510_v12 = vsel %vm1284_vm2, 1.0, %v19212_v31  ;;  %v20786_v3 = vld [vmem:[#allocation57_spill] sm:$0xff]  ;;  %v20787_v58 = vld [vmem:[#allocation58_spill] sm:$0xff] }
 0x2f4   : > { %v11433_v11 = vmax.f32 %v20739_v30, %v2299_v15  ;;  %v11438_v62 = vmax.f32 %v20743_v14, %v2300_v9  ;;  %20746 = vst [vmem:[#allocation324_spill] sm:$0xff] %v11450_v4  ;;  %20749 = vst [vmem:[#allocation213_spill] sm:$0xff] %v11464_v6  ;;  %v11490_v14 = vsel %vm1282_vm13, 1.0, %v19212_v31  ;;  %v20758_v15 = vld [vmem:[#allocation50_spill] sm:$0xff]  ;;  %v11504_v6 = vsel %vm1283_vm0, 1.0, %v19212_v31  ;;  %v20763_v4 = vld [vmem:[#allocation51_spill] sm:$0xff] }
 0x2f5   : > { %20750 = vst [vmem:[#allocation228_spill] sm:$0xff] %v11470_v61  ;;  %20755 = vst [vmem:[#allocation244_spill] sm:$0xff] %v11484_v36  ;;  %vm1306_vm12 = vcmp.eq.s32.totalorder %v11164_v33, %v20758_v15  ;;  %vm1307_vm3 = vcmp.eq.s32.totalorder %v11164_v33, %v20763_v4  ;;  %v11524_v36 = vsel %vm1285_vm1, 1.0, %v19212_v31  ;;  %vm20768_vm0 = vcmp.eq.s32.totalorder %v11164_v33, %v20658_v49  ;;  %v20771_v9 = vld [vmem:[#allocation54_spill] sm:$0xff]  ;;  %v20792_v56 = vld [vmem:[#allocation59_spill] sm:$0xff]  ;;  %v11752_v15 = vpop.permute.xlu1 %684 }
 0x2f6   : > { %20740 = vst [vmem:[#allocation275_spill] sm:$0xff] %v11433_v11  ;;  %20744 = vst [vmem:[#allocation292_spill] sm:$0xff] %v11438_v62  ;;  %v11530_v35 = vsel %vm20768_vm0, 1.0, %v19212_v31  ;;  %vm20774_vm1 = vcmp.eq.s32.totalorder %v11164_v33, %v20675_v27  ;;  %vm20776_vm0 = vcmp.eq.s32.totalorder %v11164_v33, %v20676_v26  ;;  %v20778_v62 = vld [vmem:[#allocation55_spill] sm:$0xff]  ;;  %v20779_v11 = vld [vmem:[#allocation56_spill] sm:$0xff]  ;;  %vm1313_vm2 = vcmp.eq.s32.totalorder %v11164_v33, %v20786_v3 }
 0x2f7   : > { %20756 = vst [vmem:[#allocation260_spill] sm:$0xff] %v11490_v14  ;;  %20761 = vst [vmem:[#allocation278_spill] sm:$0xff] %v11504_v6  ;;  %v11544_v6 = vsel %vm20774_vm1, 1.0, %v19212_v31  ;;  %v11550_v30 = vsel %vm20776_vm0, 1.0, %v19212_v31  ;;  %vm20782_vm1 = vcmp.eq.s32.totalorder %v11164_v33, %v20685_v25  ;;  %vm20784_vm0 = vcmp.eq.s32.totalorder %v11164_v33, %v20686_v7  ;;  %v20793_v45 = vld [vmem:[#allocation60_spill] sm:$0xff]  ;;  %v20864_v3 = vld [vmem:[#allocation18_spill] sm:$0xff] }
 0x2f8   : > { %20762 = vst [vmem:[#allocation293_spill] sm:$0xff] %v11510_v12  ;;  %20767 = vst [vmem:[#allocation309_spill] sm:$0xff] %v11524_v36  ;;  %v11564_v36 = vsel %vm20782_vm1, 1.0, %v19212_v31  ;;  %v11570_v61 = vsel %vm20784_vm0, 1.0, %v19212_v31  ;;  %vm1314_vm13 = vcmp.eq.s32.totalorder %v11164_v33, %v20787_v58  ;;  %v11590_v14 = vsel %vm1292_vm5, 1.0, %v19212_v31  ;;  %v20863_v58 = vld [vmem:[#allocation17_spill] sm:$0xff] }
 0x2f9   : > { %20769 = vst [vmem:[#allocation325_spill] sm:$0xff] %v11530_v35  ;;  %20775 = vst [vmem:[#allocation214_spill] sm:$0xff] %v11544_v6  ;;  %v11584_v6 = vsel %vm1291_vm10, 1.0, %v19212_v31  ;;  %vm1315_vm1 = vcmp.eq.s32.totalorder %v11164_v33, %v20792_v56  ;;  %vm20797_vm10 = vcmp.eq.s32.totalorder %v11164_v33, %v19362_v60  ;;  %vm1317_vm5 = vcmp.eq.s32.totalorder %v11164_v33, %v20499_v17  ;;  %v20870_v56 = vld [vmem:[#allocation78_spill] sm:$0xff]  ;;  %v20923_v21 = vld [vmem:[#allocation44_spill] sm:$0xff] }
 0x2fa   : > { %20777 = vst [vmem:[#allocation229_spill] sm:$0xff] %v11550_v30  ;;  %20783 = vst [vmem:[#allocation245_spill] sm:$0xff] %v11564_v36  ;;  %v11604_v36 = vsel %vm1293_vm9, 1.0, %v19212_v31  ;;  %v11610_v12 = vsel %vm20797_vm10, 1.0, %v19212_v31  ;;  %vm1318_vm0 = vcmp.eq.s32.totalorder %v11164_v33, %v20500_v19  ;;  %v11630_v35 = vsel %vm1296_vm4, 1.0, %v19212_v31  ;;  %v20924_v41 = vld [vmem:[#allocation45_spill] sm:$0xff] }
 0x2fb   : > { %20785 = vst [vmem:[#allocation261_spill] sm:$0xff] %v11570_v61  ;;  %20790 = vst [vmem:[#allocation279_spill] sm:$0xff] %v11584_v6  ;;  %v11624_v6 = vsel %vm1295_vm14, 1.0, %v19212_v31  ;;  %vm20805_vm14 = vcmp.eq.s32.totalorder %v11164_v33, %v20400_v20  ;;  %vm20807_vm4 = vcmp.eq.s32.totalorder %v11164_v33, %v20401_v63  ;;  %v20817_v63 = vld [vmem:[#allocation67_spill] sm:$0xff]  ;;  %v20818_v20 = vld [vmem:[#allocation68_spill] sm:$0xff] }
 0x2fc   : > { %20791 = vst [vmem:[#allocation294_spill] sm:$0xff] %v11590_v14  ;;  %20796 = vst [vmem:[#allocation310_spill] sm:$0xff] %v11604_v36  ;;  %v11644_v36 = vsel %vm20805_vm14, 1.0, %v19212_v31  ;;  %v11650_v30 = vsel %vm20807_vm4, 1.0, %v19212_v31  ;;  %vm20813_vm14 = vcmp.eq.s32.totalorder %v11164_v33, %v20406_v50  ;;  %vm20815_vm4 = vcmp.eq.s32.totalorder %v11164_v33, %v20407_v37  ;;  %v20823_v37 = vld [vmem:[#allocation69_spill] sm:$0xff]  ;;  %v20824_v50 = vld [vmem:[#allocation70_spill] sm:$0xff] }
 0x2fd   : > { %20798 = vst [vmem:[#allocation326_spill] sm:$0xff] %v11610_v12  ;;  %20801 = vst [vmem:[#allocation215_spill] sm:$0xff] %v11624_v6  ;;  %v11664_v6 = vsel %vm20813_vm14, 1.0, %v19212_v31  ;;  %v11670_v61 = vsel %vm20815_vm4, 1.0, %v19212_v31  ;;  %vm1323_vm9 = vcmp.eq.s32.totalorder %v11164_v33, %v20817_v63  ;;  %vm1324_vm10 = vcmp.eq.s32.totalorder %v11164_v33, %v20818_v20 }
 0x2fe   : > { %20802 = vst [vmem:[#allocation230_spill] sm:$0xff] %v11630_v35  ;;  %20806 = vst [vmem:[#allocation246_spill] sm:$0xff] %v11644_v36  ;;  %v11684_v36 = vsel %vm1301_vm6, 1.0, %v19212_v31  ;;  %v11690_v14 = vsel %vm1302_vm7, 1.0, %v19212_v31  ;;  %vm1325_vm14 = vcmp.eq.s32.totalorder %v11164_v33, %v20823_v37  ;;  %vm1326_vm4 = vcmp.eq.s32.totalorder %v11164_v33, %v20824_v50 }
 0x2ff   : > { %20808 = vst [vmem:[#allocation262_spill] sm:$0xff] %v11650_v30  ;;  %20814 = vst [vmem:[#allocation280_spill] sm:$0xff] %v11664_v6  ;;  %v11704_v6 = vsel %vm1303_vm11, 1.0, %v19212_v31  ;;  %v11710_v12 = vsel %vm1304_vm15, 1.0, %v19212_v31  ;;  %vm1327_vm6 = vcmp.eq.s32.totalorder %v11164_v33, %v20829_v1  ;;  %vm1328_vm7 = vcmp.eq.s32.totalorder %v11164_v33, %v20830_v40 }
 0x300   : > { %20816 = vst [vmem:[#allocation295_spill] sm:$0xff] %v11670_v61  ;;  %20821 = vst [vmem:[#allocation311_spill] sm:$0xff] %v11684_v36  ;;  %v11724_v36 = vsel %vm1305_vm8, 1.0, %v19212_v31  ;;  %v11730_v35 = vsel %vm1306_vm12, 1.0, %v19212_v31  ;;  %vm1329_vm11 = vcmp.eq.s32.totalorder %v11164_v33, %v20555_v39  ;;  %vm20838_vm8 = vcmp.eq.s32.totalorder %v11164_v33, %v20764_v22  ;;  %v20947_v39 = vld [vmem:[#allocation221_spill] sm:$0xff] }
 0x301   : > { %20822 = vst [vmem:[#allocation327_spill] sm:$0xff] %v11690_v14  ;;  %20827 = vst [vmem:[#allocation216_spill] sm:$0xff] %v11704_v6  ;;  %v11744_v6 = vsel %vm1307_vm3, 1.0, %v19212_v31  ;;  %v11750_v30 = vsel %vm20838_vm8, 1.0, %v19212_v31  ;;  %vm20842_vm3 = vcmp.eq.s32.totalorder %v11164_v33, %v20770_v5  ;;  %vm20844_vm8 = vcmp.eq.s32.totalorder %v11164_v33, %v20771_v9  ;;  %v20852_v9 = vld [vmem:[#allocation16_spill] sm:$0xff]  ;;  %v20853_v5 = vld [vmem:[#allocation77_spill] sm:$0xff] }
 0x302   : > { %20828 = vst [vmem:[#allocation231_spill] sm:$0xff] %v11710_v12  ;;  %20833 = vst [vmem:[#allocation247_spill] sm:$0xff] %v11724_v36  ;;  %v11766_v36 = vsel %vm20842_vm3, 1.0, %v19212_v31  ;;  %v11772_v61 = vsel %vm20844_vm8, 1.0, %v19212_v31  ;;  %vm20848_vm3 = vcmp.eq.s32.totalorder %v11164_v33, %v20778_v62  ;;  %vm20850_vm8 = vcmp.eq.s32.totalorder %v11164_v33, %v20779_v11 }
 0x303   : > { %20834 = vst [vmem:[#allocation263_spill] sm:$0xff] %v11730_v35  ;;  %20837 = vst [vmem:[#allocation281_spill] sm:$0xff] %v11744_v6  ;;  %v11786_v6 = vsel %vm20848_vm3, 1.0, %v19212_v31  ;;  %v11792_v14 = vsel %vm20850_vm8, 1.0, %v19212_v31  ;;  %vm1335_vm12 = vcmp.eq.s32.totalorder %v11164_v33, %v20852_v9  ;;  %v11812_v12 = vsel %vm1314_vm13, 1.0, %v19212_v31  ;;  %v20948_v9 = vld [vmem:[#allocation228_spill] sm:$0xff] }
 0x304   : > { %20839 = vst [vmem:[#allocation296_spill] sm:$0xff] %v11750_v30  ;;  %20843 = vst [vmem:[#allocation312_spill] sm:$0xff] %v11766_v36  ;;  %v11806_v36 = vsel %vm1313_vm2, 1.0, %v19212_v31  ;;  %vm20861_vm13 = vcmp.eq.s32.totalorder %v11164_v33, %v20793_v45  ;;  %vm1337_vm2 = vcmp.eq.s32.totalorder %v11164_v33, %v20863_v58  ;;  %vm1338_vm8 = vcmp.eq.s32.totalorder %v11164_v33, %v20864_v3  ;;  %v20869_v45 = vld [vmem:[#allocation19_spill] sm:$0xff]  ;;  %v20936_v58 = vld [vmem:[#allocation308_spill] sm:$0xff] }
 0x305   : > { %20845 = vst [vmem:[#allocation36_spill] sm:$0xff] %v11772_v61  ;;  %20849 = vst [vmem:[#allocation217_spill] sm:$0xff] %v11786_v6  ;;  %v11826_v6 = vsel %vm1315_vm1, 1.0, %v19212_v31  ;;  %v11832_v35 = vsel %vm20861_vm13, 1.0, %v19212_v31  ;;  %vm1343_vm3 = vcmp.eq.s32.totalorder %v11752_v15, %v20625_v52  ;;  %vm1344_vm15 = vcmp.eq.s32.totalorder %v11752_v15, %v20626_v43 }
 0x306   : > { %20851 = vst [vmem:[#allocation232_spill] sm:$0xff] %v11792_v14  ;;  %20856 = vst [vmem:[#allocation248_spill] sm:$0xff] %v11806_v36  ;;  %v11850_v36 = vsel %vm1317_vm5, 1.0, %v19212_v31  ;;  %v11856_v30 = vsel %vm1318_vm0, 1.0, %v19212_v31  ;;  %vm20873_vm5 = vcmp.eq.s32.totalorder %v11164_v33, %v19473_v28  ;;  %vm20875_vm0 = vcmp.eq.s32.totalorder %v11164_v33, %v19474_v44  ;;  %v20915_v14 = vld [vmem:[#allocation40_spill] sm:$0xff] }
 0x307   : > { %20857 = vst [vmem:[#allocation264_spill] sm:$0xff] %v11812_v12  ;;  %20860 = vst [vmem:[#allocation282_spill] sm:$0xff] %v11826_v6  ;;  %v11870_v6 = vsel %vm20873_vm5, 1.0, %v19212_v31  ;;  %v11876_v61 = vsel %vm20875_vm0, 1.0, %v19212_v31  ;;  %vm20879_vm13 = vcmp.eq.s32.totalorder %v11164_v33, %v20809_v24  ;;  %vm20881_vm5 = vcmp.eq.s32.totalorder %v11164_v33, %v20810_v59 }
 0x308   : > { %20862 = vst [vmem:[#allocation297_spill] sm:$0xff] %v11832_v35  ;;  %20867 = vst [vmem:[#allocation313_spill] sm:$0xff] %v11850_v36  ;;  %v11886_v12 = vsel %vm20879_vm13, 1.0, %v19212_v31  ;;  %v11912_v19 = vsel %vm1324_vm10, 1.0, %v19212_v31  ;;  %vm1347_vm13 = vcmp.eq.s32.totalorder %v11752_v15, %v20639_v10  ;;  %v11936_v36 = vsel %vm1326_vm4, 1.0, %v19212_v31  ;;  %v20921_v35 = vld [vmem:[#allocation42_spill] sm:$0xff] }
 0x309   : > { %20868 = vst [vmem:[#allocation37_spill] sm:$0xff] %v11856_v30  ;;  %20874 = vst [vmem:[#allocation218_spill] sm:$0xff] %v11870_v6  ;;  %v11892_v30 = vsel %vm20881_vm5, 1.0, %v19212_v31  ;;  %v11906_v6 = vsel %vm1323_vm9, 1.0, %v19212_v31  ;;  %vm1348_vm5 = vcmp.eq.s32.totalorder %v11752_v15, %v20640_v8  ;;  %vm1351_vm9 = vcmp.eq.s32.totalorder %v11752_v15, %v20675_v27 }
 0x30a   : > { %20876 = vst [vmem:[#allocation233_spill] sm:$0xff] %v11876_v61  ;;  %20880 = vst [vmem:[#allocation249_spill] sm:$0xff] %v11886_v12  ;;  %v11930_v12 = vsel %vm1325_vm14, 1.0, %v19212_v31  ;;  %vm1352_vm10 = vcmp.eq.s32.totalorder %v11752_v15, %v20676_v26  ;;  %vm1353_vm0 = vcmp.eq.s32.totalorder %v11752_v15, %v20685_v25  ;;  %vm1354_vm1 = vcmp.eq.s32.totalorder %v11752_v15, %v20686_v7  ;;  %v20970_v26 = vld [vmem:[#allocation59_spill] sm:$0xff] }
 0x30b   : > { %20882 = vst [vmem:[#allocation265_spill] sm:$0xff] %v11892_v30  ;;  %20885 = vst [vmem:[#allocation283_spill] sm:$0xff] %v11906_v6  ;;  %v11954_v6 = vsel %vm1327_vm6, 1.0, %v19212_v31  ;;  %v11960_v47 = vsel %vm1328_vm7, 1.0, %v19212_v31  ;;  %vm20898_vm6 = vcmp.eq.s32.totalorder %v11164_v33, %v20556_v57  ;;  %vm20902_vm7 = vcmp.eq.s32.totalorder %v11164_v33, %v20557_v13  ;;  %v20922_v30 = vld [vmem:[#allocation43_spill] sm:$0xff] }
 0x30c   : > { %20886 = vst [vmem:[#allocation298_spill] sm:$0xff] %v11912_v19  ;;  %20889 = vst [vmem:[#allocation314_spill] sm:$0xff] %v11930_v12  ;;  %v11974_v12 = vsel %vm1329_vm11, 1.0, %v19212_v31  ;;  %v11980_v61 = vsel %vm20898_vm6, 1.0, %v19212_v31  ;;  %v11990_v19 = vsel %vm20902_vm7, 1.0, %v19212_v31  ;;  %vm20904_vm11 = vcmp.eq.s32.totalorder %v11164_v33, %v20558_v53  ;;  %v20943_v13 = vld [vmem:[#allocation331_spill] sm:$0xff] }
 0x30d   : > { %20890 = vst [vmem:[#allocation328_spill] sm:$0xff] %v11936_v36  ;;  %20893 = vst [vmem:[#allocation219_spill] sm:$0xff] %v11954_v6  ;;  %vm20906_vm6 = vcmp.eq.s32.totalorder %v11164_v33, %v20559_v16  ;;  %vm20908_vm7 = vcmp.eq.s32.totalorder %v11164_v33, %v20560_v51  ;;  %v20916_v36 = vld [vmem:[#allocation41_spill] sm:$0xff]  ;;  %vm1364_vm14 = vcmp.eq.s32.totalorder %v11752_v15, %v20922_v30  ;;  %v20940_v51 = vld [vmem:[#allocation324_spill] sm:$0xff] }
 0x30e   : > { %20894 = vst [vmem:[#allocation234_spill] sm:$0xff] %v11960_v47  ;;  %20897 = vst [vmem:[#allocation250_spill] sm:$0xff] %v11974_v12  ;;  %v11996_v47 = vsel %vm20904_vm11, 1.0, %v19212_v31  ;;  %v12006_v6 = vsel %vm20906_vm6, 1.0, %v19212_v31  ;;  %vm20911_vm6 = vcmp.eq.s32.totalorder %v11164_v33, %v20853_v5  ;;  %vm1363_vm11 = vcmp.eq.s32.totalorder %v11752_v15, %v20921_v35 }
 0x30f   : > { %20899 = vst [vmem:[#allocation272_spill] sm:$0xff] %v11980_v61  ;;  %20903 = vst [vmem:[#allocation284_spill] sm:$0xff] %v11990_v19  ;;  %v12012_v61 = vsel %vm20908_vm7, 1.0, %v19212_v31  ;;  %v12032_v46 = vsel %vm20911_vm6, 1.0, %v19212_v31  ;;  %v20913_v19 = vld [vmem:[#allocation38_spill] sm:$0xff]  ;;  %vm20920_vm6 = vcmp.eq.s32.totalorder %v11752_v15, %v20624_v23  ;;  %vm1365_vm4 = vcmp.eq.s32.totalorder %v11752_v15, %v20923_v21  ;;  %v20935_v23 = vld [vmem:[#allocation236_spill] sm:$0xff] }
 0x310   : > { %20905 = vst [vmem:[#allocation299_spill] sm:$0xff] %v11996_v47  ;;  %20907 = vst [vmem:[#allocation315_spill] sm:$0xff] %v12006_v6  ;;  %v12026_v47 = vsel %vm1335_vm12, 1.0, %v19212_v31  ;;  %vm20919_vm12 = vcmp.eq.s32.totalorder %v11752_v15, %v20623_v42  ;;  %v2366_v12 = vsel %vm20920_vm6, 1.0, %v19212_v31  ;;  %vm1366_vm7 = vcmp.eq.s32.totalorder %v11752_v15, %v20924_v41 }
 0x311   : > { %20909 = vst [vmem:[#allocation329_spill] sm:$0xff] %v12012_v61  ;;  %20910 = vst [vmem:[#allocation220_spill] sm:$0xff] %v12026_v47  ;;  %v2365_v17 = vsel %vm20919_vm12, 1.0, %v19212_v31  ;;  %v12072_v6 = vsel %vm1338_vm8, 1.0, %v19212_v31  ;;  %v2367_v47 = vsel %vm1343_vm3, 1.0, %v19212_v31  ;;  %v2368_v61 = vsel %vm1344_vm15, 1.0, %v19212_v31 }
 0x312   : > { %20912 = vst [vmem:[#allocation235_spill] sm:$0xff] %v12032_v46  ;;  %v12066_v46 = vsel %vm1337_vm2, 1.0, %v19212_v31  ;;  %20926 = vst [vmem:[#allocation273_spill] sm:$0xff] %v12072_v6  ;;  %vm1367_vm2 = vcmp.eq.s32.totalorder %v11752_v15, %v20751_v48  ;;  %vm1368_vm12 = vcmp.eq.s32.totalorder %v11752_v15, %v20752_v0  ;;  %vm20929_vm3 = vcmp.eq.s32.totalorder %v11164_v33, %v20869_v45  ;;  %v20939_v45 = vld [vmem:[#allocation276_spill] sm:$0xff] }
 0x313   : > { %20925 = vst [vmem:[#allocation251_spill] sm:$0xff] %v12066_v46  ;;  %v12094_v52 = vsel %vm20929_vm3, 1.0, %v19212_v31  ;;  %vm20931_vm15 = vcmp.eq.s32.totalorder %v11164_v33, %v20870_v56  ;;  %v20937_v6 = vmax.f32 %v20935_v23, %v20936_v58  ;;  %v20941_v16 = vmax.f32 %v20939_v45, %v20940_v51  ;;  %v20944_v33 = vld [vmem:[#allocation213_spill] sm:$0xff]  ;;  %v20961_v46 = vld [vmem:[#allocation244_spill] sm:$0xff] }
 0x314   : > { %20930 = vst [vmem:[#allocation285_spill] sm:$0xff] %v12094_v52  ;;  %v12100_v43 = vsel %vm20931_vm15, 1.0, %v19212_v31  ;;  %v20945_v56 = vmax.f32 %v20943_v13, %v20944_v33  ;;  %v20949_v52 = vmax.f32 %v20947_v39, %v20948_v9  ;;  %vm20951_vm8 = vcmp.eq.s32.totalorder %v11752_v15, %v20627_v29  ;;  %v20953_v13 = vld [vmem:[#allocation50_spill] sm:$0xff]  ;;  %v20956_v45 = vld [vmem:[#allocation53_spill] sm:$0xff]  ;;  %v21044_v0 = vld [vmem:[#allocation268_spill] sm:$0xff] }
 0x315   : > { %20932 = vst [vmem:[#allocation300_spill] sm:$0xff] %v12100_v43  ;;  %v12109_v3 = vmax.f32 %v20937_v6, %v2365_v17  ;;  %v12114_v53 = vmax.f32 %v20941_v16, %v2366_v12  ;;  %v2369_v17 = vsel %vm20951_vm8, 1.0, %v19212_v31  ;;  %vm20952_vm6 = vcmp.eq.s32.totalorder %v11752_v15, %v20628_v38  ;;  %v20958_v12 = vld [vmem:[#allocation57_spill] sm:$0xff]  ;;  %v20988_v38 = vld [vmem:[#allocation206_spill] sm:$0xff]  ;;  %v21045_v48 = vld [vmem:[#allocation280_spill] sm:$0xff] }
 0x316   : > { %v12119_v57 = vmax.f32 %v20945_v56, %v2367_v47  ;;  %v12124_v5 = vmax.f32 %v20949_v52, %v2368_v61  ;;  %v2370_v16 = vsel %vm20952_vm6, 1.0, %v19212_v31  ;;  %v2371_v39 = vsel %vm1347_vm13, 1.0, %v19212_v31  ;;  %v20957_v56 = vld [vmem:[#allocation54_spill] sm:$0xff]  ;;  %v20960_v33 = vld [vmem:[#allocation277_spill] sm:$0xff] }
 0x317   : > { %20938 = vst [vmem:[#allocation316_spill] sm:$0xff] %v12109_v3  ;;  %20942 = vst [vmem:[#allocation330_spill] sm:$0xff] %v12114_v53  ;;  %v2372_v51 = vsel %vm1348_vm5, 1.0, %v19212_v31  ;;  %vm20954_vm8 = vcmp.eq.s32.totalorder %v11752_v15, %v20657_v18  ;;  %vm20955_vm6 = vcmp.eq.s32.totalorder %v11752_v15, %v20658_v49  ;;  %vm1371_vm15 = vcmp.eq.s32.totalorder %v11752_v15, %v20763_v4  ;;  %v20959_v47 = vld [vmem:[#allocation58_spill] sm:$0xff]  ;;  %v20964_v53 = vld [vmem:[#allocation252_spill] sm:$0xff] }
 0x318   : > { %20946 = vst [vmem:[#allocation236_spill] sm:$0xff] %v12119_v57  ;;  %20950 = vst [vmem:[#allocation308_spill] sm:$0xff] %v12124_v5  ;;  %v2373_v23 = vsel %vm20954_vm8, 1.0, %v19212_v31  ;;  %v2374_v52 = vsel %vm20955_vm6, 1.0, %v19212_v31  ;;  %vm1372_vm13 = vcmp.eq.s32.totalorder %v11752_v15, %v20764_v22  ;;  %vm1373_vm3 = vcmp.eq.s32.totalorder %v11752_v15, %v20956_v45  ;;  %v20965_v3 = vld [vmem:[#allocation260_spill] sm:$0xff]  ;;  %v20984_v49 = vld [vmem:[#allocation317_spill] sm:$0xff] }
 0x319   : > { %vm1374_vm5 = vcmp.eq.s32.totalorder %v11752_v15, %v20957_v56  ;;  %v2375_v58 = vsel %vm1351_vm9, 1.0, %v19212_v31  ;;  %v2376_v9 = vsel %vm1352_vm10, 1.0, %v19212_v31  ;;  %v2377_v6 = vsel %vm1353_vm0, 1.0, %v19212_v31  ;;  %v20985_v18 = vld [vmem:[#allocation325_spill] sm:$0xff]  ;;  %v20989_v29 = vld [vmem:[#allocation214_spill] sm:$0xff]  ;;  %v21108_v56 = vld [vmem:[#allocation320_spill] sm:$0xff] }
 0x31a   : > { %v2378_v61 = vsel %vm1354_vm1, 1.0, %v19212_v31  ;;  %v20962_v5 = vmax.f32 %v20960_v33, %v20961_v46  ;;  %v20966_v43 = vmax.f32 %v20964_v53, %v20965_v3  ;;  %vm20968_vm1 = vcmp.eq.s32.totalorder %v11752_v15, %v20691_v32  ;;  %v20971_v46 = vld [vmem:[#allocation60_spill] sm:$0xff]  ;;  %v20973_v53 = vld [vmem:[#allocation278_spill] sm:$0xff]  ;;  %v20981_v32 = vld [vmem:[#allocation309_spill] sm:$0xff] }
 0x31b   : > { %v2379_v7 = vsel %vm20968_vm1, 1.0, %v19212_v31  ;;  %vm20969_vm0 = vcmp.eq.s32.totalorder %v11752_v15, %v20692_v55  ;;  %v20986_v8 = vmax.f32 %v20984_v49, %v20985_v18  ;;  %v21004_v49 = vld [vmem:[#allocation267_spill] sm:$0xff]  ;;  %vm21012_vm1 = vcmp.eq.s32.totalorder %v11752_v15, %v19361_v2  ;;  %v21109_v45 = vld [vmem:[#allocation36_spill] sm:$0xff] }
 0x31c   : > { %v12189_v57 = vmax.f32 %v20962_v5, %v2369_v17  ;;  %v12194_v42 = vmax.f32 %v20966_v43, %v2370_v16  ;;  %v2380_v25 = vsel %vm20969_vm0, 1.0, %v19212_v31  ;;  %v20972_v5 = vld [vmem:[#allocation266_spill] sm:$0xff]  ;;  %v20976_v17 = vld [vmem:[#allocation63_spill] sm:$0xff]  ;;  %v20977_v16 = vld [vmem:[#allocation293_spill] sm:$0xff]  ;;  %vm21013_vm0 = vcmp.eq.s32.totalorder %v11752_v15, %v19362_v60 }
 0x31d   : > { %v20974_v43 = vmax.f32 %v20972_v5, %v20973_v53  ;;  %v20978_v33 = vmax.f32 %v20976_v17, %v20977_v16  ;;  %v12226_v10 = vmax.f32 %v20986_v8, %v2374_v52  ;;  %v20990_v5 = vmax.f32 %v20988_v38, %v20989_v29  ;;  %v20992_v53 = vld [vmem:[#allocation64_spill] sm:$0xff]  ;;  %v20996_v16 = vld [vmem:[#allocation237_spill] sm:$0xff]  ;;  %v21005_v52 = vld [vmem:[#allocation279_spill] sm:$0xff] }
 0x31e   : > { %20963 = vst [vmem:[#allocation276_spill] sm:$0xff] %v12189_v57  ;;  %20967 = vst [vmem:[#allocation324_spill] sm:$0xff] %v12194_v42  ;;  %v20980_v57 = vld [vmem:[#allocation301_spill] sm:$0xff]  ;;  %v21006_v29 = vmax.f32 %v21004_v49, %v21005_v52  ;;  %vm21016_vm9 = vcmp.eq.s32.totalorder %v11752_v15, %v20913_v19  ;;  %vm21019_vm6 = vcmp.eq.s32.totalorder %v11752_v15, %v20916_v36  ;;  %v21020_v49 = vld [vmem:[#allocation302_spill] sm:$0xff] }
 0x31f   : > { %v12211_v3 = vmax.f32 %v20974_v43, %v2371_v39  ;;  %v12216_v42 = vmax.f32 %v20978_v33, %v2372_v51  ;;  %v20982_v55 = vmax.f32 %v20980_v57, %v20981_v32  ;;  %20987 = vst [vmem:[#allocation228_spill] sm:$0xff] %v12226_v10  ;;  %v12231_v39 = vmax.f32 %v20990_v5, %v2375_v58  ;;  %v20993_v43 = vld [vmem:[#allocation229_spill] sm:$0xff]  ;;  %v21008_v58 = vld [vmem:[#allocation286_spill] sm:$0xff] }
 0x320   : > { %v20994_v17 = vmax.f32 %v20992_v53, %v20993_v43  ;;  %v20997_v33 = vld [vmem:[#allocation245_spill] sm:$0xff]  ;;  %v12251_v38 = vmax.f32 %v21006_v29, %v2379_v7  ;;  %v21009_v5 = vld [vmem:[#allocation294_spill] sm:$0xff]  ;;  %vm1383_vm10 = vcmp.eq.s32.totalorder %v11752_v15, %v19473_v28  ;;  %vm1385_vm8 = vcmp.eq.s32.totalorder %v11752_v15, %v20809_v24  ;;  %v21172_v24 = vld [vmem:[#allocation28_spill] sm:$0xff] }
 0x321   : > { %20975 = vst [vmem:[#allocation331_spill] sm:$0xff] %v12211_v3  ;;  %20979 = vst [vmem:[#allocation213_spill] sm:$0xff] %v12216_v42  ;;  %v12221_v27 = vmax.f32 %v20982_v55, %v2373_v23  ;;  %v20998_v57 = vmax.f32 %v20996_v16, %v20997_v33  ;;  %v21000_v55 = vld [vmem:[#allocation253_spill] sm:$0xff]  ;;  %v21010_v53 = vmax.f32 %v21008_v58, %v21009_v5  ;;  %v21015_v7 = vld [vmem:[#allocation62_spill] sm:$0xff]  ;;  %v2386_v33 = vsel %vm21019_vm6, 1.0, %v19212_v31 }
 0x322   : > { %20991 = vst [vmem:[#allocation277_spill] sm:$0xff] %v12231_v39  ;;  %v12236_v51 = vmax.f32 %v20994_v17, %v2376_v9  ;;  %v21001_v23 = vld [vmem:[#allocation261_spill] sm:$0xff]  ;;  %21007 = vst [vmem:[#allocation266_spill] sm:$0xff] %v12251_v38  ;;  %vm1387_vm6 = vcmp.eq.s32.totalorder %v11752_v15, %v20817_v63  ;;  %v21021_v52 = vld [vmem:[#allocation310_spill] sm:$0xff]  ;;  %v21110_v22 = vmax.f32 %v21108_v56, %v21109_v45  ;;  %v12512_v56 = vpop.permute.xlu0 %687 }
 0x323   : > { %20983 = vst [vmem:[#allocation221_spill] sm:$0xff] %v12221_v27  ;;  %v12241_v32 = vmax.f32 %v20998_v57, %v2377_v6  ;;  %v21002_v18 = vmax.f32 %v21000_v55, %v21001_v23  ;;  %v12256_v9 = vmax.f32 %v21010_v53, %v2380_v25  ;;  %v2381_v6 = vsel %vm21012_vm1, 1.0, %v19212_v31  ;;  %v21014_v43 = vld [vmem:[#allocation61_spill] sm:$0xff]  ;;  %v21024_v5 = vld [vmem:[#allocation318_spill] sm:$0xff] }
 0x324   : > { %20995 = vst [vmem:[#allocation244_spill] sm:$0xff] %v12236_v51  ;;  %v2383_v25 = vsel %vm21016_vm9, 1.0, %v19212_v31  ;;  %vm21017_vm1 = vcmp.eq.s32.totalorder %v11752_v15, %v20914_v34  ;;  %vm1384_vm9 = vcmp.eq.s32.totalorder %v11752_v15, %v19474_v44  ;;  %v2387_v57 = vsel %vm1363_vm11, 1.0, %v19212_v31  ;;  %v21025_v53 = vld [vmem:[#allocation326_spill] sm:$0xff] }
 0x325   : > { %20999 = vst [vmem:[#allocation252_spill] sm:$0xff] %v12241_v32  ;;  %v12246_v8 = vmax.f32 %v21002_v18, %v2378_v61  ;;  %21011 = vst [vmem:[#allocation278_spill] sm:$0xff] %v12256_v9  ;;  %v2382_v61 = vsel %vm21013_vm0, 1.0, %v19212_v31  ;;  %v2384_v17 = vsel %vm21017_vm1, 1.0, %v19212_v31  ;;  %vm21018_vm0 = vcmp.eq.s32.totalorder %v11752_v15, %v20915_v14  ;;  %v21040_v10 = vld [vmem:[#allocation254_spill] sm:$0xff] }
 0x326   : > { %v2385_v16 = vsel %vm21018_vm0, 1.0, %v19212_v31  ;;  %vm1386_vm1 = vcmp.eq.s32.totalorder %v11752_v15, %v20810_v59  ;;  %v2388_v55 = vsel %vm1364_vm14, 1.0, %v19212_v31  ;;  %v2389_v23 = vsel %vm1365_vm4, 1.0, %v19212_v31  ;;  %v21041_v27 = vld [vmem:[#allocation262_spill] sm:$0xff] }
 0x327   : > { %21003 = vst [vmem:[#allocation260_spill] sm:$0xff] %v12246_v8  ;;  %v2390_v18 = vsel %vm1366_vm7, 1.0, %v19212_v31  ;;  %vm1388_vm11 = vcmp.eq.s32.totalorder %v11752_v15, %v20818_v20  ;;  %vm1389_vm0 = vcmp.eq.s32.totalorder %v11752_v15, %v20823_v37  ;;  %vm1390_vm14 = vcmp.eq.s32.totalorder %v11752_v15, %v20824_v50  ;;  %v21168_v37 = vld [vmem:[#allocation257_spill] sm:$0xff] }
 0x328   : > { %v21022_v29 = vmax.f32 %v21020_v49, %v21021_v52  ;;  %v21026_v9 = vmax.f32 %v21024_v5, %v21025_v53  ;;  %v2391_v8 = vsel %vm1367_vm2, 1.0, %v19212_v31  ;;  %v2392_v32 = vsel %vm1368_vm12, 1.0, %v19212_v31  ;;  %v21029_v49 = vld [vmem:[#allocation215_spill] sm:$0xff]  ;;  %v21032_v52 = vld [vmem:[#allocation222_spill] sm:$0xff]  ;;  %v21169_v20 = vld [vmem:[#allocation265_spill] sm:$0xff] }
 0x329   : > { %v21042_v42 = vmax.f32 %v21040_v10, %v21041_v27  ;;  %vm21068_vm2 = vcmp.eq.s32.totalorder %v11752_v15, %v20757_v54  ;;  %vm21069_vm12 = vcmp.eq.s32.totalorder %v11752_v15, %v20953_v13  ;;  %v21112_v13 = vld [vmem:[#allocation209_spill] sm:$0xff]  ;;  %v21170_v63 = vmax.f32 %v21168_v37, %v21169_v20  ;;  %v21183_v37 = vld [vmem:[#allocation314_spill] sm:$0xff] }
 0x32a   : > { %v12321_v58 = vmax.f32 %v21022_v29, %v2381_v6  ;;  %v12326_v38 = vmax.f32 %v21026_v9, %v2382_v61  ;;  %v21028_v6 = vld [vmem:[#allocation207_spill] sm:$0xff]  ;;  %v21033_v29 = vld [vmem:[#allocation230_spill] sm:$0xff]  ;;  %v21113_v54 = vld [vmem:[#allocation217_spill] sm:$0xff] }
 0x32b   : > { %v21030_v9 = vmax.f32 %v21028_v6, %v21029_v49  ;;  %v21034_v5 = vmax.f32 %v21032_v52, %v21033_v29  ;;  %v12358_v3 = vmax.f32 %v21042_v42, %v2386_v33  ;;  %v21046_v6 = vmax.f32 %v21044_v0, %v21045_v48  ;;  %v21048_v49 = vld [vmem:[#allocation287_spill] sm:$0xff]  ;;  %v21060_v42 = vld [vmem:[#allocation208_spill] sm:$0xff] }
 0x32c   : > { %21023 = vst [vmem:[#allocation63_spill] sm:$0xff] %v12321_v58  ;;  %21027 = vst [vmem:[#allocation293_spill] sm:$0xff] %v12326_v38  ;;  %v21036_v38 = vld [vmem:[#allocation238_spill] sm:$0xff]  ;;  %v21052_v29 = vld [vmem:[#allocation303_spill] sm:$0xff] }
 0x32d   : > { %v12343_v61 = vmax.f32 %v21030_v9, %v2383_v25  ;;  %v12348_v53 = vmax.f32 %v21034_v5, %v2384_v17  ;;  %v21037_v58 = vld [vmem:[#allocation246_spill] sm:$0xff]  ;;  %21043 = vst [vmem:[#allocation325_spill] sm:$0xff] %v12358_v3  ;;  %v12363_v25 = vmax.f32 %v21046_v6, %v2387_v57  ;;  %v21049_v9 = vld [vmem:[#allocation295_spill] sm:$0xff]  ;;  %v21061_v33 = vld [vmem:[#allocation216_spill] sm:$0xff] }
 0x32e   : > { %v21038_v51 = vmax.f32 %v21036_v38, %v21037_v58  ;;  %v21050_v52 = vmax.f32 %v21048_v49, %v21049_v9  ;;  %v21053_v5 = vld [vmem:[#allocation311_spill] sm:$0xff]  ;;  %v21062_v48 = vmax.f32 %v21060_v42, %v21061_v33  ;;  %v21070_v9 = vld [vmem:[#allocation73_spill] sm:$0xff] }
 0x32f   : > { %21031 = vst [vmem:[#allocation301_spill] sm:$0xff] %v12343_v61  ;;  %21035 = vst [vmem:[#allocation309_spill] sm:$0xff] %v12348_v53  ;;  %v21054_v38 = vmax.f32 %v21052_v29, %v21053_v5  ;;  %v21057_v58 = vld [vmem:[#allocation327_spill] sm:$0xff]  ;;  %vm1393_vm7 = vcmp.eq.s32.totalorder %v11752_v15, %v21070_v9  ;;  %v2397_v29 = vsel %vm1373_vm3, 1.0, %v19212_v31  ;;  %v2398_v5 = vsel %vm1374_vm5, 1.0, %v19212_v31 }
 0x330   : > { %v12353_v39 = vmax.f32 %v21038_v51, %v2385_v16  ;;  %21047 = vst [vmem:[#allocation206_spill] sm:$0xff] %v12363_v25  ;;  %v12368_v17 = vmax.f32 %v21050_v52, %v2388_v55  ;;  %v21056_v16 = vld [vmem:[#allocation319_spill] sm:$0xff]  ;;  %v12383_v0 = vmax.f32 %v21062_v48, %v2391_v8  ;;  %v21071_v8 = vld [vmem:[#allocation74_spill] sm:$0xff]  ;;  %v2396_v52 = vsel %vm1372_vm13, 1.0, %v19212_v31 }
 0x331   : > { %v12373_v51 = vmax.f32 %v21054_v38, %v2389_v23  ;;  %v21058_v27 = vmax.f32 %v21056_v16, %v21057_v58  ;;  %v21064_v57 = vld [vmem:[#allocation223_spill] sm:$0xff]  ;;  %v2393_v23 = vsel %vm21068_vm2, 1.0, %v19212_v31  ;;  %vm1394_vm4 = vcmp.eq.s32.totalorder %v11752_v15, %v21071_v8  ;;  %v21073_v16 = vld [vmem:[#allocation76_spill] sm:$0xff]  ;;  %v21074_v58 = vld [vmem:[#allocation14_spill] sm:$0xff] }
 0x332   : > { %21039 = vst [vmem:[#allocation317_spill] sm:$0xff] %v12353_v39  ;;  %21051 = vst [vmem:[#allocation214_spill] sm:$0xff] %v12368_v17  ;;  %v21065_v6 = vld [vmem:[#allocation231_spill] sm:$0xff]  ;;  %vm21076_vm3 = vcmp.eq.s32.totalorder %v11752_v15, %v20778_v62  ;;  %vm21077_vm5 = vcmp.eq.s32.totalorder %v11752_v15, %v20779_v11  ;;  %v12490_v4 = vmax.f32 %v21110_v22, %v2398_v5 }
 0x333   : > { %21055 = vst [vmem:[#allocation64_spill] sm:$0xff] %v12373_v51  ;;  %v12378_v10 = vmax.f32 %v21058_v27, %v2390_v18  ;;  %21063 = vst [vmem:[#allocation237_spill] sm:$0xff] %v12383_v0  ;;  %v21066_v49 = vmax.f32 %v21064_v57, %v21065_v6  ;;  %v2394_v18 = vsel %vm21069_vm12, 1.0, %v19212_v31  ;;  %v21072_v38 = vld [vmem:[#allocation75_spill] sm:$0xff]  ;;  %v2399_v42 = vsel %vm21076_vm3, 1.0, %v19212_v31  ;;  %v21080_v6 = vld [vmem:[#allocation16_spill] sm:$0xff] }
 0x334   : > { %v21075_v27 = vld [vmem:[#allocation15_spill] sm:$0xff]  ;;  %v2400_v33 = vsel %vm21077_vm5, 1.0, %v19212_v31  ;;  %vm21079_vm12 = vcmp.eq.s32.totalorder %v11752_v15, %v20959_v47  ;;  %vm1399_vm13 = vcmp.eq.s32.totalorder %v11752_v15, %v21080_v6  ;;  %v21083_v0 = vld [vmem:[#allocation18_spill] sm:$0xff]  ;;  %21111 = vst [vmem:[#allocation294_spill] sm:$0xff] %v12490_v4 }
 0x335   : > { %21059 = vst [vmem:[#allocation229_spill] sm:$0xff] %v12378_v10  ;;  %v12388_v55 = vmax.f32 %v21066_v49, %v2392_v32  ;;  %v2395_v32 = vsel %vm1371_vm15, 1.0, %v19212_v31  ;;  %vm21078_vm15 = vcmp.eq.s32.totalorder %v11752_v15, %v20958_v12  ;;  %v2402_v57 = vsel %vm21079_vm12, 1.0, %v19212_v31  ;;  %v21081_v49 = vld [vmem:[#allocation77_spill] sm:$0xff]  ;;  %v21084_v10 = vld [vmem:[#allocation239_spill] sm:$0xff] }
 0x336   : > { %v2401_v48 = vsel %vm21078_vm15, 1.0, %v19212_v31  ;;  %vm1400_vm3 = vcmp.eq.s32.totalorder %v11752_v15, %v21081_v49  ;;  %v21085_v51 = vld [vmem:[#allocation247_spill] sm:$0xff]  ;;  %vm21092_vm15 = vcmp.eq.s32.totalorder %v11752_v15, %v20970_v26  ;;  %vm21093_vm12 = vcmp.eq.s32.totalorder %v11752_v15, %v20971_v46  ;;  %v21105_v26 = vld [vmem:[#allocation312_spill] sm:$0xff] }
 0x337   : > { %21067 = vst [vmem:[#allocation245_spill] sm:$0xff] %v12388_v55  ;;  %v21082_v55 = vld [vmem:[#allocation17_spill] sm:$0xff]  ;;  %v21086_v17 = vmax.f32 %v21084_v10, %v21085_v51  ;;  %v21088_v3 = vld [vmem:[#allocation255_spill] sm:$0xff]  ;;  %v2403_v47 = vsel %vm21092_vm15, 1.0, %v19212_v31  ;;  %v2404_v12 = vsel %vm21093_vm12, 1.0, %v19212_v31  ;;  %v21100_v10 = vld [vmem:[#allocation288_spill] sm:$0xff]  ;;  %vm21136_vm15 = vcmp.eq.s32.totalorder %v11752_v15, %v21014_v43 }
 0x338   : > { %v21089_v39 = vld [vmem:[#allocation263_spill] sm:$0xff]  ;;  %v21096_v51 = vld [vmem:[#allocation269_spill] sm:$0xff]  ;;  %vm21137_vm12 = vcmp.eq.s32.totalorder %v11752_v15, %v21015_v7 }
 0x339   : > { %v12453_v25 = vmax.f32 %v21086_v17, %v2393_v23  ;;  %v21090_v53 = vmax.f32 %v21088_v3, %v21089_v39  ;;  %v21094_v11 = vld [vmem:[#allocation19_spill] sm:$0xff]  ;;  %v21095_v17 = vld [vmem:[#allocation78_spill] sm:$0xff]  ;;  %v21097_v3 = vld [vmem:[#allocation281_spill] sm:$0xff] }
 0x33a   : > { %v21098_v39 = vmax.f32 %v21096_v51, %v21097_v3  ;;  %v21101_v23 = vld [vmem:[#allocation296_spill] sm:$0xff]  ;;  %v21114_v51 = vmax.f32 %v21112_v13, %v21113_v54  ;;  %v21128_v54 = vld [vmem:[#allocation270_spill] sm:$0xff] }
 0x33b   : > { %21087 = vst [vmem:[#allocation253_spill] sm:$0xff] %v12453_v25  ;;  %v12458_v61 = vmax.f32 %v21090_v53, %v2394_v18  ;;  %v21102_v18 = vmax.f32 %v21100_v10, %v21101_v23  ;;  %v21104_v25 = vld [vmem:[#allocation304_spill] sm:$0xff]  ;;  %v21129_v13 = vld [vmem:[#allocation282_spill] sm:$0xff] }
 0x33c   : > { %v12475_v53 = vmax.f32 %v21098_v39, %v2395_v32  ;;  %v21106_v46 = vmax.f32 %v21104_v25, %v21105_v26  ;;  %v12495_v32 = vmax.f32 %v21114_v51, %v2399_v42  ;;  %v21116_v3 = vld [vmem:[#allocation224_spill] sm:$0xff]  ;;  %v21130_v5 = vmax.f32 %v21128_v54, %v21129_v13  ;;  %v21132_v51 = vld [vmem:[#allocation289_spill] sm:$0xff] }
 0x33d   : > { %21091 = vst [vmem:[#allocation261_spill] sm:$0xff] %v12458_v61  ;;  %v12480_v61 = vmax.f32 %v21102_v18, %v2396_v52  ;;  %v21117_v39 = vld [vmem:[#allocation232_spill] sm:$0xff]  ;;  %v2412_v54 = vsel %vm1388_vm11, 1.0, %v19212_v31  ;;  %v2413_v13 = vsel %vm1389_vm0, 1.0, %v19212_v31 }
 0x33e   : > { %21099 = vst [vmem:[#allocation267_spill] sm:$0xff] %v12475_v53  ;;  %v12485_v62 = vmax.f32 %v21106_v46, %v2397_v29  ;;  %21115 = vst [vmem:[#allocation302_spill] sm:$0xff] %v12495_v32  ;;  %v21118_v10 = vmax.f32 %v21116_v3, %v21117_v39  ;;  %v21120_v23 = vld [vmem:[#allocation240_spill] sm:$0xff]  ;;  %v12517_v42 = vmax.f32 %v21130_v5, %v2403_v47  ;;  %v21139_v47 = vld [vmem:[#allocation21_spill] sm:$0xff]  ;;  %v2414_v5 = vsel %vm1390_vm14, 1.0, %v19212_v31 }
 0x33f   : > { %21103 = vst [vmem:[#allocation279_spill] sm:$0xff] %v12480_v61  ;;  %v21121_v18 = vld [vmem:[#allocation248_spill] sm:$0xff]  ;;  %vm1406_vm5 = vcmp.eq.s32.totalorder %v12512_v56, %v21139_v47  ;;  %v21154_v53 = vld [vmem:[#allocation26_spill] sm:$0xff]  ;;  %vm1413_vm14 = vcmp.eq.s32.totalorder %v12512_v56, %v21172_v24 }
 0x340   : > { %21107 = vst [vmem:[#allocation286_spill] sm:$0xff] %v12485_v62  ;;  %v12500_v52 = vmax.f32 %v21118_v10, %v2400_v33  ;;  %v21122_v26 = vmax.f32 %v21120_v23, %v21121_v18  ;;  %v21124_v25 = vld [vmem:[#allocation256_spill] sm:$0xff]  ;;  %21131 = vst [vmem:[#allocation207_spill] sm:$0xff] %v12517_v42  ;;  %v21133_v33 = vld [vmem:[#allocation297_spill] sm:$0xff]  ;;  %v2408_v23 = vsel %vm1384_vm9, 1.0, %v19212_v31  ;;  %v2409_v18 = vsel %vm1385_vm8, 1.0, %v19212_v31 }
 0x341   : > { %v21125_v29 = vld [vmem:[#allocation264_spill] sm:$0xff]  ;;  %v21134_v3 = vmax.f32 %v21132_v51, %v21133_v33  ;;  %v21143_v33 = vld [vmem:[#allocation25_spill] sm:$0xff]  ;;  %vm1411_vm11 = vcmp.eq.s32.totalorder %v12512_v56, %v21154_v53 }
 0x342   : > { %21119 = vst [vmem:[#allocation310_spill] sm:$0xff] %v12500_v52  ;;  %v12505_v46 = vmax.f32 %v21122_v26, %v2401_v48  ;;  %v21126_v45 = vmax.f32 %v21124_v25, %v21125_v29  ;;  %v2405_v48 = vsel %vm21136_vm15, 1.0, %v19212_v31  ;;  %v21138_v10 = vld [vmem:[#allocation20_spill] sm:$0xff]  ;;  %v2410_v26 = vsel %vm1386_vm1, 1.0, %v19212_v31  ;;  %v21140_v25 = vld [vmem:[#allocation22_spill] sm:$0xff]  ;;  %v21141_v29 = vld [vmem:[#allocation23_spill] sm:$0xff] }
 0x343   : > { %v12522_v39 = vmax.f32 %v21134_v3, %v2404_v12  ;;  %vm1405_vm2 = vcmp.eq.s32.totalorder %v12512_v56, %v21138_v10  ;;  %v2407_v12 = vsel %vm1383_vm10, 1.0, %v19212_v31  ;;  %vm1407_vm15 = vcmp.eq.s32.totalorder %v12512_v56, %v21140_v25  ;;  %v21142_v51 = vld [vmem:[#allocation24_spill] sm:$0xff]  ;;  %v21144_v3 = vld [vmem:[#allocation305_spill] sm:$0xff] }
 0x344   : > { %21123 = vst [vmem:[#allocation318_spill] sm:$0xff] %v12505_v46  ;;  %v12510_v22 = vmax.f32 %v21126_v45, %v2402_v57  ;;  %v2406_v57 = vsel %vm21137_vm12, 1.0, %v19212_v31  ;;  %vm1408_vm10 = vcmp.eq.s32.totalorder %v12512_v56, %v21141_v29  ;;  %v2411_v45 = vsel %vm1387_vm6, 1.0, %v19212_v31  ;;  %v21148_v46 = vld [vmem:[#allocation321_spill] sm:$0xff] }
 0x345   : > { %21135 = vst [vmem:[#allocation215_spill] sm:$0xff] %v12522_v39  ;;  %vm1409_vm8 = vcmp.eq.s32.totalorder %v12512_v56, %v21142_v51  ;;  %vm1410_vm9 = vcmp.eq.s32.totalorder %v12512_v56, %v21143_v33  ;;  %v21145_v39 = vld [vmem:[#allocation313_spill] sm:$0xff]  ;;  %vm21152_vm1 = vcmp.eq.s32.totalorder %v11752_v15, %v20829_v1  ;;  %vm21153_vm6 = vcmp.eq.s32.totalorder %v11752_v15, %v20830_v40 }
 0x346   : > { %21127 = vst [vmem:[#allocation326_spill] sm:$0xff] %v12510_v22  ;;  %v21146_v42 = vmax.f32 %v21144_v3, %v21145_v39  ;;  %v21149_v52 = vld [vmem:[#allocation37_spill] sm:$0xff]  ;;  %v2415_v62 = vsel %vm21152_vm1, 1.0, %v19212_v31  ;;  %v2416_v61 = vsel %vm21153_vm6, 1.0, %v19212_v31  ;;  %v21156_v39 = vld [vmem:[#allocation210_spill] sm:$0xff]  ;;  %v12616_v59 = vmax.f32 %v21170_v63, %v2410_v26 }
 0x347   : > { %v21150_v32 = vmax.f32 %v21148_v46, %v21149_v52  ;;  %v21157_v52 = vld [vmem:[#allocation218_spill] sm:$0xff]  ;;  %v21165_v1 = vld [vmem:[#allocation249_spill] sm:$0xff]  ;;  %vm21202_vm12 = vcmp.eq.s32.totalorder %v11752_v15, %v21072_v38  ;;  %vm21205_vm6 = vcmp.eq.s32.totalorder %v11752_v15, %v21075_v27 }
 0x348   : > { %v12579_v22 = vmax.f32 %v21146_v42, %v2405_v48  ;;  %v21155_v42 = vld [vmem:[#allocation27_spill] sm:$0xff]  ;;  %v21160_v48 = vld [vmem:[#allocation225_spill] sm:$0xff]  ;;  %21171 = vst [vmem:[#allocation262_spill] sm:$0xff] %v12616_v59  ;;  %v21186_v26 = vld [vmem:[#allocation322_spill] sm:$0xff] }
 0x349   : > { %v12584_v4 = vmax.f32 %v21150_v32, %v2406_v57  ;;  %vm1412_vm0 = vcmp.eq.s32.totalorder %v12512_v56, %v21155_v42  ;;  %v21158_v32 = vmax.f32 %v21156_v39, %v21157_v52  ;;  %v21161_v57 = vld [vmem:[#allocation233_spill] sm:$0xff]  ;;  %v21174_v39 = vld [vmem:[#allocation271_spill] sm:$0xff] }
 0x34a   : > { %21147 = vst [vmem:[#allocation222_spill] sm:$0xff] %v12579_v22  ;;  %v21162_v3 = vmax.f32 %v21160_v48, %v21161_v57  ;;  %v21164_v22 = vld [vmem:[#allocation241_spill] sm:$0xff]  ;;  %v21175_v52 = vld [vmem:[#allocation283_spill] sm:$0xff]  ;;  %v21178_v48 = vld [vmem:[#allocation290_spill] sm:$0xff] }
 0x34b   : > { %21151 = vst [vmem:[#allocation230_spill] sm:$0xff] %v12584_v4  ;;  %v12601_v46 = vmax.f32 %v21158_v32, %v2407_v12  ;;  %v21166_v40 = vmax.f32 %v21164_v22, %v21165_v1  ;;  %v21173_v12 = vld [vmem:[#allocation29_spill] sm:$0xff]  ;;  %v21179_v1 = vld [vmem:[#allocation298_spill] sm:$0xff]  ;;  %v21187_v57 = vld [vmem:[#allocation328_spill] sm:$0xff] }
 0x34c   : > { %v12606_v4 = vmax.f32 %v21162_v3, %v2408_v23  ;;  %v21176_v23 = vmax.f32 %v21174_v39, %v21175_v52  ;;  %v21188_v3 = vmax.f32 %v21186_v26, %v21187_v57  ;;  %v21192_v39 = vld [vmem:[#allocation211_spill] sm:$0xff]  ;;  %v2422_v57 = vsel %vm21205_vm6, 1.0, %v19212_v31 }
 0x34d   : > { %21159 = vst [vmem:[#allocation238_spill] sm:$0xff] %v12601_v46  ;;  %v12611_v50 = vmax.f32 %v21166_v40, %v2409_v18  ;;  %v21180_v40 = vmax.f32 %v21178_v48, %v21179_v1  ;;  %v21182_v18 = vld [vmem:[#allocation306_spill] sm:$0xff]  ;;  %v21193_v52 = vld [vmem:[#allocation219_spill] sm:$0xff]  ;;  %vm21208_vm6 = vcmp.eq.s32.totalorder %v11752_v15, %v21082_v55  ;;  %v21233_v55 = vld [vmem:[#allocation329_spill] sm:$0xff] }
 0x34e   : > { %21163 = vst [vmem:[#allocation246_spill] sm:$0xff] %v12606_v4  ;;  %v12625_v32 = vmax.f32 %v21176_v23, %v2411_v45  ;;  %v21184_v63 = vmax.f32 %v21182_v18, %v21183_v37  ;;  %v12640_v59 = vmax.f32 %v21188_v3, %v2414_v5  ;;  %v21191_v45 = vld [vmem:[#allocation31_spill] sm:$0xff]  ;;  %v21196_v48 = vld [vmem:[#allocation226_spill] sm:$0xff]  ;;  %v2417_v5 = vsel %vm1393_vm7, 1.0, %v19212_v31  ;;  %v21200_v37 = vld [vmem:[#allocation32_spill] sm:$0xff] }
 0x34f   : > { %21167 = vst [vmem:[#allocation254_spill] sm:$0xff] %v12611_v50  ;;  %v12630_v22 = vmax.f32 %v21180_v40, %v2412_v54  ;;  %v21190_v50 = vld [vmem:[#allocation30_spill] sm:$0xff]  ;;  %v21194_v54 = vmax.f32 %v21192_v39, %v21193_v52  ;;  %v2418_v18 = vsel %vm1394_vm4, 1.0, %v19212_v31  ;;  %vm21203_vm7 = vcmp.eq.s32.totalorder %v11752_v15, %v21073_v16  ;;  %v21207_v39 = vld [vmem:[#allocation35_spill] sm:$0xff] }
 0x350   : > { %21177 = vst [vmem:[#allocation268_spill] sm:$0xff] %v12625_v32  ;;  %v12635_v20 = vmax.f32 %v21184_v63, %v2413_v13  ;;  %21189 = vst [vmem:[#allocation295_spill] sm:$0xff] %v12640_v59  ;;  %v21197_v1 = vld [vmem:[#allocation234_spill] sm:$0xff]  ;;  %v2420_v63 = vsel %vm21203_vm7, 1.0, %v19212_v31  ;;  %vm21204_vm4 = vcmp.eq.s32.totalorder %v11752_v15, %v21074_v58  ;;  %v2423_v52 = vsel %vm1399_vm13, 1.0, %v19212_v31 }
 0x351   : > { %21181 = vst [vmem:[#allocation280_spill] sm:$0xff] %v12630_v22  ;;  %v12649_v23 = vmax.f32 %v21194_v54, %v2415_v62  ;;  %v21198_v13 = vmax.f32 %v21196_v48, %v21197_v1  ;;  %v21201_v62 = vld [vmem:[#allocation33_spill] sm:$0xff]  ;;  %v2421_v26 = vsel %vm21204_vm4, 1.0, %v19212_v31  ;;  %v21206_v3 = vld [vmem:[#allocation34_spill] sm:$0xff]  ;;  %v2424_v54 = vsel %vm1400_vm3, 1.0, %v19212_v31  ;;  %v21215_v22 = vld [vmem:[#allocation272_spill] sm:$0xff] }
 0x352   : > { %21185 = vst [vmem:[#allocation287_spill] sm:$0xff] %v12635_v20  ;;  %vm1419_vm1 = vcmp.eq.s32.totalorder %v12512_v56, %v21206_v3  ;;  %v2425_v48 = vsel %vm21208_vm6, 1.0, %v19212_v31  ;;  %vm21209_vm7 = vcmp.eq.s32.totalorder %v11752_v15, %v21083_v0  ;;  %vm1421_vm4 = vcmp.eq.s32.totalorder %v12512_v56, %v19361_v2  ;;  %v21214_v20 = vld [vmem:[#allocation258_spill] sm:$0xff] }
 0x353   : > { %21195 = vst [vmem:[#allocation303_spill] sm:$0xff] %v12649_v23  ;;  %v12654_v40 = vmax.f32 %v21198_v13, %v2416_v61  ;;  %v2419_v61 = vsel %vm21202_vm12, 1.0, %v19212_v31  ;;  %vm1420_vm12 = vcmp.eq.s32.totalorder %v12512_v56, %v21207_v39  ;;  %v2426_v1 = vsel %vm21209_vm7, 1.0, %v19212_v31  ;;  %v21210_v13 = vld [vmem:[#allocation242_spill] sm:$0xff] }
 0x354   : > { %v21216_v32 = vmax.f32 %v21214_v20, %v21215_v22  ;;  %vm21218_vm3 = vcmp.eq.s32.totalorder %v11752_v15, %v21094_v11  ;;  %vm21219_vm6 = vcmp.eq.s32.totalorder %v11752_v15, %v21095_v17  ;;  %vm1423_vm7 = vcmp.eq.s32.totalorder %v12512_v56, %v20913_v19  ;;  %v21221_v22 = vld [vmem:[#allocation284_spill] sm:$0xff]  ;;  %v21232_v11 = vld [vmem:[#allocation323_spill] sm:$0xff]  ;;  %v21325_v19 = vld [vmem:[#allocation66_spill] sm:$0xff] }
 0x355   : > { %21199 = vst [vmem:[#allocation311_spill] sm:$0xff] %v12654_v40  ;;  %v21211_v40 = vld [vmem:[#allocation250_spill] sm:$0xff]  ;;  %v2427_v46 = vsel %vm21218_vm3, 1.0, %v19212_v31  ;;  %v2428_v0 = vsel %vm21219_vm6, 1.0, %v19212_v31  ;;  %vm1424_vm13 = vcmp.eq.s32.totalorder %v12512_v56, %v20914_v34  ;;  %v21234_v49 = vmax.f32 %v21232_v11, %v21233_v55  ;;  %v21245_v11 = vld [vmem:[#allocation251_spill] sm:$0xff]  ;;  %v21324_v34 = vld [vmem:[#allocation65_spill] sm:$0xff] }
 0x356   : > { %v21212_v23 = vmax.f32 %v21210_v13, %v21211_v40  ;;  %v12716_v4 = vmax.f32 %v21216_v32, %v2418_v18  ;;  %v21224_v40 = vld [vmem:[#allocation291_spill] sm:$0xff]  ;;  %vm1429_vm3 = vcmp.eq.s32.totalorder %v12512_v56, %v20923_v21  ;;  %vm1430_vm6 = vcmp.eq.s32.totalorder %v12512_v56, %v20924_v41  ;;  %v21345_v21 = vld [vmem:[#allocation72_spill] sm:$0xff] }
 0x357   : > { %v12748_v6 = vmax.f32 %v21234_v49, %v2422_v57  ;;  %v21248_v57 = vld [vmem:[#allocation259_spill] sm:$0xff] }
 0x358   : > { %v12711_v59 = vmax.f32 %v21212_v23, %v2417_v5  ;;  %21217 = vst [vmem:[#allocation327_spill] sm:$0xff] %v12716_v4  ;;  %v21220_v23 = vld [vmem:[#allocation274_spill] sm:$0xff]  ;;  %v21225_v5 = vld [vmem:[#allocation299_spill] sm:$0xff] }
 0x359   : > { %v21222_v32 = vmax.f32 %v21220_v23, %v21221_v22  ;;  %v21226_v18 = vmax.f32 %v21224_v40, %v21225_v5  ;;  %v21228_v4 = vld [vmem:[#allocation307_spill] sm:$0xff]  ;;  %21235 = vst [vmem:[#allocation231_spill] sm:$0xff] %v12748_v6  ;;  %v21237_v23 = vld [vmem:[#allocation220_spill] sm:$0xff]  ;;  %v21249_v5 = vld [vmem:[#allocation273_spill] sm:$0xff] }
 0x35a   : > { %21213 = vst [vmem:[#allocation319_spill] sm:$0xff] %v12711_v59  ;;  %v21229_v59 = vld [vmem:[#allocation315_spill] sm:$0xff]  ;;  %v21438_v6 = vld [vmem:[#allocation44_spill] sm:$0xff] }
 0x35b   : > { %v12733_v20 = vmax.f32 %v21222_v32, %v2419_v61  ;;  %v12738_v13 = vmax.f32 %v21226_v18, %v2420_v63  ;;  %v21230_v15 = vmax.f32 %v21228_v4, %v21229_v59  ;;  %v21236_v61 = vld [vmem:[#allocation212_spill] sm:$0xff]  ;;  %v21240_v32 = vld [vmem:[#allocation227_spill] sm:$0xff]  ;;  %v21250_v18 = vmax.f32 %v21248_v57, %v21249_v5 }
 0x35c   : > { %v21238_v63 = vmax.f32 %v21236_v61, %v21237_v23  ;;  %v21241_v59 = vld [vmem:[#allocation235_spill] sm:$0xff]  ;;  %v21253_v61 = vld [vmem:[#allocation285_spill] sm:$0xff]  ;;  %v12818_v57 = vsel %vm1408_vm10, 1.0, %v19212_v31 }
 0x35d   : > { %21223 = vst [vmem:[#allocation208_spill] sm:$0xff] %v12733_v20  ;;  %21227 = vst [vmem:[#allocation216_spill] sm:$0xff] %v12738_v13  ;;  %v12743_v17 = vmax.f32 %v21230_v15, %v2421_v26  ;;  %v21242_v4 = vmax.f32 %v21240_v32, %v21241_v59  ;;  %v21244_v40 = vld [vmem:[#allocation243_spill] sm:$0xff]  ;;  %v12772_v15 = vmax.f32 %v21250_v18, %v2426_v1  ;;  %v21257_v32 = vld [vmem:[#allocation300_spill] sm:$0xff]  ;;  %v12792_v1 = vsel %vm1405_vm2, 1.0, %v19212_v31 }
 0x35e   : > { %v12757_v22 = vmax.f32 %v21238_v63, %v2423_v52  ;;  %v21246_v55 = vmax.f32 %v21244_v40, %v21245_v11  ;;  %v21252_v52 = vld [vmem:[#allocation275_spill] sm:$0xff]  ;;  %v21256_v63 = vld [vmem:[#allocation292_spill] sm:$0xff]  ;;  %21260 = vst [vmem:[#allocation288_spill] sm:$0xff] %v12792_v1  ;;  %21265 = vst [vmem:[#allocation312_spill] sm:$0xff] %v12818_v57 }
 0x35f   : > { %21231 = vst [vmem:[#allocation223_spill] sm:$0xff] %v12743_v17  ;;  %v12762_v26 = vmax.f32 %v21242_v4, %v2424_v54  ;;  %21251 = vst [vmem:[#allocation263_spill] sm:$0xff] %v12772_v15  ;;  %v21254_v54 = vmax.f32 %v21252_v52, %v21253_v61  ;;  %v12798_v4 = vsel %vm1406_vm5, 1.0, %v19212_v31  ;;  %v21266_v5 = vld [vmem:[#allocation47_spill] sm:$0xff]  ;;  %v21267_v18 = vld [vmem:[#allocation48_spill] sm:$0xff]  ;;  %v12858_v52 = vsel %vm1412_vm0, 1.0, %v19212_v31 }
 0x360   : > { %21239 = vst [vmem:[#allocation239_spill] sm:$0xff] %v12757_v22  ;;  %v12767_v49 = vmax.f32 %v21246_v55, %v2425_v48  ;;  %v21258_v48 = vmax.f32 %v21256_v63, %v21257_v32  ;;  %21261 = vst [vmem:[#allocation296_spill] sm:$0xff] %v12798_v4  ;;  %v12812_v55 = vsel %vm1407_vm15, 1.0, %v19212_v31  ;;  %vm1431_vm2 = vcmp.eq.s32.totalorder %v12512_v56, %v21266_v5  ;;  %v21272_v11 = vld [vmem:[#allocation49_spill] sm:$0xff]  ;;  %v21278_v4 = vld [vmem:[#allocation51_spill] sm:$0xff] }
 0x361   : > { %21243 = vst [vmem:[#allocation247_spill] sm:$0xff] %v12762_v26  ;;  %v12781_v23 = vmax.f32 %v21254_v54, %v2427_v46  ;;  %21264 = vst [vmem:[#allocation304_spill] sm:$0xff] %v12812_v55  ;;  %vm1432_vm5 = vcmp.eq.s32.totalorder %v12512_v56, %v21267_v18  ;;  %v12832_v32 = vsel %vm1409_vm8, 1.0, %v19212_v31  ;;  %vm1433_vm15 = vcmp.eq.s32.totalorder %v12512_v56, %v21272_v11  ;;  %v21273_v46 = vld [vmem:[#allocation50_spill] sm:$0xff]  ;;  %v21279_v40 = vld [vmem:[#allocation52_spill] sm:$0xff] }
 0x362   : > { %21247 = vst [vmem:[#allocation255_spill] sm:$0xff] %v12767_v49  ;;  %v12786_v59 = vmax.f32 %v21258_v48, %v2428_v0  ;;  %21270 = vst [vmem:[#allocation320_spill] sm:$0xff] %v12832_v32  ;;  %v12838_v48 = vsel %vm1410_vm9, 1.0, %v19212_v31  ;;  %vm1434_vm10 = vcmp.eq.s32.totalorder %v12512_v56, %v21273_v46  ;;  %v12852_v55 = vsel %vm1411_vm11, 1.0, %v19212_v31  ;;  %v21285_v1 = vld [vmem:[#allocation53_spill] sm:$0xff]  ;;  %v21286_v0 = vld [vmem:[#allocation54_spill] sm:$0xff]  ;;  %v13100_v46 = vpop.permute.xlu1 %690 }
 0x363   : > { %21255 = vst [vmem:[#allocation269_spill] sm:$0xff] %v12781_v23  ;;  %21271 = vst [vmem:[#allocation36_spill] sm:$0xff] %v12838_v48  ;;  %vm1435_vm8 = vcmp.eq.s32.totalorder %v12512_v56, %v21278_v4  ;;  %v12872_v32 = vsel %vm1413_vm14, 1.0, %v19212_v31  ;;  %vm21283_vm11 = vcmp.eq.s32.totalorder %v12512_v56, %v21173_v12  ;;  %vm21289_vm14 = vcmp.eq.s32.totalorder %v12512_v56, %v21190_v50  ;;  %v21294_v23 = vld [vmem:[#allocation56_spill] sm:$0xff]  ;;  %v21301_v15 = vld [vmem:[#allocation57_spill] sm:$0xff] }
 0x364   : > { %21259 = vst [vmem:[#allocation281_spill] sm:$0xff] %v12786_v59  ;;  %21276 = vst [vmem:[#allocation209_spill] sm:$0xff] %v12852_v55  ;;  %v12878_v63 = vsel %vm21283_vm11, 1.0, %v19212_v31  ;;  %v12892_v55 = vsel %vm21289_vm14, 1.0, %v19212_v31  ;;  %vm21291_vm11 = vcmp.eq.s32.totalorder %v12512_v56, %v21191_v45  ;;  %v21293_v59 = vld [vmem:[#allocation55_spill] sm:$0xff]  ;;  %vm21297_vm14 = vcmp.eq.s32.totalorder %v12512_v56, %v21200_v37  ;;  %v21302_v49 = vld [vmem:[#allocation58_spill] sm:$0xff] }
 0x365   : > { %21277 = vst [vmem:[#allocation217_spill] sm:$0xff] %v12858_v52  ;;  %21282 = vst [vmem:[#allocation224_spill] sm:$0xff] %v12872_v32  ;;  %v12898_v54 = vsel %vm21291_vm11, 1.0, %v19212_v31  ;;  %v12912_v32 = vsel %vm21297_vm14, 1.0, %v19212_v31  ;;  %vm21299_vm11 = vcmp.eq.s32.totalorder %v12512_v56, %v21201_v62  ;;  %vm1441_vm0 = vcmp.eq.s32.totalorder %v12512_v56, %v21301_v15  ;;  %v21307_v26 = vld [vmem:[#allocation59_spill] sm:$0xff]  ;;  %v21308_v22 = vld [vmem:[#allocation60_spill] sm:$0xff] }
 0x366   : > { %21284 = vst [vmem:[#allocation232_spill] sm:$0xff] %v12878_v63  ;;  %21290 = vst [vmem:[#allocation240_spill] sm:$0xff] %v12892_v55  ;;  %v12918_v57 = vsel %vm21299_vm11, 1.0, %v19212_v31  ;;  %vm1442_vm9 = vcmp.eq.s32.totalorder %v12512_v56, %v21302_v49  ;;  %v12932_v55 = vsel %vm1419_vm1, 1.0, %v19212_v31  ;;  %v12938_v48 = vsel %vm1420_vm12, 1.0, %v19212_v31  ;;  %v21344_v41 = vld [vmem:[#allocation71_spill] sm:$0xff] }
 0x367   : > { %21292 = vst [vmem:[#allocation248_spill] sm:$0xff] %v12898_v54  ;;  %21298 = vst [vmem:[#allocation256_spill] sm:$0xff] %v12912_v32  ;;  %vm1443_vm14 = vcmp.eq.s32.totalorder %v12512_v56, %v21307_v26  ;;  %v12952_v32 = vsel %vm1421_vm4, 1.0, %v19212_v31  ;;  %vm21312_vm1 = vcmp.eq.s32.totalorder %v12512_v56, %v19362_v60  ;;  %vm1445_vm12 = vcmp.eq.s32.totalorder %v12512_v56, %v21014_v43  ;;  %v21378_v49 = vld [vmem:[#allocation17_spill] sm:$0xff]  ;;  %v21379_v15 = vld [vmem:[#allocation18_spill] sm:$0xff] }
 0x368   : > { %21300 = vst [vmem:[#allocation264_spill] sm:$0xff] %v12918_v57  ;;  %21305 = vst [vmem:[#allocation270_spill] sm:$0xff] %v12932_v55  ;;  %v12958_v52 = vsel %vm21312_vm1, 1.0, %v19212_v31  ;;  %vm1446_vm11 = vcmp.eq.s32.totalorder %v12512_v56, %v21015_v7  ;;  %v12972_v55 = vsel %vm1423_vm7, 1.0, %v19212_v31  ;;  %v12978_v63 = vsel %vm1424_vm13, 1.0, %v19212_v31  ;;  %v21385_v26 = vld [vmem:[#allocation78_spill] sm:$0xff] }
 0x369   : > { %21306 = vst [vmem:[#allocation282_spill] sm:$0xff] %v12938_v48  ;;  %21311 = vst [vmem:[#allocation289_spill] sm:$0xff] %v12952_v32  ;;  %vm21320_vm7 = vcmp.eq.s32.totalorder %v12512_v56, %v20915_v14  ;;  %vm21322_vm13 = vcmp.eq.s32.totalorder %v12512_v56, %v20916_v36  ;;  %v21332_v36 = vld [vmem:[#allocation67_spill] sm:$0xff]  ;;  %v21333_v14 = vld [vmem:[#allocation68_spill] sm:$0xff]  ;;  %v13038_v48 = vsel %vm1430_vm6, 1.0, %v19212_v31  ;;  %vm1456_vm6 = vcmp.eq.s32.totalorder %v12512_v56, %v21345_v21 }
 0x36a   : > { %21313 = vst [vmem:[#allocation297_spill] sm:$0xff] %v12958_v52  ;;  %21316 = vst [vmem:[#allocation305_spill] sm:$0xff] %v12972_v55  ;;  %v12992_v32 = vsel %vm21320_vm7, 1.0, %v19212_v31  ;;  %v12998_v54 = vsel %vm21322_vm13, 1.0, %v19212_v31  ;;  %vm21328_vm7 = vcmp.eq.s32.totalorder %v12512_v56, %v20921_v35  ;;  %vm21330_vm13 = vcmp.eq.s32.totalorder %v12512_v56, %v20922_v30  ;;  %v21338_v30 = vld [vmem:[#allocation69_spill] sm:$0xff]  ;;  %v21339_v35 = vld [vmem:[#allocation70_spill] sm:$0xff] }
 0x36b   : > { %21317 = vst [vmem:[#allocation313_spill] sm:$0xff] %v12978_v63  ;;  %21321 = vst [vmem:[#allocation321_spill] sm:$0xff] %v12992_v32  ;;  %v13012_v55 = vsel %vm21328_vm7, 1.0, %v19212_v31  ;;  %v13018_v57 = vsel %vm21330_vm13, 1.0, %v19212_v31  ;;  %vm1451_vm4 = vcmp.eq.s32.totalorder %v12512_v56, %v21332_v36  ;;  %vm1452_vm1 = vcmp.eq.s32.totalorder %v12512_v56, %v21333_v14  ;;  %v21429_v20 = vld [vmem:[#allocation39_spill] sm:$0xff]  ;;  %v21439_v17 = vld [vmem:[#allocation45_spill] sm:$0xff] }
 0x36c   : > { %21323 = vst [vmem:[#allocation37_spill] sm:$0xff] %v12998_v54  ;;  %21329 = vst [vmem:[#allocation210_spill] sm:$0xff] %v13012_v55  ;;  %v13032_v32 = vsel %vm1429_vm3, 1.0, %v19212_v31  ;;  %vm1453_vm7 = vcmp.eq.s32.totalorder %v12512_v56, %v21338_v30  ;;  %vm1454_vm13 = vcmp.eq.s32.totalorder %v12512_v56, %v21339_v35  ;;  %v13052_v55 = vsel %vm1431_vm2, 1.0, %v19212_v31 }
 0x36d   : > { %21331 = vst [vmem:[#allocation218_spill] sm:$0xff] %v13018_v57  ;;  %21336 = vst [vmem:[#allocation225_spill] sm:$0xff] %v13032_v32  ;;  %v13058_v52 = vsel %vm1432_vm5, 1.0, %v19212_v31  ;;  %vm1455_vm3 = vcmp.eq.s32.totalorder %v12512_v56, %v21344_v41  ;;  %v13072_v32 = vsel %vm1433_vm15, 1.0, %v19212_v31  ;;  %v13078_v63 = vsel %vm1434_vm10, 1.0, %v19212_v31 }
 0x36e   : > { %21337 = vst [vmem:[#allocation233_spill] sm:$0xff] %v13038_v48  ;;  %21342 = vst [vmem:[#allocation241_spill] sm:$0xff] %v13052_v55  ;;  %vm1457_vm2 = vcmp.eq.s32.totalorder %v12512_v56, %v21070_v9  ;;  %v13092_v55 = vsel %vm1435_vm8, 1.0, %v19212_v31  ;;  %vm21353_vm15 = vcmp.eq.s32.totalorder %v12512_v56, %v21279_v40  ;;  %vm21357_vm8 = vcmp.eq.s32.totalorder %v12512_v56, %v21285_v1  ;;  %v21368_v1 = vld [vmem:[#allocation77_spill] sm:$0xff]  ;;  %v21462_v9 = vld [vmem:[#allocation308_spill] sm:$0xff] }
 0x36f   : > { %21343 = vst [vmem:[#allocation249_spill] sm:$0xff] %v13058_v52  ;;  %21348 = vst [vmem:[#allocation257_spill] sm:$0xff] %v13072_v32  ;;  %v13098_v54 = vsel %vm21353_vm15, 1.0, %v19212_v31  ;;  %v13114_v32 = vsel %vm21357_vm8, 1.0, %v19212_v31  ;;  %vm21359_vm15 = vcmp.eq.s32.totalorder %v12512_v56, %v21286_v0  ;;  %vm21363_vm8 = vcmp.eq.s32.totalorder %v12512_v56, %v21293_v59  ;;  %v21367_v0 = vld [vmem:[#allocation16_spill] sm:$0xff] }
 0x370   : > { %21349 = vst [vmem:[#allocation265_spill] sm:$0xff] %v13078_v63  ;;  %21352 = vst [vmem:[#allocation271_spill] sm:$0xff] %v13092_v55  ;;  %v13120_v57 = vsel %vm21359_vm15, 1.0, %v19212_v31  ;;  %v13134_v55 = vsel %vm21363_vm8, 1.0, %v19212_v31  ;;  %vm21365_vm15 = vcmp.eq.s32.totalorder %v12512_v56, %v21294_v23  ;;  %vm1463_vm10 = vcmp.eq.s32.totalorder %v12512_v56, %v21367_v0  ;;  %v21463_v0 = vld [vmem:[#allocation312_spill] sm:$0xff] }
 0x371   : > { %21354 = vst [vmem:[#allocation283_spill] sm:$0xff] %v13098_v54  ;;  %21358 = vst [vmem:[#allocation290_spill] sm:$0xff] %v13114_v32  ;;  %v13140_v48 = vsel %vm21365_vm15, 1.0, %v19212_v31  ;;  %v13154_v32 = vsel %vm1441_vm0, 1.0, %v19212_v31  ;;  %v13160_v52 = vsel %vm1442_vm9, 1.0, %v19212_v31  ;;  %vm21376_vm9 = vcmp.eq.s32.totalorder %v12512_v56, %v21308_v22  ;;  %v21384_v22 = vld [vmem:[#allocation19_spill] sm:$0xff] }
 0x372   : > { %21360 = vst [vmem:[#allocation298_spill] sm:$0xff] %v13120_v57  ;;  %21364 = vst [vmem:[#allocation306_spill] sm:$0xff] %v13134_v55  ;;  %v13174_v55 = vsel %vm1443_vm14, 1.0, %v19212_v31  ;;  %v13180_v63 = vsel %vm21376_vm9, 1.0, %v19212_v31  ;;  %vm1465_vm0 = vcmp.eq.s32.totalorder %v12512_v56, %v21378_v49  ;;  %vm1466_vm15 = vcmp.eq.s32.totalorder %v12512_v56, %v21379_v15  ;;  %v21451_v49 = vld [vmem:[#allocation288_spill] sm:$0xff] }
 0x373   : > { %21366 = vst [vmem:[#allocation314_spill] sm:$0xff] %v13140_v48  ;;  %21371 = vst [vmem:[#allocation322_spill] sm:$0xff] %v13154_v32  ;;  %vm1471_vm8 = vcmp.eq.s32.totalorder %v13100_v46, %v21140_v25  ;;  %vm1472_vm5 = vcmp.eq.s32.totalorder %v13100_v46, %v21141_v29  ;;  %v13198_v32 = vsel %vm1445_vm12, 1.0, %v19212_v31  ;;  %v13204_v54 = vsel %vm1446_vm11, 1.0, %v19212_v31  ;;  %v21430_v48 = vld [vmem:[#allocation40_spill] sm:$0xff] }
 0x374   : > { %21372 = vst [vmem:[#allocation328_spill] sm:$0xff] %v13160_v52  ;;  %21375 = vst [vmem:[#allocation211_spill] sm:$0xff] %v13174_v55  ;;  %vm21388_vm12 = vcmp.eq.s32.totalorder %v12512_v56, %v19473_v28  ;;  %vm21390_vm11 = vcmp.eq.s32.totalorder %v12512_v56, %v19474_v44  ;;  %vm21394_vm9 = vcmp.eq.s32.totalorder %v12512_v56, %v21324_v34  ;;  %v13260_v7 = vsel %vm1452_vm1, 1.0, %v19212_v31 }
 0x375   : > { %21377 = vst [vmem:[#allocation219_spill] sm:$0xff] %v13180_v63  ;;  %21382 = vst [vmem:[#allocation226_spill] sm:$0xff] %v13198_v32  ;;  %v13218_v55 = vsel %vm21388_vm12, 1.0, %v19212_v31  ;;  %v13224_v57 = vsel %vm21390_vm11, 1.0, %v19212_v31  ;;  %v13234_v52 = vsel %vm21394_vm9, 1.0, %v19212_v31  ;;  %vm21396_vm12 = vcmp.eq.s32.totalorder %v12512_v56, %v21325_v19  ;;  %v21436_v63 = vld [vmem:[#allocation42_spill] sm:$0xff] }
 0x376   : > { %21383 = vst [vmem:[#allocation234_spill] sm:$0xff] %v13204_v54  ;;  %21389 = vst [vmem:[#allocation242_spill] sm:$0xff] %v13218_v55  ;;  %v13240_v54 = vsel %vm21396_vm12, 1.0, %v19212_v31  ;;  %v13254_v55 = vsel %vm1451_vm4, 1.0, %v19212_v31  ;;  %vm1475_vm9 = vcmp.eq.s32.totalorder %v13100_v46, %v21154_v53  ;;  %vm1476_vm12 = vcmp.eq.s32.totalorder %v13100_v46, %v21155_v42 }
 0x377   : > { %21391 = vst [vmem:[#allocation250_spill] sm:$0xff] %v13224_v57  ;;  %21395 = vst [vmem:[#allocation258_spill] sm:$0xff] %v13234_v52  ;;  %v13278_v52 = vsel %vm1453_vm7, 1.0, %v19212_v31  ;;  %v13284_v32 = vsel %vm1454_vm13, 1.0, %v19212_v31  ;;  %vm1479_vm4 = vcmp.eq.s32.totalorder %v13100_v46, %v21190_v50  ;;  %vm1480_vm1 = vcmp.eq.s32.totalorder %v13100_v46, %v21191_v45  ;;  %v21485_v45 = vld [vmem:[#allocation59_spill] sm:$0xff] }
 0x378   : > { %21397 = vst [vmem:[#allocation272_spill] sm:$0xff] %v13240_v54  ;;  %21400 = vst [vmem:[#allocation274_spill] sm:$0xff] %v13254_v55  ;;  %vm1481_vm11 = vcmp.eq.s32.totalorder %v13100_v46, %v21200_v37  ;;  %vm1482_vm14 = vcmp.eq.s32.totalorder %v13100_v46, %v21201_v62  ;;  %v13302_v55 = vsel %vm1455_vm3, 1.0, %v19212_v31  ;;  %v13308_v61 = vsel %vm1456_vm6, 1.0, %v19212_v31  ;;  %v21437_v54 = vld [vmem:[#allocation43_spill] sm:$0xff] }
 0x379   : > { %21401 = vst [vmem:[#allocation284_spill] sm:$0xff] %v13260_v7  ;;  %21404 = vst [vmem:[#allocation291_spill] sm:$0xff] %v13278_v52  ;;  %v13322_v52 = vsel %vm1457_vm2, 1.0, %v19212_v31  ;;  %vm21413_vm3 = vcmp.eq.s32.totalorder %v12512_v56, %v21071_v8  ;;  %vm21417_vm6 = vcmp.eq.s32.totalorder %v12512_v56, %v21072_v38  ;;  %vm21419_vm2 = vcmp.eq.s32.totalorder %v12512_v56, %v21073_v16  ;;  %v21458_v38 = vld [vmem:[#allocation236_spill] sm:$0xff] }
 0x37a   : > { %21405 = vst [vmem:[#allocation299_spill] sm:$0xff] %v13284_v32  ;;  %21408 = vst [vmem:[#allocation307_spill] sm:$0xff] %v13302_v55  ;;  %v13328_v57 = vsel %vm21413_vm3, 1.0, %v19212_v31  ;;  %v13338_v7 = vsel %vm21417_vm6, 1.0, %v19212_v31  ;;  %vm21421_vm3 = vcmp.eq.s32.totalorder %v12512_v56, %v21074_v58  ;;  %vm21423_vm6 = vcmp.eq.s32.totalorder %v12512_v56, %v21075_v27  ;;  %v21431_v32 = vld [vmem:[#allocation41_spill] sm:$0xff]  ;;  %v21455_v27 = vld [vmem:[#allocation296_spill] sm:$0xff] }
 0x37b   : > { %21409 = vst [vmem:[#allocation315_spill] sm:$0xff] %v13308_v61  ;;  %21412 = vst [vmem:[#allocation323_spill] sm:$0xff] %v13322_v52  ;;  %v13344_v61 = vsel %vm21419_vm2, 1.0, %v19212_v31  ;;  %v13354_v55 = vsel %vm21421_vm3, 1.0, %v19212_v31  ;;  %vm21426_vm3 = vcmp.eq.s32.totalorder %v12512_v56, %v21368_v1  ;;  %vm1491_vm2 = vcmp.eq.s32.totalorder %v13100_v46, %v21436_v63 }
 0x37c   : > { %21414 = vst [vmem:[#allocation329_spill] sm:$0xff] %v13328_v57  ;;  %21418 = vst [vmem:[#allocation212_spill] sm:$0xff] %v13338_v7  ;;  %v13360_v57 = vsel %vm21423_vm6, 1.0, %v19212_v31  ;;  %v13380_v13 = vsel %vm21426_vm3, 1.0, %v19212_v31  ;;  %v21428_v7 = vld [vmem:[#allocation38_spill] sm:$0xff]  ;;  %vm21435_vm3 = vcmp.eq.s32.totalorder %v13100_v46, %v21139_v47  ;;  %vm1492_vm7 = vcmp.eq.s32.totalorder %v13100_v46, %v21437_v54  ;;  %v21450_v47 = vld [vmem:[#allocation316_spill] sm:$0xff] }
 0x37d   : > { %21420 = vst [vmem:[#allocation220_spill] sm:$0xff] %v13344_v61  ;;  %21422 = vst [vmem:[#allocation227_spill] sm:$0xff] %v13354_v55  ;;  %v13374_v61 = vsel %vm1463_vm10, 1.0, %v19212_v31  ;;  %vm21434_vm10 = vcmp.eq.s32.totalorder %v13100_v46, %v21138_v10  ;;  %v2494_v52 = vsel %vm21435_vm3, 1.0, %v19212_v31  ;;  %vm1493_vm13 = vcmp.eq.s32.totalorder %v13100_v46, %v21438_v6 }
 0x37e   : > { %21424 = vst [vmem:[#allocation235_spill] sm:$0xff] %v13360_v57  ;;  %21425 = vst [vmem:[#allocation243_spill] sm:$0xff] %v13374_v61  ;;  %v2493_v43 = vsel %vm21434_vm10, 1.0, %v19212_v31  ;;  %vm1494_vm6 = vcmp.eq.s32.totalorder %v13100_v46, %v21439_v17  ;;  %v13420_v55 = vsel %vm1466_vm15, 1.0, %v19212_v31  ;;  %v2495_v61 = vsel %vm1471_vm8, 1.0, %v19212_v31 }
 0x37f   : > { %21427 = vst [vmem:[#allocation251_spill] sm:$0xff] %v13380_v13  ;;  %v13414_v13 = vsel %vm1465_vm0, 1.0, %v19212_v31  ;;  %21441 = vst [vmem:[#allocation273_spill] sm:$0xff] %v13420_v55  ;;  %v2496_v57 = vsel %vm1472_vm5, 1.0, %v19212_v31  ;;  %vm1495_vm0 = vcmp.eq.s32.totalorder %v13100_v46, %v21266_v5  ;;  %vm1496_vm10 = vcmp.eq.s32.totalorder %v13100_v46, %v21267_v18  ;;  %v21559_v18 = vld [vmem:[#allocation206_spill] sm:$0xff] }
 0x380   : > { %21440 = vst [vmem:[#allocation259_spill] sm:$0xff] %v13414_v13  ;;  %vm21444_vm8 = vcmp.eq.s32.totalorder %v12512_v56, %v21384_v22  ;;  %vm21446_vm5 = vcmp.eq.s32.totalorder %v12512_v56, %v21385_v26  ;;  %v21452_v55 = vmax.f32 %v21450_v47, %v21451_v49  ;;  %v21454_v22 = vld [vmem:[#allocation330_spill] sm:$0xff]  ;;  %v21459_v56 = vld [vmem:[#allocation304_spill] sm:$0xff]  ;;  %vm21466_vm15 = vcmp.eq.s32.totalorder %v13100_v46, %v21142_v51 }
 0x381   : > { %v13442_v25 = vsel %vm21444_vm8, 1.0, %v19212_v31  ;;  %v13448_v29 = vsel %vm21446_vm5, 1.0, %v19212_v31  ;;  %v21456_v58 = vmax.f32 %v21454_v22, %v21455_v27  ;;  %v21460_v26 = vmax.f32 %v21458_v38, %v21459_v56  ;;  %v21468_v38 = vld [vmem:[#allocation50_spill] sm:$0xff]  ;;  %v21471_v22 = vld [vmem:[#allocation53_spill] sm:$0xff]  ;;  %v21475_v56 = vld [vmem:[#allocation276_spill] sm:$0xff] }
 0x382   : > { %21445 = vst [vmem:[#allocation275_spill] sm:$0xff] %v13442_v25  ;;  %21447 = vst [vmem:[#allocation285_spill] sm:$0xff] %v13448_v29  ;;  %v13457_v15 = vmax.f32 %v21452_v55, %v2493_v43  ;;  %v21464_v25 = vmax.f32 %v21462_v9, %v21463_v0  ;;  %v2497_v43 = vsel %vm21466_vm15, 1.0, %v19212_v31  ;;  %vm21467_vm3 = vcmp.eq.s32.totalorder %v13100_v46, %v21143_v33  ;;  %v21476_v13 = vld [vmem:[#allocation320_spill] sm:$0xff]  ;;  %v21503_v33 = vld [vmem:[#allocation277_spill] sm:$0xff] }
 0x383   : > { %v13462_v16 = vmax.f32 %v21456_v58, %v2494_v52  ;;  %v13467_v8 = vmax.f32 %v21460_v26, %v2495_v61  ;;  %v2498_v58 = vsel %vm21467_vm3, 1.0, %v19212_v31  ;;  %v2499_v9 = vsel %vm1475_vm9, 1.0, %v19212_v31  ;;  %v21472_v26 = vld [vmem:[#allocation54_spill] sm:$0xff]  ;;  %v21473_v52 = vld [vmem:[#allocation57_spill] sm:$0xff]  ;;  %v21504_v51 = vld [vmem:[#allocation240_spill] sm:$0xff] }
 0x384   : > { %21453 = vst [vmem:[#allocation292_spill] sm:$0xff] %v13457_v15  ;;  %v13472_v1 = vmax.f32 %v21464_v25, %v2496_v57  ;;  %v2500_v27 = vsel %vm1476_vm12, 1.0, %v19212_v31  ;;  %vm21469_vm15 = vcmp.eq.s32.totalorder %v13100_v46, %v21172_v24  ;;  %vm21470_vm3 = vcmp.eq.s32.totalorder %v13100_v46, %v21173_v12  ;;  %v21474_v61 = vld [vmem:[#allocation58_spill] sm:$0xff]  ;;  %v21480_v15 = vld [vmem:[#allocation36_spill] sm:$0xff] }
 0x385   : > { %21457 = vst [vmem:[#allocation300_spill] sm:$0xff] %v13462_v16  ;;  %21461 = vst [vmem:[#allocation316_spill] sm:$0xff] %v13467_v8  ;;  %v2501_v47 = vsel %vm21469_vm15, 1.0, %v19212_v31  ;;  %v2502_v25 = vsel %vm21470_vm3, 1.0, %v19212_v31  ;;  %vm1499_vm5 = vcmp.eq.s32.totalorder %v13100_v46, %v21278_v4  ;;  %vm1500_vm9 = vcmp.eq.s32.totalorder %v13100_v46, %v21279_v40  ;;  %v21479_v16 = vld [vmem:[#allocation324_spill] sm:$0xff]  ;;  %v21560_v5 = vld [vmem:[#allocation210_spill] sm:$0xff] }
 0x386   : > { %21465 = vst [vmem:[#allocation288_spill] sm:$0xff] %v13472_v1  ;;  %vm1501_vm8 = vcmp.eq.s32.totalorder %v13100_v46, %v21471_v22  ;;  %vm1502_vm12 = vcmp.eq.s32.totalorder %v13100_v46, %v21472_v26  ;;  %v2503_v49 = vsel %vm1479_vm4, 1.0, %v19212_v31  ;;  %v2504_v0 = vsel %vm1480_vm1, 1.0, %v19212_v31  ;;  %v21499_v12 = vld [vmem:[#allocation228_spill] sm:$0xff]  ;;  %v21623_v26 = vld [vmem:[#allocation294_spill] sm:$0xff] }
 0x387   : > { %v2505_v55 = vsel %vm1481_vm11, 1.0, %v19212_v31  ;;  %v2506_v57 = vsel %vm1482_vm14, 1.0, %v19212_v31  ;;  %v21477_v1 = vmax.f32 %v21475_v56, %v21476_v13  ;;  %v21481_v29 = vmax.f32 %v21479_v16, %v21480_v15  ;;  %v21486_v13 = vld [vmem:[#allocation60_spill] sm:$0xff]  ;;  %v21488_v16 = vld [vmem:[#allocation209_spill] sm:$0xff]  ;;  %v21624_v22 = vld [vmem:[#allocation298_spill] sm:$0xff] }
 0x388   : > { %vm21483_vm14 = vcmp.eq.s32.totalorder %v13100_v46, %v21206_v3  ;;  %vm21484_vm11 = vcmp.eq.s32.totalorder %v13100_v46, %v21207_v39  ;;  %v21496_v3 = vld [vmem:[#allocation224_spill] sm:$0xff]  ;;  %vm21531_vm4 = vcmp.eq.s32.totalorder %v13100_v46, %v21428_v7  ;;  %vm21534_vm3 = vcmp.eq.s32.totalorder %v13100_v46, %v21431_v32 }
 0x389   : > { %v13537_v8 = vmax.f32 %v21477_v1, %v2497_v43  ;;  %v13542_v10 = vmax.f32 %v21481_v29, %v2498_v58  ;;  %v2507_v62 = vsel %vm21483_vm14, 1.0, %v19212_v31  ;;  %v2508_v37 = vsel %vm21484_vm11, 1.0, %v19212_v31  ;;  %v21487_v1 = vld [vmem:[#allocation331_spill] sm:$0xff]  ;;  %v21491_v43 = vld [vmem:[#allocation213_spill] sm:$0xff]  ;;  %v21500_v24 = vld [vmem:[#allocation232_spill] sm:$0xff] }
 0x38a   : > { %v21489_v29 = vmax.f32 %v21487_v1, %v21488_v16  ;;  %v21492_v58 = vld [vmem:[#allocation217_spill] sm:$0xff]  ;;  %v21501_v42 = vmax.f32 %v21499_v12, %v21500_v24  ;;  %v21505_v1 = vmax.f32 %v21503_v33, %v21504_v51  ;;  %v21507_v16 = vld [vmem:[#allocation244_spill] sm:$0xff]  ;;  %v21519_v12 = vld [vmem:[#allocation266_spill] sm:$0xff]  ;;  %vm21527_vm14 = vcmp.eq.s32.totalorder %v13100_v46, %v19361_v2 }
 0x38b   : > { %21478 = vst [vmem:[#allocation330_spill] sm:$0xff] %v13537_v8  ;;  %21482 = vst [vmem:[#allocation296_spill] sm:$0xff] %v13542_v10  ;;  %v21493_v56 = vmax.f32 %v21491_v43, %v21492_v58  ;;  %v21495_v8 = vld [vmem:[#allocation221_spill] sm:$0xff]  ;;  %v21511_v58 = vld [vmem:[#allocation252_spill] sm:$0xff]  ;;  %vm21528_vm11 = vcmp.eq.s32.totalorder %v13100_v46, %v19362_v60  ;;  %vm1511_vm1 = vcmp.eq.s32.totalorder %v13100_v46, %v19473_v28 }
 0x38c   : > { %v13559_v15 = vmax.f32 %v21489_v29, %v2499_v9  ;;  %v21497_v39 = vmax.f32 %v21495_v8, %v21496_v3  ;;  %v13574_v53 = vmax.f32 %v21501_v42, %v2502_v25  ;;  %v13579_v9 = vmax.f32 %v21505_v1, %v2503_v49  ;;  %v21508_v29 = vld [vmem:[#allocation248_spill] sm:$0xff]  ;;  %v21520_v25 = vld [vmem:[#allocation270_spill] sm:$0xff] }
 0x38d   : > { %v13564_v10 = vmax.f32 %v21493_v56, %v2500_v27  ;;  %v21509_v43 = vmax.f32 %v21507_v16, %v21508_v29  ;;  %v21512_v56 = vld [vmem:[#allocation256_spill] sm:$0xff]  ;;  %v21521_v51 = vmax.f32 %v21519_v12, %v21520_v25  ;;  %v21523_v49 = vld [vmem:[#allocation278_spill] sm:$0xff]  ;;  %v21529_v29 = vld [vmem:[#allocation61_spill] sm:$0xff]  ;;  %vm1513_vm15 = vcmp.eq.s32.totalorder %v13100_v46, %v21324_v34 }
 0x38e   : > { %21490 = vst [vmem:[#allocation236_spill] sm:$0xff] %v13559_v15  ;;  %v13569_v50 = vmax.f32 %v21497_v39, %v2501_v47  ;;  %21502 = vst [vmem:[#allocation312_spill] sm:$0xff] %v13574_v53  ;;  %v21513_v8 = vmax.f32 %v21511_v58, %v21512_v56  ;;  %v21515_v39 = vld [vmem:[#allocation260_spill] sm:$0xff]  ;;  %v21524_v1 = vld [vmem:[#allocation282_spill] sm:$0xff]  ;;  %v2514_v56 = vsel %vm21534_vm3, 1.0, %v19212_v31  ;;  %vm1515_vm3 = vcmp.eq.s32.totalorder %v13100_v46, %v21332_v36 }
 0x38f   : > { %21494 = vst [vmem:[#allocation304_spill] sm:$0xff] %v13564_v10  ;;  %21506 = vst [vmem:[#allocation276_spill] sm:$0xff] %v13579_v9  ;;  %v13584_v27 = vmax.f32 %v21509_v43, %v2504_v0  ;;  %v21516_v47 = vld [vmem:[#allocation264_spill] sm:$0xff]  ;;  %v13599_v33 = vmax.f32 %v21521_v51, %v2507_v62  ;;  %v21525_v16 = vmax.f32 %v21523_v49, %v21524_v1  ;;  %v21530_v62 = vld [vmem:[#allocation62_spill] sm:$0xff] }
 0x390   : > { %21498 = vst [vmem:[#allocation308_spill] sm:$0xff] %v13569_v50  ;;  %v13589_v3 = vmax.f32 %v21513_v8, %v2505_v55  ;;  %v21517_v24 = vmax.f32 %v21515_v39, %v21516_v47  ;;  %v2509_v55 = vsel %vm21527_vm14, 1.0, %v19212_v31  ;;  %vm21532_vm14 = vcmp.eq.s32.totalorder %v13100_v46, %v21429_v20  ;;  %v21535_v12 = vld [vmem:[#allocation63_spill] sm:$0xff]  ;;  %v21536_v25 = vld [vmem:[#allocation289_spill] sm:$0xff]  ;;  %v21687_v34 = vld [vmem:[#allocation28_spill] sm:$0xff] }
 0x391   : > { %21510 = vst [vmem:[#allocation320_spill] sm:$0xff] %v13584_v27  ;;  %21522 = vst [vmem:[#allocation331_spill] sm:$0xff] %v13599_v33  ;;  %v13604_v0 = vmax.f32 %v21525_v16, %v2508_v37  ;;  %v2511_v37 = vsel %vm21531_vm4, 1.0, %v19212_v31  ;;  %v2512_v43 = vsel %vm21532_vm14, 1.0, %v19212_v31  ;;  %vm1512_vm4 = vcmp.eq.s32.totalorder %v13100_v46, %v19474_v44  ;;  %v21539_v1 = vld [vmem:[#allocation293_spill] sm:$0xff] }
 0x392   : > { %21514 = vst [vmem:[#allocation324_spill] sm:$0xff] %v13589_v3  ;;  %v13594_v42 = vmax.f32 %v21517_v24, %v2506_v57  ;;  %v2510_v57 = vsel %vm21528_vm11, 1.0, %v19212_v31  ;;  %vm21533_vm11 = vcmp.eq.s32.totalorder %v13100_v46, %v21430_v48  ;;  %vm1514_vm14 = vcmp.eq.s32.totalorder %v13100_v46, %v21325_v19  ;;  %v21540_v16 = vld [vmem:[#allocation297_spill] sm:$0xff] }
 0x393   : > { %21526 = vst [vmem:[#allocation209_spill] sm:$0xff] %v13604_v0  ;;  %v2513_v58 = vsel %vm21533_vm11, 1.0, %v19212_v31  ;;  %v2515_v8 = vsel %vm1491_vm2, 1.0, %v19212_v31  ;;  %v2516_v39 = vsel %vm1492_vm7, 1.0, %v19212_v31  ;;  %v2517_v47 = vsel %vm1493_vm13, 1.0, %v19212_v31  ;;  %v21555_v53 = vld [vmem:[#allocation325_spill] sm:$0xff] }
 0x394   : > { %21518 = vst [vmem:[#allocation36_spill] sm:$0xff] %v13594_v42  ;;  %v2518_v24 = vsel %vm1494_vm6, 1.0, %v19212_v31  ;;  %vm1516_vm2 = vcmp.eq.s32.totalorder %v13100_v46, %v21333_v14  ;;  %vm1517_vm11 = vcmp.eq.s32.totalorder %v13100_v46, %v21338_v30  ;;  %vm1518_vm7 = vcmp.eq.s32.totalorder %v13100_v46, %v21339_v35  ;;  %v21556_v50 = vld [vmem:[#allocation37_spill] sm:$0xff]  ;;  %v21683_v30 = vld [vmem:[#allocation262_spill] sm:$0xff]  ;;  %v21684_v14 = vld [vmem:[#allocation272_spill] sm:$0xff] }
 0x395   : > { %v21537_v51 = vmax.f32 %v21535_v12, %v21536_v25  ;;  %v21541_v0 = vmax.f32 %v21539_v1, %v21540_v16  ;;  %v2519_v42 = vsel %vm1495_vm0, 1.0, %v19212_v31  ;;  %v2520_v3 = vsel %vm1496_vm10, 1.0, %v19212_v31  ;;  %v21544_v12 = vld [vmem:[#allocation305_spill] sm:$0xff] }
 0x396   : > { %v21547_v25 = vld [vmem:[#allocation309_spill] sm:$0xff]  ;;  %v21557_v10 = vmax.f32 %v21555_v53, %v21556_v50  ;;  %vm21583_vm0 = vcmp.eq.s32.totalorder %v13100_v46, %v21272_v11  ;;  %vm21584_vm10 = vcmp.eq.s32.totalorder %v13100_v46, %v21468_v38  ;;  %v21625_v40 = vmax.f32 %v21623_v26, %v21624_v22  ;;  %v21627_v38 = vld [vmem:[#allocation302_spill] sm:$0xff]  ;;  %v13860_v26 = vpop.permute.xlu0 %693 }
 0x397   : > { %v13669_v49 = vmax.f32 %v21537_v51, %v2509_v55  ;;  %v13674_v33 = vmax.f32 %v21541_v0, %v2510_v57  ;;  %v21543_v55 = vld [vmem:[#allocation301_spill] sm:$0xff]  ;;  %v21628_v11 = vld [vmem:[#allocation306_spill] sm:$0xff]  ;;  %v21685_v36 = vmax.f32 %v21683_v30, %v21684_v14  ;;  %v21698_v30 = vld [vmem:[#allocation291_spill] sm:$0xff] }
 0x398   : > { %v21545_v0 = vmax.f32 %v21543_v55, %v21544_v12  ;;  %v21548_v51 = vld [vmem:[#allocation313_spill] sm:$0xff]  ;;  %v13706_v15 = vmax.f32 %v21557_v10, %v2514_v56  ;;  %v21561_v55 = vmax.f32 %v21559_v18, %v21560_v5  ;;  %v21563_v12 = vld [vmem:[#allocation214_spill] sm:$0xff] }
 0x399   : > { %21538 = vst [vmem:[#allocation213_spill] sm:$0xff] %v13669_v49  ;;  %21542 = vst [vmem:[#allocation217_spill] sm:$0xff] %v13674_v33  ;;  %v21549_v1 = vmax.f32 %v21547_v25, %v21548_v51  ;;  %v21551_v33 = vld [vmem:[#allocation317_spill] sm:$0xff]  ;;  %v21567_v51 = vld [vmem:[#allocation64_spill] sm:$0xff] }
 0x39a   : > { %v13691_v57 = vmax.f32 %v21545_v0, %v2511_v37  ;;  %v21552_v49 = vld [vmem:[#allocation321_spill] sm:$0xff]  ;;  %21558 = vst [vmem:[#allocation232_spill] sm:$0xff] %v13706_v15  ;;  %v13711_v37 = vmax.f32 %v21561_v55, %v2515_v8  ;;  %v21564_v0 = vld [vmem:[#allocation218_spill] sm:$0xff] }
 0x39b   : > { %v13696_v16 = vmax.f32 %v21549_v1, %v2512_v43  ;;  %v21553_v27 = vmax.f32 %v21551_v33, %v21552_v49  ;;  %v21565_v25 = vmax.f32 %v21563_v12, %v21564_v0  ;;  %v21568_v1 = vld [vmem:[#allocation225_spill] sm:$0xff] }
 0x39c   : > { %21546 = vst [vmem:[#allocation221_spill] sm:$0xff] %v13691_v57  ;;  %21562 = vst [vmem:[#allocation277_spill] sm:$0xff] %v13711_v37  ;;  %v21569_v33 = vmax.f32 %v21567_v51, %v21568_v1  ;;  %v21572_v49 = vld [vmem:[#allocation233_spill] sm:$0xff]  ;;  %v2525_v51 = vsel %vm1501_vm8, 1.0, %v19212_v31  ;;  %v2526_v1 = vsel %vm1502_vm12, 1.0, %v19212_v31  ;;  %vm21591_vm8 = vcmp.eq.s32.totalorder %v13100_v46, %v21293_v59 }
 0x39d   : > { %21550 = vst [vmem:[#allocation224_spill] sm:$0xff] %v13696_v16  ;;  %v13701_v9 = vmax.f32 %v21553_v27, %v2513_v58  ;;  %v13716_v43 = vmax.f32 %v21565_v25, %v2516_v39  ;;  %v21571_v58 = vld [vmem:[#allocation229_spill] sm:$0xff]  ;;  %v2524_v25 = vsel %vm1500_vm9, 1.0, %v19212_v31  ;;  %vm21592_vm12 = vcmp.eq.s32.totalorder %v13100_v46, %v21294_v23  ;;  %v21609_v23 = vld [vmem:[#allocation19_spill] sm:$0xff] }
 0x39e   : > { %v13721_v27 = vmax.f32 %v21569_v33, %v2517_v47  ;;  %v21573_v50 = vmax.f32 %v21571_v58, %v21572_v49  ;;  %v21575_v10 = vld [vmem:[#allocation237_spill] sm:$0xff]  ;;  %v2521_v47 = vsel %vm21583_vm0, 1.0, %v19212_v31  ;;  %v21587_v33 = vld [vmem:[#allocation75_spill] sm:$0xff]  ;;  %v21588_v58 = vld [vmem:[#allocation76_spill] sm:$0xff]  ;;  %v13838_v4 = vmax.f32 %v21625_v40, %v2526_v1 }
 0x39f   : > { %21554 = vst [vmem:[#allocation228_spill] sm:$0xff] %v13701_v9  ;;  %21566 = vst [vmem:[#allocation240_spill] sm:$0xff] %v13716_v43  ;;  %v21576_v56 = vld [vmem:[#allocation241_spill] sm:$0xff]  ;;  %v21589_v49 = vld [vmem:[#allocation14_spill] sm:$0xff] }
 0x3a0   : > { %21570 = vst [vmem:[#allocation244_spill] sm:$0xff] %v13721_v27  ;;  %v13726_v53 = vmax.f32 %v21573_v50, %v2518_v24  ;;  %v21577_v5 = vmax.f32 %v21575_v10, %v21576_v56  ;;  %v21579_v8 = vld [vmem:[#allocation245_spill] sm:$0xff]  ;;  %v2522_v24 = vsel %vm21584_vm10, 1.0, %v19212_v31  ;;  %v21590_v50 = vld [vmem:[#allocation15_spill] sm:$0xff]  ;;  %v2527_v10 = vsel %vm21591_vm8, 1.0, %v19212_v31  ;;  %21626 = vst [vmem:[#allocation282_spill] sm:$0xff] %v13838_v4 }
 0x3a1   : > { %v21580_v55 = vld [vmem:[#allocation249_spill] sm:$0xff]  ;;  %v2528_v56 = vsel %vm21592_vm12, 1.0, %v19212_v31  ;;  %vm21594_vm10 = vcmp.eq.s32.totalorder %v13100_v46, %v21474_v61 }
 0x3a2   : > { %21574 = vst [vmem:[#allocation248_spill] sm:$0xff] %v13726_v53  ;;  %v13731_v18 = vmax.f32 %v21577_v5, %v2519_v42  ;;  %v21581_v12 = vmax.f32 %v21579_v8, %v21580_v55  ;;  %v21585_v0 = vld [vmem:[#allocation73_spill] sm:$0xff]  ;;  %v21586_v42 = vld [vmem:[#allocation74_spill] sm:$0xff]  ;;  %v2530_v8 = vsel %vm21594_vm10, 1.0, %v19212_v31  ;;  %v21595_v55 = vld [vmem:[#allocation16_spill] sm:$0xff]  ;;  %vm21608_vm10 = vcmp.eq.s32.totalorder %v13100_v46, %v21486_v13 }
 0x3a3   : > { %vm1521_vm6 = vcmp.eq.s32.totalorder %v13100_v46, %v21585_v0  ;;  %vm1522_vm13 = vcmp.eq.s32.totalorder %v13100_v46, %v21586_v42  ;;  %vm1527_vm9 = vcmp.eq.s32.totalorder %v13100_v46, %v21595_v55  ;;  %v21599_v53 = vld [vmem:[#allocation253_spill] sm:$0xff] }
 0x3a4   : > { %21578 = vst [vmem:[#allocation252_spill] sm:$0xff] %v13731_v18  ;;  %v13736_v39 = vmax.f32 %v21581_v12, %v2520_v3  ;;  %v2523_v3 = vsel %vm1499_vm5, 1.0, %v19212_v31  ;;  %vm21593_vm5 = vcmp.eq.s32.totalorder %v13100_v46, %v21473_v52  ;;  %v21596_v12 = vld [vmem:[#allocation77_spill] sm:$0xff]  ;;  %v21598_v18 = vld [vmem:[#allocation18_spill] sm:$0xff]  ;;  %v2532_v52 = vsel %vm21608_vm10, 1.0, %v19212_v31 }
 0x3a5   : > { %v2529_v5 = vsel %vm21593_vm5, 1.0, %v19212_v31  ;;  %vm1528_vm8 = vcmp.eq.s32.totalorder %v13100_v46, %v21596_v12  ;;  %v21600_v27 = vld [vmem:[#allocation257_spill] sm:$0xff]  ;;  %vm21607_vm5 = vcmp.eq.s32.totalorder %v13100_v46, %v21485_v45  ;;  %v21620_v45 = vld [vmem:[#allocation290_spill] sm:$0xff]  ;;  %vm21652_vm10 = vcmp.eq.s32.totalorder %v13100_v46, %v21530_v62 }
 0x3a6   : > { %21582 = vst [vmem:[#allocation256_spill] sm:$0xff] %v13736_v39  ;;  %v21597_v39 = vld [vmem:[#allocation17_spill] sm:$0xff]  ;;  %v21601_v43 = vmax.f32 %v21599_v53, %v21600_v27  ;;  %v2531_v61 = vsel %vm21607_vm5, 1.0, %v19212_v31  ;;  %v21611_v27 = vld [vmem:[#allocation267_spill] sm:$0xff]  ;;  %vm21651_vm5 = vcmp.eq.s32.totalorder %v13100_v46, %v21529_v29 }
 0x3a7   : > { %v21603_v15 = vld [vmem:[#allocation261_spill] sm:$0xff]  ;;  %v21615_v53 = vld [vmem:[#allocation279_spill] sm:$0xff] }
 0x3a8   : > { %v13801_v37 = vmax.f32 %v21601_v43, %v2521_v47  ;;  %v21604_v9 = vld [vmem:[#allocation265_spill] sm:$0xff]  ;;  %v21610_v43 = vld [vmem:[#allocation78_spill] sm:$0xff]  ;;  %v21616_v47 = vld [vmem:[#allocation283_spill] sm:$0xff] }
 0x3a9   : > { %v21605_v16 = vmax.f32 %v21603_v15, %v21604_v9  ;;  %v21612_v15 = vld [vmem:[#allocation271_spill] sm:$0xff] }
 0x3aa   : > { %21602 = vst [vmem:[#allocation260_spill] sm:$0xff] %v13801_v37  ;;  %v21613_v9 = vmax.f32 %v21611_v27, %v21612_v15  ;;  %v21619_v37 = vld [vmem:[#allocation286_spill] sm:$0xff]  ;;  %v21629_v27 = vmax.f32 %v21627_v38, %v21628_v11  ;;  %v21643_v11 = vld [vmem:[#allocation207_spill] sm:$0xff] }
 0x3ab   : > { %v13806_v57 = vmax.f32 %v21605_v16, %v2522_v24  ;;  %v21617_v24 = vmax.f32 %v21615_v53, %v21616_v47  ;;  %v21621_v13 = vmax.f32 %v21619_v37, %v21620_v45  ;;  %v21631_v15 = vld [vmem:[#allocation310_spill] sm:$0xff]  ;;  %v21644_v38 = vld [vmem:[#allocation211_spill] sm:$0xff] }
 0x3ac   : > { %v13823_v16 = vmax.f32 %v21613_v9, %v2523_v3  ;;  %v13843_v3 = vmax.f32 %v21629_v27, %v2527_v10  ;;  %v21632_v9 = vld [vmem:[#allocation314_spill] sm:$0xff]  ;;  %v21645_v1 = vmax.f32 %v21643_v11, %v21644_v38  ;;  %v21647_v27 = vld [vmem:[#allocation215_spill] sm:$0xff]  ;;  %v2540_v11 = vsel %vm1516_vm2, 1.0, %v19212_v31 }
 0x3ad   : > { %21606 = vst [vmem:[#allocation264_spill] sm:$0xff] %v13806_v57  ;;  %v13828_v57 = vmax.f32 %v21617_v24, %v2524_v25  ;;  %v13833_v59 = vmax.f32 %v21621_v13, %v2525_v51  ;;  %v21633_v53 = vmax.f32 %v21631_v15, %v21632_v9  ;;  %v21635_v47 = vld [vmem:[#allocation318_spill] sm:$0xff]  ;;  %v21640_v51 = vld [vmem:[#allocation328_spill] sm:$0xff]  ;;  %v2541_v38 = vsel %vm1517_vm11, 1.0, %v19212_v31 }
 0x3ae   : > { %21614 = vst [vmem:[#allocation266_spill] sm:$0xff] %v13823_v16  ;;  %21630 = vst [vmem:[#allocation63_spill] sm:$0xff] %v13843_v3  ;;  %v21636_v24 = vld [vmem:[#allocation322_spill] sm:$0xff]  ;;  %v13865_v10 = vmax.f32 %v21645_v1, %v2531_v61  ;;  %v21654_v61 = vld [vmem:[#allocation21_spill] sm:$0xff]  ;;  %v2542_v1 = vsel %vm1518_vm7, 1.0, %v19212_v31  ;;  %vm1541_vm7 = vcmp.eq.s32.totalorder %v13860_v26, %v21687_v34 }
 0x3af   : > { %21618 = vst [vmem:[#allocation270_spill] sm:$0xff] %v13828_v57  ;;  %21622 = vst [vmem:[#allocation278_spill] sm:$0xff] %v13833_v59  ;;  %v13848_v25 = vmax.f32 %v21633_v53, %v2528_v56  ;;  %v21637_v45 = vmax.f32 %v21635_v47, %v21636_v24  ;;  %v21639_v37 = vld [vmem:[#allocation326_spill] sm:$0xff]  ;;  %v21648_v56 = vld [vmem:[#allocation219_spill] sm:$0xff]  ;;  %vm1534_vm12 = vcmp.eq.s32.totalorder %v13860_v26, %v21654_v61  ;;  %v2536_v47 = vsel %vm1512_vm4, 1.0, %v19212_v31 }
 0x3b0   : > { %v21641_v22 = vmax.f32 %v21639_v37, %v21640_v51  ;;  %21646 = vst [vmem:[#allocation301_spill] sm:$0xff] %v13865_v10  ;;  %v21649_v15 = vmax.f32 %v21647_v27, %v21648_v56  ;;  %v21653_v53 = vld [vmem:[#allocation20_spill] sm:$0xff]  ;;  %v2537_v24 = vsel %vm1513_vm15, 1.0, %v19212_v31  ;;  %v21655_v37 = vld [vmem:[#allocation22_spill] sm:$0xff]  ;;  %v21656_v51 = vld [vmem:[#allocation23_spill] sm:$0xff] }
 0x3b1   : > { %21634 = vst [vmem:[#allocation289_spill] sm:$0xff] %v13848_v25  ;;  %v13853_v13 = vmax.f32 %v21637_v45, %v2529_v5  ;;  %v2533_v5 = vsel %vm21651_vm5, 1.0, %v19212_v31  ;;  %vm1533_vm0 = vcmp.eq.s32.totalorder %v13860_v26, %v21653_v53  ;;  %v2538_v45 = vsel %vm1514_vm14, 1.0, %v19212_v31  ;;  %v21657_v27 = vld [vmem:[#allocation24_spill] sm:$0xff]  ;;  %v21658_v56 = vld [vmem:[#allocation25_spill] sm:$0xff]  ;;  %v21664_v25 = vld [vmem:[#allocation234_spill] sm:$0xff] }
 0x3b2   : > { %v13858_v40 = vmax.f32 %v21641_v22, %v2530_v8  ;;  %v13870_v9 = vmax.f32 %v21649_v15, %v2532_v52  ;;  %v2534_v8 = vsel %vm21652_vm10, 1.0, %v19212_v31  ;;  %v2535_v52 = vsel %vm1511_vm1, 1.0, %v19212_v31  ;;  %v21659_v15 = vld [vmem:[#allocation222_spill] sm:$0xff] }
 0x3b3   : > { %21638 = vst [vmem:[#allocation293_spill] sm:$0xff] %v13853_v13  ;;  %vm1535_vm5 = vcmp.eq.s32.totalorder %v13860_v26, %v21655_v37  ;;  %vm1536_vm1 = vcmp.eq.s32.totalorder %v13860_v26, %v21656_v51  ;;  %v2539_v22 = vsel %vm1515_vm3, 1.0, %v19212_v31  ;;  %vm1537_vm15 = vcmp.eq.s32.totalorder %v13860_v26, %v21657_v27  ;;  %v21663_v13 = vld [vmem:[#allocation230_spill] sm:$0xff] }
 0x3b4   : > { %21642 = vst [vmem:[#allocation297_spill] sm:$0xff] %v13858_v40  ;;  %21650 = vst [vmem:[#allocation305_spill] sm:$0xff] %v13870_v9  ;;  %vm1538_vm4 = vcmp.eq.s32.totalorder %v13860_v26, %v21658_v56  ;;  %v21660_v9 = vld [vmem:[#allocation226_spill] sm:$0xff]  ;;  %v21665_v3 = vmax.f32 %v21663_v13, %v21664_v25  ;;  %vm21667_vm14 = vcmp.eq.s32.totalorder %v13100_v46, %v21344_v41 }
 0x3b5   : > { %v21661_v10 = vmax.f32 %v21659_v15, %v21660_v9  ;;  %v2543_v59 = vsel %vm21667_vm14, 1.0, %v19212_v31  ;;  %vm21668_vm3 = vcmp.eq.s32.totalorder %v13100_v46, %v21345_v21  ;;  %v21669_v16 = vld [vmem:[#allocation26_spill] sm:$0xff]  ;;  %v13964_v19 = vmax.f32 %v21685_v36, %v2538_v45  ;;  %v21701_v45 = vld [vmem:[#allocation295_spill] sm:$0xff] }
 0x3b6   : > { %v13932_v4 = vmax.f32 %v21665_v3, %v2534_v8  ;;  %v2544_v57 = vsel %vm21668_vm3, 1.0, %v19212_v31  ;;  %vm1539_vm2 = vcmp.eq.s32.totalorder %v13860_v26, %v21669_v16  ;;  %v21671_v9 = vld [vmem:[#allocation238_spill] sm:$0xff]  ;;  %vm21717_vm10 = vcmp.eq.s32.totalorder %v13100_v46, %v21587_v33 }
 0x3b7   : > { %v13927_v40 = vmax.f32 %v21661_v10, %v2533_v5  ;;  %v21670_v10 = vld [vmem:[#allocation27_spill] sm:$0xff]  ;;  %v21672_v25 = vld [vmem:[#allocation242_spill] sm:$0xff]  ;;  %21686 = vst [vmem:[#allocation37_spill] sm:$0xff] %v13964_v19  ;;  %vm21720_vm3 = vcmp.eq.s32.totalorder %v13100_v46, %v21590_v50 }
 0x3b8   : > { %21666 = vst [vmem:[#allocation313_spill] sm:$0xff] %v13932_v4  ;;  %vm1540_vm11 = vcmp.eq.s32.totalorder %v13860_v26, %v21670_v10  ;;  %v21673_v3 = vmax.f32 %v21671_v9, %v21672_v25  ;;  %v21675_v5 = vld [vmem:[#allocation246_spill] sm:$0xff]  ;;  %v21689_v9 = vld [vmem:[#allocation268_spill] sm:$0xff] }
 0x3b9   : > { %21662 = vst [vmem:[#allocation309_spill] sm:$0xff] %v13927_v40  ;;  %v21676_v8 = vld [vmem:[#allocation250_spill] sm:$0xff] }
 0x3ba   : > { %v13949_v13 = vmax.f32 %v21673_v3, %v2535_v52  ;;  %v21677_v15 = vmax.f32 %v21675_v5, %v21676_v8  ;;  %v21679_v40 = vld [vmem:[#allocation254_spill] sm:$0xff]  ;;  %v21688_v52 = vld [vmem:[#allocation29_spill] sm:$0xff]  ;;  %v21693_v5 = vld [vmem:[#allocation280_spill] sm:$0xff] }
 0x3bb   : > { %v21680_v41 = vld [vmem:[#allocation258_spill] sm:$0xff]  ;;  %v21702_v8 = vld [vmem:[#allocation299_spill] sm:$0xff] }
 0x3bc   : > { %21674 = vst [vmem:[#allocation317_spill] sm:$0xff] %v13949_v13  ;;  %v13954_v4 = vmax.f32 %v21677_v15, %v2536_v47  ;;  %v21681_v21 = vmax.f32 %v21679_v40, %v21680_v41  ;;  %v21690_v25 = vld [vmem:[#allocation274_spill] sm:$0xff]  ;;  %v21694_v41 = vld [vmem:[#allocation284_spill] sm:$0xff]  ;;  %v21703_v15 = vmax.f32 %v21701_v45, %v21702_v8  ;;  %v2550_v8 = vsel %vm21720_vm3, 1.0, %v19212_v31 }
 0x3bd   : > { %v21691_v47 = vmax.f32 %v21689_v9, %v21690_v25  ;;  %v21707_v9 = vld [vmem:[#allocation303_spill] sm:$0xff]  ;;  %vm21723_vm3 = vcmp.eq.s32.totalorder %v13100_v46, %v21597_v39 }
 0x3be   : > { %21678 = vst [vmem:[#allocation321_spill] sm:$0xff] %v13954_v4  ;;  %v13959_v35 = vmax.f32 %v21681_v21, %v2537_v24  ;;  %v21695_v21 = vmax.f32 %v21693_v5, %v21694_v41  ;;  %v21697_v24 = vld [vmem:[#allocation287_spill] sm:$0xff]  ;;  %v13988_v19 = vmax.f32 %v21703_v15, %v2542_v1  ;;  %v2545_v1 = vsel %vm1521_vm6, 1.0, %v19212_v31  ;;  %v21721_v15 = vld [vmem:[#allocation34_spill] sm:$0xff] }
 0x3bf   : > { %v13973_v3 = vmax.f32 %v21691_v47, %v2539_v22  ;;  %v21699_v36 = vmax.f32 %v21697_v24, %v21698_v30  ;;  %v21706_v22 = vld [vmem:[#allocation31_spill] sm:$0xff]  ;;  %v2546_v24 = vsel %vm1522_vm13, 1.0, %v19212_v31  ;;  %v21715_v30 = vld [vmem:[#allocation32_spill] sm:$0xff]  ;;  %vm21718_vm6 = vcmp.eq.s32.totalorder %v13100_v46, %v21588_v58 }
 0x3c0   : > { %21682 = vst [vmem:[#allocation325_spill] sm:$0xff] %v13959_v35  ;;  %v13978_v40 = vmax.f32 %v21695_v21, %v2540_v11  ;;  %21704 = vst [vmem:[#allocation218_spill] sm:$0xff] %v13988_v19  ;;  %v21705_v35 = vld [vmem:[#allocation30_spill] sm:$0xff]  ;;  %v21708_v25 = vld [vmem:[#allocation307_spill] sm:$0xff]  ;;  %vm21719_vm13 = vcmp.eq.s32.totalorder %v13100_v46, %v21589_v49  ;;  %vm1547_vm14 = vcmp.eq.s32.totalorder %v13860_v26, %v21721_v15 }
 0x3c1   : > { %21692 = vst [vmem:[#allocation206_spill] sm:$0xff] %v13973_v3  ;;  %v13983_v14 = vmax.f32 %v21699_v36, %v2541_v38  ;;  %v21709_v11 = vmax.f32 %v21707_v9, %v21708_v25  ;;  %v21711_v5 = vld [vmem:[#allocation311_spill] sm:$0xff]  ;;  %v2548_v36 = vsel %vm21718_vm6, 1.0, %v19212_v31  ;;  %v2549_v45 = vsel %vm21719_vm13, 1.0, %v19212_v31 }
 0x3c2   : > { %21696 = vst [vmem:[#allocation210_spill] sm:$0xff] %v13978_v40  ;;  %v21712_v41 = vld [vmem:[#allocation315_spill] sm:$0xff]  ;;  %v2551_v25 = vsel %vm1527_vm9, 1.0, %v19212_v31  ;;  %vm21724_vm6 = vcmp.eq.s32.totalorder %v13100_v46, %v21598_v18  ;;  %vm1549_vm13 = vcmp.eq.s32.totalorder %v13860_v26, %v19361_v2  ;;  %v21730_v40 = vld [vmem:[#allocation329_spill] sm:$0xff]  ;;  %vm1552_vm9 = vcmp.eq.s32.totalorder %v13860_v26, %v21429_v20 }
 0x3c3   : > { %21700 = vst [vmem:[#allocation214_spill] sm:$0xff] %v13983_v14  ;;  %v13997_v47 = vmax.f32 %v21709_v11, %v2543_v59  ;;  %v21713_v38 = vmax.f32 %v21711_v5, %v21712_v41  ;;  %v21716_v59 = vld [vmem:[#allocation33_spill] sm:$0xff]  ;;  %v21722_v9 = vld [vmem:[#allocation35_spill] sm:$0xff]  ;;  %v2552_v11 = vsel %vm1528_vm8, 1.0, %v19212_v31  ;;  %v2553_v5 = vsel %vm21723_vm3, 1.0, %v19212_v31 }
 0x3c4   : > { %v2554_v41 = vsel %vm21724_vm6, 1.0, %v19212_v31  ;;  %v21729_v14 = vld [vmem:[#allocation327_spill] sm:$0xff]  ;;  %vm21733_vm8 = vcmp.eq.s32.totalorder %v13100_v46, %v21609_v23  ;;  %vm21734_vm3 = vcmp.eq.s32.totalorder %v13100_v46, %v21610_v43  ;;  %vm1551_vm6 = vcmp.eq.s32.totalorder %v13860_v26, %v21428_v7  ;;  %v21839_v20 = vld [vmem:[#allocation65_spill] sm:$0xff]  ;;  %v21840_v7 = vld [vmem:[#allocation66_spill] sm:$0xff] }
 0x3c5   : > { %21710 = vst [vmem:[#allocation64_spill] sm:$0xff] %v13997_v47  ;;  %v14002_v21 = vmax.f32 %v21713_v38, %v2544_v57  ;;  %v2547_v57 = vsel %vm21717_vm10, 1.0, %v19212_v31  ;;  %vm1548_vm10 = vcmp.eq.s32.totalorder %v13860_v26, %v21722_v9  ;;  %v21725_v38 = vld [vmem:[#allocation319_spill] sm:$0xff]  ;;  %v21731_v3 = vmax.f32 %v21729_v14, %v21730_v40  ;;  %v21736_v40 = vld [vmem:[#allocation212_spill] sm:$0xff] }
 0x3c6   : > { %v2555_v13 = vsel %vm21733_vm8, 1.0, %v19212_v31  ;;  %v2556_v18 = vsel %vm21734_vm3, 1.0, %v19212_v31  ;;  %v21747_v23 = vld [vmem:[#allocation231_spill] sm:$0xff]  ;;  %vm1557_vm8 = vcmp.eq.s32.totalorder %v13860_v26, %v21438_v6  ;;  %vm1558_vm3 = vcmp.eq.s32.totalorder %v13860_v26, %v21439_v17  ;;  %v21860_v6 = vld [vmem:[#allocation72_spill] sm:$0xff] }
 0x3c7   : > { %21714 = vst [vmem:[#allocation225_spill] sm:$0xff] %v14002_v21  ;;  %v21726_v21 = vld [vmem:[#allocation323_spill] sm:$0xff]  ;;  %v14064_v4 = vmax.f32 %v21731_v3, %v2546_v24 }
 0x3c8   : > { %v21727_v47 = vmax.f32 %v21725_v38, %v21726_v21  ;;  %v21739_v21 = vld [vmem:[#allocation216_spill] sm:$0xff]  ;;  %v21748_v39 = vld [vmem:[#allocation235_spill] sm:$0xff] }
 0x3c9   : > { %21732 = vst [vmem:[#allocation233_spill] sm:$0xff] %v14064_v4  ;;  %v21743_v4 = vld [vmem:[#allocation223_spill] sm:$0xff]  ;;  %v21749_v12 = vmax.f32 %v21747_v23, %v21748_v39 }
 0x3ca   : > { %v14059_v19 = vmax.f32 %v21727_v47, %v2545_v1  ;;  %v21735_v47 = vld [vmem:[#allocation208_spill] sm:$0xff]  ;;  %v21760_v23 = vld [vmem:[#allocation259_spill] sm:$0xff] }
 0x3cb   : > { %v21737_v3 = vmax.f32 %v21735_v47, %v21736_v40  ;;  %v21740_v1 = vld [vmem:[#allocation220_spill] sm:$0xff]  ;;  %v14096_v55 = vmax.f32 %v21749_v12, %v2550_v8  ;;  %v21752_v47 = vld [vmem:[#allocation243_spill] sm:$0xff] }
 0x3cc   : > { %21728 = vst [vmem:[#allocation229_spill] sm:$0xff] %v14059_v19  ;;  %v21741_v24 = vmax.f32 %v21739_v21, %v21740_v1  ;;  %v21744_v19 = vld [vmem:[#allocation227_spill] sm:$0xff]  ;;  %v21764_v1 = vld [vmem:[#allocation273_spill] sm:$0xff] }
 0x3cd   : > { %v14081_v14 = vmax.f32 %v21737_v3, %v2547_v57  ;;  %v21745_v46 = vmax.f32 %v21743_v4, %v21744_v19  ;;  %21750 = vst [vmem:[#allocation249_spill] sm:$0xff] %v14096_v55  ;;  %v21751_v57 = vld [vmem:[#allocation239_spill] sm:$0xff]  ;;  %v21953_v55 = vld [vmem:[#allocation44_spill] sm:$0xff] }
 0x3ce   : > { %v14086_v38 = vmax.f32 %v21741_v24, %v2548_v36  ;;  %v21753_v36 = vmax.f32 %v21751_v57, %v21752_v47  ;;  %v21755_v3 = vld [vmem:[#allocation247_spill] sm:$0xff] }
 0x3cf   : > { %21738 = vst [vmem:[#allocation237_spill] sm:$0xff] %v14081_v14  ;;  %v14091_v43 = vmax.f32 %v21745_v46, %v2549_v45  ;;  %v21756_v19 = vld [vmem:[#allocation251_spill] sm:$0xff] }
 0x3d0   : > { %21742 = vst [vmem:[#allocation241_spill] sm:$0xff] %v14086_v38  ;;  %v14105_v40 = vmax.f32 %v21753_v36, %v2551_v25  ;;  %v21757_v4 = vmax.f32 %v21755_v3, %v21756_v19  ;;  %v21759_v21 = vld [vmem:[#allocation255_spill] sm:$0xff]  ;;  %v21767_v25 = vld [vmem:[#allocation269_spill] sm:$0xff] }
 0x3d1   : > { %21746 = vst [vmem:[#allocation245_spill] sm:$0xff] %v14091_v43  ;;  %v21761_v39 = vmax.f32 %v21759_v21, %v21760_v23  ;;  %v21763_v8 = vld [vmem:[#allocation263_spill] sm:$0xff]  ;;  %v21771_v36 = vld [vmem:[#allocation281_spill] sm:$0xff]  ;;  %v21794_v21 = vld [vmem:[#allocation52_spill] sm:$0xff] }
 0x3d2   : > { %21754 = vst [vmem:[#allocation253_spill] sm:$0xff] %v14105_v40  ;;  %v14110_v45 = vmax.f32 %v21757_v4, %v2552_v11  ;;  %v21765_v24 = vmax.f32 %v21763_v8, %v21764_v1  ;;  %v21768_v57 = vld [vmem:[#allocation275_spill] sm:$0xff]  ;;  %v21772_v3 = vld [vmem:[#allocation285_spill] sm:$0xff]  ;;  %v14146_v4 = vsel %vm1534_vm12, 1.0, %v19212_v31  ;;  %v14166_v8 = vsel %vm1536_vm1, 1.0, %v19212_v31  ;;  %v21823_v40 = vld [vmem:[#allocation60_spill] sm:$0xff] }
 0x3d3   : > { %v14115_v12 = vmax.f32 %v21761_v39, %v2553_v5  ;;  %v21769_v11 = vmax.f32 %v21767_v25, %v21768_v57  ;;  %v21773_v5 = vmax.f32 %v21771_v36, %v21772_v3  ;;  %21776 = vst [vmem:[#allocation283_spill] sm:$0xff] %v14146_v4  ;;  %v14160_v39 = vsel %vm1535_vm5, 1.0, %v19212_v31  ;;  %21780 = vst [vmem:[#allocation290_spill] sm:$0xff] %v14166_v8  ;;  %v21781_v1 = vld [vmem:[#allocation47_spill] sm:$0xff]  ;;  %v21787_v23 = vld [vmem:[#allocation49_spill] sm:$0xff] }
 0x3d4   : > { %21758 = vst [vmem:[#allocation257_spill] sm:$0xff] %v14110_v45  ;;  %v14120_v46 = vmax.f32 %v21765_v24, %v2554_v41  ;;  %v14140_v41 = vsel %vm1533_vm0, 1.0, %v19212_v31  ;;  %21779 = vst [vmem:[#allocation286_spill] sm:$0xff] %v14160_v39  ;;  %vm1559_vm0 = vcmp.eq.s32.totalorder %v13860_v26, %v21781_v1  ;;  %v21782_v24 = vld [vmem:[#allocation48_spill] sm:$0xff]  ;;  %v14180_v3 = vsel %vm1537_vm15, 1.0, %v19212_v31  ;;  %v21793_v4 = vld [vmem:[#allocation51_spill] sm:$0xff] }
 0x3d5   : > { %21762 = vst [vmem:[#allocation261_spill] sm:$0xff] %v14115_v12  ;;  %v14129_v47 = vmax.f32 %v21769_v11, %v2555_v13  ;;  %v14134_v19 = vmax.f32 %v21773_v5, %v2556_v18  ;;  %21775 = vst [vmem:[#allocation279_spill] sm:$0xff] %v14140_v41  ;;  %vm1560_vm12 = vcmp.eq.s32.totalorder %v13860_v26, %v21782_v24  ;;  %v14186_v5 = vsel %vm1538_vm4, 1.0, %v19212_v31  ;;  %v21788_v13 = vld [vmem:[#allocation50_spill] sm:$0xff]  ;;  %v21800_v41 = vld [vmem:[#allocation53_spill] sm:$0xff] }
 0x3d6   : > { %21766 = vst [vmem:[#allocation265_spill] sm:$0xff] %v14120_v46  ;;  %21785 = vst [vmem:[#allocation294_spill] sm:$0xff] %v14180_v3  ;;  %vm1561_vm5 = vcmp.eq.s32.totalorder %v13860_v26, %v21787_v23  ;;  %vm1562_vm1 = vcmp.eq.s32.totalorder %v13860_v26, %v21788_v13  ;;  %v14200_v39 = vsel %vm1539_vm2, 1.0, %v19212_v31  ;;  %v14206_v25 = vsel %vm1540_vm11, 1.0, %v19212_v31  ;;  %v21801_v18 = vld [vmem:[#allocation54_spill] sm:$0xff]  ;;  %v21816_v46 = vld [vmem:[#allocation57_spill] sm:$0xff]  ;;  %v14448_v13 = vpop.permute.xlu1 %696 }
 0x3d7   : > { %21770 = vst [vmem:[#allocation267_spill] sm:$0xff] %v14129_v47  ;;  %21774 = vst [vmem:[#allocation271_spill] sm:$0xff] %v14134_v19  ;;  %vm1563_vm15 = vcmp.eq.s32.totalorder %v13860_v26, %v21793_v4  ;;  %v14220_v3 = vsel %vm1541_vm7, 1.0, %v19212_v31  ;;  %vm21798_vm2 = vcmp.eq.s32.totalorder %v13860_v26, %v21688_v52  ;;  %vm21804_vm7 = vcmp.eq.s32.totalorder %v13860_v26, %v21705_v35  ;;  %v21808_v19 = vld [vmem:[#allocation55_spill] sm:$0xff]  ;;  %v21809_v47 = vld [vmem:[#allocation56_spill] sm:$0xff] }
 0x3d8   : > { %21786 = vst [vmem:[#allocation298_spill] sm:$0xff] %v14186_v5  ;;  %21791 = vst [vmem:[#allocation302_spill] sm:$0xff] %v14200_v39  ;;  %v14226_v36 = vsel %vm21798_vm2, 1.0, %v19212_v31  ;;  %v14240_v39 = vsel %vm21804_vm7, 1.0, %v19212_v31  ;;  %vm21806_vm2 = vcmp.eq.s32.totalorder %v13860_v26, %v21706_v22  ;;  %vm21812_vm7 = vcmp.eq.s32.totalorder %v13860_v26, %v21715_v30  ;;  %v21817_v12 = vld [vmem:[#allocation58_spill] sm:$0xff]  ;;  %v21822_v45 = vld [vmem:[#allocation59_spill] sm:$0xff] }
 0x3d9   : > { %21792 = vst [vmem:[#allocation306_spill] sm:$0xff] %v14206_v25  ;;  %21797 = vst [vmem:[#allocation310_spill] sm:$0xff] %v14220_v3  ;;  %v14246_v11 = vsel %vm21806_vm2, 1.0, %v19212_v31  ;;  %v14260_v3 = vsel %vm21812_vm7, 1.0, %v19212_v31  ;;  %vm21814_vm2 = vcmp.eq.s32.totalorder %v13860_v26, %v21716_v59  ;;  %vm1569_vm11 = vcmp.eq.s32.totalorder %v13860_v26, %v21816_v46  ;;  %v21859_v17 = vld [vmem:[#allocation71_spill] sm:$0xff]  ;;  %v21894_v46 = vld [vmem:[#allocation18_spill] sm:$0xff] }
 0x3da   : > { %21799 = vst [vmem:[#allocation314_spill] sm:$0xff] %v14226_v36  ;;  %21805 = vst [vmem:[#allocation318_spill] sm:$0xff] %v14240_v39  ;;  %v14266_v8 = vsel %vm21814_vm2, 1.0, %v19212_v31  ;;  %vm1570_vm4 = vcmp.eq.s32.totalorder %v13860_v26, %v21817_v12  ;;  %v14280_v39 = vsel %vm1547_vm14, 1.0, %v19212_v31  ;;  %v14286_v5 = vsel %vm1548_vm10, 1.0, %v19212_v31  ;;  %v21893_v12 = vld [vmem:[#allocation17_spill] sm:$0xff] }
 0x3db   : > { %21807 = vst [vmem:[#allocation322_spill] sm:$0xff] %v14246_v11  ;;  %21813 = vst [vmem:[#allocation326_spill] sm:$0xff] %v14260_v3  ;;  %vm1571_vm7 = vcmp.eq.s32.totalorder %v13860_v26, %v21822_v45  ;;  %v14300_v3 = vsel %vm1549_vm13, 1.0, %v19212_v31  ;;  %vm21827_vm14 = vcmp.eq.s32.totalorder %v13860_v26, %v19362_v60  ;;  %vm1573_vm10 = vcmp.eq.s32.totalorder %v13860_v26, %v21529_v29  ;;  %v21900_v45 = vld [vmem:[#allocation78_spill] sm:$0xff]  ;;  %v21944_v14 = vld [vmem:[#allocation39_spill] sm:$0xff] }
 0x3dc   : > { %21815 = vst [vmem:[#allocation328_spill] sm:$0xff] %v14266_v8  ;;  %21820 = vst [vmem:[#allocation207_spill] sm:$0xff] %v14280_v39  ;;  %v14306_v25 = vsel %vm21827_vm14, 1.0, %v19212_v31  ;;  %vm1574_vm2 = vcmp.eq.s32.totalorder %v13860_v26, %v21530_v62  ;;  %v14320_v39 = vsel %vm1551_vm6, 1.0, %v19212_v31  ;;  %v14326_v36 = vsel %vm1552_vm9, 1.0, %v19212_v31  ;;  %v21954_v43 = vld [vmem:[#allocation45_spill] sm:$0xff] }
 0x3dd   : > { %21821 = vst [vmem:[#allocation211_spill] sm:$0xff] %v14286_v5  ;;  %21826 = vst [vmem:[#allocation215_spill] sm:$0xff] %v14300_v3  ;;  %vm21835_vm6 = vcmp.eq.s32.totalorder %v13860_v26, %v21430_v48  ;;  %vm21837_vm9 = vcmp.eq.s32.totalorder %v13860_v26, %v21431_v32  ;;  %v21847_v32 = vld [vmem:[#allocation67_spill] sm:$0xff]  ;;  %v21848_v48 = vld [vmem:[#allocation68_spill] sm:$0xff]  ;;  %v14386_v5 = vsel %vm1558_vm3, 1.0, %v19212_v31  ;;  %vm1584_vm3 = vcmp.eq.s32.totalorder %v13860_v26, %v21860_v6 }
 0x3de   : > { %21828 = vst [vmem:[#allocation219_spill] sm:$0xff] %v14306_v25  ;;  %21831 = vst [vmem:[#allocation222_spill] sm:$0xff] %v14320_v39  ;;  %v14340_v3 = vsel %vm21835_vm6, 1.0, %v19212_v31  ;;  %v14346_v11 = vsel %vm21837_vm9, 1.0, %v19212_v31  ;;  %vm21843_vm6 = vcmp.eq.s32.totalorder %v13860_v26, %v21436_v63  ;;  %vm21845_vm9 = vcmp.eq.s32.totalorder %v13860_v26, %v21437_v54  ;;  %v21853_v54 = vld [vmem:[#allocation69_spill] sm:$0xff]  ;;  %v21854_v63 = vld [vmem:[#allocation70_spill] sm:$0xff] }
 0x3df   : > { %21832 = vst [vmem:[#allocation226_spill] sm:$0xff] %v14326_v36  ;;  %21836 = vst [vmem:[#allocation230_spill] sm:$0xff] %v14340_v3  ;;  %v14360_v39 = vsel %vm21843_vm6, 1.0, %v19212_v31  ;;  %v14366_v8 = vsel %vm21845_vm9, 1.0, %v19212_v31  ;;  %vm1579_vm13 = vcmp.eq.s32.totalorder %v13860_v26, %v21847_v32  ;;  %vm1580_vm14 = vcmp.eq.s32.totalorder %v13860_v26, %v21848_v48 }
 0x3e0   : > { %21838 = vst [vmem:[#allocation234_spill] sm:$0xff] %v14346_v11  ;;  %21844 = vst [vmem:[#allocation238_spill] sm:$0xff] %v14360_v39  ;;  %v14380_v3 = vsel %vm1557_vm8, 1.0, %v19212_v31  ;;  %vm1581_vm6 = vcmp.eq.s32.totalorder %v13860_v26, %v21853_v54  ;;  %vm1582_vm9 = vcmp.eq.s32.totalorder %v13860_v26, %v21854_v63  ;;  %v14400_v39 = vsel %vm1559_vm0, 1.0, %v19212_v31 }
 0x3e1   : > { %21846 = vst [vmem:[#allocation242_spill] sm:$0xff] %v14366_v8  ;;  %21851 = vst [vmem:[#allocation246_spill] sm:$0xff] %v14380_v3  ;;  %v14406_v25 = vsel %vm1560_vm12, 1.0, %v19212_v31  ;;  %vm1583_vm8 = vcmp.eq.s32.totalorder %v13860_v26, %v21859_v17  ;;  %v14420_v3 = vsel %vm1561_vm5, 1.0, %v19212_v31  ;;  %v14426_v36 = vsel %vm1562_vm1, 1.0, %v19212_v31 }
 0x3e2   : > { %21852 = vst [vmem:[#allocation250_spill] sm:$0xff] %v14386_v5  ;;  %21857 = vst [vmem:[#allocation254_spill] sm:$0xff] %v14400_v39  ;;  %vm1585_vm0 = vcmp.eq.s32.totalorder %v13860_v26, %v21585_v0  ;;  %v14440_v39 = vsel %vm1563_vm15, 1.0, %v19212_v31  ;;  %vm21868_vm5 = vcmp.eq.s32.totalorder %v13860_v26, %v21794_v21  ;;  %vm21872_vm15 = vcmp.eq.s32.totalorder %v13860_v26, %v21800_v41  ;;  %v21883_v41 = vld [vmem:[#allocation77_spill] sm:$0xff]  ;;  %v21977_v0 = vld [vmem:[#allocation288_spill] sm:$0xff] }
 0x3e3   : > { %21858 = vst [vmem:[#allocation258_spill] sm:$0xff] %v14406_v25  ;;  %21863 = vst [vmem:[#allocation262_spill] sm:$0xff] %v14420_v3  ;;  %v14446_v11 = vsel %vm21868_vm5, 1.0, %v19212_v31  ;;  %v14462_v3 = vsel %vm21872_vm15, 1.0, %v19212_v31  ;;  %vm21874_vm5 = vcmp.eq.s32.totalorder %v13860_v26, %v21801_v18  ;;  %vm21878_vm15 = vcmp.eq.s32.totalorder %v13860_v26, %v21808_v19  ;;  %v21882_v18 = vld [vmem:[#allocation16_spill] sm:$0xff] }
 0x3e4   : > { %21864 = vst [vmem:[#allocation272_spill] sm:$0xff] %v14426_v36  ;;  %21867 = vst [vmem:[#allocation268_spill] sm:$0xff] %v14440_v39  ;;  %v14468_v8 = vsel %vm21874_vm5, 1.0, %v19212_v31  ;;  %v14482_v39 = vsel %vm21878_vm15, 1.0, %v19212_v31  ;;  %vm21880_vm5 = vcmp.eq.s32.totalorder %v13860_v26, %v21809_v47  ;;  %vm1591_vm1 = vcmp.eq.s32.totalorder %v13860_v26, %v21882_v18  ;;  %v21978_v18 = vld [vmem:[#allocation290_spill] sm:$0xff] }
 0x3e5   : > { %21869 = vst [vmem:[#allocation274_spill] sm:$0xff] %v14446_v11  ;;  %21873 = vst [vmem:[#allocation280_spill] sm:$0xff] %v14462_v3  ;;  %v14488_v5 = vsel %vm21880_vm5, 1.0, %v19212_v31  ;;  %v14502_v3 = vsel %vm1569_vm11, 1.0, %v19212_v31  ;;  %v14508_v25 = vsel %vm1570_vm4, 1.0, %v19212_v31  ;;  %vm21891_vm4 = vcmp.eq.s32.totalorder %v13860_v26, %v21823_v40  ;;  %v21899_v40 = vld [vmem:[#allocation19_spill] sm:$0xff] }
 0x3e6   : > { %21875 = vst [vmem:[#allocation284_spill] sm:$0xff] %v14468_v8  ;;  %21879 = vst [vmem:[#allocation287_spill] sm:$0xff] %v14482_v39  ;;  %v14522_v39 = vsel %vm1571_vm7, 1.0, %v19212_v31  ;;  %v14528_v36 = vsel %vm21891_vm4, 1.0, %v19212_v31  ;;  %vm1593_vm11 = vcmp.eq.s32.totalorder %v13860_v26, %v21893_v12  ;;  %vm1594_vm5 = vcmp.eq.s32.totalorder %v13860_v26, %v21894_v46  ;;  %v21966_v12 = vld [vmem:[#allocation279_spill] sm:$0xff] }
 0x3e7   : > { %21881 = vst [vmem:[#allocation291_spill] sm:$0xff] %v14488_v5  ;;  %21886 = vst [vmem:[#allocation295_spill] sm:$0xff] %v14502_v3  ;;  %vm1599_vm15 = vcmp.eq.s32.totalorder %v14448_v13, %v21655_v37  ;;  %vm1600_vm12 = vcmp.eq.s32.totalorder %v14448_v13, %v21656_v51  ;;  %v14546_v3 = vsel %vm1573_vm10, 1.0, %v19212_v31  ;;  %v14552_v11 = vsel %vm1574_vm2, 1.0, %v19212_v31  ;;  %v21945_v5 = vld [vmem:[#allocation40_spill] sm:$0xff] }
 0x3e8   : > { %21887 = vst [vmem:[#allocation299_spill] sm:$0xff] %v14508_v25  ;;  %21890 = vst [vmem:[#allocation303_spill] sm:$0xff] %v14522_v39  ;;  %vm21903_vm10 = vcmp.eq.s32.totalorder %v13860_v26, %v19473_v28  ;;  %vm21905_vm2 = vcmp.eq.s32.totalorder %v13860_v26, %v19474_v44  ;;  %vm21909_vm4 = vcmp.eq.s32.totalorder %v13860_v26, %v21839_v20  ;;  %v14608_v62 = vsel %vm1580_vm14, 1.0, %v19212_v31 }
 0x3e9   : > { %21892 = vst [vmem:[#allocation307_spill] sm:$0xff] %v14528_v36  ;;  %21897 = vst [vmem:[#allocation311_spill] sm:$0xff] %v14546_v3  ;;  %v14566_v39 = vsel %vm21903_vm10, 1.0, %v19212_v31  ;;  %v14572_v8 = vsel %vm21905_vm2, 1.0, %v19212_v31  ;;  %v14582_v25 = vsel %vm21909_vm4, 1.0, %v19212_v31  ;;  %vm21911_vm10 = vcmp.eq.s32.totalorder %v13860_v26, %v21840_v7  ;;  %v21951_v36 = vld [vmem:[#allocation42_spill] sm:$0xff] }
 0x3ea   : > { %21898 = vst [vmem:[#allocation315_spill] sm:$0xff] %v14552_v11  ;;  %21904 = vst [vmem:[#allocation319_spill] sm:$0xff] %v14566_v39  ;;  %v14588_v11 = vsel %vm21911_vm10, 1.0, %v19212_v31  ;;  %v14602_v39 = vsel %vm1579_vm13, 1.0, %v19212_v31  ;;  %vm1603_vm4 = vcmp.eq.s32.totalorder %v14448_v13, %v21669_v16  ;;  %vm1604_vm10 = vcmp.eq.s32.totalorder %v14448_v13, %v21670_v10 }
 0x3eb   : > { %21906 = vst [vmem:[#allocation323_spill] sm:$0xff] %v14572_v8  ;;  %21910 = vst [vmem:[#allocation327_spill] sm:$0xff] %v14582_v25  ;;  %v14626_v25 = vsel %vm1581_vm6, 1.0, %v19212_v31  ;;  %v14632_v3 = vsel %vm1582_vm9, 1.0, %v19212_v31  ;;  %vm1607_vm13 = vcmp.eq.s32.totalorder %v14448_v13, %v21705_v35  ;;  %vm1608_vm14 = vcmp.eq.s32.totalorder %v14448_v13, %v21706_v22  ;;  %v22000_v22 = vld [vmem:[#allocation59_spill] sm:$0xff] }
 0x3ec   : > { %21912 = vst [vmem:[#allocation329_spill] sm:$0xff] %v14588_v11  ;;  %21915 = vst [vmem:[#allocation208_spill] sm:$0xff] %v14602_v39  ;;  %vm1609_vm2 = vcmp.eq.s32.totalorder %v14448_v13, %v21715_v30  ;;  %vm1610_vm7 = vcmp.eq.s32.totalorder %v14448_v13, %v21716_v59  ;;  %v14650_v39 = vsel %vm1583_vm8, 1.0, %v19212_v31  ;;  %v14656_v57 = vsel %vm1584_vm3, 1.0, %v19212_v31  ;;  %v21952_v11 = vld [vmem:[#allocation43_spill] sm:$0xff] }
 0x3ed   : > { %21916 = vst [vmem:[#allocation212_spill] sm:$0xff] %v14608_v62  ;;  %21919 = vst [vmem:[#allocation216_spill] sm:$0xff] %v14626_v25  ;;  %v14670_v25 = vsel %vm1585_vm0, 1.0, %v19212_v31  ;;  %vm21928_vm8 = vcmp.eq.s32.totalorder %v13860_v26, %v21586_v42  ;;  %vm21932_vm3 = vcmp.eq.s32.totalorder %v13860_v26, %v21587_v33  ;;  %vm21934_vm0 = vcmp.eq.s32.totalorder %v13860_v26, %v21588_v58  ;;  %v21973_v33 = vld [vmem:[#allocation316_spill] sm:$0xff] }
 0x3ee   : > { %21920 = vst [vmem:[#allocation220_spill] sm:$0xff] %v14632_v3  ;;  %21923 = vst [vmem:[#allocation223_spill] sm:$0xff] %v14650_v39  ;;  %v14676_v8 = vsel %vm21928_vm8, 1.0, %v19212_v31  ;;  %v14686_v62 = vsel %vm21932_vm3, 1.0, %v19212_v31  ;;  %vm21936_vm8 = vcmp.eq.s32.totalorder %v13860_v26, %v21589_v49  ;;  %vm21938_vm3 = vcmp.eq.s32.totalorder %v13860_v26, %v21590_v50  ;;  %v21946_v3 = vld [vmem:[#allocation41_spill] sm:$0xff]  ;;  %v21970_v50 = vld [vmem:[#allocation283_spill] sm:$0xff] }
 0x3ef   : > { %21924 = vst [vmem:[#allocation227_spill] sm:$0xff] %v14656_v57  ;;  %21927 = vst [vmem:[#allocation231_spill] sm:$0xff] %v14670_v25  ;;  %v14692_v57 = vsel %vm21934_vm0, 1.0, %v19212_v31  ;;  %v14702_v39 = vsel %vm21936_vm8, 1.0, %v19212_v31  ;;  %vm21941_vm8 = vcmp.eq.s32.totalorder %v13860_v26, %v21883_v41  ;;  %vm1619_vm0 = vcmp.eq.s32.totalorder %v14448_v13, %v21951_v36 }
 0x3f0   : > { %21929 = vst [vmem:[#allocation235_spill] sm:$0xff] %v14676_v8  ;;  %21933 = vst [vmem:[#allocation239_spill] sm:$0xff] %v14686_v62  ;;  %v14708_v8 = vsel %vm21938_vm3, 1.0, %v19212_v31  ;;  %v14728_v38 = vsel %vm21941_vm8, 1.0, %v19212_v31  ;;  %v21943_v62 = vld [vmem:[#allocation38_spill] sm:$0xff]  ;;  %vm21950_vm8 = vcmp.eq.s32.totalorder %v14448_v13, %v21654_v61  ;;  %vm1620_vm6 = vcmp.eq.s32.totalorder %v14448_v13, %v21952_v11  ;;  %v21965_v61 = vld [vmem:[#allocation292_spill] sm:$0xff] }
 0x3f1   : > { %21935 = vst [vmem:[#allocation243_spill] sm:$0xff] %v14692_v57  ;;  %21937 = vst [vmem:[#allocation247_spill] sm:$0xff] %v14702_v39  ;;  %v14722_v57 = vsel %vm1591_vm1, 1.0, %v19212_v31  ;;  %vm21949_vm1 = vcmp.eq.s32.totalorder %v14448_v13, %v21653_v53  ;;  %v2622_v25 = vsel %vm21950_vm8, 1.0, %v19212_v31  ;;  %vm1621_vm9 = vcmp.eq.s32.totalorder %v14448_v13, %v21953_v55 }
 0x3f2   : > { %21939 = vst [vmem:[#allocation251_spill] sm:$0xff] %v14708_v8  ;;  %21940 = vst [vmem:[#allocation255_spill] sm:$0xff] %v14722_v57  ;;  %v2621_v29 = vsel %vm21949_vm1, 1.0, %v19212_v31  ;;  %vm1622_vm3 = vcmp.eq.s32.totalorder %v14448_v13, %v21954_v43  ;;  %v14768_v39 = vsel %vm1594_vm5, 1.0, %v19212_v31  ;;  %v2623_v57 = vsel %vm1599_vm15, 1.0, %v19212_v31  ;;  %v22143_v43 = vld [vmem:[#allocation287_spill] sm:$0xff] }
 0x3f3   : > { %21942 = vst [vmem:[#allocation259_spill] sm:$0xff] %v14728_v38  ;;  %v14762_v38 = vsel %vm1593_vm11, 1.0, %v19212_v31  ;;  %21956 = vst [vmem:[#allocation273_spill] sm:$0xff] %v14768_v39  ;;  %v2624_v8 = vsel %vm1600_vm12, 1.0, %v19212_v31  ;;  %vm1623_vm11 = vcmp.eq.s32.totalorder %v14448_v13, %v21781_v1  ;;  %vm1624_vm1 = vcmp.eq.s32.totalorder %v14448_v13, %v21782_v24  ;;  %v22074_v24 = vld [vmem:[#allocation277_spill] sm:$0xff]  ;;  %v22075_v1 = vld [vmem:[#allocation238_spill] sm:$0xff] }
 0x3f4   : > { %21955 = vst [vmem:[#allocation263_spill] sm:$0xff] %v14762_v38  ;;  %vm21959_vm15 = vcmp.eq.s32.totalorder %v13860_v26, %v21899_v40  ;;  %vm21961_vm12 = vcmp.eq.s32.totalorder %v13860_v26, %v21900_v45  ;;  %v21967_v39 = vmax.f32 %v21965_v61, %v21966_v12  ;;  %v21969_v40 = vld [vmem:[#allocation300_spill] sm:$0xff]  ;;  %v21974_v26 = vld [vmem:[#allocation286_spill] sm:$0xff]  ;;  %vm21981_vm5 = vcmp.eq.s32.totalorder %v14448_v13, %v21657_v27 }
 0x3f5   : > { %v14790_v37 = vsel %vm21959_vm15, 1.0, %v19212_v31  ;;  %v14796_v51 = vsel %vm21961_vm12, 1.0, %v19212_v31  ;;  %v21971_v49 = vmax.f32 %v21969_v40, %v21970_v50  ;;  %v21975_v45 = vmax.f32 %v21973_v33, %v21974_v26  ;;  %v21983_v33 = vld [vmem:[#allocation50_spill] sm:$0xff]  ;;  %v21986_v40 = vld [vmem:[#allocation53_spill] sm:$0xff] }
 0x3f6   : > { %21960 = vst [vmem:[#allocation269_spill] sm:$0xff] %v14790_v37  ;;  %21962 = vst [vmem:[#allocation275_spill] sm:$0xff] %v14796_v51  ;;  %v14805_v46 = vmax.f32 %v21967_v39, %v2621_v29  ;;  %v21979_v37 = vmax.f32 %v21977_v0, %v21978_v18  ;;  %v2625_v29 = vsel %vm21981_vm5, 1.0, %v19212_v31  ;;  %vm21982_vm8 = vcmp.eq.s32.totalorder %v14448_v13, %v21658_v56  ;;  %v21990_v26 = vld [vmem:[#allocation330_spill] sm:$0xff]  ;;  %v22018_v56 = vld [vmem:[#allocation276_spill] sm:$0xff] }
 0x3f7   : > { %v14810_v58 = vmax.f32 %v21971_v49, %v2622_v25  ;;  %v14815_v42 = vmax.f32 %v21975_v45, %v2623_v57  ;;  %v2626_v49 = vsel %vm21982_vm8, 1.0, %v19212_v31  ;;  %v2627_v0 = vsel %vm1603_vm4, 1.0, %v19212_v31  ;;  %v21987_v45 = vld [vmem:[#allocation54_spill] sm:$0xff]  ;;  %v21988_v25 = vld [vmem:[#allocation57_spill] sm:$0xff] }
 0x3f8   : > { %21968 = vst [vmem:[#allocation281_spill] sm:$0xff] %v14805_v46  ;;  %v14820_v41 = vmax.f32 %v21979_v37, %v2624_v8  ;;  %v2628_v50 = vsel %vm1604_vm10, 1.0, %v19212_v31  ;;  %vm21984_vm5 = vcmp.eq.s32.totalorder %v14448_v13, %v21687_v34  ;;  %vm21985_vm8 = vcmp.eq.s32.totalorder %v14448_v13, %v21688_v52  ;;  %v21989_v57 = vld [vmem:[#allocation58_spill] sm:$0xff]  ;;  %v22014_v52 = vld [vmem:[#allocation312_spill] sm:$0xff] }
 0x3f9   : > { %21972 = vst [vmem:[#allocation285_spill] sm:$0xff] %v14810_v58  ;;  %21976 = vst [vmem:[#allocation65_spill] sm:$0xff] %v14815_v42  ;;  %v2629_v61 = vsel %vm21984_vm5, 1.0, %v19212_v31  ;;  %v2630_v37 = vsel %vm21985_vm8, 1.0, %v19212_v31  ;;  %vm1627_vm12 = vcmp.eq.s32.totalorder %v14448_v13, %v21793_v4  ;;  %vm1628_vm4 = vcmp.eq.s32.totalorder %v14448_v13, %v21794_v21  ;;  %v21991_v38 = vld [vmem:[#allocation294_spill] sm:$0xff]  ;;  %v21994_v58 = vld [vmem:[#allocation296_spill] sm:$0xff] }
 0x3fa   : > { %21980 = vst [vmem:[#allocation38_spill] sm:$0xff] %v14820_v41  ;;  %vm1629_vm15 = vcmp.eq.s32.totalorder %v14448_v13, %v21986_v40  ;;  %vm1630_vm10 = vcmp.eq.s32.totalorder %v14448_v13, %v21987_v45  ;;  %v2631_v12 = vsel %vm1607_vm13, 1.0, %v19212_v31  ;;  %v2632_v18 = vsel %vm1608_vm14, 1.0, %v19212_v31  ;;  %v21995_v46 = vld [vmem:[#allocation298_spill] sm:$0xff]  ;;  %v22139_v21 = vld [vmem:[#allocation284_spill] sm:$0xff] }
 0x3fb   : > { %v2633_v39 = vsel %vm1609_vm2, 1.0, %v19212_v31  ;;  %v2634_v8 = vsel %vm1610_vm7, 1.0, %v19212_v31  ;;  %v21992_v41 = vmax.f32 %v21990_v26, %v21991_v38  ;;  %v21996_v51 = vmax.f32 %v21994_v58, %v21995_v46  ;;  %v22001_v38 = vld [vmem:[#allocation60_spill] sm:$0xff]  ;;  %v22003_v58 = vld [vmem:[#allocation302_spill] sm:$0xff] }
 0x3fc   : > { %vm21998_vm7 = vcmp.eq.s32.totalorder %v14448_v13, %v21721_v15  ;;  %vm21999_vm2 = vcmp.eq.s32.totalorder %v14448_v13, %v21722_v9  ;;  %v22011_v15 = vld [vmem:[#allocation310_spill] sm:$0xff]  ;;  %vm22046_vm13 = vcmp.eq.s32.totalorder %v14448_v13, %v21943_v62  ;;  %vm22049_vm8 = vcmp.eq.s32.totalorder %v14448_v13, %v21946_v3 }
 0x3fd   : > { %v14885_v42 = vmax.f32 %v21992_v41, %v2625_v29  ;;  %v14890_v53 = vmax.f32 %v21996_v51, %v2626_v49  ;;  %v2635_v59 = vsel %vm21998_vm7, 1.0, %v19212_v31  ;;  %v2636_v30 = vsel %vm21999_vm2, 1.0, %v19212_v31  ;;  %v22002_v41 = vld [vmem:[#allocation236_spill] sm:$0xff]  ;;  %v22007_v49 = vld [vmem:[#allocation306_spill] sm:$0xff] }
 0x3fe   : > { %v22004_v51 = vmax.f32 %v22002_v41, %v22003_v58  ;;  %v22006_v29 = vld [vmem:[#allocation304_spill] sm:$0xff]  ;;  %v22015_v34 = vld [vmem:[#allocation314_spill] sm:$0xff]  ;;  %vm22042_vm7 = vcmp.eq.s32.totalorder %v14448_v13, %v19361_v2  ;;  %vm22043_vm2 = vcmp.eq.s32.totalorder %v14448_v13, %v19362_v60  ;;  %vm1639_vm14 = vcmp.eq.s32.totalorder %v14448_v13, %v19473_v28 }
 0x3ff   : > { %21993 = vst [vmem:[#allocation39_spill] sm:$0xff] %v14885_v42  ;;  %21997 = vst [vmem:[#allocation40_spill] sm:$0xff] %v14890_v53  ;;  %v22008_v26 = vmax.f32 %v22006_v29, %v22007_v49  ;;  %v22010_v42 = vld [vmem:[#allocation308_spill] sm:$0xff]  ;;  %v22016_v10 = vmax.f32 %v22014_v52, %v22015_v34  ;;  %v22019_v27 = vld [vmem:[#allocation318_spill] sm:$0xff]  ;;  %vm1641_vm5 = vcmp.eq.s32.totalorder %v14448_v13, %v21839_v20 }
 0x400   : > { %v14907_v46 = vmax.f32 %v22004_v51, %v2627_v0  ;;  %v22012_v9 = vmax.f32 %v22010_v42, %v22011_v15  ;;  %v22020_v41 = vmax.f32 %v22018_v56, %v22019_v27  ;;  %v22022_v58 = vld [vmem:[#allocation320_spill] sm:$0xff]  ;;  %v22023_v51 = vld [vmem:[#allocation322_spill] sm:$0xff]  ;;  %v22034_v52 = vld [vmem:[#allocation331_spill] sm:$0xff] }
 0x401   : > { %v14912_v53 = vmax.f32 %v22008_v26, %v2628_v50  ;;  %v14922_v16 = vmax.f32 %v22016_v10, %v2630_v37  ;;  %v22024_v29 = vmax.f32 %v22022_v58, %v22023_v51  ;;  %v22026_v49 = vld [vmem:[#allocation324_spill] sm:$0xff]  ;;  %v22027_v26 = vld [vmem:[#allocation326_spill] sm:$0xff]  ;;  %v22035_v37 = vld [vmem:[#allocation207_spill] sm:$0xff] }
 0x402   : > { %22005 = vst [vmem:[#allocation41_spill] sm:$0xff] %v14907_v46  ;;  %v14917_v35 = vmax.f32 %v22012_v9, %v2629_v61  ;;  %v14927_v0 = vmax.f32 %v22020_v41, %v2631_v12  ;;  %v22028_v42 = vmax.f32 %v22026_v49, %v22027_v26  ;;  %v22030_v9 = vld [vmem:[#allocation36_spill] sm:$0xff]  ;;  %v22036_v27 = vmax.f32 %v22034_v52, %v22035_v37  ;;  %v22038_v12 = vld [vmem:[#allocation209_spill] sm:$0xff]  ;;  %v22039_v41 = vld [vmem:[#allocation211_spill] sm:$0xff] }
 0x403   : > { %22009 = vst [vmem:[#allocation42_spill] sm:$0xff] %v14912_v53  ;;  %22017 = vst [vmem:[#allocation44_spill] sm:$0xff] %v14922_v16  ;;  %v14932_v50 = vmax.f32 %v22024_v29, %v2632_v18  ;;  %v22031_v61 = vld [vmem:[#allocation328_spill] sm:$0xff]  ;;  %v22040_v58 = vmax.f32 %v22038_v12, %v22039_v41  ;;  %v22044_v51 = vld [vmem:[#allocation61_spill] sm:$0xff]  ;;  %v2642_v26 = vsel %vm22049_vm8, 1.0, %v19212_v31  ;;  %vm1643_vm8 = vcmp.eq.s32.totalorder %v14448_v13, %v21847_v32 }
 0x404   : > { %22013 = vst [vmem:[#allocation43_spill] sm:$0xff] %v14917_v35  ;;  %22021 = vst [vmem:[#allocation292_spill] sm:$0xff] %v14927_v0  ;;  %v14937_v15 = vmax.f32 %v22028_v42, %v2633_v39  ;;  %v22032_v34 = vmax.f32 %v22030_v9, %v22031_v61  ;;  %v14947_v56 = vmax.f32 %v22036_v27, %v2635_v59  ;;  %v2637_v39 = vsel %vm22042_vm7, 1.0, %v19212_v31  ;;  %v22045_v59 = vld [vmem:[#allocation62_spill] sm:$0xff]  ;;  %v22050_v52 = vld [vmem:[#allocation213_spill] sm:$0xff] }
 0x405   : > { %22025 = vst [vmem:[#allocation279_spill] sm:$0xff] %v14932_v50  ;;  %v14952_v18 = vmax.f32 %v22040_v58, %v2636_v30  ;;  %v2639_v30 = vsel %vm22046_vm13, 1.0, %v19212_v31  ;;  %vm22047_vm7 = vcmp.eq.s32.totalorder %v14448_v13, %v21944_v14  ;;  %vm1640_vm13 = vcmp.eq.s32.totalorder %v14448_v13, %v19474_v44  ;;  %v22051_v37 = vld [vmem:[#allocation215_spill] sm:$0xff]  ;;  %v22054_v41 = vld [vmem:[#allocation217_spill] sm:$0xff]  ;;  %v22070_v16 = vld [vmem:[#allocation232_spill] sm:$0xff] }
 0x406   : > { %22029 = vst [vmem:[#allocation300_spill] sm:$0xff] %v14937_v15  ;;  %v14942_v10 = vmax.f32 %v22032_v34, %v2634_v8  ;;  %22037 = vst [vmem:[#allocation316_spill] sm:$0xff] %v14947_v56  ;;  %v2638_v8 = vsel %vm22043_vm2, 1.0, %v19212_v31  ;;  %v2640_v29 = vsel %vm22047_vm7, 1.0, %v19212_v31  ;;  %vm22048_vm2 = vcmp.eq.s32.totalorder %v14448_v13, %v21945_v5  ;;  %v22055_v58 = vld [vmem:[#allocation219_spill] sm:$0xff]  ;;  %v22071_v35 = vld [vmem:[#allocation234_spill] sm:$0xff] }
 0x407   : > { %22041 = vst [vmem:[#allocation286_spill] sm:$0xff] %v14952_v18  ;;  %v2641_v49 = vsel %vm22048_vm2, 1.0, %v19212_v31  ;;  %vm1642_vm7 = vcmp.eq.s32.totalorder %v14448_v13, %v21840_v7  ;;  %v2643_v42 = vsel %vm1619_vm0, 1.0, %v19212_v31  ;;  %v2644_v9 = vsel %vm1620_vm6, 1.0, %v19212_v31  ;;  %v22138_v40 = vld [vmem:[#allocation282_spill] sm:$0xff]  ;;  %v22202_v7 = vld [vmem:[#allocation28_spill] sm:$0xff] }
 0x408   : > { %22033 = vst [vmem:[#allocation283_spill] sm:$0xff] %v14942_v10  ;;  %v2645_v61 = vsel %vm1621_vm9, 1.0, %v19212_v31  ;;  %v2646_v34 = vsel %vm1622_vm3, 1.0, %v19212_v31  ;;  %vm1644_vm0 = vcmp.eq.s32.totalorder %v14448_v13, %v21848_v48  ;;  %vm1645_vm2 = vcmp.eq.s32.totalorder %v14448_v13, %v21853_v54  ;;  %v22199_v54 = vld [vmem:[#allocation329_spill] sm:$0xff] }
 0x409   : > { %vm1646_vm6 = vcmp.eq.s32.totalorder %v14448_v13, %v21854_v63  ;;  %v22052_v27 = vmax.f32 %v22050_v52, %v22051_v37  ;;  %v22056_v18 = vmax.f32 %v22054_v41, %v22055_v58  ;;  %v2647_v10 = vsel %vm1623_vm11, 1.0, %v19212_v31  ;;  %v22059_v52 = vld [vmem:[#allocation222_spill] sm:$0xff]  ;;  %v22062_v37 = vld [vmem:[#allocation224_spill] sm:$0xff]  ;;  %v22198_v63 = vld [vmem:[#allocation37_spill] sm:$0xff] }
 0x40a   : > { %v2648_v15 = vsel %vm1624_vm1, 1.0, %v19212_v31  ;;  %v22072_v53 = vmax.f32 %v22070_v16, %v22071_v35  ;;  %vm22098_vm11 = vcmp.eq.s32.totalorder %v14448_v13, %v21787_v23  ;;  %vm22099_vm1 = vcmp.eq.s32.totalorder %v14448_v13, %v21983_v33  ;;  %v22142_v23 = vld [vmem:[#allocation63_spill] sm:$0xff] }
 0x40b   : > { %v15017_v12 = vmax.f32 %v22052_v27, %v2637_v39  ;;  %v15022_v56 = vmax.f32 %v22056_v18, %v2638_v8  ;;  %v22058_v39 = vld [vmem:[#allocation221_spill] sm:$0xff]  ;;  %v22063_v27 = vld [vmem:[#allocation226_spill] sm:$0xff]  ;;  %v22140_v4 = vmax.f32 %v22138_v40, %v22139_v21  ;;  %v22200_v48 = vmax.f32 %v22198_v63, %v22199_v54  ;;  %v22213_v54 = vld [vmem:[#allocation216_spill] sm:$0xff] }
 0x40c   : > { %v22060_v18 = vmax.f32 %v22058_v39, %v22059_v52  ;;  %v22064_v41 = vmax.f32 %v22062_v37, %v22063_v27  ;;  %v15054_v46 = vmax.f32 %v22072_v53, %v2642_v26  ;;  %v22076_v39 = vmax.f32 %v22074_v24, %v22075_v1  ;;  %v22078_v52 = vld [vmem:[#allocation240_spill] sm:$0xff]  ;;  %v22091_v26 = vld [vmem:[#allocation254_spill] sm:$0xff]  ;;  %v22158_v40 = vld [vmem:[#allocation301_spill] sm:$0xff] }
 0x40d   : > { %22053 = vst [vmem:[#allocation288_spill] sm:$0xff] %v15017_v12  ;;  %22057 = vst [vmem:[#allocation290_spill] sm:$0xff] %v15022_v56  ;;  %v22066_v56 = vld [vmem:[#allocation228_spill] sm:$0xff]  ;;  %v22067_v12 = vld [vmem:[#allocation230_spill] sm:$0xff] }
 0x40e   : > { %v15039_v8 = vmax.f32 %v22060_v18, %v2639_v30  ;;  %v15044_v58 = vmax.f32 %v22064_v41, %v2640_v29  ;;  %v22068_v50 = vmax.f32 %v22066_v56, %v22067_v12  ;;  %22073 = vst [vmem:[#allocation298_spill] sm:$0xff] %v15054_v46  ;;  %v15059_v30 = vmax.f32 %v22076_v39, %v2643_v42  ;;  %v22079_v18 = vld [vmem:[#allocation242_spill] sm:$0xff]  ;;  %v22082_v27 = vld [vmem:[#allocation244_spill] sm:$0xff] }
 0x40f   : > { %v22080_v37 = vmax.f32 %v22078_v52, %v22079_v18  ;;  %v22083_v41 = vld [vmem:[#allocation246_spill] sm:$0xff]  ;;  %v22090_v53 = vld [vmem:[#allocation252_spill] sm:$0xff]  ;;  %v22100_v18 = vld [vmem:[#allocation73_spill] sm:$0xff] }
 0x410   : > { %22061 = vst [vmem:[#allocation330_spill] sm:$0xff] %v15039_v8  ;;  %22065 = vst [vmem:[#allocation294_spill] sm:$0xff] %v15044_v58  ;;  %v15049_v0 = vmax.f32 %v22068_v50, %v2641_v49  ;;  %v22084_v56 = vmax.f32 %v22082_v27, %v22083_v41  ;;  %v22086_v49 = vld [vmem:[#allocation248_spill] sm:$0xff]  ;;  %v22087_v12 = vld [vmem:[#allocation250_spill] sm:$0xff]  ;;  %v22092_v1 = vmax.f32 %v22090_v53, %v22091_v26  ;;  %v2653_v27 = vsel %vm1629_vm15, 1.0, %v19212_v31 }
 0x411   : > { %22077 = vst [vmem:[#allocation236_spill] sm:$0xff] %v15059_v30  ;;  %v15064_v29 = vmax.f32 %v22080_v37, %v2644_v9  ;;  %v22088_v35 = vmax.f32 %v22086_v49, %v22087_v12  ;;  %v22094_v42 = vld [vmem:[#allocation256_spill] sm:$0xff]  ;;  %v22095_v39 = vld [vmem:[#allocation258_spill] sm:$0xff]  ;;  %vm1649_vm3 = vcmp.eq.s32.totalorder %v14448_v13, %v22100_v18  ;;  %v2652_v37 = vsel %vm1628_vm4, 1.0, %v19212_v31 }
 0x412   : > { %22069 = vst [vmem:[#allocation296_spill] sm:$0xff] %v15049_v0  ;;  %v15069_v50 = vmax.f32 %v22084_v56, %v2645_v61  ;;  %v15079_v24 = vmax.f32 %v22092_v1, %v2647_v10  ;;  %v22096_v52 = vmax.f32 %v22094_v42, %v22095_v39  ;;  %v2649_v61 = vsel %vm22098_vm11, 1.0, %v19212_v31  ;;  %v22101_v10 = vld [vmem:[#allocation74_spill] sm:$0xff]  ;;  %v22102_v56 = vld [vmem:[#allocation75_spill] sm:$0xff]  ;;  %v22103_v49 = vld [vmem:[#allocation76_spill] sm:$0xff] }
 0x413   : > { %22081 = vst [vmem:[#allocation302_spill] sm:$0xff] %v15064_v29  ;;  %v15074_v16 = vmax.f32 %v22088_v35, %v2646_v34  ;;  %v2650_v34 = vsel %vm22099_vm1, 1.0, %v19212_v31  ;;  %vm1650_vm9 = vcmp.eq.s32.totalorder %v14448_v13, %v22101_v10  ;;  %v2654_v41 = vsel %vm1630_vm10, 1.0, %v19212_v31  ;;  %v22104_v12 = vld [vmem:[#allocation14_spill] sm:$0xff]  ;;  %v22105_v35 = vld [vmem:[#allocation15_spill] sm:$0xff]  ;;  %v22110_v39 = vld [vmem:[#allocation16_spill] sm:$0xff] }
 0x414   : > { %22085 = vst [vmem:[#allocation304_spill] sm:$0xff] %v15069_v50  ;;  %22093 = vst [vmem:[#allocation308_spill] sm:$0xff] %v15079_v24  ;;  %v15084_v9 = vmax.f32 %v22096_v52, %v2648_v15  ;;  %v2651_v15 = vsel %vm1627_vm12, 1.0, %v19212_v31  ;;  %vm22106_vm15 = vcmp.eq.s32.totalorder %v14448_v13, %v21808_v19  ;;  %vm22107_vm10 = vcmp.eq.s32.totalorder %v14448_v13, %v21809_v47  ;;  %v22111_v52 = vld [vmem:[#allocation77_spill] sm:$0xff]  ;;  %v22113_v24 = vld [vmem:[#allocation18_spill] sm:$0xff]  ;;  %v15164_v47 = vpop.permute.xlu0 %699 }
 0x415   : > { %22089 = vst [vmem:[#allocation306_spill] sm:$0xff] %v15074_v16  ;;  %v2655_v53 = vsel %vm22106_vm15, 1.0, %v19212_v31  ;;  %v2656_v26 = vsel %vm22107_vm10, 1.0, %v19212_v31  ;;  %vm22108_vm12 = vcmp.eq.s32.totalorder %v14448_v13, %v21988_v25  ;;  %vm22109_vm1 = vcmp.eq.s32.totalorder %v14448_v13, %v21989_v57  ;;  %v22114_v16 = vld [vmem:[#allocation260_spill] sm:$0xff]  ;;  %v22115_v50 = vld [vmem:[#allocation262_spill] sm:$0xff] }
 0x416   : > { %22097 = vst [vmem:[#allocation310_spill] sm:$0xff] %v15084_v9  ;;  %v2657_v1 = vsel %vm22108_vm12, 1.0, %v19212_v31  ;;  %v2658_v42 = vsel %vm22109_vm1, 1.0, %v19212_v31  ;;  %vm1655_vm4 = vcmp.eq.s32.totalorder %v14448_v13, %v22110_v39  ;;  %vm1656_vm15 = vcmp.eq.s32.totalorder %v14448_v13, %v22111_v52  ;;  %v22112_v9 = vld [vmem:[#allocation17_spill] sm:$0xff]  ;;  %v22118_v46 = vld [vmem:[#allocation264_spill] sm:$0xff]  ;;  %v22262_v39 = vld [vmem:[#allocation251_spill] sm:$0xff] }
 0x417   : > { %v22116_v29 = vmax.f32 %v22114_v16, %v22115_v50  ;;  %v22119_v0 = vld [vmem:[#allocation272_spill] sm:$0xff]  ;;  %vm22122_vm12 = vcmp.eq.s32.totalorder %v14448_v13, %v22000_v22  ;;  %vm22123_vm1 = vcmp.eq.s32.totalorder %v14448_v13, %v22001_v38  ;;  %v22124_v50 = vld [vmem:[#allocation19_spill] sm:$0xff]  ;;  %v22134_v38 = vld [vmem:[#allocation278_spill] sm:$0xff]  ;;  %v15188_v33 = vmax.f32 %v22140_v4, %v2654_v41 }
 0x418   : > { %v22120_v58 = vmax.f32 %v22118_v46, %v22119_v0  ;;  %v2659_v57 = vsel %vm22122_vm12, 1.0, %v19212_v31  ;;  %v2660_v25 = vsel %vm22123_vm1, 1.0, %v19212_v31  ;;  %v22126_v46 = vld [vmem:[#allocation266_spill] sm:$0xff]  ;;  %v22127_v0 = vld [vmem:[#allocation268_spill] sm:$0xff]  ;;  %v22159_v41 = vld [vmem:[#allocation303_spill] sm:$0xff]  ;;  %vm22166_vm12 = vcmp.eq.s32.totalorder %v14448_v13, %v22044_v51 }
 0x419   : > { %v15149_v30 = vmax.f32 %v22116_v29, %v2649_v61  ;;  %v22125_v29 = vld [vmem:[#allocation78_spill] sm:$0xff]  ;;  %v22135_v22 = vld [vmem:[#allocation280_spill] sm:$0xff]  ;;  %22141 = vst [vmem:[#allocation322_spill] sm:$0xff] %v15188_v33  ;;  %vm22167_vm1 = vcmp.eq.s32.totalorder %v14448_v13, %v22045_v59 }
 0x41a   : > { %v15154_v8 = vmax.f32 %v22120_v58, %v2650_v34  ;;  %v22128_v58 = vmax.f32 %v22126_v46, %v22127_v0  ;;  %v22130_v61 = vld [vmem:[#allocation270_spill] sm:$0xff]  ;;  %v22136_v19 = vmax.f32 %v22134_v38, %v22135_v22  ;;  %v22144_v46 = vmax.f32 %v22142_v23, %v22143_v43  ;;  %v22146_v0 = vld [vmem:[#allocation289_spill] sm:$0xff] }
 0x41b   : > { %22117 = vst [vmem:[#allocation312_spill] sm:$0xff] %v15149_v30  ;;  %v22131_v34 = vld [vmem:[#allocation274_spill] sm:$0xff]  ;;  %v22154_v38 = vld [vmem:[#allocation297_spill] sm:$0xff]  ;;  %v22160_v43 = vmax.f32 %v22158_v40, %v22159_v41  ;;  %v2669_v40 = vsel %vm1645_vm2, 1.0, %v19212_v31  ;;  %v2670_v41 = vsel %vm1646_vm6, 1.0, %v19212_v31  ;;  %vm1669_vm6 = vcmp.eq.s32.totalorder %v15164_v47, %v22202_v7  ;;  %v22328_v7 = vld [vmem:[#allocation60_spill] sm:$0xff] }
 0x41c   : > { %22121 = vst [vmem:[#allocation314_spill] sm:$0xff] %v15154_v8  ;;  %v15173_v16 = vmax.f32 %v22128_v58, %v2651_v15  ;;  %v22132_v8 = vmax.f32 %v22130_v61, %v22131_v34  ;;  %v15183_v45 = vmax.f32 %v22136_v19, %v2653_v27  ;;  %v15193_v15 = vmax.f32 %v22144_v46, %v2655_v53  ;;  %v22147_v58 = vld [vmem:[#allocation291_spill] sm:$0xff]  ;;  %v22162_v53 = vld [vmem:[#allocation305_spill] sm:$0xff] }
 0x41d   : > { %v22148_v61 = vmax.f32 %v22146_v0, %v22147_v58  ;;  %v22151_v34 = vld [vmem:[#allocation295_spill] sm:$0xff]  ;;  %v15213_v23 = vmax.f32 %v22160_v43, %v2659_v57  ;;  %v22168_v58 = vld [vmem:[#allocation20_spill] sm:$0xff]  ;;  %v22169_v57 = vld [vmem:[#allocation21_spill] sm:$0xff] }
 0x41e   : > { %22129 = vst [vmem:[#allocation276_spill] sm:$0xff] %v15173_v16  ;;  %v15178_v30 = vmax.f32 %v22132_v8, %v2652_v37  ;;  %22137 = vst [vmem:[#allocation320_spill] sm:$0xff] %v15183_v45  ;;  %v22150_v37 = vld [vmem:[#allocation293_spill] sm:$0xff]  ;;  %v22155_v27 = vld [vmem:[#allocation299_spill] sm:$0xff]  ;;  %vm1661_vm11 = vcmp.eq.s32.totalorder %v15164_v47, %v22168_v58  ;;  %vm1662_vm10 = vcmp.eq.s32.totalorder %v15164_v47, %v22169_v57 }
 0x41f   : > { %22145 = vst [vmem:[#allocation324_spill] sm:$0xff] %v15193_v15  ;;  %v15198_v8 = vmax.f32 %v22148_v61, %v2656_v26  ;;  %v22152_v22 = vmax.f32 %v22150_v37, %v22151_v34  ;;  %v22156_v21 = vmax.f32 %v22154_v38, %v22155_v27  ;;  %22161 = vst [vmem:[#allocation331_spill] sm:$0xff] %v15213_v23  ;;  %v22163_v46 = vld [vmem:[#allocation307_spill] sm:$0xff]  ;;  %v2664_v61 = vsel %vm1640_vm13, 1.0, %v19212_v31  ;;  %v22172_v43 = vld [vmem:[#allocation24_spill] sm:$0xff] }
 0x420   : > { %22133 = vst [vmem:[#allocation318_spill] sm:$0xff] %v15178_v30  ;;  %v22164_v0 = vmax.f32 %v22162_v53, %v22163_v46  ;;  %v2665_v37 = vsel %vm1641_vm5, 1.0, %v19212_v31  ;;  %v2666_v34 = vsel %vm1642_vm7, 1.0, %v19212_v31  ;;  %v22171_v38 = vld [vmem:[#allocation23_spill] sm:$0xff]  ;;  %v2667_v27 = vsel %vm1643_vm8, 1.0, %v19212_v31  ;;  %v22173_v53 = vld [vmem:[#allocation25_spill] sm:$0xff] }
 0x421   : > { %22149 = vst [vmem:[#allocation326_spill] sm:$0xff] %v15198_v8  ;;  %v15203_v19 = vmax.f32 %v22152_v22, %v2657_v1  ;;  %v15208_v4 = vmax.f32 %v22156_v21, %v2658_v42  ;;  %v2661_v1 = vsel %vm22166_vm12, 1.0, %v19212_v31  ;;  %v2662_v42 = vsel %vm22167_vm1, 1.0, %v19212_v31  ;;  %v22170_v22 = vld [vmem:[#allocation22_spill] sm:$0xff]  ;;  %v22174_v46 = vld [vmem:[#allocation309_spill] sm:$0xff]  ;;  %v22195_v16 = vld [vmem:[#allocation327_spill] sm:$0xff] }
 0x422   : > { %v15218_v26 = vmax.f32 %v22164_v0, %v2660_v25  ;;  %v2663_v25 = vsel %vm1639_vm14, 1.0, %v19212_v31  ;;  %vm1663_vm12 = vcmp.eq.s32.totalorder %v15164_v47, %v22170_v22  ;;  %vm1664_vm14 = vcmp.eq.s32.totalorder %v15164_v47, %v22171_v38  ;;  %v22175_v0 = vld [vmem:[#allocation311_spill] sm:$0xff]  ;;  %v22184_v30 = vld [vmem:[#allocation26_spill] sm:$0xff] }
 0x423   : > { %22153 = vst [vmem:[#allocation36_spill] sm:$0xff] %v15203_v19  ;;  %22157 = vst [vmem:[#allocation328_spill] sm:$0xff] %v15208_v4  ;;  %v2668_v21 = vsel %vm1644_vm0, 1.0, %v19212_v31  ;;  %vm1665_vm5 = vcmp.eq.s32.totalorder %v15164_v47, %v22172_v43  ;;  %vm1666_vm13 = vcmp.eq.s32.totalorder %v15164_v47, %v22173_v53  ;;  %v22178_v4 = vld [vmem:[#allocation313_spill] sm:$0xff]  ;;  %v22179_v19 = vld [vmem:[#allocation315_spill] sm:$0xff]  ;;  %vm22182_vm7 = vcmp.eq.s32.totalorder %v14448_v13, %v21859_v17 }
 0x424   : > { %22165 = vst [vmem:[#allocation207_spill] sm:$0xff] %v15218_v26  ;;  %v22176_v26 = vmax.f32 %v22174_v46, %v22175_v0  ;;  %v22180_v8 = vmax.f32 %v22178_v4, %v22179_v19  ;;  %v2671_v33 = vsel %vm22182_vm7, 1.0, %v19212_v31  ;;  %vm22183_vm8 = vcmp.eq.s32.totalorder %v14448_v13, %v21860_v6  ;;  %v22187_v19 = vld [vmem:[#allocation319_spill] sm:$0xff]  ;;  %v22302_v43 = vld [vmem:[#allocation41_spill] sm:$0xff]  ;;  %v22370_v22 = vld [vmem:[#allocation314_spill] sm:$0xff] }
 0x425   : > { %v2672_v45 = vsel %vm22183_vm8, 1.0, %v19212_v31  ;;  %vm1667_vm0 = vcmp.eq.s32.totalorder %v15164_v47, %v22184_v30  ;;  %v22191_v46 = vld [vmem:[#allocation323_spill] sm:$0xff]  ;;  %v15312_v32 = vmax.f32 %v22200_v48, %v2666_v34  ;;  %v22216_v34 = vld [vmem:[#allocation218_spill] sm:$0xff]  ;;  %vm22232_vm1 = vcmp.eq.s32.totalorder %v14448_v13, %v22102_v56 }
 0x426   : > { %v15275_v23 = vmax.f32 %v22176_v26, %v2661_v1  ;;  %v15280_v15 = vmax.f32 %v22180_v8, %v2662_v42  ;;  %v22185_v26 = vld [vmem:[#allocation27_spill] sm:$0xff]  ;;  %v22186_v1 = vld [vmem:[#allocation317_spill] sm:$0xff]  ;;  %vm22235_vm8 = vcmp.eq.s32.totalorder %v14448_v13, %v22105_v35  ;;  %v15514_v57 = vsel %vm1664_vm14, 1.0, %v19212_v31  ;;  %v22323_v30 = vld [vmem:[#allocation58_spill] sm:$0xff] }
 0x427   : > { %vm1668_vm2 = vcmp.eq.s32.totalorder %v15164_v47, %v22185_v26  ;;  %v22188_v8 = vmax.f32 %v22186_v1, %v22187_v19  ;;  %v22190_v42 = vld [vmem:[#allocation321_spill] sm:$0xff]  ;;  %22201 = vst [vmem:[#allocation215_spill] sm:$0xff] %v15312_v32  ;;  %v22204_v1 = vld [vmem:[#allocation206_spill] sm:$0xff]  ;;  %v22205_v19 = vld [vmem:[#allocation208_spill] sm:$0xff]  ;;  %v15534_v38 = vsel %vm1666_vm13, 1.0, %v19212_v31  ;;  %v15548_v58 = vsel %vm1667_vm0, 1.0, %v19212_v31 }
 0x428   : > { %22177 = vst [vmem:[#allocation209_spill] sm:$0xff] %v15275_v23  ;;  %22181 = vst [vmem:[#allocation211_spill] sm:$0xff] %v15280_v15  ;;  %v22192_v0 = vmax.f32 %v22190_v42, %v22191_v46  ;;  %v22194_v23 = vld [vmem:[#allocation325_spill] sm:$0xff]  ;;  %v22208_v42 = vld [vmem:[#allocation210_spill] sm:$0xff]  ;;  %v15554_v53 = vsel %vm1668_vm2, 1.0, %v19212_v31  ;;  %vm1698_vm13 = vcmp.eq.s32.totalorder %v15164_v47, %v22323_v30 }
 0x429   : > { %v15297_v4 = vmax.f32 %v22188_v8, %v2663_v25  ;;  %v22196_v6 = vmax.f32 %v22194_v23, %v22195_v16  ;;  %v22203_v25 = vld [vmem:[#allocation29_spill] sm:$0xff]  ;;  %v22209_v16 = vld [vmem:[#allocation212_spill] sm:$0xff] }
 0x42a   : > { %v15302_v15 = vmax.f32 %v22192_v0, %v2664_v61  ;;  %v22206_v61 = vmax.f32 %v22204_v1, %v22205_v19  ;;  %v22217_v46 = vld [vmem:[#allocation220_spill] sm:$0xff]  ;;  %v22223_v19 = vld [vmem:[#allocation223_spill] sm:$0xff]  ;;  %vm22305_vm0 = vcmp.eq.s32.totalorder %v15164_v47, %v22203_v25 }
 0x42b   : > { %22189 = vst [vmem:[#allocation61_spill] sm:$0xff] %v15297_v4  ;;  %v15307_v17 = vmax.f32 %v22196_v6, %v2665_v37  ;;  %v22210_v6 = vmax.f32 %v22208_v42, %v22209_v16  ;;  %v22212_v37 = vld [vmem:[#allocation214_spill] sm:$0xff]  ;;  %v22218_v0 = vmax.f32 %v22216_v34, %v22217_v46  ;;  %v22222_v1 = vld [vmem:[#allocation64_spill] sm:$0xff]  ;;  %v22226_v42 = vld [vmem:[#allocation225_spill] sm:$0xff]  ;;  %v2678_v46 = vsel %vm22235_vm8, 1.0, %v19212_v31 }
 0x42c   : > { %22193 = vst [vmem:[#allocation62_spill] sm:$0xff] %v15302_v15  ;;  %v15321_v8 = vmax.f32 %v22206_v61, %v2667_v27  ;;  %v22214_v63 = vmax.f32 %v22212_v37, %v22213_v54  ;;  %v22221_v27 = vld [vmem:[#allocation31_spill] sm:$0xff]  ;;  %v2674_v37 = vsel %vm1650_vm9, 1.0, %v19212_v31  ;;  %v22230_v54 = vld [vmem:[#allocation32_spill] sm:$0xff]  ;;  %vm22234_vm9 = vcmp.eq.s32.totalorder %v14448_v13, %v22104_v12  ;;  %v22416_v4 = vld [vmem:[#allocation77_spill] sm:$0xff] }
 0x42d   : > { %22197 = vst [vmem:[#allocation213_spill] sm:$0xff] %v15307_v17  ;;  %v15326_v23 = vmax.f32 %v22210_v6, %v2668_v21  ;;  %v15336_v32 = vmax.f32 %v22218_v0, %v2670_v41  ;;  %v22220_v17 = vld [vmem:[#allocation30_spill] sm:$0xff]  ;;  %v22224_v21 = vmax.f32 %v22222_v1, %v22223_v19  ;;  %v22227_v16 = vld [vmem:[#allocation227_spill] sm:$0xff]  ;;  %v2673_v41 = vsel %vm1649_vm3, 1.0, %v19212_v31 }
 0x42e   : > { %22207 = vst [vmem:[#allocation217_spill] sm:$0xff] %v15321_v8  ;;  %v15331_v48 = vmax.f32 %v22214_v63, %v2669_v40  ;;  %v22228_v40 = vmax.f32 %v22226_v42, %v22227_v16  ;;  %vm22233_vm3 = vcmp.eq.s32.totalorder %v14448_v13, %v22103_v49  ;;  %v2677_v34 = vsel %vm22234_vm9, 1.0, %v19212_v31  ;;  %v22236_v0 = vld [vmem:[#allocation34_spill] sm:$0xff]  ;;  %v22237_v1 = vld [vmem:[#allocation35_spill] sm:$0xff] }
 0x42f   : > { %22211 = vst [vmem:[#allocation219_spill] sm:$0xff] %v15326_v23  ;;  %22219 = vst [vmem:[#allocation222_spill] sm:$0xff] %v15336_v32  ;;  %v15345_v61 = vmax.f32 %v22224_v21, %v2671_v33  ;;  %v22231_v33 = vld [vmem:[#allocation33_spill] sm:$0xff]  ;;  %v2676_v63 = vsel %vm22233_vm3, 1.0, %v19212_v31  ;;  %vm1675_vm7 = vcmp.eq.s32.totalorder %v15164_v47, %v22236_v0  ;;  %v2679_v19 = vsel %vm1655_vm4, 1.0, %v19212_v31  ;;  %v22245_v23 = vld [vmem:[#allocation235_spill] sm:$0xff] }
 0x430   : > { %22215 = vst [vmem:[#allocation221_spill] sm:$0xff] %v15331_v48  ;;  %v15350_v6 = vmax.f32 %v22228_v40, %v2672_v45  ;;  %v2675_v45 = vsel %vm22232_vm1, 1.0, %v19212_v31  ;;  %vm1676_vm1 = vcmp.eq.s32.totalorder %v15164_v47, %v22237_v1  ;;  %v2680_v21 = vsel %vm1656_vm15, 1.0, %v19212_v31  ;;  %v22240_v40 = vld [vmem:[#allocation229_spill] sm:$0xff]  ;;  %v22334_v0 = vld [vmem:[#allocation288_spill] sm:$0xff] }
 0x431   : > { %22225 = vst [vmem:[#allocation224_spill] sm:$0xff] %v15345_v61  ;;  %vm22238_vm8 = vcmp.eq.s32.totalorder %v14448_v13, %v22112_v9  ;;  %vm22239_vm3 = vcmp.eq.s32.totalorder %v14448_v13, %v22113_v24  ;;  %vm1677_vm9 = vcmp.eq.s32.totalorder %v15164_v47, %v19361_v2  ;;  %v22244_v48 = vld [vmem:[#allocation233_spill] sm:$0xff]  ;;  %vm22248_vm15 = vcmp.eq.s32.totalorder %v14448_v13, %v22124_v50  ;;  %v22352_v2 = vld [vmem:[#allocation68_spill] sm:$0xff] }
 0x432   : > { %22229 = vst [vmem:[#allocation226_spill] sm:$0xff] %v15350_v6  ;;  %v2681_v42 = vsel %vm22238_vm8, 1.0, %v19212_v31  ;;  %v2682_v16 = vsel %vm22239_vm3, 1.0, %v19212_v31  ;;  %v22241_v6 = vld [vmem:[#allocation231_spill] sm:$0xff]  ;;  %v22246_v9 = vmax.f32 %v22244_v48, %v22245_v23  ;;  %v2683_v24 = vsel %vm22248_vm15, 1.0, %v19212_v31  ;;  %v22261_v50 = vld [vmem:[#allocation249_spill] sm:$0xff] }
 0x433   : > { %v22242_v61 = vmax.f32 %v22240_v40, %v22241_v6  ;;  %vm22249_vm8 = vcmp.eq.s32.totalorder %v14448_v13, %v22125_v29  ;;  %vm1679_vm3 = vcmp.eq.s32.totalorder %v15164_v47, %v21943_v62  ;;  %vm1680_vm4 = vcmp.eq.s32.totalorder %v15164_v47, %v21944_v14  ;;  %v22251_v23 = vld [vmem:[#allocation239_spill] sm:$0xff]  ;;  %v22253_v6 = vld [vmem:[#allocation241_spill] sm:$0xff]  ;;  %v22358_v62 = vld [vmem:[#allocation70_spill] sm:$0xff] }
 0x434   : > { %v15412_v8 = vmax.f32 %v22246_v9, %v2674_v37  ;;  %v2684_v52 = vsel %vm22249_vm8, 1.0, %v19212_v31  ;;  %v22263_v35 = vmax.f32 %v22261_v50, %v22262_v39  ;;  %v22274_v39 = vld [vmem:[#allocation263_spill] sm:$0xff]  ;;  %vm1685_vm15 = vcmp.eq.s32.totalorder %v15164_v47, %v21953_v55  ;;  %v22365_v55 = vld [vmem:[#allocation308_spill] sm:$0xff] }
 0x435   : > { %v15407_v32 = vmax.f32 %v22242_v61, %v2673_v41  ;;  %v22250_v61 = vld [vmem:[#allocation237_spill] sm:$0xff]  ;;  %v22254_v41 = vld [vmem:[#allocation243_spill] sm:$0xff]  ;;  %v15574_v26 = vsel %vm22305_vm0, 1.0, %v19212_v31  ;;  %vm22313_vm0 = vcmp.eq.s32.totalorder %v15164_v47, %v22221_v27 }
 0x436   : > { %22247 = vst [vmem:[#allocation230_spill] sm:$0xff] %v15412_v8  ;;  %v22252_v9 = vmax.f32 %v22250_v61, %v22251_v23  ;;  %v22255_v37 = vmax.f32 %v22253_v6, %v22254_v41  ;;  %v22257_v8 = vld [vmem:[#allocation245_spill] sm:$0xff]  ;;  %v15444_v12 = vmax.f32 %v22263_v35, %v2678_v46  ;;  %v22266_v61 = vld [vmem:[#allocation255_spill] sm:$0xff]  ;;  %22306 = vst [vmem:[#allocation252_spill] sm:$0xff] %v15574_v26  ;;  %v15594_v25 = vsel %vm22313_vm0, 1.0, %v19212_v31 }
 0x437   : > { %22243 = vst [vmem:[#allocation228_spill] sm:$0xff] %v15407_v32  ;;  %v22258_v32 = vld [vmem:[#allocation247_spill] sm:$0xff]  ;;  %v22273_v6 = vld [vmem:[#allocation261_spill] sm:$0xff]  ;;  %22314 = vst [vmem:[#allocation256_spill] sm:$0xff] %v15594_v25  ;;  %vm22320_vm0 = vcmp.eq.s32.totalorder %v15164_v47, %v22231_v33  ;;  %v15628_v26 = vsel %vm1675_vm7, 1.0, %v19212_v31  ;;  %v15634_v33 = vsel %vm1676_vm1, 1.0, %v19212_v31  ;;  %vm22332_vm7 = vcmp.eq.s32.totalorder %v15164_v47, %v19362_v60 }
 0x438   : > { %v15429_v48 = vmax.f32 %v22252_v9, %v2675_v45  ;;  %v15434_v40 = vmax.f32 %v22255_v37, %v2676_v63  ;;  %v22259_v13 = vmax.f32 %v22257_v8, %v22258_v32  ;;  %22264 = vst [vmem:[#allocation277_spill] sm:$0xff] %v15444_v12  ;;  %v22265_v45 = vld [vmem:[#allocation253_spill] sm:$0xff]  ;;  %v22270_v32 = vld [vmem:[#allocation259_spill] sm:$0xff]  ;;  %v22275_v35 = vmax.f32 %v22273_v6, %v22274_v39 }
 0x439   : > { %v22267_v63 = vmax.f32 %v22265_v45, %v22266_v61  ;;  %v22269_v9 = vld [vmem:[#allocation257_spill] sm:$0xff]  ;;  %v22300_v6 = vld [vmem:[#allocation51_spill] sm:$0xff]  ;;  %v15614_v27 = vsel %vm22320_vm0, 1.0, %v19212_v31  ;;  %22326 = vst [vmem:[#allocation73_spill] sm:$0xff] %v15634_v33  ;;  %v15648_v25 = vsel %vm1677_vm9, 1.0, %v19212_v31  ;;  %v15654_v1 = vsel %vm22332_vm7, 1.0, %v19212_v31 }
 0x43a   : > { %22256 = vst [vmem:[#allocation232_spill] sm:$0xff] %v15434_v40  ;;  %v15439_v29 = vmax.f32 %v22259_v13, %v2677_v34  ;;  %v22271_v8 = vmax.f32 %v22269_v9, %v22270_v32  ;;  %v15463_v50 = vmax.f32 %v22275_v35, %v2681_v42  ;;  %v22277_v46 = vld [vmem:[#allocation265_spill] sm:$0xff]  ;;  %v22286_v9 = vld [vmem:[#allocation275_spill] sm:$0xff]  ;;  %v15508_v35 = vsel %vm1663_vm12, 1.0, %v19212_v31  ;;  %v22316_v40 = vld [vmem:[#allocation56_spill] sm:$0xff] }
 0x43b   : > { %v15453_v23 = vmax.f32 %v22267_v63, %v2679_v19  ;;  %v22278_v41 = vld [vmem:[#allocation273_spill] sm:$0xff]  ;;  %v22281_v19 = vld [vmem:[#allocation267_spill] sm:$0xff]  ;;  %22321 = vst [vmem:[#allocation258_spill] sm:$0xff] %v15614_v27  ;;  %22331 = vst [vmem:[#allocation74_spill] sm:$0xff] %v15648_v25  ;;  %vm1701_vm1 = vcmp.eq.s32.totalorder %v15164_v47, %v22044_v51  ;;  %vm1702_vm0 = vcmp.eq.s32.totalorder %v15164_v47, %v22045_v59  ;;  %v15668_v27 = vsel %vm1679_vm3, 1.0, %v19212_v31 }
 0x43c   : > { %22260 = vst [vmem:[#allocation234_spill] sm:$0xff] %v15439_v29  ;;  %v15458_v34 = vmax.f32 %v22271_v8, %v2680_v21  ;;  %22276 = vst [vmem:[#allocation242_spill] sm:$0xff] %v15463_v50  ;;  %v22279_v37 = vmax.f32 %v22277_v46, %v22278_v41  ;;  %v22282_v45 = vld [vmem:[#allocation269_spill] sm:$0xff]  ;;  %v22285_v63 = vld [vmem:[#allocation271_spill] sm:$0xff]  ;;  %v15494_v8 = vsel %vm1662_vm10, 1.0, %v19212_v31  ;;  %v15674_v60 = vsel %vm1680_vm4, 1.0, %v19212_v31 }
 0x43d   : > { %22268 = vst [vmem:[#allocation238_spill] sm:$0xff] %v15453_v23  ;;  %v22283_v21 = vmax.f32 %v22281_v19, %v22282_v45  ;;  %v22287_v42 = vmax.f32 %v22285_v63, %v22286_v9  ;;  %v22291_v39 = vld [vmem:[#allocation285_spill] sm:$0xff]  ;;  %v22292_v46 = vld [vmem:[#allocation47_spill] sm:$0xff]  ;;  %v22293_v41 = vld [vmem:[#allocation48_spill] sm:$0xff]  ;;  %vm22340_vm3 = vcmp.eq.s32.totalorder %v15164_v47, %v21945_v5  ;;  %vm22342_vm4 = vcmp.eq.s32.totalorder %v15164_v47, %v21946_v3 }
 0x43e   : > { %22272 = vst [vmem:[#allocation240_spill] sm:$0xff] %v15458_v34  ;;  %v15468_v13 = vmax.f32 %v22279_v37, %v2682_v16  ;;  %v15488_v16 = vsel %vm1661_vm11, 1.0, %v19212_v31  ;;  %vm1687_vm11 = vcmp.eq.s32.totalorder %v15164_v47, %v22292_v46  ;;  %vm1688_vm10 = vcmp.eq.s32.totalorder %v15164_v47, %v22293_v41  ;;  %v22294_v37 = vld [vmem:[#allocation65_spill] sm:$0xff]  ;;  %v22295_v45 = vld [vmem:[#allocation38_spill] sm:$0xff]  ;;  %v22299_v19 = vld [vmem:[#allocation40_spill] sm:$0xff] }
 0x43f   : > { %v15477_v61 = vmax.f32 %v22283_v21, %v2683_v24  ;;  %v15482_v32 = vmax.f32 %v22287_v42, %v2684_v52  ;;  %v22289_v24 = vld [vmem:[#allocation45_spill] sm:$0xff]  ;;  %v15528_v21 = vsel %vm1665_vm5, 1.0, %v19212_v31  ;;  %v22297_v9 = vld [vmem:[#allocation50_spill] sm:$0xff]  ;;  %v22298_v42 = vld [vmem:[#allocation39_spill] sm:$0xff]  ;;  %vm1691_vm5 = vcmp.eq.s32.totalorder %v15164_v47, %v22300_v6  ;;  %22333 = vst [vmem:[#allocation75_spill] sm:$0xff] %v15654_v1 }
 0x440   : > { %22280 = vst [vmem:[#allocation244_spill] sm:$0xff] %v15468_v13  ;;  %vm1686_vm8 = vcmp.eq.s32.totalorder %v15164_v47, %v22289_v24  ;;  %v22290_v52 = vld [vmem:[#allocation281_spill] sm:$0xff]  ;;  %vm1690_vm14 = vcmp.eq.s32.totalorder %v15164_v47, %v22297_v9  ;;  %v15568_v13 = vsel %vm1669_vm6, 1.0, %v19212_v31  ;;  %v22308_v34 = vld [vmem:[#allocation54_spill] sm:$0xff]  ;;  %vm22311_vm6 = vcmp.eq.s32.totalorder %v15164_v47, %v22220_v17  ;;  %v22315_v29 = vld [vmem:[#allocation55_spill] sm:$0xff] }
 0x441   : > { %22284 = vst [vmem:[#allocation246_spill] sm:$0xff] %v15477_v61  ;;  %22288 = vst [vmem:[#allocation248_spill] sm:$0xff] %v15482_v32  ;;  %v22296_v63 = vld [vmem:[#allocation49_spill] sm:$0xff]  ;;  %v22301_v32 = vld [vmem:[#allocation52_spill] sm:$0xff]  ;;  %v15588_v12 = vsel %vm22311_vm6, 1.0, %v19212_v31  ;;  %vm22319_vm6 = vcmp.eq.s32.totalorder %v15164_v47, %v22230_v54  ;;  %v15688_v33 = vsel %vm22340_vm3, 1.0, %v19212_v31  ;;  %vm22347_vm3 = vcmp.eq.s32.totalorder %v15164_v47, %v21951_v36 }
 0x442   : > { %vm1689_vm12 = vcmp.eq.s32.totalorder %v15164_v47, %v22296_v63  ;;  %v22303_v61 = vld [vmem:[#allocation42_spill] sm:$0xff]  ;;  %22304 = vst [vmem:[#allocation250_spill] sm:$0xff] %v15568_v13  ;;  %v22307_v50 = vld [vmem:[#allocation53_spill] sm:$0xff]  ;;  %22312 = vst [vmem:[#allocation254_spill] sm:$0xff] %v15588_v12  ;;  %v15608_v23 = vsel %vm22319_vm6, 1.0, %v19212_v31  ;;  %v15694_v14 = vsel %vm22342_vm4, 1.0, %v19212_v31  ;;  %vm22349_vm4 = vcmp.eq.s32.totalorder %v15164_v47, %v21952_v11 }
 0x443   : > { %v22322_v13 = vld [vmem:[#allocation57_spill] sm:$0xff]  ;;  %v22324_v17 = vld [vmem:[#allocation300_spill] sm:$0xff]  ;;  %v22327_v12 = vld [vmem:[#allocation59_spill] sm:$0xff]  ;;  %22336 = vst [vmem:[#allocation76_spill] sm:$0xff] %v15668_v27  ;;  %v15708_v1 = vsel %vm22347_vm3, 1.0, %v19212_v31  ;;  %v15714_v3 = vsel %vm22349_vm4, 1.0, %v19212_v31  ;;  %vm1708_vm7 = vcmp.eq.s32.totalorder %v15164_v47, %v22352_v2  ;;  %vm1710_vm4 = vcmp.eq.s32.totalorder %v15164_v47, %v22358_v62 }
 0x444   : > { %vm1697_vm2 = vcmp.eq.s32.totalorder %v15164_v47, %v22322_v13  ;;  %vm1699_vm6 = vcmp.eq.s32.totalorder %v15164_v47, %v22327_v12  ;;  %v22329_v54 = vld [vmem:[#allocation316_spill] sm:$0xff]  ;;  %22337 = vst [vmem:[#allocation260_spill] sm:$0xff] %v15674_v60  ;;  %22341 = vst [vmem:[#allocation262_spill] sm:$0xff] %v15688_v33  ;;  %v22344_v25 = vld [vmem:[#allocation66_spill] sm:$0xff]  ;;  %v15728_v60 = vsel %vm1685_vm15, 1.0, %v19212_v31  ;;  %v15734_v11 = vsel %vm1686_vm8, 1.0, %v19212_v31 }
 0x445   : > { %22343 = vst [vmem:[#allocation264_spill] sm:$0xff] %v15694_v14  ;;  %22348 = vst [vmem:[#allocation272_spill] sm:$0xff] %v15708_v1  ;;  %v22351_v27 = vld [vmem:[#allocation67_spill] sm:$0xff]  ;;  %v22357_v33 = vld [vmem:[#allocation69_spill] sm:$0xff]  ;;  %v15748_v14 = vsel %vm1687_vm11, 1.0, %v19212_v31  ;;  %v15754_v24 = vsel %vm1688_vm10, 1.0, %v19212_v31  ;;  %vm22372_vm11 = vcmp.eq.s32.totalorder %v15164_v47, %v22301_v32  ;;  %vm22376_vm10 = vcmp.eq.s32.totalorder %v15164_v47, %v22307_v50 }
 0x446   : > { %22350 = vst [vmem:[#allocation266_spill] sm:$0xff] %v15714_v3  ;;  %vm1707_vm9 = vcmp.eq.s32.totalorder %v15164_v47, %v22351_v27  ;;  %22355 = vst [vmem:[#allocation268_spill] sm:$0xff] %v15728_v60  ;;  %vm1709_vm3 = vcmp.eq.s32.totalorder %v15164_v47, %v22357_v33  ;;  %v22363_v1 = vld [vmem:[#allocation71_spill] sm:$0xff]  ;;  %v22364_v5 = vld [vmem:[#allocation72_spill] sm:$0xff]  ;;  %v15768_v3 = vsel %vm1689_vm12, 1.0, %v19212_v31  ;;  %v15774_v41 = vsel %vm1690_vm14, 1.0, %v19212_v31 }
 0x447   : > { %22356 = vst [vmem:[#allocation270_spill] sm:$0xff] %v15734_v11  ;;  %22361 = vst [vmem:[#allocation274_spill] sm:$0xff] %v15748_v14  ;;  %vm1711_vm15 = vcmp.eq.s32.totalorder %v15164_v47, %v22363_v1  ;;  %vm1712_vm8 = vcmp.eq.s32.totalorder %v15164_v47, %v22364_v5  ;;  %v22366_v11 = vld [vmem:[#allocation310_spill] sm:$0xff]  ;;  %v22369_v60 = vld [vmem:[#allocation312_spill] sm:$0xff]  ;;  %v15784_v46 = vsel %vm1691_vm5, 1.0, %v19212_v31  ;;  %v15790_v63 = vsel %vm22372_vm11, 1.0, %v19212_v31 }
 0x448   : > { %22362 = vst [vmem:[#allocation278_spill] sm:$0xff] %v15754_v24  ;;  %22367 = vst [vmem:[#allocation280_spill] sm:$0xff] %v15768_v3  ;;  %v22374_v9 = vld [vmem:[#allocation276_spill] sm:$0xff]  ;;  %v22375_v36 = vld [vmem:[#allocation318_spill] sm:$0xff]  ;;  %v15800_v14 = vsel %vm22376_vm10, 1.0, %v19212_v31  ;;  %vm22378_vm12 = vcmp.eq.s32.totalorder %v15164_v47, %v22308_v34  ;;  %vm22382_vm14 = vcmp.eq.s32.totalorder %v15164_v47, %v22315_v29  ;;  %vm22384_vm5 = vcmp.eq.s32.totalorder %v15164_v47, %v22316_v40 }
 0x449   : > { %22368 = vst [vmem:[#allocation282_spill] sm:$0xff] %v15774_v41  ;;  %22371 = vst [vmem:[#allocation284_spill] sm:$0xff] %v15784_v46  ;;  %v15806_v6 = vsel %vm22378_vm12, 1.0, %v19212_v31  ;;  %v22380_v32 = vld [vmem:[#allocation320_spill] sm:$0xff]  ;;  %v22381_v24 = vld [vmem:[#allocation322_spill] sm:$0xff]  ;;  %v15816_v3 = vsel %vm22382_vm14, 1.0, %v19212_v31  ;;  %vm1713_vm11 = vcmp.eq.s32.totalorder %v15164_v47, %v22100_v18  ;;  %vm1714_vm10 = vcmp.eq.s32.totalorder %v15164_v47, %v22101_v10 }
 0x44a   : > { %22373 = vst [vmem:[#allocation63_spill] sm:$0xff] %v15790_v63  ;;  %22377 = vst [vmem:[#allocation287_spill] sm:$0xff] %v15800_v14  ;;  %v15822_v50 = vsel %vm22384_vm5, 1.0, %v19212_v31  ;;  %v15832_v46 = vsel %vm1697_vm2, 1.0, %v19212_v31  ;;  %v15838_v29 = vsel %vm1698_vm13, 1.0, %v19212_v31  ;;  %vm22393_vm13 = vcmp.eq.s32.totalorder %v15164_v47, %v22328_v7  ;;  %v22429_v59 = vld [vmem:[#allocation143_spill] sm:$0xff] }
 0x44b   : > { %22379 = vst [vmem:[#allocation289_spill] sm:$0xff] %v15806_v6  ;;  %22383 = vst [vmem:[#allocation291_spill] sm:$0xff] %v15816_v3  ;;  %v15858_v30 = vsel %vm22393_vm13, 1.0, %v19212_v31  ;;  %vm1715_vm2 = vcmp.eq.s32.totalorder %v15164_v47, %v22102_v56  ;;  %vm1716_vm12 = vcmp.eq.s32.totalorder %v15164_v47, %v22103_v49  ;;  %v15872_v63 = vsel %vm1701_vm1, 1.0, %v19212_v31  ;;  %v22432_v14 = vld [vmem:[#allocation18_spill] sm:$0xff]  ;;  %v22433_v5 = vld [vmem:[#allocation144_spill] sm:$0xff] }
 0x44c   : > { %22385 = vst [vmem:[#allocation293_spill] sm:$0xff] %v15822_v50  ;;  %22388 = vst [vmem:[#allocation295_spill] sm:$0xff] %v15832_v46  ;;  %v15852_v50 = vsel %vm1699_vm6, 1.0, %v19212_v31  ;;  %v15878_v7 = vsel %vm1702_vm0, 1.0, %v19212_v31  ;;  %vm22401_vm6 = vcmp.eq.s32.totalorder %v15164_v47, %v19473_v28  ;;  %vm22403_vm1 = vcmp.eq.s32.totalorder %v15164_v47, %v19474_v44  ;;  %v22409_v44 = vld [vmem:[#allocation14_spill] sm:$0xff]  ;;  %v22439_v40 = vld [vmem:[#allocation147_spill] sm:$0xff] }
 0x44d   : > { %22389 = vst [vmem:[#allocation297_spill] sm:$0xff] %v15838_v29  ;;  %22392 = vst [vmem:[#allocation299_spill] sm:$0xff] %v15852_v50  ;;  %v15888_v12 = vsel %vm22401_vm6, 1.0, %v19212_v31  ;;  %v15894_v51 = vsel %vm22403_vm1, 1.0, %v19212_v31  ;;  %vm22405_vm0 = vcmp.eq.s32.totalorder %v15164_v47, %v21839_v20  ;;  %vm22407_vm14 = vcmp.eq.s32.totalorder %v15164_v47, %v22344_v25  ;;  %v22431_v20 = vld [vmem:[#allocation17_spill] sm:$0xff]  ;;  %v22437_v62 = vld [vmem:[#allocation146_spill] sm:$0xff] }
 0x44e   : > { %22394 = vst [vmem:[#allocation301_spill] sm:$0xff] %v15858_v30  ;;  %22397 = vst [vmem:[#allocation303_spill] sm:$0xff] %v15872_v63  ;;  %v15904_v50 = vsel %vm22405_vm0, 1.0, %v19212_v31  ;;  %v15910_v28 = vsel %vm22407_vm14, 1.0, %v19212_v31  ;;  %vm1717_vm5 = vcmp.eq.s32.totalorder %v15164_v47, %v22409_v44  ;;  %v15924_v15 = vsel %vm1707_vm9, 1.0, %v19212_v31  ;;  %v22434_v63 = vld [vmem:[#allocation81_spill] sm:$0xff] }
 0x44f   : > { %22398 = vst [vmem:[#allocation305_spill] sm:$0xff] %v15878_v7  ;;  %22402 = vst [vmem:[#allocation307_spill] sm:$0xff] %v15888_v12  ;;  %v22410_v7 = vld [vmem:[#allocation15_spill] sm:$0xff]  ;;  %v15930_v25 = vsel %vm1708_vm7, 1.0, %v19212_v31  ;;  %v22415_v12 = vld [vmem:[#allocation16_spill] sm:$0xff]  ;;  %vm1720_vm1 = vcmp.eq.s32.totalorder %v15164_v47, %v22416_v4  ;;  %v15950_v2 = vsel %vm1710_vm4, 1.0, %v19212_v31  ;;  %vm1721_vm9 = vcmp.eq.s32.totalorder %v15164_v47, %v22431_v20 }
 0x450   : > { %22404 = vst [vmem:[#allocation20_spill] sm:$0xff] %v15894_v51  ;;  %22406 = vst [vmem:[#allocation21_spill] sm:$0xff] %v15904_v50  ;;  %vm1718_vm13 = vcmp.eq.s32.totalorder %v15164_v47, %v22410_v7  ;;  %vm1719_vm6 = vcmp.eq.s32.totalorder %v15164_v47, %v22415_v12  ;;  %v15944_v51 = vsel %vm1709_vm3, 1.0, %v19212_v31  ;;  %v15960_v27 = vsel %vm1711_vm15, 1.0, %v19212_v31  ;;  %v22427_v50 = vld [vmem:[#allocation142_spill] sm:$0xff]  ;;  %v22435_v30 = vld [vmem:[#allocation145_spill] sm:$0xff] }
 0x451   : > { %22408 = vst [vmem:[#allocation22_spill] sm:$0xff] %v15910_v28  ;;  %22413 = vst [vmem:[#allocation23_spill] sm:$0xff] %v15924_v15  ;;  %v15966_v33 = vsel %vm1712_vm8, 1.0, %v19212_v31  ;;  %v22428_v15 = vld [vmem:[#allocation79_spill] sm:$0xff]  ;;  %v22430_v28 = vld [vmem:[#allocation80_spill] sm:$0xff]  ;;  %vm1722_vm7 = vcmp.eq.s32.totalorder %v15164_v47, %v22432_v14  ;;  %v2791_v46 = vmax.f32 %v22434_v63, %v22433_v5  ;;  %v22444_v63 = vmax.f32 %v22291_v39, %v15494_v8 }
 0x452   : > { %22414 = vst [vmem:[#allocation24_spill] sm:$0xff] %v15930_v25  ;;  %22419 = vst [vmem:[#allocation25_spill] sm:$0xff] %v15944_v51  ;;  %v2770_v1 = vmax.f32 %v22430_v28, %v22429_v59  ;;  %v22436_v25 = vld [vmem:[#allocation82_spill] sm:$0xff]  ;;  %v22438_v51 = vld [vmem:[#allocation83_spill] sm:$0xff]  ;;  %v22443_v28 = vmax.f32 %v22290_v52, %v15488_v16  ;;  %v22450_v34 = vmax.f32 %v22295_v45, %v15514_v57  ;;  %v16040_v10 = vsel %vm1715_vm2, 1.0, %v19212_v31 }
 0x453   : > { %22420 = vst [vmem:[#allocation309_spill] sm:$0xff] %v15950_v2  ;;  %22423 = vst [vmem:[#allocation311_spill] sm:$0xff] %v15960_v27  ;;  %v2749_v2 = vmax.f32 %v22428_v15, %v22427_v50  ;;  %v2812_v27 = vmax.f32 %v22436_v25, %v22435_v30  ;;  %v22440_v15 = vld [vmem:[#allocation84_spill] sm:$0xff]  ;;  %v22441_v29 = vld [vmem:[#allocation19_spill] sm:$0xff]  ;;  %v22451_v16 = vmax.f32 %v22298_v42, %v15528_v21  ;;  %v16062_v49 = vsel %vm1718_vm13, 1.0, %v19212_v31 }
 0x454   : > { %22424 = vst [vmem:[#allocation313_spill] sm:$0xff] %v15966_v33  ;;  %v2833_v33 = vmax.f32 %v22438_v51, %v22437_v62  ;;  %v2854_v50 = vmax.f32 %v22440_v15, %v22439_v40  ;;  %vm1723_vm3 = vcmp.eq.s32.totalorder %v15164_v47, %v22441_v29  ;;  %v22442_v59 = vld [vmem:[#allocation78_spill] sm:$0xff]  ;;  %v2784_v30 = vmax.f32 %v22444_v63, %v2770_v1  ;;  %v22445_v25 = vld [vmem:[#allocation148_spill] sm:$0xff]  ;;  %v22446_v5 = vld [vmem:[#allocation85_spill] sm:$0xff] }
 0x455   : > { %vm1724_vm4 = vcmp.eq.s32.totalorder %v15164_v47, %v22442_v59  ;;  %v2763_v13 = vmax.f32 %v22443_v28, %v2749_v2  ;;  %v2875_v51 = vmax.f32 %v22446_v5, %v22445_v25  ;;  %v22447_v62 = vld [vmem:[#allocation149_spill] sm:$0xff]  ;;  %v22448_v41 = vld [vmem:[#allocation86_spill] sm:$0xff]  ;;  %v22449_v15 = vmax.f32 %v22294_v37, %v15508_v35  ;;  %v22455_v21 = vld [vmem:[#allocation228_spill] sm:$0xff]  ;;  %22460 = vst [vmem:[#allocation27_spill] sm:$0xff] %v16062_v49 }
 0x456   : > { %v2896_v40 = vmax.f32 %v22448_v41, %v22447_v62  ;;  %v2826_v6 = vmax.f32 %v22450_v34, %v2812_v27  ;;  %v2847_v52 = vmax.f32 %v22451_v16, %v2833_v33  ;;  %v22452_v8 = vmax.f32 %v22299_v19, %v15534_v38  ;;  %v22456_v18 = vld [vmem:[#allocation230_spill] sm:$0xff]  ;;  %v22477_v47 = vld [vmem:[#allocation151_spill] sm:$0xff]  ;;  %v22480_v42 = vld [vmem:[#allocation89_spill] sm:$0xff] }
 0x457   : > { %v2805_v3 = vmax.f32 %v22449_v15, %v2791_v46  ;;  %v16018_v41 = vsel %vm1713_vm11, 1.0, %v19212_v31  ;;  %v16024_v35 = vsel %vm1714_vm10, 1.0, %v19212_v31  ;;  %v22453_v57 = vmax.f32 %v22302_v43, %v15548_v58  ;;  %v22458_v43 = vld [vmem:[#allocation232_spill] sm:$0xff]  ;;  %v22481_v38 = vld [vmem:[#allocation153_spill] sm:$0xff]  ;;  %v22496_v5 = vld [vmem:[#allocation94_spill] sm:$0xff] }
 0x458   : > { %v2868_v39 = vmax.f32 %v22452_v8, %v2854_v50  ;;  %v22454_v19 = vmax.f32 %v22303_v61, %v15554_v53  ;;  %v16046_v58 = vsel %vm1716_vm12, 1.0, %v19212_v31  ;;  %v2764_v46 = vrot.slane %v2763_v13, 4  ;;  %v22479_v61 = vld [vmem:[#allocation152_spill] sm:$0xff]  ;;  %v22494_v49 = vld [vmem:[#allocation93_spill] sm:$0xff]  ;;  %v22500_v63 = vld [vmem:[#allocation279_spill] sm:$0xff] }
 0x459   : > { %v2889_v37 = vmax.f32 %v22453_v57, %v2875_v51  ;;  %22457 = vst [vmem:[#allocation315_spill] sm:$0xff] %v16046_v58  ;;  %v2785_v34 = vrot.slane %v2784_v30, 4  ;;  %v2806_v27 = vrot.slane %v2805_v3, 4  ;;  %v2827_v2 = vrot.slane %v2826_v6, 4 }
 0x45a   : > { %v2910_v45 = vmax.f32 %v22454_v19, %v2896_v40  ;;  %v2848_v33 = vrot.slane %v2847_v52, 4  ;;  %v2869_v56 = vrot.slane %v2868_v39, 4  ;;  %v16056_v1 = vsel %vm1717_vm5, 1.0, %v19212_v31 }
 0x45b   : > { %22459 = vst [vmem:[#allocation26_spill] sm:$0xff] %v16056_v1  ;;  %v2890_v50 = vrot.slane %v2889_v37, 4  ;;  %v16072_v44 = vsel %vm1719_vm6, 1.0, %v19212_v31  ;;  %v16078_v7 = vsel %vm1720_vm1, 1.0, %v19212_v31  ;;  %v2765_v8 = vmax.f32 %v2763_v13, %v2764_v46  ;;  %v22487_v13 = vld [vmem:[#allocation43_spill] sm:$0xff]  ;;  %v22498_v1 = vld [vmem:[#allocation254_spill] sm:$0xff] }
 0x45c   : > { %v2911_v28 = vrot.slane %v2910_v45, 4  ;;  %22463 = vst [vmem:[#allocation317_spill] sm:$0xff] %v16072_v44  ;;  %22464 = vst [vmem:[#allocation319_spill] sm:$0xff] %v16078_v7  ;;  %v2786_v57 = vmax.f32 %v2784_v30, %v2785_v34  ;;  %v2807_v19 = vmax.f32 %v2805_v3, %v2806_v27  ;;  %v2828_v51 = vmax.f32 %v2826_v6, %v2827_v2  ;;  %v22476_v30 = vld [vmem:[#allocation87_spill] sm:$0xff]  ;;  %v22486_v6 = vld [vmem:[#allocation92_spill] sm:$0xff] }
 0x45d   : > { %v2849_v25 = vmax.f32 %v2847_v52, %v2848_v33  ;;  %v2870_v12 = vmax.f32 %v2868_v39, %v2869_v56  ;;  %v16088_v53 = vsel %vm1721_vm9, 1.0, %v19212_v31  ;;  %v16094_v4 = vsel %vm1722_vm7, 1.0, %v19212_v31  ;;  %v22488_v7 = vld [vmem:[#allocation250_spill] sm:$0xff] }
 0x45e   : > { %22467 = vst [vmem:[#allocation321_spill] sm:$0xff] %v16088_v53  ;;  %22468 = vst [vmem:[#allocation323_spill] sm:$0xff] %v16094_v4  ;;  %v2891_v40 = vmax.f32 %v2889_v37, %v2890_v50  ;;  %v2912_v16 = vmax.f32 %v2910_v45, %v2911_v28  ;;  %v16104_v20 = vsel %vm1723_vm3, 1.0, %v19212_v31  ;;  %v16110_v14 = vsel %vm1724_vm4, 1.0, %v19212_v31  ;;  %v22475_v28 = vld [vmem:[#allocation150_spill] sm:$0xff]  ;;  %v22478_v31 = vld [vmem:[#allocation88_spill] sm:$0xff] }
 0x45f   : > { %22471 = vst [vmem:[#allocation325_spill] sm:$0xff] %v16104_v20  ;;  %22472 = vst [vmem:[#allocation327_spill] sm:$0xff] %v16110_v14  ;;  %v2766_v46 = vrot.slane %v2765_v8, 2  ;;  %v2787_v34 = vrot.slane %v2786_v57, 2  ;;  %v2808_v27 = vrot.slane %v2807_v19, 2  ;;  %v2829_v2 = vrot.slane %v2828_v51, 2 }
 0x460   : > { %v2850_v33 = vrot.slane %v2849_v25, 2  ;;  %v2871_v29 = vrot.slane %v2870_v12, 2  ;;  %v2892_v56 = vrot.slane %v2891_v40, 2  ;;  %v2913_v50 = vrot.slane %v2912_v16, 2  ;;  %v22482_v20 = vld [vmem:[#allocation90_spill] sm:$0xff]  ;;  %v22484_v37 = vld [vmem:[#allocation91_spill] sm:$0xff] }
 0x461   : > { %v2917_v3 = vmax.f32 %v22476_v30, %v22475_v28  ;;  %v2938_v59 = vmax.f32 %v22478_v31, %v22477_v47  ;;  %v2959_v39 = vmax.f32 %v22480_v42, %v22479_v61  ;;  %v2980_v45 = vmax.f32 %v22482_v20, %v22481_v38  ;;  %v22483_v14 = vld [vmem:[#allocation154_spill] sm:$0xff]  ;;  %v22485_v4 = vld [vmem:[#allocation155_spill] sm:$0xff]  ;;  %v22490_v30 = vld [vmem:[#allocation44_spill] sm:$0xff] }
 0x462   : > { %v3001_v52 = vmax.f32 %v22484_v37, %v22483_v14  ;;  %v3022_v53 = vmax.f32 %v22486_v6, %v22485_v4  ;;  %v22489_v15 = vmax.f32 %v22487_v13, %v22488_v7  ;;  %v22491_v28 = vld [vmem:[#allocation252_spill] sm:$0xff]  ;;  %v22495_v61 = vld [vmem:[#allocation157_spill] sm:$0xff]  ;;  %v22503_v7 = vmax.f32 %v22324_v17, %v15608_v23  ;;  %v22504_v13 = vld [vmem:[#allocation283_spill] sm:$0xff] }
 0x463   : > { %v22492_v62 = vmax.f32 %v22490_v30, %v22491_v28  ;;  %v22493_v31 = vld [vmem:[#allocation156_spill] sm:$0xff]  ;;  %v3064_v38 = vmax.f32 %v22496_v5, %v22495_v61  ;;  %v2788_v30 = vmax.f32 %v2786_v57, %v2787_v34  ;;  %v22507_v5 = vmax.f32 %v22329_v54, %v15628_v26 }
 0x464   : > { %v2931_v44 = vmax.f32 %v22489_v15, %v2917_v3  ;;  %v3043_v42 = vmax.f32 %v22494_v49, %v22493_v31  ;;  %v22497_v20 = vld [vmem:[#allocation292_spill] sm:$0xff]  ;;  %v3015_v15 = vmax.f32 %v22503_v7, %v3001_v52  ;;  %v2767_v49 = vmax.f32 %v2765_v8, %v2766_v46 }
 0x465   : > { %v2952_v47 = vmax.f32 %v22492_v62, %v2938_v59  ;;  %v22499_v14 = vmax.f32 %v22497_v20, %v22498_v1  ;;  %v22501_v4 = vld [vmem:[#allocation256_spill] sm:$0xff]  ;;  %v22505_v62 = vld [vmem:[#allocation258_spill] sm:$0xff]  ;;  %v2851_v20 = vmax.f32 %v2849_v25, %v2850_v33  ;;  %v2893_v23 = vmax.f32 %v2891_v40, %v2892_v56 }
 0x466   : > { %v22502_v6 = vmax.f32 %v22500_v63, %v22501_v4  ;;  %v22506_v3 = vmax.f32 %v22504_v13, %v22505_v62  ;;  %v3057_v28 = vmax.f32 %v22507_v5, %v3043_v42  ;;  %v22508_v1 = vld [vmem:[#allocation286_spill] sm:$0xff]  ;;  %v2809_v63 = vmax.f32 %v2807_v19, %v2808_v27 }
 0x467   : > { %v2973_v37 = vmax.f32 %v22499_v14, %v2959_v39  ;;  %v22509_v39 = vld [vmem:[#allocation73_spill] sm:$0xff]  ;;  %v2872_v14 = vmax.f32 %v2870_v12, %v2871_v29  ;;  %v2914_v17 = vmax.f32 %v2912_v16, %v2913_v50  ;;  %v2932_v52 = vrot.slane %v2931_v44, 4 }
 0x468   : > { %v2994_v58 = vmax.f32 %v22502_v6, %v2980_v45  ;;  %v3036_v59 = vmax.f32 %v22506_v3, %v3022_v53  ;;  %v22510_v31 = vmax.f32 %v22508_v1, %v22509_v39  ;;  %v2830_v45 = vmax.f32 %v2828_v51, %v2829_v2 }
 0x469   : > { %v2953_v4 = vrot.slane %v2952_v47, 4  ;;  %v2974_v6 = vrot.slane %v2973_v37, 4  ;;  %v3016_v8 = vrot.slane %v3015_v15, 4  ;;  %v2768_v46 = vrot.slane %v2767_v49, 1 }
 0x46a   : > { %v3078_v61 = vmax.f32 %v22510_v31, %v3064_v38  ;;  %v2995_v53 = vrot.slane %v2994_v58, 4  ;;  %v3037_v57 = vrot.slane %v3036_v59, 4  ;;  %v2789_v34 = vrot.slane %v2788_v30, 1  ;;  %v22516_v31 = vld [vmem:[#allocation158_spill] sm:$0xff] }
 0x46b   : > { %v3058_v26 = vrot.slane %v3057_v28, 4  ;;  %v2810_v42 = vrot.slane %v2809_v63, 1  ;;  %v2831_v7 = vrot.slane %v2830_v45, 1  ;;  %v2852_v13 = vrot.slane %v2851_v20, 1 }
 0x46c   : > { %v3079_v54 = vrot.slane %v3078_v61, 4  ;;  %v2873_v38 = vrot.slane %v2872_v14, 1  ;;  %v2894_v19 = vrot.slane %v2893_v23, 1  ;;  %v2915_v51 = vrot.slane %v2914_v17, 1 }
 0x46d   : > { %v2933_v25 = vmax.f32 %v2931_v44, %v2932_v52  ;;  %v2954_v12 = vmax.f32 %v2952_v47, %v2953_v4  ;;  %v2975_v40 = vmax.f32 %v2973_v37, %v2974_v6  ;;  %v2996_v16 = vmax.f32 %v2994_v58, %v2995_v53  ;;  %v22521_v4 = vld [vmem:[#allocation46_spill] sm:$0xff]  ;;  %v22522_v6 = vld [vmem:[#allocation161_spill] sm:$0xff] }
 0x46e   : > { %v3017_v27 = vmax.f32 %v3015_v15, %v3016_v8  ;;  %v3038_v2 = vmax.f32 %v3036_v59, %v3037_v57  ;;  %v16156_v33 = vmax.f32 %v2767_v49, %v2768_v46  ;;  %v16158_v29 = vmax.f32 %v2788_v30, %v2789_v34  ;;  %v22524_v8 = vld [vmem:[#allocation162_spill] sm:$0xff]  ;;  %v22526_v34 = vld [vmem:[#allocation163_spill] sm:$0xff] }
 0x46f   : > { %v3059_v56 = vmax.f32 %v3057_v28, %v3058_v26  ;;  %v3080_v50 = vmax.f32 %v3078_v61, %v3079_v54  ;;  %v16160_v62 = vmax.f32 %v2809_v63, %v2810_v42  ;;  %v16162_v3 = vmax.f32 %v2830_v45, %v2831_v7  ;;  %v22517_v61 = vld [vmem:[#allocation95_spill] sm:$0xff]  ;;  %v22525_v57 = vld [vmem:[#allocation98_spill] sm:$0xff] }
 0x470   : > { %v16164_v5 = vmax.f32 %v2851_v20, %v2852_v13  ;;  %v16166_v1 = vmax.f32 %v2872_v14, %v2873_v38  ;;  %v16168_v44 = vmax.f32 %v2893_v23, %v2894_v19  ;;  %v16170_v47 = vmax.f32 %v2914_v17, %v2915_v51  ;;  %v22518_v45 = vld [vmem:[#allocation159_spill] sm:$0xff]  ;;  %v22519_v20 = vld [vmem:[#allocation96_spill] sm:$0xff]  ;;  %v22523_v17 = vld [vmem:[#allocation97_spill] sm:$0xff] }
 0x471   : > { %22511 = vst [vmem:[#allocation37_spill] sm:$0xff] %v16162_v3  ;;  %v2934_v58 = vrot.slane %v2933_v25, 2  ;;  %v2955_v37 = vrot.slane %v2954_v12, 2  ;;  %v2976_v15 = vrot.slane %v2975_v40, 2  ;;  %v2997_v59 = vrot.slane %v2996_v16, 2  ;;  %v22520_v14 = vld [vmem:[#allocation160_spill] sm:$0xff] }
 0x472   : > { %22512 = vst [vmem:[#allocation329_spill] sm:$0xff] %v16164_v5  ;;  %22513 = vst [vmem:[#allocation28_spill] sm:$0xff] %v16166_v1  ;;  %v3018_v49 = vrot.slane %v3017_v27, 2  ;;  %v3039_v30 = vrot.slane %v3038_v2, 2  ;;  %v3060_v28 = vrot.slane %v3059_v56, 2  ;;  %v3081_v39 = vrot.slane %v3080_v50, 2 }
 0x473   : > { %22514 = vst [vmem:[#allocation29_spill] sm:$0xff] %v16168_v44  ;;  %22515 = vst [vmem:[#allocation206_spill] sm:$0xff] %v16170_v47  ;;  %v3085_v63 = vmax.f32 %v22517_v61, %v22516_v31  ;;  %v3106_v52 = vmax.f32 %v22519_v20, %v22518_v45  ;;  %v3127_v23 = vmax.f32 %v22521_v4, %v22520_v14  ;;  %v22527_v26 = vld [vmem:[#allocation99_spill] sm:$0xff]  ;;  %v22528_v42 = vld [vmem:[#allocation74_spill] sm:$0xff] }
 0x474   : > { %v3148_v53 = vmax.f32 %v22523_v17, %v22522_v6  ;;  %v3169_v46 = vmax.f32 %v22525_v57, %v22524_v8  ;;  %v3190_v54 = vmax.f32 %v22527_v26, %v22526_v34  ;;  %v22529_v7 = vmax.f32 %v22334_v0, %v22528_v42  ;;  %v22530_v38 = vld [vmem:[#allocation290_spill] sm:$0xff]  ;;  %v22531_v19 = vld [vmem:[#allocation75_spill] sm:$0xff]  ;;  %v22533_v61 = vld [vmem:[#allocation164_spill] sm:$0xff] }
 0x475   : > { %v22532_v51 = vmax.f32 %v22530_v38, %v22531_v19  ;;  %v22534_v45 = vld [vmem:[#allocation100_spill] sm:$0xff]  ;;  %v22535_v14 = vld [vmem:[#allocation165_spill] sm:$0xff]  ;;  %v22537_v17 = vld [vmem:[#allocation330_spill] sm:$0xff] }
 0x476   : > { %v3099_v13 = vmax.f32 %v22529_v7, %v3085_v63  ;;  %v3211_v20 = vmax.f32 %v22534_v45, %v22533_v61  ;;  %v22536_v4 = vld [vmem:[#allocation101_spill] sm:$0xff]  ;;  %v22538_v47 = vld [vmem:[#allocation76_spill] sm:$0xff]  ;;  %v22540_v44 = vld [vmem:[#allocation294_spill] sm:$0xff]  ;;  %v2935_v61 = vmax.f32 %v2933_v25, %v2934_v58  ;;  %v2956_v45 = vmax.f32 %v2954_v12, %v2955_v37 }
 0x477   : > { %v3120_v31 = vmax.f32 %v22532_v51, %v3106_v52  ;;  %v3232_v6 = vmax.f32 %v22536_v4, %v22535_v14  ;;  %v22539_v8 = vmax.f32 %v22537_v17, %v22538_v47  ;;  %v22541_v34 = vld [vmem:[#allocation260_spill] sm:$0xff]  ;;  %v22544_v63 = vld [vmem:[#allocation262_spill] sm:$0xff] }
 0x478   : > { %v22542_v26 = vmax.f32 %v22540_v44, %v22541_v34  ;;  %v22543_v0 = vld [vmem:[#allocation296_spill] sm:$0xff]  ;;  %v22546_v38 = vld [vmem:[#allocation298_spill] sm:$0xff]  ;;  %v2977_v44 = vmax.f32 %v2975_v40, %v2976_v15  ;;  %v3019_v34 = vmax.f32 %v3017_v27, %v3018_v49  ;;  %v2936_v58 = vrot.slane %v2935_v61, 1 }
 0x479   : > { %v3141_v57 = vmax.f32 %v22539_v8, %v3127_v23  ;;  %v22545_v42 = vmax.f32 %v22543_v0, %v22544_v63  ;;  %v22547_v52 = vld [vmem:[#allocation264_spill] sm:$0xff]  ;;  %v22552_v47 = vld [vmem:[#allocation302_spill] sm:$0xff]  ;;  %v3061_v0 = vmax.f32 %v3059_v56, %v3060_v28  ;;  %v3100_v63 = vrot.slane %v3099_v13, 4 }
 0x47a   : > { %v3162_v1 = vmax.f32 %v22542_v26, %v3148_v53  ;;  %v22548_v19 = vmax.f32 %v22546_v38, %v22547_v52  ;;  %v22549_v5 = vld [vmem:[#allocation236_spill] sm:$0xff]  ;;  %v22553_v23 = vld [vmem:[#allocation266_spill] sm:$0xff]  ;;  %v2998_v53 = vmax.f32 %v2996_v16, %v2997_v59  ;;  %v3040_v26 = vmax.f32 %v3038_v2, %v3039_v30 }
 0x47b   : > { %v3183_v7 = vmax.f32 %v22545_v42, %v3169_v46  ;;  %v22550_v14 = vld [vmem:[#allocation272_spill] sm:$0xff]  ;;  %v22554_v17 = vmax.f32 %v22552_v47, %v22553_v23  ;;  %v3082_v46 = vmax.f32 %v3080_v50, %v3081_v39  ;;  %v3121_v42 = vrot.slane %v3120_v31, 4 }
 0x47c   : > { %v3204_v51 = vmax.f32 %v22548_v19, %v3190_v54  ;;  %v22551_v4 = vmax.f32 %v22549_v5, %v22550_v14  ;;  %v3142_v38 = vrot.slane %v3141_v57, 4  ;;  %v3163_v54 = vrot.slane %v3162_v1, 4 }
 0x47d   : > { %v3246_v8 = vmax.f32 %v22554_v17, %v3232_v6  ;;  %v3184_v25 = vrot.slane %v3183_v7, 4  ;;  %v2957_v37 = vrot.slane %v2956_v45, 1  ;;  %v2978_v52 = vrot.slane %v2977_v44, 1 }
 0x47e   : > { %v3225_v3 = vmax.f32 %v22551_v4, %v3211_v20  ;;  %v3205_v12 = vrot.slane %v3204_v51, 4  ;;  %v2999_v19 = vrot.slane %v2998_v53, 1  ;;  %v3020_v14 = vrot.slane %v3019_v34, 1 }
 0x47f   : > { %v3247_v20 = vrot.slane %v3246_v8, 4  ;;  %v3041_v6 = vrot.slane %v3040_v26, 1  ;;  %v3062_v40 = vrot.slane %v3061_v0, 1  ;;  %v3083_v16 = vrot.slane %v3082_v46, 1 }
 0x480   : > { %v3226_v5 = vrot.slane %v3225_v3, 4  ;;  %v3101_v27 = vmax.f32 %v3099_v13, %v3100_v63  ;;  %v3122_v2 = vmax.f32 %v3120_v31, %v3121_v42  ;;  %v3143_v56 = vmax.f32 %v3141_v57, %v3142_v38  ;;  %v22560_v63 = vld [vmem:[#allocation102_spill] sm:$0xff]  ;;  %v22561_v42 = vld [vmem:[#allocation167_spill] sm:$0xff] }
 0x481   : > { %v3164_v50 = vmax.f32 %v3162_v1, %v3163_v54  ;;  %v3185_v15 = vmax.f32 %v3183_v7, %v3184_v25  ;;  %v3206_v59 = vmax.f32 %v3204_v51, %v3205_v12  ;;  %v16212_v49 = vmax.f32 %v2935_v61, %v2936_v58  ;;  %v22564_v54 = vld [vmem:[#allocation104_spill] sm:$0xff]  ;;  %v22565_v25 = vld [vmem:[#allocation169_spill] sm:$0xff]  ;;  %v22567_v58 = vld [vmem:[#allocation170_spill] sm:$0xff] }
 0x482   : > { %v16214_v30 = vmax.f32 %v2956_v45, %v2957_v37  ;;  %v3227_v28 = vmax.f32 %v3225_v3, %v3226_v5  ;;  %v3248_v39 = vmax.f32 %v3246_v8, %v3247_v20  ;;  %v16216_v4 = vmax.f32 %v2977_v44, %v2978_v52  ;;  %v22559_v44 = vld [vmem:[#allocation166_spill] sm:$0xff]  ;;  %v22569_v20 = vld [vmem:[#allocation171_spill] sm:$0xff] }
 0x483   : > { %v16218_v47 = vmax.f32 %v2998_v53, %v2999_v19  ;;  %v16220_v23 = vmax.f32 %v3019_v34, %v3020_v14  ;;  %v16222_v17 = vmax.f32 %v3040_v26, %v3041_v6  ;;  %v16224_v13 = vmax.f32 %v3061_v0, %v3062_v40  ;;  %v22562_v34 = vld [vmem:[#allocation103_spill] sm:$0xff]  ;;  %v22563_v26 = vld [vmem:[#allocation168_spill] sm:$0xff]  ;;  %v22568_v37 = vld [vmem:[#allocation106_spill] sm:$0xff] }
 0x484   : > { %v16226_v31 = vmax.f32 %v3082_v46, %v3083_v16  ;;  %v3102_v1 = vrot.slane %v3101_v27, 2  ;;  %v3123_v57 = vrot.slane %v3122_v2, 2  ;;  %v3144_v7 = vrot.slane %v3143_v56, 2  ;;  %v22566_v46 = vld [vmem:[#allocation105_spill] sm:$0xff]  ;;  %v22570_v52 = vld [vmem:[#allocation107_spill] sm:$0xff]  ;;  %v22571_v14 = vld [vmem:[#allocation304_spill] sm:$0xff] }
 0x485   : > { %22555 = vst [vmem:[#allocation208_spill] sm:$0xff] %v16220_v23  ;;  %22556 = vst [vmem:[#allocation210_spill] sm:$0xff] %v16222_v17  ;;  %v3165_v51 = vrot.slane %v3164_v50, 2  ;;  %v3186_v61 = vrot.slane %v3185_v15, 2  ;;  %v3207_v45 = vrot.slane %v3206_v59, 2  ;;  %v3228_v3 = vrot.slane %v3227_v28, 2 }
 0x486   : > { %22557 = vst [vmem:[#allocation212_spill] sm:$0xff] %v16224_v13  ;;  %22558 = vst [vmem:[#allocation214_spill] sm:$0xff] %v16226_v31  ;;  %v3249_v8 = vrot.slane %v3248_v39, 2  ;;  %v3253_v53 = vmax.f32 %v22560_v63, %v22559_v44  ;;  %v3274_v38 = vmax.f32 %v22562_v34, %v22561_v42  ;;  %v3295_v0 = vmax.f32 %v22564_v54, %v22563_v26  ;;  %v22572_v6 = vld [vmem:[#allocation268_spill] sm:$0xff]  ;;  %v22574_v44 = vld [vmem:[#allocation306_spill] sm:$0xff] }
 0x487   : > { %v3316_v12 = vmax.f32 %v22566_v46, %v22565_v25  ;;  %v3337_v5 = vmax.f32 %v22568_v37, %v22567_v58  ;;  %v3358_v19 = vmax.f32 %v22570_v52, %v22569_v20  ;;  %v22573_v40 = vmax.f32 %v22571_v14, %v22572_v6  ;;  %v22575_v63 = vld [vmem:[#allocation270_spill] sm:$0xff]  ;;  %v22577_v34 = vld [vmem:[#allocation172_spill] sm:$0xff]  ;;  %v22579_v54 = vld [vmem:[#allocation173_spill] sm:$0xff] }
 0x488   : > { %v22576_v31 = vmax.f32 %v22574_v44, %v22575_v63  ;;  %v22578_v13 = vld [vmem:[#allocation108_spill] sm:$0xff]  ;;  %v22580_v17 = vld [vmem:[#allocation109_spill] sm:$0xff]  ;;  %v22581_v46 = vld [vmem:[#allocation274_spill] sm:$0xff]  ;;  %v3124_v44 = vmax.f32 %v3122_v2, %v3123_v57 }
 0x489   : > { %v3267_v16 = vmax.f32 %v22573_v40, %v3253_v53  ;;  %v3379_v26 = vmax.f32 %v22578_v13, %v22577_v34  ;;  %v3400_v25 = vmax.f32 %v22580_v17, %v22579_v54  ;;  %v22582_v58 = vmax.f32 %v22365_v55, %v22581_v46  ;;  %v22583_v20 = vld [vmem:[#allocation278_spill] sm:$0xff]  ;;  %v22585_v53 = vld [vmem:[#allocation280_spill] sm:$0xff]  ;;  %v22591_v55 = vld [vmem:[#allocation63_spill] sm:$0xff] }
 0x48a   : > { %v3288_v42 = vmax.f32 %v22576_v31, %v3274_v38  ;;  %v22584_v52 = vmax.f32 %v22366_v11, %v22583_v20  ;;  %v22586_v14 = vmax.f32 %v22369_v60, %v22585_v53  ;;  %v22587_v31 = vld [vmem:[#allocation282_spill] sm:$0xff]  ;;  %v3103_v13 = vmax.f32 %v3101_v27, %v3102_v1  ;;  %v22589_v17 = vld [vmem:[#allocation284_spill] sm:$0xff] }
 0x48b   : > { %v3309_v37 = vmax.f32 %v22582_v58, %v3295_v0  ;;  %v22588_v38 = vmax.f32 %v22370_v22, %v22587_v31  ;;  %v22590_v63 = vmax.f32 %v22374_v9, %v22589_v17  ;;  %v22592_v0 = vmax.f32 %v22375_v36, %v22591_v55 }
 0x48c   : > { %v3330_v23 = vmax.f32 %v22584_v52, %v3316_v12  ;;  %v3351_v6 = vmax.f32 %v22586_v14, %v3337_v5  ;;  %v3145_v11 = vmax.f32 %v3143_v56, %v3144_v7  ;;  %v3166_v12 = vmax.f32 %v3164_v50, %v3165_v51 }
 0x48d   : > { %v3372_v40 = vmax.f32 %v22588_v38, %v3358_v19  ;;  %v3393_v34 = vmax.f32 %v22590_v63, %v3379_v26  ;;  %v3414_v54 = vmax.f32 %v22592_v0, %v3400_v25  ;;  %v3187_v46 = vmax.f32 %v3185_v15, %v3186_v61  ;;  %v22596_v0 = vld [vmem:[#allocation174_spill] sm:$0xff] }
 0x48e   : > { %v3208_v58 = vmax.f32 %v3206_v59, %v3207_v45  ;;  %v3229_v60 = vmax.f32 %v3227_v28, %v3228_v3  ;;  %v3250_v5 = vmax.f32 %v3248_v39, %v3249_v8  ;;  %v3268_v20 = vrot.slane %v3267_v16, 4 }
 0x48f   : > { %v3289_v52 = vrot.slane %v3288_v42, 4  ;;  %v3310_v22 = vrot.slane %v3309_v37, 4  ;;  %v3331_v19 = vrot.slane %v3330_v23, 4  ;;  %v3352_v27 = vrot.slane %v3351_v6, 4 }
 0x490   : > { %v3373_v2 = vrot.slane %v3372_v40, 4  ;;  %v3104_v1 = vrot.slane %v3103_v13, 1  ;;  %v3125_v57 = vrot.slane %v3124_v44, 1  ;;  %v3394_v9 = vrot.slane %v3393_v34, 4 }
 0x491   : > { %v3415_v26 = vrot.slane %v3414_v54, 4  ;;  %v3146_v53 = vrot.slane %v3145_v11, 1  ;;  %v3167_v14 = vrot.slane %v3166_v12, 1  ;;  %v3188_v36 = vrot.slane %v3187_v46, 1 }
 0x492   : > { %v3209_v25 = vrot.slane %v3208_v58, 1  ;;  %v3230_v56 = vrot.slane %v3229_v60, 1  ;;  %v3251_v50 = vrot.slane %v3250_v5, 1  ;;  %v3269_v15 = vmax.f32 %v3267_v16, %v3268_v20 }
 0x493   : > { %v3290_v59 = vmax.f32 %v3288_v42, %v3289_v52  ;;  %v3311_v28 = vmax.f32 %v3309_v37, %v3310_v22  ;;  %v3332_v39 = vmax.f32 %v3330_v23, %v3331_v19  ;;  %v3353_v7 = vmax.f32 %v3351_v6, %v3352_v27  ;;  %v22601_v52 = vld [vmem:[#allocation112_spill] sm:$0xff]  ;;  %v22602_v22 = vld [vmem:[#allocation177_spill] sm:$0xff]  ;;  %v22604_v27 = vld [vmem:[#allocation178_spill] sm:$0xff] }
 0x494   : > { %v3374_v51 = vmax.f32 %v3372_v40, %v3373_v2  ;;  %v16268_v61 = vmax.f32 %v3103_v13, %v3104_v1  ;;  %v16270_v45 = vmax.f32 %v3124_v44, %v3125_v57  ;;  %v3395_v3 = vmax.f32 %v3393_v34, %v3394_v9  ;;  %v22605_v2 = vld [vmem:[#allocation114_spill] sm:$0xff]  ;;  %v22606_v57 = vld [vmem:[#allocation179_spill] sm:$0xff] }
 0x495   : > { %v3416_v8 = vmax.f32 %v3414_v54, %v3415_v26  ;;  %v16272_v31 = vmax.f32 %v3145_v11, %v3146_v53  ;;  %v16274_v38 = vmax.f32 %v3166_v12, %v3167_v14  ;;  %v16276_v17 = vmax.f32 %v3187_v46, %v3188_v36  ;;  %v22597_v54 = vld [vmem:[#allocation110_spill] sm:$0xff]  ;;  %v22598_v12 = vld [vmem:[#allocation175_spill] sm:$0xff] }
 0x496   : > { %v16278_v63 = vmax.f32 %v3208_v58, %v3209_v25  ;;  %v16280_v16 = vmax.f32 %v3229_v60, %v3230_v56  ;;  %v16282_v42 = vmax.f32 %v3250_v5, %v3251_v50  ;;  %v3270_v23 = vrot.slane %v3269_v15, 2  ;;  %v22599_v46 = vld [vmem:[#allocation111_spill] sm:$0xff]  ;;  %v22600_v58 = vld [vmem:[#allocation176_spill] sm:$0xff]  ;;  %v22603_v5 = vld [vmem:[#allocation113_spill] sm:$0xff] }
 0x497   : > { %v3291_v37 = vrot.slane %v3290_v59, 2  ;;  %v3312_v6 = vrot.slane %v3311_v28, 2  ;;  %v3333_v40 = vrot.slane %v3332_v39, 2  ;;  %v3354_v13 = vrot.slane %v3353_v7, 2  ;;  %v22607_v9 = vld [vmem:[#allocation115_spill] sm:$0xff]  ;;  %v22610_v25 = vld [vmem:[#allocation289_spill] sm:$0xff] }
 0x498   : > { %22593 = vst [vmem:[#allocation216_spill] sm:$0xff] %v16278_v63  ;;  %22594 = vst [vmem:[#allocation218_spill] sm:$0xff] %v16280_v16  ;;  %v3375_v44 = vrot.slane %v3374_v51, 2  ;;  %v3396_v34 = vrot.slane %v3395_v3, 2  ;;  %v3417_v55 = vrot.slane %v3416_v8, 2  ;;  %v3421_v11 = vmax.f32 %v22597_v54, %v22596_v0  ;;  %v22608_v53 = vld [vmem:[#allocation287_spill] sm:$0xff] }
 0x499   : > { %22595 = vst [vmem:[#allocation220_spill] sm:$0xff] %v16282_v42  ;;  %v3442_v20 = vmax.f32 %v22599_v46, %v22598_v12  ;;  %v3463_v60 = vmax.f32 %v22601_v52, %v22600_v58  ;;  %v3484_v19 = vmax.f32 %v22603_v5, %v22602_v22  ;;  %v3505_v1 = vmax.f32 %v22605_v2, %v22604_v27  ;;  %v22612_v0 = vld [vmem:[#allocation180_spill] sm:$0xff]  ;;  %v22614_v46 = vld [vmem:[#allocation181_spill] sm:$0xff]  ;;  %v22617_v5 = vld [vmem:[#allocation291_spill] sm:$0xff] }
 0x49a   : > { %v3526_v26 = vmax.f32 %v22607_v9, %v22606_v57  ;;  %v22609_v14 = vmax.f32 %v22380_v32, %v22608_v53  ;;  %v22611_v56 = vmax.f32 %v22381_v24, %v22610_v25  ;;  %v22613_v54 = vld [vmem:[#allocation116_spill] sm:$0xff]  ;;  %v22615_v58 = vld [vmem:[#allocation117_spill] sm:$0xff]  ;;  %v22619_v57 = vld [vmem:[#allocation326_spill] sm:$0xff] }
 0x49b   : > { %v3547_v12 = vmax.f32 %v22613_v54, %v22612_v0  ;;  %v3568_v52 = vmax.f32 %v22615_v58, %v22614_v46  ;;  %v22616_v22 = vld [vmem:[#allocation324_spill] sm:$0xff]  ;;  %v22620_v9 = vld [vmem:[#allocation293_spill] sm:$0xff]  ;;  %v22623_v53 = vld [vmem:[#allocation295_spill] sm:$0xff]  ;;  %v16326_v54 = vmax.f32 %v3269_v15, %v3270_v23  ;;  %v16344_v15 = vmax.f32 %v3353_v7, %v3354_v13 }
 0x49c   : > { %v3435_v36 = vmax.f32 %v22609_v14, %v3421_v11  ;;  %v3456_v50 = vmax.f32 %v22611_v56, %v3442_v20  ;;  %v22618_v27 = vmax.f32 %v22616_v22, %v22617_v5  ;;  %v22621_v42 = vmax.f32 %v22619_v57, %v22620_v9  ;;  %v22622_v11 = vld [vmem:[#allocation36_spill] sm:$0xff]  ;;  %v22626_v25 = vld [vmem:[#allocation297_spill] sm:$0xff]  ;;  %v22628_v46 = vld [vmem:[#allocation331_spill] sm:$0xff] }
 0x49d   : > { %v22624_v24 = vmax.f32 %v22622_v11, %v22623_v53  ;;  %v22625_v14 = vld [vmem:[#allocation328_spill] sm:$0xff]  ;;  %v22629_v58 = vld [vmem:[#allocation299_spill] sm:$0xff]  ;;  %v22632_v5 = vld [vmem:[#allocation301_spill] sm:$0xff]  ;;  %v16340_v57 = vmax.f32 %v3311_v28, %v3312_v6  ;;  %v16346_v23 = vmax.f32 %v3374_v51, %v3375_v44 }
 0x49e   : > { %v16309_v2 = vmax.f32 %v22618_v27, %v3463_v60  ;;  %v16314_v32 = vmax.f32 %v22621_v42, %v3484_v19  ;;  %v22627_v56 = vmax.f32 %v22625_v14, %v22626_v25  ;;  %v16328_v60 = vmax.f32 %v3290_v59, %v3291_v37  ;;  %v22631_v19 = vld [vmem:[#allocation207_spill] sm:$0xff] }
 0x49f   : > { %v16319_v20 = vmax.f32 %v22624_v24, %v3505_v1  ;;  %v22630_v22 = vmax.f32 %v22628_v46, %v22629_v58  ;;  %v22633_v1 = vmax.f32 %v22631_v19, %v22632_v5  ;;  %v16348_v59 = vmax.f32 %v3395_v3, %v3396_v34 }
 0x4a0   : > { %v16324_v0 = vmax.f32 %v22627_v56, %v3526_v26  ;;  %v16342_v26 = vmax.f32 %v3332_v39, %v3333_v40  ;;  %v16350_v37 = vmax.f32 %v3416_v8, %v3417_v55  ;;  %v3436_v9 = vrot.slane %v3435_v36, 4 }
 0x4a1   : > { %v16333_v42 = vmax.f32 %v22630_v22, %v3547_v12  ;;  %v16338_v27 = vmax.f32 %v22633_v1, %v3568_v52  ;;  %v3457_v12 = vrot.slane %v3456_v50, 4  ;;  %v3478_v11 = vrot.slane %v16309_v2, 4 }
 0x4a2   : > { %v3499_v53 = vrot.slane %v16314_v32, 4  ;;  %v3520_v52 = vrot.slane %v16319_v20, 4  ;;  %v3541_v28 = vrot.slane %v16324_v0, 4  ;;  %v3272_v39 = vrot.slane %v16326_v54, 1 }
 0x4a3   : > { %v3293_v7 = vrot.slane %v16328_v60, 1  ;;  %v3562_v51 = vrot.slane %v16333_v42, 4  ;;  %v3583_v3 = vrot.slane %v16338_v27, 4  ;;  %v3314_v8 = vrot.slane %v16340_v57, 1 }
 0x4a4   : > { %v3335_v6 = vrot.slane %v16342_v26, 1  ;;  %v3356_v40 = vrot.slane %v16344_v15, 1  ;;  %v3377_v13 = vrot.slane %v16346_v23, 1  ;;  %v3398_v44 = vrot.slane %v16348_v59, 1 }
 0x4a5   : > { %v3419_v34 = vrot.slane %v16350_v37, 1  ;;  %v3437_v55 = vmax.f32 %v3435_v36, %v3436_v9  ;;  %v3458_v24 = vmax.f32 %v3456_v50, %v3457_v12 }
 0x4a6   : > { %5048 = shalt.err (!%p5045_p1)
}
 0x4a7   : > { %s5049_s24 = scalar_lea.hbm %s16369_s10, 16  ;;  %s5053_s30 = scalar_lea.hbm %s17283_s2, 32 }
 0x4a8   : > { %p5050_p4 = scmp.ne.s32.totalorder %s16369_s10, %s5049_s24  ;;  %p5054_p6 = scmp.lt.u32.totalorder %s16369_s10, %s17283_s2 }
 0x4a9   : > { %p5055_p8 = scmp.lt.u32.totalorder %s5053_s30, %s5049_s24  ;;  %p5057_p10 = scmp.lt.u32.totalorder %s5049_s24, %s16369_s10 }
 0x4aa   : > { %p5051_p2 = pnand %p5050_p4, %p5286_p3 }
 0x4ab   : > { %p5056_p9 = por %p5055_p8, %p5054_p6 }
 0x4ac   : > { %p5052_p5 = pneg %p5051_p2 }
 0x4ad   : > { %p5058_p11 = por %p5057_p10, %p5056_p9 }
 0x4af   : > { %p5059_p0 = pnand %p5058_p11, %p5052_p5 }
 0x4b1   : > { %5062 = shalt.err (!%p5059_p0)
}
 0x4b2   : > { %4927 = dma.vmem_to_hbm [thread:$0]  (%p5286_p3), %s16371_s28, 16, %s16369_s10, %s4694_s5   ;;  %v3479_v36 = vmax.f32 %v16309_v2, %v3478_v11  ;;  %v3500_v50 = vmax.f32 %v16314_v32, %v3499_v53  ;;  %v3521_v14 = vmax.f32 %v16319_v20, %v3520_v52  ;;  %v3542_v25 = vmax.f32 %v16324_v0, %v3541_v28  ;;  %v22642_v12 = vld [vmem:[#allocation182_spill] sm:$0xff]  ;;  %v22644_v53 = vld [vmem:[#allocation183_spill] sm:$0xff]  ;;  %v22646_v28 = vld [vmem:[#allocation184_spill] sm:$0xff] }
 0x4b3   : > { %v16403_v56 = vmax.f32 %v16326_v54, %v3272_v39  ;;  %v16406_v46 = vmax.f32 %v16328_v60, %v3293_v7  ;;  %v3563_v58 = vmax.f32 %v16333_v42, %v3562_v51  ;;  %v3584_v22 = vmax.f32 %v16338_v27, %v3583_v3  ;;  %v22648_v7 = vld [vmem:[#allocation185_spill] sm:$0xff]  ;;  %v22650_v3 = vld [vmem:[#allocation186_spill] sm:$0xff]  ;;  %s4917_s29 = sshll.u32 %s5169_s18, 6  ;;  %s4918_s28 = sshll.u32 %s5173_s19, 8 }
 0x4b4   : > { %v16411_v19 = vmax.f32 %v16340_v57, %v3314_v8  ;;  %v16414_v2 = vmax.f32 %v16342_v26, %v3335_v6  ;;  %v16417_v32 = vmax.f32 %v16344_v15, %v3356_v40  ;;  %v16420_v20 = vmax.f32 %v16346_v23, %v3377_v13  ;;  %v22643_v15 = vld [vmem:[#allocation118_spill] sm:$0xff]  ;;  %v22645_v23 = vld [vmem:[#allocation119_spill] sm:$0xff]  ;;  %s4723_s18 = sadd.s32 %s4918_s28, %s4917_s29  ;;  %s4727_s10 = sshll.u32 %s5349_s17, 4  ;;  %s17215_s10 = int_to_ptr.vmem [resolvable:$true] %s4727_s10 }
 0x4b5   : > { %22634 = vst [vmem:[#allocation30_spill] sm:$0xff] %v16403_v56  ;;  %22635 = vst [vmem:[#allocation31_spill] sm:$0xff] %v16406_v46  ;;  %v16423_v0 = vmax.f32 %v16348_v59, %v3398_v44  ;;  %v16426_v54 = vmax.f32 %v16350_v37, %v3419_v34  ;;  %v3438_v60 = vrot.slane %v3437_v55, 2  ;;  %v3459_v42 = vrot.slane %v3458_v24, 2  ;;  %v22647_v59 = vld [vmem:[#allocation120_spill] sm:$0xff]  ;;  %v22649_v37 = vld [vmem:[#allocation121_spill] sm:$0xff] }
 0x4b6   : > { %22636 = vst [vmem:[#allocation64_spill] sm:$0xff] %v16411_v19  ;;  %22637 = vst [vmem:[#allocation223_spill] sm:$0xff] %v16414_v2  ;;  %v3480_v5 = vrot.slane %v3479_v36, 2  ;;  %v3501_v1 = vrot.slane %v3500_v50, 2  ;;  %v3522_v27 = vrot.slane %v3521_v14, 2  ;;  %v3543_v57 = vrot.slane %v3542_v25, 2 }
 0x4b7   : > { %22638 = vst [vmem:[#allocation225_spill] sm:$0xff] %v16417_v32  ;;  %22639 = vst [vmem:[#allocation227_spill] sm:$0xff] %v16420_v20  ;;  %v3564_v26 = vrot.slane %v3563_v58, 2  ;;  %v3585_v9 = vrot.slane %v3584_v22, 2  ;;  %v3589_v11 = vmax.f32 %v22643_v15, %v22642_v12  ;;  %v3610_v52 = vmax.f32 %v22645_v23, %v22644_v53  ;;  %v22651_v8 = vld [vmem:[#allocation122_spill] sm:$0xff]  ;;  %v22652_v40 = vld [vmem:[#allocation187_spill] sm:$0xff] }
 0x4b8   : > { %22640 = vst [vmem:[#allocation32_spill] sm:$0xff] %v16423_v0  ;;  %22641 = vst [vmem:[#allocation33_spill] sm:$0xff] %v16426_v54  ;;  %v3631_v39 = vmax.f32 %v22647_v59, %v22646_v28  ;;  %v3652_v51 = vmax.f32 %v22649_v37, %v22648_v7  ;;  %v3673_v6 = vmax.f32 %v22651_v8, %v22650_v3  ;;  %v22653_v13 = vld [vmem:[#allocation123_spill] sm:$0xff]  ;;  %v22654_v0 = vld [vmem:[#allocation209_spill] sm:$0xff]  ;;  %s4919_s19 = sshll.u32 %s4723_s18, 4  ;;  %s4698_s25 = scalar_lea.sflag [#allocation5], %s198_s27 }
 0x4b9   : > { %v3694_v44 = vmax.f32 %v22653_v13, %v22652_v40  ;;  %v3439_v34 = vmax.f32 %v3437_v55, %v3438_v60  ;;  %v3460_v54 = vmax.f32 %v3458_v24, %v3459_v42  ;;  %v22655_v20 = vld [vmem:[#allocation303_spill] sm:$0xff]  ;;  %v22658_v53 = vld [vmem:[#allocation305_spill] sm:$0xff]  ;;  %v22663_v37 = vld [vmem:[#allocation62_spill] sm:$0xff]  ;;  %v3502_v13 = vmax.f32 %v3500_v50, %v3501_v1  ;;  %s17213_s21 = scalar_lea.hbm %s17284_s3, %s4919_s19  ;;  %s5063_s24 = scalar_lea.vmem %s17215_s10, 1024 }
 0x4ba   : > { %v22656_v12 = vmax.f32 %v22654_v0, %v22655_v20  ;;  %v22657_v32 = vld [vmem:[#allocation211_spill] sm:$0xff]  ;;  %v22660_v28 = vld [vmem:[#allocation61_spill] sm:$0xff]  ;;  %v22664_v46 = vld [vmem:[#allocation20_spill] sm:$0xff]  ;;  %p5064_p3 = scmp.ne.s32.totalorder %s17215_s10, %s5063_s24  ;;  %s5194_s20 = smov [#allocation4]  }
 0x4bb   : > { %v22659_v23 = vmax.f32 %v22657_v32, %v22658_v53  ;;  %v22661_v59 = vld [vmem:[#allocation307_spill] sm:$0xff]  ;;  %v22665_v3 = vmax.f32 %v22663_v37, %v22664_v46  ;;  %v22666_v56 = vld [vmem:[#allocation213_spill] sm:$0xff]  ;;  %v22670_v42 = vld [vmem:[#allocation22_spill] sm:$0xff]  ;;  %v3565_v46 = vmax.f32 %v3563_v58, %v3564_v26  ;;  %s5067_s26 = sshll.u32 %s5194_s20, 4  ;;  %s5068_s26 = int_to_ptr.vmem [resolvable:$false] %s5067_s26 }
 0x4bc   : > { %v3603_v15 = vmax.f32 %v22656_v12, %v3589_v11  ;;  %v22662_v19 = vmax.f32 %v22660_v28, %v22661_v59  ;;  %v22667_v40 = vld [vmem:[#allocation21_spill] sm:$0xff]  ;;  %v22669_v60 = vld [vmem:[#allocation215_spill] sm:$0xff]  ;;  %v3481_v11 = vmax.f32 %v3479_v36, %v3480_v5  ;;  %v22672_v32 = vld [vmem:[#allocation188_spill] sm:$0xff]  ;;  %v3544_v28 = vmax.f32 %v3542_v25, %v3543_v57  ;;  %p5065_p1 = pnand %p5064_p3, %p5315_p12  ;;  %s5069_s30 = scalar_lea.vmem %s5068_s26, 2048 }
 0x4bd   : > { %v3624_v2 = vmax.f32 %v22659_v23, %v3610_v52  ;;  %v3666_v8 = vmax.f32 %v22665_v3, %v3652_v51  ;;  %v22668_v55 = vmax.f32 %v22666_v56, %v22667_v40  ;;  %v22671_v20 = vmax.f32 %v22669_v60, %v22670_v42  ;;  %v22673_v52 = vld [vmem:[#allocation124_spill] sm:$0xff]  ;;  %v22674_v53 = vld [vmem:[#allocation189_spill] sm:$0xff]  ;;  %p5070_p2 = scmp.lt.s32.totalorder %s17215_s10, %s5068_s26  ;;  %p5071_p5 = scmp.lt.s32.totalorder %s5069_s30, %s5063_s24 }
 0x4be   : > { %v3645_v7 = vmax.f32 %v22662_v19, %v3631_v39  ;;  %v3715_v12 = vmax.f32 %v22673_v52, %v22672_v32  ;;  %v22675_v23 = vld [vmem:[#allocation125_spill] sm:$0xff]  ;;  %v3523_v39 = vmax.f32 %v3521_v14, %v3522_v27  ;;  %v3586_v51 = vmax.f32 %v3584_v22, %v3585_v9  ;;  %p5066_p4 = pneg %p5065_p1 }
 0x4bf   : > { %v3687_v24 = vmax.f32 %v22668_v55, %v3673_v6  ;;  %v3708_v0 = vmax.f32 %v22671_v20, %v3694_v44  ;;  %v3736_v19 = vmax.f32 %v22675_v23, %v22674_v53  ;;  %v3604_v59 = vrot.slane %v3603_v15, 4  ;;  %v22676_v56 = vld [vmem:[#allocation217_spill] sm:$0xff]  ;;  %v22677_v6 = vld [vmem:[#allocation23_spill] sm:$0xff]  ;;  %v22680_v44 = vld [vmem:[#allocation24_spill] sm:$0xff]  ;;  %p5072_p6 = por %p5071_p5, %p5070_p2 }
 0x4c0   : > { %v3625_v37 = vrot.slane %v3624_v2, 4  ;;  %v22678_v3 = vmax.f32 %v22676_v56, %v22677_v6  ;;  %v22679_v55 = vld [vmem:[#allocation219_spill] sm:$0xff]  ;;  %v3646_v5 = vrot.slane %v3645_v7, 4  ;;  %v3667_v1 = vrot.slane %v3666_v8, 4 }
 0x4c1   : > { %v22681_v36 = vmax.f32 %v22679_v55, %v22680_v44  ;;  %v3688_v60 = vrot.slane %v3687_v24, 4  ;;  %v3709_v42 = vrot.slane %v3708_v0, 4  ;;  %v3440_v20 = vrot.slane %v3439_v34, 1  ;;  %p5073_p8 = pnand %p5072_p6, %p5066_p4 }
 0x4c2   : > { %v3729_v40 = vmax.f32 %v22678_v3, %v3715_v12  ;;  %v3461_v32 = vrot.slane %v3460_v54, 1  ;;  %v3482_v14 = vrot.slane %v3481_v11, 1  ;;  %v3503_v25 = vrot.slane %v3502_v13, 1 }
 0x4c3   : > { %v3750_v50 = vmax.f32 %v22681_v36, %v3736_v19  ;;  %v3524_v58 = vrot.slane %v3523_v39, 1  ;;  %v3545_v22 = vrot.slane %v3544_v28, 1  ;;  %v3566_v27 = vrot.slane %v3565_v46, 1 }
 0x4c4   : > { %v3587_v57 = vrot.slane %v3586_v51, 1  ;;  %v3605_v26 = vmax.f32 %v3603_v15, %v3604_v59  ;;  %v3626_v9 = vmax.f32 %v3624_v2, %v3625_v37  ;;  %v3730_v52 = vrot.slane %v3729_v40, 4 }
 0x4c5   : > { %v3751_v12 = vrot.slane %v3750_v50, 4  ;;  %v3647_v53 = vmax.f32 %v3645_v7, %v3646_v5  ;;  %v3668_v23 = vmax.f32 %v3666_v8, %v3667_v1  ;;  %v3689_v56 = vmax.f32 %v3687_v24, %v3688_v60  ;;  %v22691_v5 = vld [vmem:[#allocation126_spill] sm:$0xff]  ;;  %v22692_v1 = vld [vmem:[#allocation191_spill] sm:$0xff] }
 0x4c6   : > { %v3710_v19 = vmax.f32 %v3708_v0, %v3709_v42  ;;  %v16468_v6 = vmax.f32 %v3439_v34, %v3440_v20  ;;  %v16470_v3 = vmax.f32 %v3460_v54, %v3461_v32  ;;  %v16472_v55 = vmax.f32 %v3481_v11, %v3482_v14  ;;  %v22690_v11 = vld [vmem:[#allocation190_spill] sm:$0xff]  ;;  %v22695_v42 = vld [vmem:[#allocation128_spill] sm:$0xff]  ;;  %v22696_v20 = vld [vmem:[#allocation193_spill] sm:$0xff] }
 0x4c7   : > { %v16474_v44 = vmax.f32 %v3502_v13, %v3503_v25  ;;  %v16476_v36 = vmax.f32 %v3523_v39, %v3524_v58  ;;  %v16478_v16 = vmax.f32 %v3544_v28, %v3545_v22  ;;  %v16480_v15 = vmax.f32 %v3565_v46, %v3566_v27  ;;  %v22693_v39 = vld [vmem:[#allocation127_spill] sm:$0xff]  ;;  %v22694_v28 = vld [vmem:[#allocation192_spill] sm:$0xff]  ;;  %v22698_v14 = vld [vmem:[#allocation194_spill] sm:$0xff] }
 0x4c8   : > { %22682 = vst [vmem:[#allocation34_spill] sm:$0xff] %v16468_v6  ;;  %22683 = vst [vmem:[#allocation35_spill] sm:$0xff] %v16470_v3  ;;  %v16482_v2 = vmax.f32 %v3586_v51, %v3587_v57  ;;  %v3606_v7 = vrot.slane %v3605_v26, 2  ;;  %v3627_v8 = vrot.slane %v3626_v9, 2  ;;  %v3731_v24 = vmax.f32 %v3729_v40, %v3730_v52  ;;  %v22697_v51 = vld [vmem:[#allocation129_spill] sm:$0xff]  ;;  %v22699_v25 = vld [vmem:[#allocation130_spill] sm:$0xff] }
 0x4c9   : > { %22684 = vst [vmem:[#allocation229_spill] sm:$0xff] %v16472_v55  ;;  %22685 = vst [vmem:[#allocation231_spill] sm:$0xff] %v16474_v44  ;;  %v3752_v0 = vmax.f32 %v3750_v50, %v3751_v12  ;;  %v3648_v34 = vrot.slane %v3647_v53, 2  ;;  %v3669_v59 = vrot.slane %v3668_v23, 2  ;;  %v3690_v54 = vrot.slane %v3689_v56, 2  ;;  %v22700_v50 = vld [vmem:[#allocation195_spill] sm:$0xff] }
 0x4ca   : > { %22686 = vst [vmem:[#allocation233_spill] sm:$0xff] %v16476_v36  ;;  %22687 = vst [vmem:[#allocation235_spill] sm:$0xff] %v16478_v16  ;;  %v3711_v37 = vrot.slane %v3710_v19, 2  ;;  %v3757_v13 = vmax.f32 %v22691_v5, %v22690_v11  ;;  %v3778_v60 = vmax.f32 %v22693_v39, %v22692_v1  ;;  %v3799_v46 = vmax.f32 %v22695_v42, %v22694_v28  ;;  %v22701_v58 = vld [vmem:[#allocation131_spill] sm:$0xff]  ;;  %v22702_v27 = vld [vmem:[#allocation196_spill] sm:$0xff] }
 0x4cb   : > { %22688 = vst [vmem:[#allocation237_spill] sm:$0xff] %v16480_v15  ;;  %22689 = vst [vmem:[#allocation239_spill] sm:$0xff] %v16482_v2  ;;  %v3820_v32 = vmax.f32 %v22697_v51, %v22696_v20  ;;  %v3841_v40 = vmax.f32 %v22699_v25, %v22698_v14  ;;  %v3862_v22 = vmax.f32 %v22701_v58, %v22700_v50  ;;  %v22703_v57 = vld [vmem:[#allocation132_spill] sm:$0xff]  ;;  %v22704_v12 = vld [vmem:[#allocation197_spill] sm:$0xff] }
 0x4cc   : > { %v3883_v52 = vmax.f32 %v22703_v57, %v22702_v27  ;;  %v22705_v11 = vld [vmem:[#allocation133_spill] sm:$0xff]  ;;  %v22709_v28 = vld [vmem:[#allocation222_spill] sm:$0xff]  ;;  %v22712_v51 = vld [vmem:[#allocation224_spill] sm:$0xff]  ;;  %v22718_v27 = vmax.f32 %v22455_v21, %v16018_v41  ;;  %v3670_v41 = vmax.f32 %v3668_v23, %v3669_v59  ;;  %v3691_v21 = vmax.f32 %v3689_v56, %v3690_v54 }
 0x4cd   : > { %v3904_v5 = vmax.f32 %v22705_v11, %v22704_v12  ;;  %v22706_v2 = vld [vmem:[#allocation221_spill] sm:$0xff]  ;;  %v22713_v36 = vld [vmem:[#allocation311_spill] sm:$0xff]  ;;  %v22715_v44 = vld [vmem:[#allocation226_spill] sm:$0xff]  ;;  %v22720_v12 = vmax.f32 %v15429_v48, %v16040_v10  ;;  %v3607_v11 = vmax.f32 %v3605_v26, %v3606_v7 }
 0x4ce   : > { %v22707_v1 = vld [vmem:[#allocation25_spill] sm:$0xff]  ;;  %v22714_v14 = vmax.f32 %v22712_v51, %v22713_v36  ;;  %v3855_v57 = vmax.f32 %v22718_v27, %v3841_v40  ;;  %v3692_v23 = vrot.slane %v3691_v21, 1 }
 0x4cf   : > { %v22708_v39 = vmax.f32 %v22706_v2, %v22707_v1  ;;  %v22710_v42 = vld [vmem:[#allocation309_spill] sm:$0xff]  ;;  %v22719_v2 = vmax.f32 %v22456_v18, %v16024_v35  ;;  %v3732_v1 = vrot.slane %v3731_v24, 2 }
 0x4d0   : > { %v22711_v16 = vmax.f32 %v22709_v28, %v22710_v42  ;;  %v3813_v25 = vmax.f32 %v22714_v14, %v3799_v46  ;;  %v22716_v50 = vld [vmem:[#allocation313_spill] sm:$0xff]  ;;  %v3649_v28 = vmax.f32 %v3647_v53, %v3648_v34  ;;  %v3856_v18 = vrot.slane %v3855_v57, 4 }
 0x4d1   : > { %v3771_v15 = vmax.f32 %v22708_v39, %v3757_v13  ;;  %v22717_v58 = vmax.f32 %v22715_v44, %v22716_v50  ;;  %v3876_v13 = vmax.f32 %v22719_v2, %v3862_v22  ;;  %v3753_v44 = vrot.slane %v3752_v0, 2 }
 0x4d2   : > { %v3792_v20 = vmax.f32 %v22711_v16, %v3778_v60  ;;  %v3897_v16 = vmax.f32 %v22720_v12, %v3883_v52  ;;  %v22721_v60 = vld [vmem:[#allocation315_spill] sm:$0xff]  ;;  %v3628_v39 = vmax.f32 %v3626_v9, %v3627_v8  ;;  %v3814_v42 = vrot.slane %v3813_v25, 4 }
 0x4d3   : > { %v3834_v55 = vmax.f32 %v22717_v58, %v3820_v32  ;;  %v22722_v36 = vmax.f32 %v22458_v43, %v22721_v60  ;;  %v3772_v32 = vrot.slane %v3771_v15, 4  ;;  %v3877_v51 = vrot.slane %v3876_v13, 4 }
 0x4d4   : > { %v3793_v40 = vrot.slane %v3792_v20, 4  ;;  %v3898_v48 = vrot.slane %v3897_v16, 4  ;;  %v3608_v52 = vrot.slane %v3607_v11, 1  ;;  %v16524_v14 = vmax.f32 %v3710_v19, %v3711_v37  ;;  %v22751_v37 = vld [vmem:[#allocation317_spill] sm:$0xff] }
 0x4d5   : > { %v3918_v46 = vmax.f32 %v22722_v36, %v3904_v5  ;;  %v3835_v35 = vrot.slane %v3834_v55, 4  ;;  %v3773_v22 = vmax.f32 %v3771_v15, %v3772_v32  ;;  %v16526_v43 = vmax.f32 %v3731_v24, %v3732_v1  ;;  %v22731_v32 = vld [vmem:[#allocation135_spill] sm:$0xff] }
 0x4d6   : > { %v16528_v26 = vmax.f32 %v3752_v0, %v3753_v44  ;;  %v3629_v7 = vrot.slane %v3628_v39, 1  ;;  %v3650_v9 = vrot.slane %v3649_v28, 1  ;;  %v3671_v53 = vrot.slane %v3670_v41, 1  ;;  %v22730_v44 = vld [vmem:[#allocation199_spill] sm:$0xff] }
 0x4d7   : > { %v3919_v10 = vrot.slane %v3918_v46, 4  ;;  %v16530_v56 = vmax.f32 %v3792_v20, %v3793_v40  ;;  %v16532_v8 = vmax.f32 %v3813_v25, %v3814_v42  ;;  %v16534_v34 = vmax.f32 %v3834_v55, %v3835_v35  ;;  %v22734_v40 = vld [vmem:[#allocation201_spill] sm:$0xff] }
 0x4d8   : > { %v16536_v15 = vmax.f32 %v3855_v57, %v3856_v18  ;;  %v3774_v59 = vrot.slane %v3773_v22, 2  ;;  %v16538_v54 = vmax.f32 %v3876_v13, %v3877_v51  ;;  %v16540_v19 = vmax.f32 %v3897_v16, %v3898_v48  ;;  %v22735_v42 = vld [vmem:[#allocation137_spill] sm:$0xff]  ;;  %v22736_v18 = vld [vmem:[#allocation202_spill] sm:$0xff]  ;;  %v22738_v48 = vld [vmem:[#allocation203_spill] sm:$0xff] }
 0x4d9   : > { %v16542_v24 = vmax.f32 %v3918_v46, %v3919_v10  ;;  %v16544_v0 = vmax.f32 %v3607_v11, %v3608_v52  ;;  %v16549_v25 = vmax.f32 %v3628_v39, %v3629_v7  ;;  %v16551_v55 = vmax.f32 %v3649_v28, %v3650_v9  ;;  %v22728_v46 = vld [vmem:[#allocation198_spill] sm:$0xff]  ;;  %v22732_v28 = vld [vmem:[#allocation200_spill] sm:$0xff]  ;;  %v22739_v10 = vld [vmem:[#allocation139_spill] sm:$0xff] }
 0x4da   : > { %v16553_v50 = vmax.f32 %v3670_v41, %v3671_v53  ;;  %v16555_v58 = vmax.f32 %v3691_v21, %v3692_v23  ;;  %v3795_v27 = vrot.slane %v16530_v56, 2  ;;  %v3816_v57 = vrot.slane %v16532_v8, 2  ;;  %v22729_v11 = vld [vmem:[#allocation134_spill] sm:$0xff]  ;;  %v22733_v41 = vld [vmem:[#allocation136_spill] sm:$0xff]  ;;  %v22742_v23 = vld [vmem:[#allocation205_spill] sm:$0xff] }
 0x4db   : > { %22723 = vst [vmem:[#allocation241_spill] sm:$0xff] %v16544_v0  ;;  %22724 = vst [vmem:[#allocation243_spill] sm:$0xff] %v16549_v25  ;;  %v3837_v2 = vrot.slane %v16534_v34, 2  ;;  %v3858_v13 = vrot.slane %v16536_v15, 2  ;;  %v16561_v12 = vmax.f32 %v3773_v22, %v3774_v59  ;;  %v3879_v16 = vrot.slane %v16538_v54, 2  ;;  %v22737_v22 = vld [vmem:[#allocation138_spill] sm:$0xff] }
 0x4dc   : > { %22725 = vst [vmem:[#allocation245_spill] sm:$0xff] %v16551_v55  ;;  %22726 = vst [vmem:[#allocation247_spill] sm:$0xff] %v16553_v50  ;;  %v3900_v60 = vrot.slane %v16540_v19, 2  ;;  %v3921_v36 = vrot.slane %v16542_v24, 2  ;;  %v3925_v1 = vmax.f32 %v22729_v11, %v22728_v46  ;;  %v3946_v39 = vmax.f32 %v22731_v32, %v22730_v44  ;;  %v22740_v7 = vld [vmem:[#allocation204_spill] sm:$0xff]  ;;  %v22743_v59 = vld [vmem:[#allocation141_spill] sm:$0xff] }
 0x4dd   : > { %22727 = vst [vmem:[#allocation249_spill] sm:$0xff] %v16555_v58  ;;  %v3967_v21 = vmax.f32 %v22733_v41, %v22732_v28  ;;  %v3988_v35 = vmax.f32 %v22735_v42, %v22734_v40  ;;  %v4009_v51 = vmax.f32 %v22737_v22, %v22736_v18  ;;  %v4030_v52 = vmax.f32 %v22739_v10, %v22738_v48  ;;  %v22741_v9 = vld [vmem:[#allocation140_spill] sm:$0xff]  ;;  %v22744_v11 = vld [vmem:[#allocation234_spill] sm:$0xff]  ;;  %v22747_v28 = vld [vmem:[#allocation277_spill] sm:$0xff] }
 0x4de   : > { %v4051_v53 = vmax.f32 %v22741_v9, %v22740_v7  ;;  %v4072_v46 = vmax.f32 %v22743_v59, %v22742_v23  ;;  %v22745_v44 = vld [vmem:[#allocation26_spill] sm:$0xff]  ;;  %v22748_v41 = vld [vmem:[#allocation27_spill] sm:$0xff]  ;;  %v22753_v58 = vld [vmem:[#allocation240_spill] sm:$0xff]  ;;  %v3796_v6 = vmax.f32 %v16530_v56, %v3795_v27  ;;  %v3817_v63 = vmax.f32 %v16532_v8, %v3816_v57 }
 0x4df   : > { %v22746_v32 = vmax.f32 %v22744_v11, %v22745_v44  ;;  %v22749_v5 = vmax.f32 %v22747_v28, %v22748_v41  ;;  %v22750_v42 = vld [vmem:[#allocation238_spill] sm:$0xff]  ;;  %v22754_v48 = vld [vmem:[#allocation319_spill] sm:$0xff]  ;;  %v22757_v9 = vld [vmem:[#allocation321_spill] sm:$0xff] }
 0x4e0   : > { %v22752_v18 = vmax.f32 %v22750_v42, %v22751_v37  ;;  %v22755_v10 = vmax.f32 %v22753_v58, %v22754_v48  ;;  %v22756_v7 = vld [vmem:[#allocation242_spill] sm:$0xff]  ;;  %v22759_v59 = vld [vmem:[#allocation244_spill] sm:$0xff]  ;;  %v22760_v25 = vld [vmem:[#allocation323_spill] sm:$0xff]  ;;  %v3818_v27 = vrot.slane %v3817_v63, 1 }
 0x4e1   : > { %v3939_v20 = vmax.f32 %v22746_v32, %v3925_v1  ;;  %v3960_v40 = vmax.f32 %v22749_v5, %v3946_v39  ;;  %v22758_v55 = vmax.f32 %v22756_v7, %v22757_v9  ;;  %v22761_v11 = vmax.f32 %v22759_v59, %v22760_v25  ;;  %v22762_v44 = vld [vmem:[#allocation246_spill] sm:$0xff]  ;;  %v22763_v32 = vld [vmem:[#allocation325_spill] sm:$0xff]  ;;  %v22765_v39 = vld [vmem:[#allocation248_spill] sm:$0xff] }
 0x4e2   : > { %v3981_v22 = vmax.f32 %v22752_v18, %v3967_v21  ;;  %v4002_v50 = vmax.f32 %v22755_v10, %v3988_v35  ;;  %v22764_v28 = vmax.f32 %v22762_v44, %v22763_v32  ;;  %v22766_v41 = vld [vmem:[#allocation327_spill] sm:$0xff] }
 0x4e3   : > { %v4023_v23 = vmax.f32 %v22758_v55, %v4009_v51  ;;  %v4044_v1 = vmax.f32 %v22761_v11, %v4030_v52  ;;  %v22767_v37 = vmax.f32 %v22765_v39, %v22766_v41  ;;  %v3940_v42 = vrot.slane %v3939_v20, 4 }
 0x4e4   : > { %v4065_v5 = vmax.f32 %v22764_v28, %v4051_v53  ;;  %v3961_v18 = vrot.slane %v3960_v40, 4  ;;  %v3982_v58 = vrot.slane %v3981_v22, 4  ;;  %v4003_v35 = vrot.slane %v4002_v50, 4 }
 0x4e5   : > { %v4086_v21 = vmax.f32 %v22767_v37, %v4072_v46  ;;  %v4024_v48 = vrot.slane %v4023_v23, 4  ;;  %v4045_v10 = vrot.slane %v4044_v1, 4  ;;  %v3941_v51 = vmax.f32 %v3939_v20, %v3940_v42 }
 0x4e6   : > { %v4066_v7 = vrot.slane %v4065_v5, 4  ;;  %v3962_v9 = vmax.f32 %v3960_v40, %v3961_v18  ;;  %v3983_v25 = vmax.f32 %v3981_v22, %v3982_v58  ;;  %v4004_v52 = vmax.f32 %v4002_v50, %v4003_v35  ;;  %v22786_v35 = vld [vmem:[#allocation64_spill] sm:$0xff]  ;;  %v22788_v58 = vld [vmem:[#allocation223_spill] sm:$0xff] }
 0x4e7   : > { %v4087_v55 = vrot.slane %v4086_v21, 4  ;;  %v4025_v59 = vmax.f32 %v4023_v23, %v4024_v48  ;;  %v4046_v11 = vmax.f32 %v4044_v1, %v4045_v10  ;;  %v3942_v32 = vrot.slane %v3941_v51, 2  ;;  %v22783_v48 = vld [vmem:[#allocation30_spill] sm:$0xff] }
 0x4e8   : > { %v4067_v44 = vmax.f32 %v4065_v5, %v4066_v7  ;;  %v3963_v28 = vrot.slane %v3962_v9, 2  ;;  %v3984_v39 = vrot.slane %v3983_v25, 2  ;;  %v4005_v46 = vrot.slane %v4004_v52, 2 }
 0x4e9   : > { %v4088_v53 = vmax.f32 %v4086_v21, %v4087_v55  ;;  %v4026_v41 = vrot.slane %v4025_v59, 2  ;;  %v4047_v37 = vrot.slane %v4046_v11, 2  ;;  %v3838_v20 = vmax.f32 %v16534_v34, %v3837_v2 }
 0x4ea   : > { %v4068_v0 = vrot.slane %v4067_v44, 2  ;;  %v3859_v50 = vmax.f32 %v16536_v15, %v3858_v13  ;;  %v3880_v40 = vmax.f32 %v16538_v54, %v3879_v16  ;;  %v16612_v22 = vmax.f32 %v16540_v19, %v3900_v60 }
 0x4eb   : > { %v4089_v3 = vrot.slane %v4088_v53, 2  ;;  %v16615_v23 = vmax.f32 %v16542_v24, %v3921_v36  ;;  %v16617_v1 = vmax.f32 %v3941_v51, %v3942_v32  ;;  %v16619_v5 = vmax.f32 %v3962_v9, %v3963_v28 }
 0x4ec   : > { %v16621_v21 = vmax.f32 %v3983_v25, %v3984_v39  ;;  %v16623_v56 = vmax.f32 %v4004_v52, %v4005_v46  ;;  %v16625_v8 = vmax.f32 %v4025_v59, %v4026_v41  ;;  %v3776_v34 = vrot.slane %v16561_v12, 1  ;;  %v22769_v25 = vld [vmem:[#allocation37_spill] sm:$0xff]  ;;  %v22775_v39 = vld [vmem:[#allocation206_spill] sm:$0xff] }
 0x4ed   : > { %v16628_v15 = vmax.f32 %v4046_v11, %v4047_v37  ;;  %v16630_v54 = vmax.f32 %v4067_v44, %v4068_v0  ;;  %v16632_v19 = vmax.f32 %v4088_v53, %v4089_v3  ;;  %v3797_v24 = vrot.slane %v3796_v6, 1  ;;  %v22771_v44 = vld [vmem:[#allocation329_spill] sm:$0xff]  ;;  %v22772_v53 = vld [vmem:[#allocation28_spill] sm:$0xff] }
 0x4ee   : > { %v3839_v57 = vrot.slane %v3838_v20, 1  ;;  %v3860_v2 = vrot.slane %v3859_v50, 1  ;;  %v3881_v13 = vrot.slane %v3880_v40, 1  ;;  %v3902_v16 = vrot.slane %v16612_v22, 1 }
 0x4ef   : > { %v3923_v60 = vrot.slane %v16615_v23, 1  ;;  %v3944_v36 = vrot.slane %v16617_v1, 1  ;;  %v3965_v42 = vrot.slane %v16619_v5, 1  ;;  %v3986_v18 = vrot.slane %v16621_v21, 1 }
 0x4f0   : > { %v4007_v0 = vrot.slane %v16623_v56, 1  ;;  %v16645_v10 = vmul.f32 1.6, %v16156_v33  ;;  %v22768_v7 = vrot.slane %v16524_v14, 1  ;;  %v16651_v51 = vmul.f32 1.6, %v16158_v29 }
 0x4f1   : > { %v16654_v9 = vmul.f32 1.6, %v16160_v62  ;;  %v16657_v52 = vmul.f32 1.6, %v22769_v25  ;;  %v22770_v59 = vrot.slane %v16526_v43, 1  ;;  %v22774_v29 = vrot.slane %v16528_v26, 1 }
 0x4f2   : > { %v3714_v55 = vmax.f32 %v16524_v14, %v22768_v7  ;;  %v16663_v33 = vmul.f32 1.6, %v22771_v44  ;;  %v16666_v32 = vmul.f32 1.6, %v22772_v53  ;;  %v22773_v14 = vld [vmem:[#allocation29_spill] sm:$0xff]  ;;  %v3777_v37 = vmax.f32 %v16561_v12, %v3776_v34  ;;  %v22777_v53 = vld [vmem:[#allocation210_spill] sm:$0xff] }
 0x4f3   : > { %v3735_v11 = vmax.f32 %v16526_v43, %v22770_v59  ;;  %v16669_v28 = vmul.f32 1.6, %v22773_v14  ;;  %v3756_v62 = vmax.f32 %v16528_v26, %v22774_v29  ;;  %v16675_v46 = vmul.f32 1.6, %v22775_v39  ;;  %v22776_v59 = vld [vmem:[#allocation208_spill] sm:$0xff] }
 0x4f4   : > { %v16678_v41 = vmul.f32 1.6, %v16212_v49  ;;  %v16681_v43 = vmul.f32 1.6, %v16214_v30  ;;  %v16685_v7 = vmul.f32 1.6, %v16216_v4  ;;  %v3798_v26 = vmax.f32 %v3796_v6, %v3797_v24 }
 0x4f5   : > { %v16688_v25 = vmul.f32 1.6, %v16218_v47  ;;  %v16691_v44 = vmul.f32 1.6, %v22776_v59  ;;  %v16694_v14 = vmul.f32 1.6, %v22777_v53  ;;  %v3819_v12 = vmax.f32 %v3817_v63, %v3818_v27 }
 0x4f6   : > { %v22778_v49 = vld [vmem:[#allocation212_spill] sm:$0xff]  ;;  %v22779_v30 = vld [vmem:[#allocation214_spill] sm:$0xff]  ;;  %v16703_v4 = vmul.f32 1.6, %v16268_v61  ;;  %v16706_v47 = vmul.f32 1.6, %v16270_v45  ;;  %v3840_v6 = vmax.f32 %v3838_v20, %v3839_v57  ;;  %v3861_v63 = vmax.f32 %v3859_v50, %v3860_v2 }
 0x4f7   : > { %v16697_v29 = vmul.f32 1.6, %v22778_v49  ;;  %v16700_v39 = vmul.f32 1.6, %v22779_v30  ;;  %v16709_v34 = vmul.f32 1.6, %v16272_v31  ;;  %v3882_v20 = vmax.f32 %v3880_v40, %v3881_v13 }
 0x4f8   : > { %v16712_v24 = vmul.f32 1.6, %v16274_v38  ;;  %v16715_v59 = vmul.f32 1.6, %v16276_v17  ;;  %v22780_v53 = vld [vmem:[#allocation216_spill] sm:$0xff]  ;;  %v22781_v27 = vld [vmem:[#allocation218_spill] sm:$0xff]  ;;  %v3903_v50 = vmax.f32 %v16612_v22, %v3902_v16  ;;  %v3924_v40 = vmax.f32 %v16615_v23, %v3923_v60 }
 0x4f9   : > { %v16718_v49 = vmul.f32 1.6, %v22780_v53  ;;  %v16721_v61 = vmul.f32 1.6, %v22781_v27  ;;  %v22782_v30 = vld [vmem:[#allocation220_spill] sm:$0xff]  ;;  %v22785_v57 = vld [vmem:[#allocation31_spill] sm:$0xff]  ;;  %v3945_v22 = vmax.f32 %v16617_v1, %v3944_v36  ;;  %v3966_v23 = vmax.f32 %v16619_v5, %v3965_v42 }
 0x4fa   : > { %v16724_v45 = vmul.f32 1.6, %v22782_v30  ;;  %v16727_v31 = vmul.f32 1.6, %v22783_v48  ;;  %v16730_v38 = vmul.f32 1.6, %v22785_v57  ;;  %v3987_v1 = vmax.f32 %v16621_v21, %v3986_v18 }
 0x4fb   : > { %v16733_v17 = vmul.f32 1.6, %v22786_v35  ;;  %v16736_v53 = vmul.f32 1.6, %v22788_v58  ;;  %v22790_v2 = vld [vmem:[#allocation225_spill] sm:$0xff]  ;;  %v22791_v30 = vld [vmem:[#allocation227_spill] sm:$0xff]  ;;  %v4008_v5 = vmax.f32 %v16623_v56, %v4007_v0 }
 0x4fc   : > { %22784 = vst [vmem:[#allocation251_spill] sm:$0xff] %v16727_v31  ;;  %v16740_v27 = vmul.f32 1.6, %v22790_v2  ;;  %v16743_v3 = vmul.f32 1.6, %v22791_v30  ;;  %v22793_v48 = vld [vmem:[#allocation32_spill] sm:$0xff] }
 0x4fd   : > { %22787 = vst [vmem:[#allocation253_spill] sm:$0xff] %v16733_v17  ;;  %22789 = vst [vmem:[#allocation255_spill] sm:$0xff] %v16736_v53  ;;  %v16746_v31 = vmul.f32 1.6, %v22793_v48  ;;  %v22795_v13 = vld [vmem:[#allocation33_spill] sm:$0xff]  ;;  %v22796_v35 = vld [vmem:[#allocation34_spill] sm:$0xff] }
 0x4fe   : > { %22792 = vst [vmem:[#allocation257_spill] sm:$0xff] %v16743_v3  ;;  %v16750_v57 = vmul.f32 1.6, %v22795_v13  ;;  %v16753_v17 = vmul.f32 1.6, %v22796_v35  ;;  %v22798_v58 = vld [vmem:[#allocation35_spill] sm:$0xff] }
 0x4ff   : > { %22794 = vst [vmem:[#allocation259_spill] sm:$0xff] %v16746_v31  ;;  %v16756_v53 = vmul.f32 1.6, %v22798_v58  ;;  %v22800_v16 = vld [vmem:[#allocation229_spill] sm:$0xff]  ;;  %v22801_v30 = vld [vmem:[#allocation231_spill] sm:$0xff]  ;;  %v22815_v21 = vrot.slane %v16625_v8, 1 }
 0x500   : > { %22797 = vst [vmem:[#allocation261_spill] sm:$0xff] %v16753_v17  ;;  %v16760_v2 = vmul.f32 1.6, %v22800_v16  ;;  %v16763_v3 = vmul.f32 1.6, %v22801_v30  ;;  %v22803_v48 = vld [vmem:[#allocation233_spill] sm:$0xff] }
 0x501   : > { %22799 = vst [vmem:[#allocation263_spill] sm:$0xff] %v16756_v53  ;;  %v16766_v31 = vmul.f32 1.6, %v22803_v48  ;;  %v22805_v60 = vld [vmem:[#allocation235_spill] sm:$0xff]  ;;  %v22806_v35 = vld [vmem:[#allocation237_spill] sm:$0xff]  ;;  %v4029_v18 = vmax.f32 %v16625_v8, %v22815_v21  ;;  %v22816_v56 = vrot.slane %v16628_v15, 1 }
 0x502   : > { %22802 = vst [vmem:[#allocation265_spill] sm:$0xff] %v16763_v3  ;;  %v16770_v13 = vmul.f32 1.6, %v22805_v60  ;;  %v16773_v17 = vmul.f32 1.6, %v22806_v35  ;;  %v22808_v58 = vld [vmem:[#allocation239_spill] sm:$0xff] }
 0x503   : > { %22804 = vst [vmem:[#allocation273_spill] sm:$0xff] %v16766_v31  ;;  %v16776_v53 = vmul.f32 1.6, %v22808_v58  ;;  %v22809_v36 = vld [vmem:[#allocation241_spill] sm:$0xff]  ;;  %v22810_v30 = vld [vmem:[#allocation243_spill] sm:$0xff]  ;;  %v4050_v0 = vmax.f32 %v16628_v15, %v22816_v56  ;;  %v22819_v21 = vrot.slane %v16632_v19, 1 }
 0x504   : > { %22807 = vst [vmem:[#allocation267_spill] sm:$0xff] %v16773_v17  ;;  %v16780_v16 = vmul.f32 1.6, %v22809_v36  ;;  %v16783_v3 = vmul.f32 1.6, %v22810_v30  ;;  %v22811_v48 = vld [vmem:[#allocation245_spill] sm:$0xff] }
 0x505   : > { %v16786_v31 = vmul.f32 1.6, %v22811_v48  ;;  %v22812_v42 = vld [vmem:[#allocation247_spill] sm:$0xff]  ;;  %v22813_v35 = vld [vmem:[#allocation249_spill] sm:$0xff]  ;;  %v16795_v58 = vmul.f32 1.6, %v3714_v55  ;;  %v4092_v15 = vmax.f32 %v16632_v19, %v22819_v21 }
 0x506   : > { %v16790_v60 = vmul.f32 1.6, %v22812_v42  ;;  %v16793_v17 = vmul.f32 1.6, %v22813_v35  ;;  %v16800_v36 = vmul.f32 1.6, %v3735_v11 }
 0x507   : > { %22814 = vst [vmem:[#allocation269_spill] sm:$0xff] %v16795_v58  ;;  %v16802_v30 = vmul.f32 1.6, %v3756_v62  ;;  %v16804_v48 = vmul.f32 1.6, %v3777_v37  ;;  %v22818_v58 = vrot.slane %v16630_v54, 1 }
 0x508   : > { %v16809_v42 = vmul.f32 1.6, %v3798_v26  ;;  %v16811_v35 = vmul.f32 1.6, %v3819_v12  ;;  %v16813_v55 = vmul.f32 1.6, %v3840_v6 }
 0x509   : > { %v4071_v8 = vmax.f32 %v16630_v54, %v22818_v58  ;;  %v16818_v11 = vmul.f32 1.6, %v3861_v63  ;;  %v16820_v62 = vmul.f32 1.6, %v3882_v20  ;;  %v16822_v37 = vmul.f32 1.6, %v3903_v50 }
 0x50a   : > { %22817 = vst [vmem:[#allocation271_spill] sm:$0xff] %v16813_v55  ;;  %v16827_v26 = vmul.f32 1.6, %v3924_v40  ;;  %v16829_v12 = vmul.f32 1.6, %v3945_v22 }
 0x50b   : > { %v16831_v6 = vmul.f32 1.6, %v3966_v23  ;;  %v16833_v56 = vmul.f32 1.6, %v3987_v1  ;;  %v16835_v55 = vmul.f32 1.6, %v4008_v5 }
 0x50c   : > { %v16837_v54 = vmul.f32 1.6, %v4029_v18  ;;  %v16839_v63 = vmul.f32 1.6, %v4050_v0  ;;  %v16842_v20 = vadd.f32 -0.8, %v16645_v10 }
 0x50d   : > { %v16845_v50 = vadd.f32 -0.8, %v16651_v51  ;;  %v16847_v19 = vmul.f32 1.6, %v4071_v8  ;;  %v16850_v40 = vadd.f32 -0.8, %v16654_v9 }
 0x50e   : > { %v16853_v22 = vadd.f32 -0.8, %v16657_v52  ;;  %v16855_v23 = vmul.f32 1.6, %v4092_v15  ;;  %v16858_v1 = vadd.f32 -0.8, %v16663_v33 }
 0x50f   : > { %v16861_v5 = vadd.f32 -0.8, %v16666_v32  ;;  %v16864_v10 = vadd.f32 -0.8, %v16669_v28  ;;  %v16867_v51 = vadd.f32 -0.8, %v16675_v46 }
 0x510   : > { %v16870_v9 = vadd.f32 -0.8, %v16678_v41  ;;  %v16873_v52 = vadd.f32 -0.8, %v16681_v43  ;;  %v16876_v58 = vadd.f32 -0.8, %v16685_v7 }
 0x511   : > { %v16879_v33 = vadd.f32 -0.8, %v16688_v25  ;;  %v16884_v28 = vadd.f32 -0.8, %v16691_v44  ;;  %v16887_v46 = vadd.f32 -0.8, %v16694_v14 }
 0x512   : > { %22820 = vst [vmem:[#allocation275_spill] sm:$0xff] %v16873_v52  ;;  %22821 = vst [vmem:[#allocation45_spill] sm:$0xff] %v16876_v58  ;;  %v16890_v41 = vadd.f32 -0.8, %v16697_v29  ;;  %v16895_v7 = vadd.f32 -0.8, %v16700_v39 }
 0x513   : > { %22822 = vst [vmem:[#allocation281_spill] sm:$0xff] %v16879_v33  ;;  %22823 = vst [vmem:[#allocation285_spill] sm:$0xff] %v16884_v28  ;;  %v16898_v25 = vadd.f32 -0.8, %v16703_v4  ;;  %v16901_v18 = vadd.f32 -0.8, %v16706_v47 }
 0x514   : > { %22824 = vst [vmem:[#allocation47_spill] sm:$0xff] %v16887_v46  ;;  %v16906_v14 = vadd.f32 -0.8, %v16709_v34  ;;  %v16909_v29 = vadd.f32 -0.8, %v16712_v24  ;;  %v22826_v24 = vld [vmem:[#allocation251_spill] sm:$0xff] }
 0x515   : > { %v16912_v0 = vadd.f32 -0.8, %v16715_v59  ;;  %v16917_v4 = vadd.f32 -0.8, %v16718_v49  ;;  %v16920_v47 = vadd.f32 -0.8, %v16721_v61 }
 0x516   : > { %22825 = vst [vmem:[#allocation48_spill] sm:$0xff] %v16909_v29  ;;  %v16923_v8 = vadd.f32 -0.8, %v16724_v45  ;;  %v16928_v21 = vadd.f32 -0.8, %v22826_v24  ;;  %v22827_v15 = vld [vmem:[#allocation253_spill] sm:$0xff] }
 0x517   : > { %v16931_v59 = vadd.f32 -0.8, %v16730_v38  ;;  %v16934_v39 = vadd.f32 -0.8, %v22827_v15  ;;  %v22828_v61 = vld [vmem:[#allocation255_spill] sm:$0xff]  ;;  %v22829_v43 = vld [vmem:[#allocation257_spill] sm:$0xff] }
 0x518   : > { %v16939_v44 = vadd.f32 -0.8, %v22828_v61  ;;  %v16942_v45 = vadd.f32 -0.8, %v16740_v27  ;;  %v16945_v34 = vadd.f32 -0.8, %v22829_v43 }
 0x519   : > { %v22830_v38 = vld [vmem:[#allocation259_spill] sm:$0xff]  ;;  %v16953_v15 = vadd.f32 -0.8, %v16750_v57  ;;  %v22831_v52 = vld [vmem:[#allocation261_spill] sm:$0xff]  ;;  %v16964_v43 = vadd.f32 -0.8, %v16760_v2 }
 0x51a   : > { %v16950_v32 = vadd.f32 -0.8, %v22830_v38  ;;  %v16956_v49 = vadd.f32 -0.8, %v22831_v52  ;;  %v22832_v27 = vld [vmem:[#allocation263_spill] sm:$0xff]  ;;  %v22833_v58 = vld [vmem:[#allocation265_spill] sm:$0xff] }
 0x51b   : > { %v16961_v33 = vadd.f32 -0.8, %v22832_v27  ;;  %v16967_v24 = vadd.f32 -0.8, %v22833_v58  ;;  %v22834_v57 = vld [vmem:[#allocation273_spill] sm:$0xff]  ;;  %v22835_v28 = vld [vmem:[#allocation267_spill] sm:$0xff] }
 0x51c   : > { %v16972_v46 = vadd.f32 -0.8, %v22834_v57  ;;  %v16975_v52 = vadd.f32 -0.8, %v16770_v13  ;;  %v16978_v61 = vadd.f32 -0.8, %v22835_v28 }
 0x51d   : > { %v16983_v2 = vadd.f32 -0.8, %v16776_v53  ;;  %v16986_v58 = vadd.f32 -0.8, %v16780_v16  ;;  %v16989_v38 = vadd.f32 -0.8, %v16783_v3  ;;  %v4386_v53 = vcombine.low %v16920_v47, %v16923_v8 }
 0x51e   : > { %v16994_v13 = vadd.f32 -0.8, %v16786_v31  ;;  %v16997_v28 = vadd.f32 -0.8, %v16790_v60  ;;  %v17000_v27 = vadd.f32 -0.8, %v16793_v17  ;;  %v4432_v31 = vcombine.low %v16928_v21, %v16931_v59 }
 0x51f   : > { %v22836_v16 = vld [vmem:[#allocation269_spill] sm:$0xff]  ;;  %v17008_v3 = vadd.f32 -0.8, %v16800_v36  ;;  %v17011_v57 = vadd.f32 -0.8, %v16802_v30  ;;  %v4433_v8 = vcombine.low %v16934_v39, %v16939_v44  ;;  %v22837_v36 = vld [vmem:[#allocation271_spill] sm:$0xff]  ;;  %v4435_v39 = vcombine.low %v16950_v32, %v16953_v15 }
 0x520   : > { %v17005_v29 = vadd.f32 -0.8, %v22836_v16  ;;  %v17016_v60 = vadd.f32 -0.8, %v16804_v48  ;;  %v17019_v17 = vadd.f32 -0.8, %v16809_v42  ;;  %v4434_v48 = vcombine.low %v16942_v45, %v16945_v34 }
 0x521   : > { %v17022_v47 = vadd.f32 -0.8, %v16811_v35  ;;  %v17027_v16 = vadd.f32 -0.8, %v22837_v36  ;;  %v17030_v30 = vadd.f32 -0.8, %v16818_v11  ;;  %v4481_v34 = vcombine.low %v16956_v49, %v16961_v33 }
 0x522   : > { %v17033_v21 = vadd.f32 -0.8, %v16820_v62  ;;  %v17038_v42 = vadd.f32 -0.8, %v16822_v37  ;;  %v17041_v35 = vadd.f32 -0.8, %v16827_v26  ;;  %v22838_v45 = vlaneseq }
 0x523   : > { %v17044_v44 = vadd.f32 -0.8, %v16829_v12  ;;  %v17049_v11 = vadd.f32 -0.8, %v16831_v6  ;;  %v17052_v62 = vadd.f32 -0.8, %v16833_v56  ;;  %v4484_v49 = vcombine.low %v16978_v61, %v16983_v2 }
 0x524   : > { %v17057_v37 = vadd.f32 -0.8, %v16835_v55  ;;  %v17060_v26 = vadd.f32 -0.8, %v16837_v54  ;;  %v5193_v12 = vmov 1966171168   ;;  %v4482_v55 = vcombine.low %v16964_v43, %v16967_v24 }
 0x525   : > { %v4290_v59 = vunpack.c.l.s4 %v5193_v12  ;;  %v4293_v36 = vshrl.u32 %v22838_v45, 7  ;;  %v17064_v32 = vadd.f32 -0.8, %v16839_v63  ;;  %v17067_v6 = vadd.f32 -0.8, %v16847_v19  ;;  %v22848_v12 = vld [vmem:[#allocation285_spill] sm:$0xff] }
 0x526   : > { %v17070_v56 = vadd.f32 -0.8, %v16855_v23  ;;  %v4483_v54 = vcombine.low %v16972_v46, %v16975_v52  ;;  %v4530_v63 = vcombine.low %v16986_v58, %v16989_v38  ;;  %v4531_v19 = vcombine.low %v16994_v13, %v16997_v28 }
 0x527   : > { %v4291_v33 = vunpack.c.0.s8 %v4290_v59  ;;  %v4532_v23 = vcombine.low %v17000_v27, %v17005_v29  ;;  %v4533_v15 = vcombine.low %v17008_v3, %v17011_v57  ;;  %v4579_v24 = vcombine.low %v17016_v60, %v17019_v17  ;;  %v22849_v59 = vld [vmem:[#allocation47_spill] sm:$0xff] }
 0x528   : > { %v4580_v46 = vcombine.low %v17022_v47, %v17027_v16  ;;  %v4581_v61 = vcombine.low %v17030_v30, %v17033_v21  ;;  %v4582_v38 = vcombine.low %v17038_v42, %v17041_v35  ;;  %v4628_v29 = vcombine.low %v17044_v44, %v17049_v11  ;;  %v22843_v16 = vld [vmem:[#allocation275_spill] sm:$0xff]  ;;  %v22845_v30 = vld [vmem:[#allocation45_spill] sm:$0xff] }
 0x529   : > { %v17088_v43 = vsub.s32 %v4291_v33, %v4293_v36  ;;  %v4629_v52 = vcombine.low %v17052_v62, %v17057_v37  ;;  %v4630_v27 = vcombine.low %v17060_v26, %v17064_v32  ;;  %v4631_v2 = vcombine.low %v17067_v6, %v17070_v56  ;;  %v22846_v21 = vld [vmem:[#allocation281_spill] sm:$0xff] }
 0x52a   : > { %v22839_v58 = vcombine.low %v16842_v20, %v16845_v50  ;;  %v22840_v13 = vcombine.low %v16850_v40, %v16853_v22  ;;  %v22841_v3 = vcombine.low %v16858_v1, %v16861_v5  ;;  %v22842_v17 = vcombine.low %v16864_v10, %v16867_v51 }
 0x52b   : > { %v22844_v20 = vcombine.low %v16870_v9, %v22843_v16  ;;  %v22847_v40 = vcombine.low %v22845_v30, %v22846_v21  ;;  %v22850_v1 = vcombine.low %v22848_v12, %v22849_v59  ;;  %v22851_v10 = vcombine.low %v16890_v41, %v16895_v7 }
 0x52c   : > { %v4295_v57 = vrot.slane %v22839_v58, %v17088_v43  ;;  %v4302_v28 = vrot.slane %v22840_v13, %v17088_v43  ;;  %v4309_v60 = vrot.slane %v22841_v3, %v17088_v43  ;;  %v4316_v47 = vrot.slane %v22842_v17, %v17088_v43  ;;  %v22853_v58 = vld [vmem:[#allocation48_spill] sm:$0xff] }
 0x52d   : > { %v4344_v50 = vrot.slane %v22844_v20, %v17088_v43  ;;  %v4351_v22 = vrot.slane %v22847_v40, %v17088_v43  ;;  %v4358_v5 = vrot.slane %v22850_v1, %v17088_v43  ;;  %v4365_v51 = vrot.slane %v22851_v10, %v17088_v43 }
 0x52e   : > { %v4317_v45 = vcombine.low %v4295_v57, %v4302_v28  ;;  %v4318_v36 = vcombine.low %v4309_v60, %v4316_v47  ;;  %v22852_v9 = vcombine.low %v16898_v25, %v16901_v18  ;;  %v22854_v13 = vcombine.low %v16906_v14, %v22853_v58 }
 0x52f   : > { %v4366_v17 = vcombine.low %v4344_v50, %v4351_v22  ;;  %v4367_v16 = vcombine.low %v4358_v5, %v4365_v51  ;;  %v22855_v20 = vcombine.low %v16912_v0, %v16917_v4  ;;  %v4414_v7 = vrot.slane %v4386_v53, %v17088_v43 }
 0x530   : > { %v4393_v33 = vrot.slane %v22852_v9, %v17088_v43  ;;  %v4400_v3 = vrot.slane %v22854_v13, %v17088_v43  ;;  %v4325_v57 = vrot.slane %v4317_v45, %v17088_v43  ;;  %v4332_v28 = vrot.slane %v4318_v36, %v17088_v43 }
 0x531   : > { %v4407_v41 = vrot.slane %v22855_v20, %v17088_v43  ;;  %v4442_v18 = vrot.slane %v4432_v31, %v17088_v43  ;;  %v4374_v60 = vrot.slane %v4366_v17, %v17088_v43  ;;  %v4381_v14 = vrot.slane %v4367_v16, %v17088_v43 }
 0x532   : > { %v4415_v25 = vcombine.low %v4393_v33, %v4400_v3  ;;  %v4449_v50 = vrot.slane %v4433_v8, %v17088_v43  ;;  %v4333_v30 = vcombine.low %v4325_v57, %v4332_v28  ;;  %v4456_v4 = vrot.slane %v4434_v48, %v17088_v43 }
 0x533   : > { %v4416_v47 = vcombine.low %v4407_v41, %v4414_v7  ;;  %v4463_v53 = vrot.slane %v4435_v39, %v17088_v43  ;;  %v4382_v21 = vcombine.low %v4374_v60, %v4381_v14  ;;  %v4491_v22 = vrot.slane %v4481_v34, %v17088_v43 }
 0x534   : > { %v4423_v0 = vrot.slane %v4415_v25, %v17088_v43  ;;  %v4464_v31 = vcombine.low %v4442_v18, %v4449_v50  ;;  %v4498_v59 = vrot.slane %v4482_v55, %v17088_v43  ;;  %v4505_v1 = vrot.slane %v4483_v54, %v17088_v43  ;;  %4685 = vst [vmem:[%s5349_s17] sm:$0xff] %v4333_v30 }
 0x535   : > { %v4430_v40 = vrot.slane %v4416_v47, %v17088_v43  ;;  %v4465_v12 = vcombine.low %v4456_v4, %v4463_v53  ;;  %v4512_v8 = vrot.slane %v4484_v49, %v17088_v43  ;;  %v4540_v39 = vrot.slane %v4530_v63, %v17088_v43  ;;  %4686 = vst [vmem:[%s5349_s17 + $0x8] sm:$0xff] %v4382_v21 }
 0x536   : > { %v4472_v48 = vrot.slane %v4464_v31, %v17088_v43  ;;  %v4547_v10 = vrot.slane %v4531_v19, %v17088_v43  ;;  %v4513_v51 = vcombine.low %v4491_v22, %v4498_v59  ;;  %v4554_v54 = vrot.slane %v4532_v23, %v17088_v43 }
 0x537   : > { %v4431_v5 = vcombine.low %v4423_v0, %v4430_v40  ;;  %v4479_v34 = vrot.slane %v4465_v12, %v17088_v43  ;;  %v4514_v55 = vcombine.low %v4505_v1, %v4512_v8  ;;  %v4561_v45 = vrot.slane %v4533_v15, %v17088_v43 }
 0x538   : > { %v4562_v49 = vcombine.low %v4540_v39, %v4547_v10  ;;  %v4589_v36 = vrot.slane %v4579_v24, %v17088_v43  ;;  %v4596_v9 = vrot.slane %v4580_v46, %v17088_v43  ;;  %v4521_v19 = vrot.slane %v4513_v51, %v17088_v43 }
 0x539   : > { %4687 = vst [vmem:[%s5349_s17 + $0x10] sm:$0xff] %v4431_v5  ;;  %v4480_v63 = vcombine.low %v4472_v48, %v4479_v34  ;;  %v4528_v33 = vrot.slane %v4514_v55, %v17088_v43  ;;  %v4603_v58 = vrot.slane %v4581_v61, %v17088_v43  ;;  %v4563_v23 = vcombine.low %v4554_v54, %v4561_v45 }
 0x53a   : > { %v4570_v15 = vrot.slane %v4562_v49, %v17088_v43  ;;  %v4610_v24 = vrot.slane %v4582_v38, %v17088_v43  ;;  %v4611_v46 = vcombine.low %v4589_v36, %v4596_v9  ;;  %v4638_v3 = vrot.slane %v4628_v29, %v17088_v43 }
 0x53b   : > { %v4529_v13 = vcombine.low %v4521_v19, %v4528_v33  ;;  %v4645_v61 = vrot.slane %v4629_v52, %v17088_v43  ;;  %v4652_v17 = vrot.slane %v4630_v27, %v17088_v43  ;;  %4688 = vst [vmem:[%s5349_s17 + $0x18] sm:$0xff] %v4480_v63  ;;  %v4577_v42 = vrot.slane %v4563_v23, %v17088_v43 }
 0x53c   : > { %v4612_v35 = vcombine.low %v4603_v58, %v4610_v24  ;;  %v4619_v44 = vrot.slane %v4611_v46, %v17088_v43  ;;  %v4659_v11 = vrot.slane %v4631_v2, %v17088_v43 }
 0x53d   : > { %v4660_v62 = vcombine.low %v4638_v3, %v4645_v61  ;;  %4689 = vst [vmem:[%s5349_s17 + $0x20] sm:$0xff] %v4529_v13  ;;  %v4578_v37 = vcombine.low %v4570_v15, %v4577_v42 }
 0x53e   : > { %v4626_v26 = vrot.slane %v4612_v35, %v17088_v43  ;;  %v4661_v32 = vcombine.low %v4652_v17, %v4659_v11 }
 0x53f   : > { %v4668_v38 = vrot.slane %v4660_v62, %v17088_v43  ;;  %4690 = vst [vmem:[%s5349_s17 + $0x28] sm:$0xff] %v4578_v37 }
 0x540   : > { %v4627_v29 = vcombine.low %v4619_v44, %v4626_v26  ;;  %v4675_v52 = vrot.slane %v4661_v32, %v17088_v43 }
 0x542   : > { %v4676_v6 = vcombine.low %v4668_v38, %v4675_v52  ;;  %4691 = vst [vmem:[%s5349_s17 + $0x30] sm:$0xff] %v4627_v29 }
 0x544   : > { %4692 = vst [vmem:[%s5349_s17 + $0x38] sm:$0xff] %v4676_v6 }
 0x545   : > { %5076 = shalt.err (!%p5073_p8)
}
 0x546   : > { %s5077_s17 = scalar_lea.hbm %s17213_s21, 1024  ;;  %s5081_s8 = scalar_lea.hbm %s17284_s3, 8192 }
 0x547   : > { %p5078_p9 = scmp.ne.s32.totalorder %s17213_s21, %s5077_s17  ;;  %p5082_p0 = scmp.lt.u32.totalorder %s17213_s21, %s17284_s3 }
 0x548   : > { %p5083_p3 = scmp.lt.u32.totalorder %s5081_s8, %s5077_s17  ;;  %p5085_p4 = scmp.lt.u32.totalorder %s5077_s17, %s17213_s21 }
 0x549   : > { %p5079_p10 = pnand %p5078_p9, %p5315_p12 }
 0x54a   : > { %p5084_p1 = por %p5083_p3, %p5082_p0 }
 0x54b   : > { %p5080_p11 = pneg %p5079_p10 }
 0x54c   : > { %p5086_p2 = por %p5085_p4, %p5084_p1 }
 0x54e   : > { %p5087_p5 = pnand %p5086_p2, %p5080_p11 }
 0x550   : > { %5090 = shalt.err (!%p5087_p5)
}
 0x551   : > { %4928 = dma.vmem_to_hbm [thread:$0]  (%p5315_p12), %s17215_s10, 1024, %s17213_s21, %s4698_s25  }
 0x552 PF: > { %p4938_p6 = scmp.ge.s32.totalorder %s5185_s22, 2  ;;  %s4739_s18 = sand.u32 1, %s5157_s15  }
 0x553   : > { %s4740_s19 = scalar_lea.sflag [#allocation3], %s4739_s18 }
 0x554   : > { %p4932_p8 = pnand %p4938_p6, %p5303_p7 }
 0x556   : > { %5136 = dma.done.wait (!%p4932_p8), %s4740_s19, 16  }
 0x557   : > { %5138 = vsyncadd (!%p4932_p8), %s4740_s19, 4294967280  ;;  %s4747_s5 = sand.u32 1, %s5145_s12   ;;  %p4935_p9 = pnand %p4938_p6, %p5327_p13 }
 0x558   : > { %s4748_s9 = scalar_lea.sflag [#allocation5], %s4747_s5 }
 0x559   : > { %5140 = dma.done.wait (!%p4935_p9), %s4748_s9, 1024  }
 0x55a   : > { %5142 = vsyncadd (!%p4935_p9), %s4748_s9, 4294966272  ;;  %s20_s22 = sadd.s32 1, %s5185_s22   ;;  %s22856_s6 = sld [smem:[#allocation8_spill]] }
 0x55b   : > { %p17_p12 = scmp.ge.s32.totalorder %s20_s22, 10   ;;  %s22857_s17 = sld [smem:[#allocation13_spill]] }
 0x55c   : > { %s22858_s18 = sld [smem:[#allocation9_spill]]  ;;  %s22859_s19 = sld [smem:[#allocation10_spill]] }
 0x55d   : > { %s22860_s20 = sld [smem:[#allocation11_spill]]  ;;  %s22861_s21 = sld [smem:[#allocation12_spill]] }
 0x55e   : > { %s22862_s12 = smov %s5149_s13  ;;  %s22863_s13 = smov %s5153_s14 }
 0x55f   : > { %s22864_s14 = smov %s5323_s11  ;;  %s22865_s15 = smov %s5161_s16 }
 0x560   : > { %s22866_s16 = smov %s22856_s6  ;;  %19 = sbr.rel (!%p17_p12) target bundleno = 9 (0x9), region = 87 }
 0x567   :  { %4753 = vsyncpa [#allocation3], 1 }
 0x568   :  { %4755 = vsyncpa [#allocation3 + $0x1], 1 }
 0x569   :  { %4756 = vsyncpa [#allocation5], 1 }
 0x56a   :  { %4758 = vsyncpa [#allocation5 + $0x1], 1 }

</bundles_post_ra>
